<compile_context>
chip_gen: v6e
topology: v6e:2x2x1
jax: 0.10.0
libtpu: 0.0.40
codegen_flags: <defaults>
</compile_context>

<pallas_src>
from functools import partial

import jax
import jax.numpy as jnp
from jax import lax
from jax.experimental import pallas as pl
from jax.experimental.pallas import tpu as pltpu


def gru_classifier_kernel(x_ref, w_ref, b_ref, out_ref):
    # x_ref:  (T, B, Hp)        input, feature dim zero-padded from D to Hp lanes
    # w_ref:  (Hp, 12*Hp + Op)  [w_ih0 | w_hh0 | w_ih1 | w_hh1 | w_fc], per-gate lane-padded
    # b_ref:  (1, 8*Hp + Op)    [b_gi0 | b_hn0 | b_gi1 | b_hn1 | b_fc]
    # out_ref:(B, Op)           softmax probabilities (padded columns exactly 0)
    T, B, Hp = x_ref.shape
    G = 3 * Hp
    Op = out_ref.shape[1]

    # Static column offsets into the packed weight slab.
    W_IH0, W_HH0, W_IH1, W_HH1, W_FC = 0, G, 2 * G, 3 * G, 4 * G

    # Biases are tiny (a few vregs): hoist them.  The big (128,384) weights stay in VMEM
    # and are sliced from w_ref at each dot site — hoisting them (144 vregs) would only
    # force spills out of the 64-entry vreg file.
    b_gi0 = b_ref[:, 0:G]
    b_hn0 = b_ref[:, G:G + Hp]
    b_gi1 = b_ref[:, G + Hp:2 * G + Hp]
    b_hn1 = b_ref[:, 2 * G + Hp:2 * G + 2 * Hp]
    b_fc = b_ref[:, 2 * G + 2 * Hp:2 * G + 2 * Hp + Op]

    def cell(gi, h, w_off, b_hn):
        # PyTorch GRU cell, gate order [r, z, n]; input-side r/z biases already in gi.
        gh = jnp.dot(h, w_ref[:, w_off:w_off + G],
                     preferred_element_type=jnp.float32)
        r = jax.nn.sigmoid(gi[:, 0:Hp] + gh[:, 0:Hp])
        z = jax.nn.sigmoid(gi[:, Hp:2 * Hp] + gh[:, Hp:2 * Hp])
        n = jnp.tanh(gi[:, 2 * Hp:3 * Hp] + r * (gh[:, 2 * Hp:3 * Hp] + b_hn))
        return (1.0 - z) * n + z * h

    def step(t, carry):
        h0, h1 = carry
        # Layer-0 input projection: independent of the carries, so it sits off the serial
        # recurrence chain in the fully unrolled schedule.
        gi0 = jnp.dot(x_ref[t], w_ref[:, W_IH0:W_IH0 + G],
                      preferred_element_type=jnp.float32) + b_gi0
        h0 = cell(gi0, h0, W_HH0, b_hn0)
        gi1 = jnp.dot(h0, w_ref[:, W_IH1:W_IH1 + G],
                      preferred_element_type=jnp.float32) + b_gi1
        h1 = cell(gi1, h1, W_HH1, b_hn1)
        return (h0, h1)

    h0 = jnp.zeros((B, Hp), jnp.float32)
    h1 = jnp.zeros((B, Hp), jnp.float32)
    _, h1 = lax.fori_loop(0, T, step, (h0, h1), unroll=True)

    logits = jnp.dot(h1, w_ref[:, W_FC:W_FC + Op],
                     preferred_element_type=jnp.float32) + b_fc
    m = jnp.max(logits, axis=-1, keepdims=True)
    e = jnp.exp(logits - m)
    # Exact divide (not pl.reciprocal approx) so probabilities sum to 1 to fp accuracy.
    out_ref[...] = e / jnp.sum(e, axis=-1, keepdims=True)


def _round_up(n, m):
    return ((n + m - 1) // m) * m


def prepare_params(params):
    """One-time re-layout of PyTorch-layout GRU+FC params into two lane-aligned slabs.

    Runs ONCE at param-load time; nothing here is on the per-call path.
    Returns (w_slab, b_slab):
      w_slab: (Hp, 12*Hp + Op) = [w_ih0 | w_hh0 | w_ih1 | w_hh1 | w_fc]
      b_slab: (1, 8*Hp + Op)   = [b_gi0 | b_hn0 | b_gi1 | b_hn1 | b_fc]
    Each gate occupies its own 128-lane-aligned chunk; zero padding keeps padded hidden
    lanes at exactly 0 through the recurrence.
    """
    H = params["w_hh0"].shape[0]
    O = params["w_fc"].shape[1]
    Hp = _round_up(H, 128)
    Op = _round_up(O, 128)

    def gate_cols(w):
        # (in, 3H) gate order [r,z,n] -> (in, 3*Hp); each gate zero-padded to Hp lanes.
        return jnp.concatenate(
            [jnp.pad(w[:, g * H:(g + 1) * H], ((0, 0), (0, Hp - H))) for g in range(3)],
            axis=1)

    def pad_rows(w):
        return jnp.pad(w, ((0, Hp - w.shape[0]), (0, 0)))

    w_ih0 = pad_rows(gate_cols(params["w_ih0"]))   # (Hp, 3Hp); rows >= D are zero
    w_hh0 = pad_rows(gate_cols(params["w_hh0"]))   # (Hp, 3Hp); rows >= H are zero
    w_ih1 = pad_rows(gate_cols(params["w_ih1"]))
    w_hh1 = pad_rows(gate_cols(params["w_hh1"]))
    w_fc = jnp.pad(params["w_fc"], ((0, Hp - H), (0, Op - O)))         # (Hp, Op)
    w_slab = jnp.concatenate([w_ih0, w_hh0, w_ih1, w_hh1, w_fc], axis=1)

    def fold_bias(b_ih, b_hh):
        # Fold b_hh's r/z parts into the input-side bias; keep b_hn separate (inside r*(.)).
        zpad = jnp.zeros((1, Hp - H), jnp.float32)
        b_gi = jnp.concatenate(
            [b_ih[:, 0:H] + b_hh[:, 0:H], zpad,
             b_ih[:, H:2 * H] + b_hh[:, H:2 * H], zpad,
             b_ih[:, 2 * H:3 * H], zpad], axis=1)                       # (1, 3Hp)
        b_hn = jnp.concatenate([b_hh[:, 2 * H:3 * H], zpad], axis=1)    # (1, Hp)
        return b_gi, b_hn

    b_gi0, b_hn0 = fold_bias(params["b_ih0"], params["b_hh0"])
    b_gi1, b_hn1 = fold_bias(params["b_ih1"], params["b_hh1"])
    # Padded logit columns get a huge negative bias -> softmax gives them exactly 0.
    b_fc = jnp.concatenate(
        [params["b_fc"], jnp.full((1, Op - O), -1e30, jnp.float32)], axis=1)   # (1, Op)
    b_slab = jnp.concatenate([b_gi0, b_hn0, b_gi1, b_hn1, b_fc], axis=1)

    return jax.device_put(w_slab), jax.device_put(b_slab)


@partial(jax.jit, static_argnames=("output_dim",))
def gru_entry_classifier(x_btd, w_slab, b_slab, *, output_dim):
    """x_btd: (B, T, D) float32, batch_first like the PyTorch module.

    Per-call path: pad x's feature dim to Hp lanes + go time-major (one cheap fused op),
    one gridless pallas_call with 3 VMEM-resident operands, slice the lane-dense output.
    """
    B, T, D = x_btd.shape
    Hp = w_slab.shape[0]
    Op = w_slab.shape[1] - 12 * Hp

    x_tbh = jnp.transpose(jnp.pad(x_btd, ((0, 0), (0, 0), (0, Hp - D))), (1, 0, 2))

    vmem = pl.BlockSpec(memory_space=pltpu.MemorySpace.VMEM)
    out = pl.pallas_call(
        gru_classifier_kernel,
        out_shape=jax.ShapeDtypeStruct((B, Op), jnp.float32),
        in_specs=[vmem, vmem, vmem],
        out_specs=vmem,
    )(x_tbh, w_slab, b_slab)
    return out[:, :output_dim]


def reference_forward(x_btd, params):
    """Pure-JAX reference matching PyTorch nn.GRU (eval) + Linear + Softmax."""
    B, T, D = x_btd.shape
    H = params["w_hh0"].shape[0]
    hi = lax.Precision.HIGHEST

    def cell(x, h, w_ih, w_hh, b_ih, b_hh):
        gi = jnp.dot(x, w_ih, precision=hi) + b_ih
        gh = jnp.dot(h, w_hh, precision=hi) + b_hh
        r = jax.nn.sigmoid(gi[:, :H] + gh[:, :H])
        z = jax.nn.sigmoid(gi[:, H:2 * H] + gh[:, H:2 * H])
        n = jnp.tanh(gi[:, 2 * H:] + r * gh[:, 2 * H:])
        return (1.0 - z) * n + z * h

    h0 = jnp.zeros((B, H), jnp.float32)
    h1 = jnp.zeros((B, H), jnp.float32)
    for t in range(T):
        x_t = x_btd[:, t, :]
        h0 = cell(x_t, h0, params["w_ih0"], params["w_hh0"],
                  params["b_ih0"][0], params["b_hh0"][0])
        h1 = cell(h0, h1, params["w_ih1"], params["w_hh1"],
                  params["b_ih1"][0], params["b_hh1"][0])
    logits = jnp.dot(h1, params["w_fc"], precision=hi) + params["b_fc"][0]
    return jax.nn.softmax(logits, axis=1)


def init_params(key, input_dim, hidden_dim, output_dim):
    """Deterministic init mirroring PyTorch shapes (weights stored transposed, gates [r,z,n])."""
    H = hidden_dim
    k = 1.0 / jnp.sqrt(jnp.float32(H))
    keys = jax.random.split(key, 10)
    u = lambda kk, shape: jax.random.uniform(kk, shape, jnp.float32, -k, k)
    return {
        # layer 0: input_dim -> hidden
        "w_ih0": u(keys[0], (input_dim, 3 * H)),
        "w_hh0": u(keys[1], (H, 3 * H)),
        "b_ih0": u(keys[2], (1, 3 * H)),
        "b_hh0": u(keys[3], (1, 3 * H)),
        # layer 1: hidden -> hidden
        "w_ih1": u(keys[4], (H, 3 * H)),
        "w_hh1": u(keys[5], (H, 3 * H)),
        "b_ih1": u(keys[6], (1, 3 * H)),
        "b_hh1": u(keys[7], (1, 3 * H)),
        # fc: hidden -> output
        "w_fc": u(keys[8], (H, output_dim)),
        "b_fc": u(keys[9], (1, output_dim)),
    }


if __name__ == "__main__":
    B, T, D = 8, 8, 5            # batch, sequence length, input_dim (module default input_dim=5)
    H, O = 64, 2                 # hidden_dim (module default), output_dim

    root = jax.random.PRNGKey(0)
    kx, kp = jax.random.split(root)
    x = jax.random.normal(kx, (B, T, D), jnp.float32)
    params = init_params(kp, D, H, O)

    # One-time weight re-layout (NOT on the per-call path).
    w_slab, b_slab = prepare_params(params)

    out = gru_entry_classifier(x, w_slab, b_slab, output_dim=O)
    out = jax.block_until_ready(out)

    ref = reference_forward(x, params)
    assert out.shape == (B, O)
    assert jnp.allclose(jnp.sum(out, axis=1), 1.0, atol=1e-5)
    assert jnp.allclose(out, ref, atol=1e-4, rtol=1e-4), (out, ref)

    print("KERNEL_OK")
</pallas_src>

<mosaic_0001>
module attributes {stable_mosaic.version = 11 : i64} {
  func.func @gru_classifier_kernel(%arg0: memref<8x8x128xf32, #tpu.memory_space<vmem>>, %arg1: memref<128x1664xf32, #tpu.memory_space<vmem>>, %arg2: memref<1x1152xf32, #tpu.memory_space<vmem>>, %arg3: memref<8x128xf32, #tpu.memory_space<vmem>>) attributes {dimension_semantics = [], scalar_prefetch = 0 : i64, scratch_operands = 0 : i64, tpu.core_type = #tpu.core_type<tc>} {
    %c0 = arith.constant 0 : index
    %c0_0 = arith.constant 0 : index
    %0 = vector.load %arg2[%c0, %c0_0] : memref<1x1152xf32, #tpu.memory_space<vmem>>, vector<1x384xf32>
    %c0_1 = arith.constant 0 : index
    %c384 = arith.constant 384 : index
    %1 = vector.load %arg2[%c0_1, %c384] : memref<1x1152xf32, #tpu.memory_space<vmem>>, vector<1x128xf32>
    %c0_2 = arith.constant 0 : index
    %c512 = arith.constant 512 : index
    %2 = vector.load %arg2[%c0_2, %c512] : memref<1x1152xf32, #tpu.memory_space<vmem>>, vector<1x384xf32>
    %c0_3 = arith.constant 0 : index
    %c896 = arith.constant 896 : index
    %3 = vector.load %arg2[%c0_3, %c896] : memref<1x1152xf32, #tpu.memory_space<vmem>>, vector<1x128xf32>
    %c0_4 = arith.constant 0 : index
    %c1024 = arith.constant 1024 : index
    %4 = vector.load %arg2[%c0_4, %c1024] : memref<1x1152xf32, #tpu.memory_space<vmem>>, vector<1x128xf32>
    %cst = arith.constant 0.000000e+00 : f32
    %5 = vector.broadcast %cst : f32 to vector<8x128xf32>
    %cst_5 = arith.constant 0.000000e+00 : f32
    %6 = vector.broadcast %cst_5 : f32 to vector<8x128xf32>
    %c0_i32 = arith.constant 0 : i32
    %7 = arith.index_cast %c0_i32 : i32 to index
    %c0_6 = arith.constant 0 : index
    %c0_7 = arith.constant 0 : index
    %8 = vector.load %arg0[%7, %c0_6, %c0_7] : memref<8x8x128xf32, #tpu.memory_space<vmem>>, vector<1x8x128xf32>
    %9 = vector.shape_cast %8 : vector<1x8x128xf32> to vector<8x128xf32>
    %c0_8 = arith.constant 0 : index
    %c0_9 = arith.constant 0 : index
    %10 = vector.load %arg1[%c0_8, %c0_9] : memref<128x1664xf32, #tpu.memory_space<vmem>>, vector<128x384xf32>
    %cst_10 = arith.constant dense<0.000000e+00> : vector<8x384xf32>
    %11 = tpu.matmul %9, %10, %cst_10 {dimension_numbers = #tpu.dot_dimension_numbers<[1], [0], [0], [1], [0, 0, 1, 1], [], []>} : vector<8x128xf32>, vector<128x384xf32>, vector<8x384xf32> -> vector<8x384xf32>
    %12 = vector.broadcast %0 : vector<1x384xf32> to vector<8x384xf32>
    %13 = arith.addf %11, %12 : vector<8x384xf32>
    %c0_11 = arith.constant 0 : index
    %c384_12 = arith.constant 384 : index
    %14 = vector.load %arg1[%c0_11, %c384_12] : memref<128x1664xf32, #tpu.memory_space<vmem>>, vector<128x384xf32>
    %cst_13 = arith.constant dense<0.000000e+00> : vector<8x384xf32>
    %15 = tpu.matmul %5, %14, %cst_13 {dimension_numbers = #tpu.dot_dimension_numbers<[1], [0], [0], [1], [0, 0, 1, 1], [], []>} : vector<8x128xf32>, vector<128x384xf32>, vector<8x384xf32> -> vector<8x384xf32>
    %16 = vector.extract_strided_slice %13 {offsets = [0, 0], sizes = [8, 128], strides = [1, 1]} : vector<8x384xf32> to vector<8x128xf32>
    %17 = vector.extract_strided_slice %15 {offsets = [0, 0], sizes = [8, 128], strides = [1, 1]} : vector<8x384xf32> to vector<8x128xf32>
    %18 = arith.addf %16, %17 : vector<8x128xf32>
    %19 = arith.negf %18 : vector<8x128xf32>
    %20 = math.exp %19 : vector<8x128xf32>
    %cst_14 = arith.constant 1.000000e+00 : f32
    %21 = vector.broadcast %cst_14 : f32 to vector<8x128xf32>
    %22 = arith.addf %21, %20 : vector<8x128xf32>
    %23 = arith.divf %21, %22 : vector<8x128xf32>
    %24 = vector.extract_strided_slice %13 {offsets = [0, 128], sizes = [8, 128], strides = [1, 1]} : vector<8x384xf32> to vector<8x128xf32>
    %25 = vector.extract_strided_slice %15 {offsets = [0, 128], sizes = [8, 128], strides = [1, 1]} : vector<8x384xf32> to vector<8x128xf32>
    %26 = arith.addf %24, %25 : vector<8x128xf32>
    %27 = arith.negf %26 : vector<8x128xf32>
    %28 = math.exp %27 : vector<8x128xf32>
    %cst_15 = arith.constant 1.000000e+00 : f32
    %29 = vector.broadcast %cst_15 : f32 to vector<8x128xf32>
    %30 = arith.addf %29, %28 : vector<8x128xf32>
    %31 = arith.divf %29, %30 : vector<8x128xf32>
    %32 = vector.extract_strided_slice %13 {offsets = [0, 256], sizes = [8, 128], strides = [1, 1]} : vector<8x384xf32> to vector<8x128xf32>
    %33 = vector.extract_strided_slice %15 {offsets = [0, 256], sizes = [8, 128], strides = [1, 1]} : vector<8x384xf32> to vector<8x128xf32>
    %34 = vector.broadcast %1 : vector<1x128xf32> to vector<8x128xf32>
    %35 = arith.addf %33, %34 : vector<8x128xf32>
    %36 = arith.mulf %23, %35 : vector<8x128xf32>
    %37 = arith.addf %32, %36 : vector<8x128xf32>
    %38 = math.tanh %37 : vector<8x128xf32>
    %cst_16 = arith.constant 1.000000e+00 : f32
    %39 = vector.broadcast %cst_16 : f32 to vector<8x128xf32>
    %40 = arith.subf %39, %31 : vector<8x128xf32>
    %41 = arith.mulf %40, %38 : vector<8x128xf32>
    %42 = arith.mulf %31, %5 : vector<8x128xf32>
    %43 = arith.addf %41, %42 : vector<8x128xf32>
    %c0_17 = arith.constant 0 : index
    %c768 = arith.constant 768 : index
    %44 = vector.load %arg1[%c0_17, %c768] : memref<128x1664xf32, #tpu.memory_space<vmem>>, vector<128x384xf32>
    %cst_18 = arith.constant dense<0.000000e+00> : vector<8x384xf32>
    %45 = tpu.matmul %43, %44, %cst_18 {dimension_numbers = #tpu.dot_dimension_numbers<[1], [0], [0], [1], [0, 0, 1, 1], [], []>} : vector<8x128xf32>, vector<128x384xf32>, vector<8x384xf32> -> vector<8x384xf32>
    %46 = vector.broadcast %2 : vector<1x384xf32> to vector<8x384xf32>
    %47 = arith.addf %45, %46 : vector<8x384xf32>
    %c0_19 = arith.constant 0 : index
    %c1152 = arith.constant 1152 : index
    %48 = vector.load %arg1[%c0_19, %c1152] : memref<128x1664xf32, #tpu.memory_space<vmem>>, vector<128x384xf32>
    %cst_20 = arith.constant dense<0.000000e+00> : vector<8x384xf32>
    %49 = tpu.matmul %6, %48, %cst_20 {dimension_numbers = #tpu.dot_dimension_numbers<[1], [0], [0], [1], [0, 0, 1, 1], [], []>} : vector<8x128xf32>, vector<128x384xf32>, vector<8x384xf32> -> vector<8x384xf32>
    %50 = vector.extract_strided_slice %47 {offsets = [0, 0], sizes = [8, 128], strides = [1, 1]} : vector<8x384xf32> to vector<8x128xf32>
    %51 = vector.extract_strided_slice %49 {offsets = [0, 0], sizes = [8, 128], strides = [1, 1]} : vector<8x384xf32> to vector<8x128xf32>
    %52 = arith.addf %50, %51 : vector<8x128xf32>
    %53 = arith.negf %52 : vector<8x128xf32>
    %54 = math.exp %53 : vector<8x128xf32>
    %cst_21 = arith.constant 1.000000e+00 : f32
    %55 = vector.broadcast %cst_21 : f32 to vector<8x128xf32>
    %56 = arith.addf %55, %54 : vector<8x128xf32>
    %57 = arith.divf %55, %56 : vector<8x128xf32>
    %58 = vector.extract_strided_slice %47 {offsets = [0, 128], sizes = [8, 128], strides = [1, 1]} : vector<8x384xf32> to vector<8x128xf32>
    %59 = vector.extract_strided_slice %49 {offsets = [0, 128], sizes = [8, 128], strides = [1, 1]} : vector<8x384xf32> to vector<8x128xf32>
    %60 = arith.addf %58, %59 : vector<8x128xf32>
    %61 = arith.negf %60 : vector<8x128xf32>
    %62 = math.exp %61 : vector<8x128xf32>
    %cst_22 = arith.constant 1.000000e+00 : f32
    %63 = vector.broadcast %cst_22 : f32 to vector<8x128xf32>
    %64 = arith.addf %63, %62 : vector<8x128xf32>
    %65 = arith.divf %63, %64 : vector<8x128xf32>
    %66 = vector.extract_strided_slice %47 {offsets = [0, 256], sizes = [8, 128], strides = [1, 1]} : vector<8x384xf32> to vector<8x128xf32>
    %67 = vector.extract_strided_slice %49 {offsets = [0, 256], sizes = [8, 128], strides = [1, 1]} : vector<8x384xf32> to vector<8x128xf32>
    %68 = vector.broadcast %3 : vector<1x128xf32> to vector<8x128xf32>
    %69 = arith.addf %67, %68 : vector<8x128xf32>
    %70 = arith.mulf %57, %69 : vector<8x128xf32>
    %71 = arith.addf %66, %70 : vector<8x128xf32>
    %72 = math.tanh %71 : vector<8x128xf32>
    %cst_23 = arith.constant 1.000000e+00 : f32
    %73 = vector.broadcast %cst_23 : f32 to vector<8x128xf32>
    %74 = arith.subf %73, %65 : vector<8x128xf32>
    %75 = arith.mulf %74, %72 : vector<8x128xf32>
    %76 = arith.mulf %65, %6 : vector<8x128xf32>
    %77 = arith.addf %75, %76 : vector<8x128xf32>
    %c1_i32 = arith.constant 1 : i32
    %78 = arith.index_cast %c1_i32 : i32 to index
    %c0_24 = arith.constant 0 : index
    %c0_25 = arith.constant 0 : index
    %79 = vector.load %arg0[%78, %c0_24, %c0_25] : memref<8x8x128xf32, #tpu.memory_space<vmem>>, vector<1x8x128xf32>
    %80 = vector.shape_cast %79 : vector<1x8x128xf32> to vector<8x128xf32>
    %c0_26 = arith.constant 0 : index
    %c0_27 = arith.constant 0 : index
    %81 = vector.load %arg1[%c0_26, %c0_27] : memref<128x1664xf32, #tpu.memory_space<vmem>>, vector<128x384xf32>
    %cst_28 = arith.constant dense<0.000000e+00> : vector<8x384xf32>
    %82 = tpu.matmul %80, %81, %cst_28 {dimension_numbers = #tpu.dot_dimension_numbers<[1], [0], [0], [1], [0, 0, 1, 1], [], []>} : vector<8x128xf32>, vector<128x384xf32>, vector<8x384xf32> -> vector<8x384xf32>
    %83 = vector.broadcast %0 : vector<1x384xf32> to vector<8x384xf32>
    %84 = arith.addf %82, %83 : vector<8x384xf32>
    %c0_29 = arith.constant 0 : index
    %c384_30 = arith.constant 384 : index
    %85 = vector.load %arg1[%c0_29, %c384_30] : memref<128x1664xf32, #tpu.memory_space<vmem>>, vector<128x384xf32>
    %cst_31 = arith.constant dense<0.000000e+00> : vector<8x384xf32>
    %86 = tpu.matmul %43, %85, %cst_31 {dimension_numbers = #tpu.dot_dimension_numbers<[1], [0], [0], [1], [0, 0, 1, 1], [], []>} : vector<8x128xf32>, vector<128x384xf32>, vector<8x384xf32> -> vector<8x384xf32>
    %87 = vector.extract_strided_slice %84 {offsets = [0, 0], sizes = [8, 128], strides = [1, 1]} : vector<8x384xf32> to vector<8x128xf32>
    %88 = vector.extract_strided_slice %86 {offsets = [0, 0], sizes = [8, 128], strides = [1, 1]} : vector<8x384xf32> to vector<8x128xf32>
    %89 = arith.addf %87, %88 : vector<8x128xf32>
    %90 = arith.negf %89 : vector<8x128xf32>
    %91 = math.exp %90 : vector<8x128xf32>
    %cst_32 = arith.constant 1.000000e+00 : f32
    %92 = vector.broadcast %cst_32 : f32 to vector<8x128xf32>
    %93 = arith.addf %92, %91 : vector<8x128xf32>
    %94 = arith.divf %92, %93 : vector<8x128xf32>
    %95 = vector.extract_strided_slice %84 {offsets = [0, 128], sizes = [8, 128], strides = [1, 1]} : vector<8x384xf32> to vector<8x128xf32>
    %96 = vector.extract_strided_slice %86 {offsets = [0, 128], sizes = [8, 128], strides = [1, 1]} : vector<8x384xf32> to vector<8x128xf32>
    %97 = arith.addf %95, %96 : vector<8x128xf32>
    %98 = arith.negf %97 : vector<8x128xf32>
    %99 = math.exp %98 : vector<8x128xf32>
    %cst_33 = arith.constant 1.000000e+00 : f32
    %100 = vector.broadcast %cst_33 : f32 to vector<8x128xf32>
    %101 = arith.addf %100, %99 : vector<8x128xf32>
    %102 = arith.divf %100, %101 : vector<8x128xf32>
    %103 = vector.extract_strided_slice %84 {offsets = [0, 256], sizes = [8, 128], strides = [1, 1]} : vector<8x384xf32> to vector<8x128xf32>
    %104 = vector.extract_strided_slice %86 {offsets = [0, 256], sizes = [8, 128], strides = [1, 1]} : vector<8x384xf32> to vector<8x128xf32>
    %105 = vector.broadcast %1 : vector<1x128xf32> to vector<8x128xf32>
    %106 = arith.addf %104, %105 : vector<8x128xf32>
    %107 = arith.mulf %94, %106 : vector<8x128xf32>
    %108 = arith.addf %103, %107 : vector<8x128xf32>
    %109 = math.tanh %108 : vector<8x128xf32>
    %cst_34 = arith.constant 1.000000e+00 : f32
    %110 = vector.broadcast %cst_34 : f32 to vector<8x128xf32>
    %111 = arith.subf %110, %102 : vector<8x128xf32>
    %112 = arith.mulf %111, %109 : vector<8x128xf32>
    %113 = arith.mulf %102, %43 : vector<8x128xf32>
    %114 = arith.addf %112, %113 : vector<8x128xf32>
    %c0_35 = arith.constant 0 : index
    %c768_36 = arith.constant 768 : index
    %115 = vector.load %arg1[%c0_35, %c768_36] : memref<128x1664xf32, #tpu.memory_space<vmem>>, vector<128x384xf32>
    %cst_37 = arith.constant dense<0.000000e+00> : vector<8x384xf32>
    %116 = tpu.matmul %114, %115, %cst_37 {dimension_numbers = #tpu.dot_dimension_numbers<[1], [0], [0], [1], [0, 0, 1, 1], [], []>} : vector<8x128xf32>, vector<128x384xf32>, vector<8x384xf32> -> vector<8x384xf32>
    %117 = vector.broadcast %2 : vector<1x384xf32> to vector<8x384xf32>
    %118 = arith.addf %116, %117 : vector<8x384xf32>
    %c0_38 = arith.constant 0 : index
    %c1152_39 = arith.constant 1152 : index
    %119 = vector.load %arg1[%c0_38, %c1152_39] : memref<128x1664xf32, #tpu.memory_space<vmem>>, vector<128x384xf32>
    %cst_40 = arith.constant dense<0.000000e+00> : vector<8x384xf32>
    %120 = tpu.matmul %77, %119, %cst_40 {dimension_numbers = #tpu.dot_dimension_numbers<[1], [0], [0], [1], [0, 0, 1, 1], [], []>} : vector<8x128xf32>, vector<128x384xf32>, vector<8x384xf32> -> vector<8x384xf32>
    %121 = vector.extract_strided_slice %118 {offsets = [0, 0], sizes = [8, 128], strides = [1, 1]} : vector<8x384xf32> to vector<8x128xf32>
    %122 = vector.extract_strided_slice %120 {offsets = [0, 0], sizes = [8, 128], strides = [1, 1]} : vector<8x384xf32> to vector<8x128xf32>
    %123 = arith.addf %121, %122 : vector<8x128xf32>
    %124 = arith.negf %123 : vector<8x128xf32>
    %125 = math.exp %124 : vector<8x128xf32>
    %cst_41 = arith.constant 1.000000e+00 : f32
    %126 = vector.broadcast %cst_41 : f32 to vector<8x128xf32>
    %127 = arith.addf %126, %125 : vector<8x128xf32>
    %128 = arith.divf %126, %127 : vector<8x128xf32>
    %129 = vector.extract_strided_slice %118 {offsets = [0, 128], sizes = [8, 128], strides = [1, 1]} : vector<8x384xf32> to vector<8x128xf32>
    %130 = vector.extract_strided_slice %120 {offsets = [0, 128], sizes = [8, 128], strides = [1, 1]} : vector<8x384xf32> to vector<8x128xf32>
    %131 = arith.addf %129, %130 : vector<8x128xf32>
    %132 = arith.negf %131 : vector<8x128xf32>
    %133 = math.exp %132 : vector<8x128xf32>
    %cst_42 = arith.constant 1.000000e+00 : f32
    %134 = vector.broadcast %cst_42 : f32 to vector<8x128xf32>
    %135 = arith.addf %134, %133 : vector<8x128xf32>
    %136 = arith.divf %134, %135 : vector<8x128xf32>
    %137 = vector.extract_strided_slice %118 {offsets = [0, 256], sizes = [8, 128], strides = [1, 1]} : vector<8x384xf32> to vector<8x128xf32>
    %138 = vector.extract_strided_slice %120 {offsets = [0, 256], sizes = [8, 128], strides = [1, 1]} : vector<8x384xf32> to vector<8x128xf32>
    %139 = vector.broadcast %3 : vector<1x128xf32> to vector<8x128xf32>
    %140 = arith.addf %138, %139 : vector<8x128xf32>
    %141 = arith.mulf %128, %140 : vector<8x128xf32>
    %142 = arith.addf %137, %141 : vector<8x128xf32>
    %143 = math.tanh %142 : vector<8x128xf32>
    %cst_43 = arith.constant 1.000000e+00 : f32
    %144 = vector.broadcast %cst_43 : f32 to vector<8x128xf32>
    %145 = arith.subf %144, %136 : vector<8x128xf32>
    %146 = arith.mulf %145, %143 : vector<8x128xf32>
    %147 = arith.mulf %136, %77 : vector<8x128xf32>
    %148 = arith.addf %146, %147 : vector<8x128xf32>
    %c2_i32 = arith.constant 2 : i32
    %149 = arith.index_cast %c2_i32 : i32 to index
    %c0_44 = arith.constant 0 : index
    %c0_45 = arith.constant 0 : index
    %150 = vector.load %arg0[%149, %c0_44, %c0_45] : memref<8x8x128xf32, #tpu.memory_space<vmem>>, vector<1x8x128xf32>
    %151 = vector.shape_cast %150 : vector<1x8x128xf32> to vector<8x128xf32>
    %c0_46 = arith.constant 0 : index
    %c0_47 = arith.constant 0 : index
    %152 = vector.load %arg1[%c0_46, %c0_47] : memref<128x1664xf32, #tpu.memory_space<vmem>>, vector<128x384xf32>
    %cst_48 = arith.constant dense<0.000000e+00> : vector<8x384xf32>
    %153 = tpu.matmul %151, %152, %cst_48 {dimension_numbers = #tpu.dot_dimension_numbers<[1], [0], [0], [1], [0, 0, 1, 1], [], []>} : vector<8x128xf32>, vector<128x384xf32>, vector<8x384xf32> -> vector<8x384xf32>
    %154 = vector.broadcast %0 : vector<1x384xf32> to vector<8x384xf32>
    %155 = arith.addf %153, %154 : vector<8x384xf32>
    %c0_49 = arith.constant 0 : index
    %c384_50 = arith.constant 384 : index
    %156 = vector.load %arg1[%c0_49, %c384_50] : memref<128x1664xf32, #tpu.memory_space<vmem>>, vector<128x384xf32>
    %cst_51 = arith.constant dense<0.000000e+00> : vector<8x384xf32>
    %157 = tpu.matmul %114, %156, %cst_51 {dimension_numbers = #tpu.dot_dimension_numbers<[1], [0], [0], [1], [0, 0, 1, 1], [], []>} : vector<8x128xf32>, vector<128x384xf32>, vector<8x384xf32> -> vector<8x384xf32>
    %158 = vector.extract_strided_slice %155 {offsets = [0, 0], sizes = [8, 128], strides = [1, 1]} : vector<8x384xf32> to vector<8x128xf32>
    %159 = vector.extract_strided_slice %157 {offsets = [0, 0], sizes = [8, 128], strides = [1, 1]} : vector<8x384xf32> to vector<8x128xf32>
    %160 = arith.addf %158, %159 : vector<8x128xf32>
    %161 = arith.negf %160 : vector<8x128xf32>
    %162 = math.exp %161 : vector<8x128xf32>
    %cst_52 = arith.constant 1.000000e+00 : f32
    %163 = vector.broadcast %cst_52 : f32 to vector<8x128xf32>
    %164 = arith.addf %163, %162 : vector<8x128xf32>
    %165 = arith.divf %163, %164 : vector<8x128xf32>
    %166 = vector.extract_strided_slice %155 {offsets = [0, 128], sizes = [8, 128], strides = [1, 1]} : vector<8x384xf32> to vector<8x128xf32>
    %167 = vector.extract_strided_slice %157 {offsets = [0, 128], sizes = [8, 128], strides = [1, 1]} : vector<8x384xf32> to vector<8x128xf32>
    %168 = arith.addf %166, %167 : vector<8x128xf32>
    %169 = arith.negf %168 : vector<8x128xf32>
    %170 = math.exp %169 : vector<8x128xf32>
    %cst_53 = arith.constant 1.000000e+00 : f32
    %171 = vector.broadcast %cst_53 : f32 to vector<8x128xf32>
    %172 = arith.addf %171, %170 : vector<8x128xf32>
    %173 = arith.divf %171, %172 : vector<8x128xf32>
    %174 = vector.extract_strided_slice %155 {offsets = [0, 256], sizes = [8, 128], strides = [1, 1]} : vector<8x384xf32> to vector<8x128xf32>
    %175 = vector.extract_strided_slice %157 {offsets = [0, 256], sizes = [8, 128], strides = [1, 1]} : vector<8x384xf32> to vector<8x128xf32>
    %176 = vector.broadcast %1 : vector<1x128xf32> to vector<8x128xf32>
    %177 = arith.addf %175, %176 : vector<8x128xf32>
    %178 = arith.mulf %165, %177 : vector<8x128xf32>
    %179 = arith.addf %174, %178 : vector<8x128xf32>
    %180 = math.tanh %179 : vector<8x128xf32>
    %cst_54 = arith.constant 1.000000e+00 : f32
    %181 = vector.broadcast %cst_54 : f32 to vector<8x128xf32>
    %182 = arith.subf %181, %173 : vector<8x128xf32>
    %183 = arith.mulf %182, %180 : vector<8x128xf32>
    %184 = arith.mulf %173, %114 : vector<8x128xf32>
    %185 = arith.addf %183, %184 : vector<8x128xf32>
    %c0_55 = arith.constant 0 : index
    %c768_56 = arith.constant 768 : index
    %186 = vector.load %arg1[%c0_55, %c768_56] : memref<128x1664xf32, #tpu.memory_space<vmem>>, vector<128x384xf32>
    %cst_57 = arith.constant dense<0.000000e+00> : vector<8x384xf32>
    %187 = tpu.matmul %185, %186, %cst_57 {dimension_numbers = #tpu.dot_dimension_numbers<[1], [0], [0], [1], [0, 0, 1, 1], [], []>} : vector<8x128xf32>, vector<128x384xf32>, vector<8x384xf32> -> vector<8x384xf32>
    %188 = vector.broadcast %2 : vector<1x384xf32> to vector<8x384xf32>
    %189 = arith.addf %187, %188 : vector<8x384xf32>
    %c0_58 = arith.constant 0 : index
    %c1152_59 = arith.constant 1152 : index
    %190 = vector.load %arg1[%c0_58, %c1152_59] : memref<128x1664xf32, #tpu.memory_space<vmem>>, vector<128x384xf32>
    %cst_60 = arith.constant dense<0.000000e+00> : vector<8x384xf32>
    %191 = tpu.matmul %148, %190, %cst_60 {dimension_numbers = #tpu.dot_dimension_numbers<[1], [0], [0], [1], [0, 0, 1, 1], [], []>} : vector<8x128xf32>, vector<128x384xf32>, vector<8x384xf32> -> vector<8x384xf32>
    %192 = vector.extract_strided_slice %189 {offsets = [0, 0], sizes = [8, 128], strides = [1, 1]} : vector<8x384xf32> to vector<8x128xf32>
    %193 = vector.extract_strided_slice %191 {offsets = [0, 0], sizes = [8, 128], strides = [1, 1]} : vector<8x384xf32> to vector<8x128xf32>
    %194 = arith.addf %192, %193 : vector<8x128xf32>
    %195 = arith.negf %194 : vector<8x128xf32>
    %196 = math.exp %195 : vector<8x128xf32>
    %cst_61 = arith.constant 1.000000e+00 : f32
    %197 = vector.broadcast %cst_61 : f32 to vector<8x128xf32>
    %198 = arith.addf %197, %196 : vector<8x128xf32>
    %199 = arith.divf %197, %198 : vector<8x128xf32>
    %200 = vector.extract_strided_slice %189 {offsets = [0, 128], sizes = [8, 128], strides = [1, 1]} : vector<8x384xf32> to vector<8x128xf32>
    %201 = vector.extract_strided_slice %191 {offsets = [0, 128], sizes = [8, 128], strides = [1, 1]} : vector<8x384xf32> to vector<8x128xf32>
    %202 = arith.addf %200, %201 : vector<8x128xf32>
    %203 = arith.negf %202 : vector<8x128xf32>
    %204 = math.exp %203 : vector<8x128xf32>
    %cst_62 = arith.constant 1.000000e+00 : f32
    %205 = vector.broadcast %cst_62 : f32 to vector<8x128xf32>
    %206 = arith.addf %205, %204 : vector<8x128xf32>
    %207 = arith.divf %205, %206 : vector<8x128xf32>
    %208 = vector.extract_strided_slice %189 {offsets = [0, 256], sizes = [8, 128], strides = [1, 1]} : vector<8x384xf32> to vector<8x128xf32>
    %209 = vector.extract_strided_slice %191 {offsets = [0, 256], sizes = [8, 128], strides = [1, 1]} : vector<8x384xf32> to vector<8x128xf32>
    %210 = vector.broadcast %3 : vector<1x128xf32> to vector<8x128xf32>
    %211 = arith.addf %209, %210 : vector<8x128xf32>
    %212 = arith.mulf %199, %211 : vector<8x128xf32>
    %213 = arith.addf %208, %212 : vector<8x128xf32>
    %214 = math.tanh %213 : vector<8x128xf32>
    %cst_63 = arith.constant 1.000000e+00 : f32
    %215 = vector.broadcast %cst_63 : f32 to vector<8x128xf32>
    %216 = arith.subf %215, %207 : vector<8x128xf32>
    %217 = arith.mulf %216, %214 : vector<8x128xf32>
    %218 = arith.mulf %207, %148 : vector<8x128xf32>
    %219 = arith.addf %217, %218 : vector<8x128xf32>
    %c3_i32 = arith.constant 3 : i32
    %220 = arith.index_cast %c3_i32 : i32 to index
    %c0_64 = arith.constant 0 : index
    %c0_65 = arith.constant 0 : index
    %221 = vector.load %arg0[%220, %c0_64, %c0_65] : memref<8x8x128xf32, #tpu.memory_space<vmem>>, vector<1x8x128xf32>
    %222 = vector.shape_cast %221 : vector<1x8x128xf32> to vector<8x128xf32>
    %c0_66 = arith.constant 0 : index
    %c0_67 = arith.constant 0 : index
    %223 = vector.load %arg1[%c0_66, %c0_67] : memref<128x1664xf32, #tpu.memory_space<vmem>>, vector<128x384xf32>
    %cst_68 = arith.constant dense<0.000000e+00> : vector<8x384xf32>
    %224 = tpu.matmul %222, %223, %cst_68 {dimension_numbers = #tpu.dot_dimension_numbers<[1], [0], [0], [1], [0, 0, 1, 1], [], []>} : vector<8x128xf32>, vector<128x384xf32>, vector<8x384xf32> -> vector<8x384xf32>
    %225 = vector.broadcast %0 : vector<1x384xf32> to vector<8x384xf32>
    %226 = arith.addf %224, %225 : vector<8x384xf32>
    %c0_69 = arith.constant 0 : index
    %c384_70 = arith.constant 384 : index
    %227 = vector.load %arg1[%c0_69, %c384_70] : memref<128x1664xf32, #tpu.memory_space<vmem>>, vector<128x384xf32>
    %cst_71 = arith.constant dense<0.000000e+00> : vector<8x384xf32>
    %228 = tpu.matmul %185, %227, %cst_71 {dimension_numbers = #tpu.dot_dimension_numbers<[1], [0], [0], [1], [0, 0, 1, 1], [], []>} : vector<8x128xf32>, vector<128x384xf32>, vector<8x384xf32> -> vector<8x384xf32>
    %229 = vector.extract_strided_slice %226 {offsets = [0, 0], sizes = [8, 128], strides = [1, 1]} : vector<8x384xf32> to vector<8x128xf32>
    %230 = vector.extract_strided_slice %228 {offsets = [0, 0], sizes = [8, 128], strides = [1, 1]} : vector<8x384xf32> to vector<8x128xf32>
    %231 = arith.addf %229, %230 : vector<8x128xf32>
    %232 = arith.negf %231 : vector<8x128xf32>
    %233 = math.exp %232 : vector<8x128xf32>
    %cst_72 = arith.constant 1.000000e+00 : f32
    %234 = vector.broadcast %cst_72 : f32 to vector<8x128xf32>
    %235 = arith.addf %234, %233 : vector<8x128xf32>
    %236 = arith.divf %234, %235 : vector<8x128xf32>
    %237 = vector.extract_strided_slice %226 {offsets = [0, 128], sizes = [8, 128], strides = [1, 1]} : vector<8x384xf32> to vector<8x128xf32>
    %238 = vector.extract_strided_slice %228 {offsets = [0, 128], sizes = [8, 128], strides = [1, 1]} : vector<8x384xf32> to vector<8x128xf32>
    %239 = arith.addf %237, %238 : vector<8x128xf32>
    %240 = arith.negf %239 : vector<8x128xf32>
    %241 = math.exp %240 : vector<8x128xf32>
    %cst_73 = arith.constant 1.000000e+00 : f32
    %242 = vector.broadcast %cst_73 : f32 to vector<8x128xf32>
    %243 = arith.addf %242, %241 : vector<8x128xf32>
    %244 = arith.divf %242, %243 : vector<8x128xf32>
    %245 = vector.extract_strided_slice %226 {offsets = [0, 256], sizes = [8, 128], strides = [1, 1]} : vector<8x384xf32> to vector<8x128xf32>
    %246 = vector.extract_strided_slice %228 {offsets = [0, 256], sizes = [8, 128], strides = [1, 1]} : vector<8x384xf32> to vector<8x128xf32>
    %247 = vector.broadcast %1 : vector<1x128xf32> to vector<8x128xf32>
    %248 = arith.addf %246, %247 : vector<8x128xf32>
    %249 = arith.mulf %236, %248 : vector<8x128xf32>
    %250 = arith.addf %245, %249 : vector<8x128xf32>
    %251 = math.tanh %250 : vector<8x128xf32>
    %cst_74 = arith.constant 1.000000e+00 : f32
    %252 = vector.broadcast %cst_74 : f32 to vector<8x128xf32>
    %253 = arith.subf %252, %244 : vector<8x128xf32>
    %254 = arith.mulf %253, %251 : vector<8x128xf32>
    %255 = arith.mulf %244, %185 : vector<8x128xf32>
    %256 = arith.addf %254, %255 : vector<8x128xf32>
    %c0_75 = arith.constant 0 : index
    %c768_76 = arith.constant 768 : index
    %257 = vector.load %arg1[%c0_75, %c768_76] : memref<128x1664xf32, #tpu.memory_space<vmem>>, vector<128x384xf32>
    %cst_77 = arith.constant dense<0.000000e+00> : vector<8x384xf32>
    %258 = tpu.matmul %256, %257, %cst_77 {dimension_numbers = #tpu.dot_dimension_numbers<[1], [0], [0], [1], [0, 0, 1, 1], [], []>} : vector<8x128xf32>, vector<128x384xf32>, vector<8x384xf32> -> vector<8x384xf32>
    %259 = vector.broadcast %2 : vector<1x384xf32> to vector<8x384xf32>
    %260 = arith.addf %258, %259 : vector<8x384xf32>
    %c0_78 = arith.constant 0 : index
    %c1152_79 = arith.constant 1152 : index
    %261 = vector.load %arg1[%c0_78, %c1152_79] : memref<128x1664xf32, #tpu.memory_space<vmem>>, vector<128x384xf32>
    %cst_80 = arith.constant dense<0.000000e+00> : vector<8x384xf32>
    %262 = tpu.matmul %219, %261, %cst_80 {dimension_numbers = #tpu.dot_dimension_numbers<[1], [0], [0], [1], [0, 0, 1, 1], [], []>} : vector<8x128xf32>, vector<128x384xf32>, vector<8x384xf32> -> vector<8x384xf32>
    %263 = vector.extract_strided_slice %260 {offsets = [0, 0], sizes = [8, 128], strides = [1, 1]} : vector<8x384xf32> to vector<8x128xf32>
    %264 = vector.extract_strided_slice %262 {offsets = [0, 0], sizes = [8, 128], strides = [1, 1]} : vector<8x384xf32> to vector<8x128xf32>
    %265 = arith.addf %263, %264 : vector<8x128xf32>
    %266 = arith.negf %265 : vector<8x128xf32>
    %267 = math.exp %266 : vector<8x128xf32>
    %cst_81 = arith.constant 1.000000e+00 : f32
    %268 = vector.broadcast %cst_81 : f32 to vector<8x128xf32>
    %269 = arith.addf %268, %267 : vector<8x128xf32>
    %270 = arith.divf %268, %269 : vector<8x128xf32>
    %271 = vector.extract_strided_slice %260 {offsets = [0, 128], sizes = [8, 128], strides = [1, 1]} : vector<8x384xf32> to vector<8x128xf32>
    %272 = vector.extract_strided_slice %262 {offsets = [0, 128], sizes = [8, 128], strides = [1, 1]} : vector<8x384xf32> to vector<8x128xf32>
    %273 = arith.addf %271, %272 : vector<8x128xf32>
    %274 = arith.negf %273 : vector<8x128xf32>
    %275 = math.exp %274 : vector<8x128xf32>
    %cst_82 = arith.constant 1.000000e+00 : f32
    %276 = vector.broadcast %cst_82 : f32 to vector<8x128xf32>
    %277 = arith.addf %276, %275 : vector<8x128xf32>
    %278 = arith.divf %276, %277 : vector<8x128xf32>
    %279 = vector.extract_strided_slice %260 {offsets = [0, 256], sizes = [8, 128], strides = [1, 1]} : vector<8x384xf32> to vector<8x128xf32>
    %280 = vector.extract_strided_slice %262 {offsets = [0, 256], sizes = [8, 128], strides = [1, 1]} : vector<8x384xf32> to vector<8x128xf32>
    %281 = vector.broadcast %3 : vector<1x128xf32> to vector<8x128xf32>
    %282 = arith.addf %280, %281 : vector<8x128xf32>
    %283 = arith.mulf %270, %282 : vector<8x128xf32>
    %284 = arith.addf %279, %283 : vector<8x128xf32>
    %285 = math.tanh %284 : vector<8x128xf32>
    %cst_83 = arith.constant 1.000000e+00 : f32
    %286 = vector.broadcast %cst_83 : f32 to vector<8x128xf32>
    %287 = arith.subf %286, %278 : vector<8x128xf32>
    %288 = arith.mulf %287, %285 : vector<8x128xf32>
    %289 = arith.mulf %278, %219 : vector<8x128xf32>
    %290 = arith.addf %288, %289 : vector<8x128xf32>
    %c4_i32 = arith.constant 4 : i32
    %291 = arith.index_cast %c4_i32 : i32 to index
    %c0_84 = arith.constant 0 : index
    %c0_85 = arith.constant 0 : index
    %292 = vector.load %arg0[%291, %c0_84, %c0_85] : memref<8x8x128xf32, #tpu.memory_space<vmem>>, vector<1x8x128xf32>
    %293 = vector.shape_cast %292 : vector<1x8x128xf32> to vector<8x128xf32>
    %c0_86 = arith.constant 0 : index
    %c0_87 = arith.constant 0 : index
    %294 = vector.load %arg1[%c0_86, %c0_87] : memref<128x1664xf32, #tpu.memory_space<vmem>>, vector<128x384xf32>
    %cst_88 = arith.constant dense<0.000000e+00> : vector<8x384xf32>
    %295 = tpu.matmul %293, %294, %cst_88 {dimension_numbers = #tpu.dot_dimension_numbers<[1], [0], [0], [1], [0, 0, 1, 1], [], []>} : vector<8x128xf32>, vector<128x384xf32>, vector<8x384xf32> -> vector<8x384xf32>
    %296 = vector.broadcast %0 : vector<1x384xf32> to vector<8x384xf32>
    %297 = arith.addf %295, %296 : vector<8x384xf32>
    %c0_89 = arith.constant 0 : index
    %c384_90 = arith.constant 384 : index
    %298 = vector.load %arg1[%c0_89, %c384_90] : memref<128x1664xf32, #tpu.memory_space<vmem>>, vector<128x384xf32>
    %cst_91 = arith.constant dense<0.000000e+00> : vector<8x384xf32>
    %299 = tpu.matmul %256, %298, %cst_91 {dimension_numbers = #tpu.dot_dimension_numbers<[1], [0], [0], [1], [0, 0, 1, 1], [], []>} : vector<8x128xf32>, vector<128x384xf32>, vector<8x384xf32> -> vector<8x384xf32>
    %300 = vector.extract_strided_slice %297 {offsets = [0, 0], sizes = [8, 128], strides = [1, 1]} : vector<8x384xf32> to vector<8x128xf32>
    %301 = vector.extract_strided_slice %299 {offsets = [0, 0], sizes = [8, 128], strides = [1, 1]} : vector<8x384xf32> to vector<8x128xf32>
    %302 = arith.addf %300, %301 : vector<8x128xf32>
    %303 = arith.negf %302 : vector<8x128xf32>
    %304 = math.exp %303 : vector<8x128xf32>
    %cst_92 = arith.constant 1.000000e+00 : f32
    %305 = vector.broadcast %cst_92 : f32 to vector<8x128xf32>
    %306 = arith.addf %305, %304 : vector<8x128xf32>
    %307 = arith.divf %305, %306 : vector<8x128xf32>
    %308 = vector.extract_strided_slice %297 {offsets = [0, 128], sizes = [8, 128], strides = [1, 1]} : vector<8x384xf32> to vector<8x128xf32>
    %309 = vector.extract_strided_slice %299 {offsets = [0, 128], sizes = [8, 128], strides = [1, 1]} : vector<8x384xf32> to vector<8x128xf32>
    %310 = arith.addf %308, %309 : vector<8x128xf32>
    %311 = arith.negf %310 : vector<8x128xf32>
    %312 = math.exp %311 : vector<8x128xf32>
    %cst_93 = arith.constant 1.000000e+00 : f32
    %313 = vector.broadcast %cst_93 : f32 to vector<8x128xf32>
    %314 = arith.addf %313, %312 : vector<8x128xf32>
    %315 = arith.divf %313, %314 : vector<8x128xf32>
    %316 = vector.extract_strided_slice %297 {offsets = [0, 256], sizes = [8, 128], strides = [1, 1]} : vector<8x384xf32> to vector<8x128xf32>
    %317 = vector.extract_strided_slice %299 {offsets = [0, 256], sizes = [8, 128], strides = [1, 1]} : vector<8x384xf32> to vector<8x128xf32>
    %318 = vector.broadcast %1 : vector<1x128xf32> to vector<8x128xf32>
    %319 = arith.addf %317, %318 : vector<8x128xf32>
    %320 = arith.mulf %307, %319 : vector<8x128xf32>
    %321 = arith.addf %316, %320 : vector<8x128xf32>
    %322 = math.tanh %321 : vector<8x128xf32>
    %cst_94 = arith.constant 1.000000e+00 : f32
    %323 = vector.broadcast %cst_94 : f32 to vector<8x128xf32>
    %324 = arith.subf %323, %315 : vector<8x128xf32>
    %325 = arith.mulf %324, %322 : vector<8x128xf32>
    %326 = arith.mulf %315, %256 : vector<8x128xf32>
    %327 = arith.addf %325, %326 : vector<8x128xf32>
    %c0_95 = arith.constant 0 : index
    %c768_96 = arith.constant 768 : index
    %328 = vector.load %arg1[%c0_95, %c768_96] : memref<128x1664xf32, #tpu.memory_space<vmem>>, vector<128x384xf32>
    %cst_97 = arith.constant dense<0.000000e+00> : vector<8x384xf32>
    %329 = tpu.matmul %327, %328, %cst_97 {dimension_numbers = #tpu.dot_dimension_numbers<[1], [0], [0], [1], [0, 0, 1, 1], [], []>} : vector<8x128xf32>, vector<128x384xf32>, vector<8x384xf32> -> vector<8x384xf32>
    %330 = vector.broadcast %2 : vector<1x384xf32> to vector<8x384xf32>
    %331 = arith.addf %329, %330 : vector<8x384xf32>
    %c0_98 = arith.constant 0 : index
    %c1152_99 = arith.constant 1152 : index
    %332 = vector.load %arg1[%c0_98, %c1152_99] : memref<128x1664xf32, #tpu.memory_space<vmem>>, vector<128x384xf32>
    %cst_100 = arith.constant dense<0.000000e+00> : vector<8x384xf32>
    %333 = tpu.matmul %290, %332, %cst_100 {dimension_numbers = #tpu.dot_dimension_numbers<[1], [0], [0], [1], [0, 0, 1, 1], [], []>} : vector<8x128xf32>, vector<128x384xf32>, vector<8x384xf32> -> vector<8x384xf32>
    %334 = vector.extract_strided_slice %331 {offsets = [0, 0], sizes = [8, 128], strides = [1, 1]} : vector<8x384xf32> to vector<8x128xf32>
    %335 = vector.extract_strided_slice %333 {offsets = [0, 0], sizes = [8, 128], strides = [1, 1]} : vector<8x384xf32> to vector<8x128xf32>
    %336 = arith.addf %334, %335 : vector<8x128xf32>
    %337 = arith.negf %336 : vector<8x128xf32>
    %338 = math.exp %337 : vector<8x128xf32>
    %cst_101 = arith.constant 1.000000e+00 : f32
    %339 = vector.broadcast %cst_101 : f32 to vector<8x128xf32>
    %340 = arith.addf %339, %338 : vector<8x128xf32>
    %341 = arith.divf %339, %340 : vector<8x128xf32>
    %342 = vector.extract_strided_slice %331 {offsets = [0, 128], sizes = [8, 128], strides = [1, 1]} : vector<8x384xf32> to vector<8x128xf32>
    %343 = vector.extract_strided_slice %333 {offsets = [0, 128], sizes = [8, 128], strides = [1, 1]} : vector<8x384xf32> to vector<8x128xf32>
    %344 = arith.addf %342, %343 : vector<8x128xf32>
    %345 = arith.negf %344 : vector<8x128xf32>
    %346 = math.exp %345 : vector<8x128xf32>
    %cst_102 = arith.constant 1.000000e+00 : f32
    %347 = vector.broadcast %cst_102 : f32 to vector<8x128xf32>
    %348 = arith.addf %347, %346 : vector<8x128xf32>
    %349 = arith.divf %347, %348 : vector<8x128xf32>
    %350 = vector.extract_strided_slice %331 {offsets = [0, 256], sizes = [8, 128], strides = [1, 1]} : vector<8x384xf32> to vector<8x128xf32>
    %351 = vector.extract_strided_slice %333 {offsets = [0, 256], sizes = [8, 128], strides = [1, 1]} : vector<8x384xf32> to vector<8x128xf32>
    %352 = vector.broadcast %3 : vector<1x128xf32> to vector<8x128xf32>
    %353 = arith.addf %351, %352 : vector<8x128xf32>
    %354 = arith.mulf %341, %353 : vector<8x128xf32>
    %355 = arith.addf %350, %354 : vector<8x128xf32>
    %356 = math.tanh %355 : vector<8x128xf32>
    %cst_103 = arith.constant 1.000000e+00 : f32
    %357 = vector.broadcast %cst_103 : f32 to vector<8x128xf32>
    %358 = arith.subf %357, %349 : vector<8x128xf32>
    %359 = arith.mulf %358, %356 : vector<8x128xf32>
    %360 = arith.mulf %349, %290 : vector<8x128xf32>
    %361 = arith.addf %359, %360 : vector<8x128xf32>
    %c5_i32 = arith.constant 5 : i32
    %362 = arith.index_cast %c5_i32 : i32 to index
    %c0_104 = arith.constant 0 : index
    %c0_105 = arith.constant 0 : index
    %363 = vector.load %arg0[%362, %c0_104, %c0_105] : memref<8x8x128xf32, #tpu.memory_space<vmem>>, vector<1x8x128xf32>
    %364 = vector.shape_cast %363 : vector<1x8x128xf32> to vector<8x128xf32>
    %c0_106 = arith.constant 0 : index
    %c0_107 = arith.constant 0 : index
    %365 = vector.load %arg1[%c0_106, %c0_107] : memref<128x1664xf32, #tpu.memory_space<vmem>>, vector<128x384xf32>
    %cst_108 = arith.constant dense<0.000000e+00> : vector<8x384xf32>
    %366 = tpu.matmul %364, %365, %cst_108 {dimension_numbers = #tpu.dot_dimension_numbers<[1], [0], [0], [1], [0, 0, 1, 1], [], []>} : vector<8x128xf32>, vector<128x384xf32>, vector<8x384xf32> -> vector<8x384xf32>
    %367 = vector.broadcast %0 : vector<1x384xf32> to vector<8x384xf32>
    %368 = arith.addf %366, %367 : vector<8x384xf32>
    %c0_109 = arith.constant 0 : index
    %c384_110 = arith.constant 384 : index
    %369 = vector.load %arg1[%c0_109, %c384_110] : memref<128x1664xf32, #tpu.memory_space<vmem>>, vector<128x384xf32>
    %cst_111 = arith.constant dense<0.000000e+00> : vector<8x384xf32>
    %370 = tpu.matmul %327, %369, %cst_111 {dimension_numbers = #tpu.dot_dimension_numbers<[1], [0], [0], [1], [0, 0, 1, 1], [], []>} : vector<8x128xf32>, vector<128x384xf32>, vector<8x384xf32> -> vector<8x384xf32>
    %371 = vector.extract_strided_slice %368 {offsets = [0, 0], sizes = [8, 128], strides = [1, 1]} : vector<8x384xf32> to vector<8x128xf32>
    %372 = vector.extract_strided_slice %370 {offsets = [0, 0], sizes = [8, 128], strides = [1, 1]} : vector<8x384xf32> to vector<8x128xf32>
    %373 = arith.addf %371, %372 : vector<8x128xf32>
    %374 = arith.negf %373 : vector<8x128xf32>
    %375 = math.exp %374 : vector<8x128xf32>
    %cst_112 = arith.constant 1.000000e+00 : f32
    %376 = vector.broadcast %cst_112 : f32 to vector<8x128xf32>
    %377 = arith.addf %376, %375 : vector<8x128xf32>
    %378 = arith.divf %376, %377 : vector<8x128xf32>
    %379 = vector.extract_strided_slice %368 {offsets = [0, 128], sizes = [8, 128], strides = [1, 1]} : vector<8x384xf32> to vector<8x128xf32>
    %380 = vector.extract_strided_slice %370 {offsets = [0, 128], sizes = [8, 128], strides = [1, 1]} : vector<8x384xf32> to vector<8x128xf32>
    %381 = arith.addf %379, %380 : vector<8x128xf32>
    %382 = arith.negf %381 : vector<8x128xf32>
    %383 = math.exp %382 : vector<8x128xf32>
    %cst_113 = arith.constant 1.000000e+00 : f32
    %384 = vector.broadcast %cst_113 : f32 to vector<8x128xf32>
    %385 = arith.addf %384, %383 : vector<8x128xf32>
    %386 = arith.divf %384, %385 : vector<8x128xf32>
    %387 = vector.extract_strided_slice %368 {offsets = [0, 256], sizes = [8, 128], strides = [1, 1]} : vector<8x384xf32> to vector<8x128xf32>
    %388 = vector.extract_strided_slice %370 {offsets = [0, 256], sizes = [8, 128], strides = [1, 1]} : vector<8x384xf32> to vector<8x128xf32>
    %389 = vector.broadcast %1 : vector<1x128xf32> to vector<8x128xf32>
    %390 = arith.addf %388, %389 : vector<8x128xf32>
    %391 = arith.mulf %378, %390 : vector<8x128xf32>
    %392 = arith.addf %387, %391 : vector<8x128xf32>
    %393 = math.tanh %392 : vector<8x128xf32>
    %cst_114 = arith.constant 1.000000e+00 : f32
    %394 = vector.broadcast %cst_114 : f32 to vector<8x128xf32>
    %395 = arith.subf %394, %386 : vector<8x128xf32>
    %396 = arith.mulf %395, %393 : vector<8x128xf32>
    %397 = arith.mulf %386, %327 : vector<8x128xf32>
    %398 = arith.addf %396, %397 : vector<8x128xf32>
    %c0_115 = arith.constant 0 : index
    %c768_116 = arith.constant 768 : index
    %399 = vector.load %arg1[%c0_115, %c768_116] : memref<128x1664xf32, #tpu.memory_space<vmem>>, vector<128x384xf32>
    %cst_117 = arith.constant dense<0.000000e+00> : vector<8x384xf32>
    %400 = tpu.matmul %398, %399, %cst_117 {dimension_numbers = #tpu.dot_dimension_numbers<[1], [0], [0], [1], [0, 0, 1, 1], [], []>} : vector<8x128xf32>, vector<128x384xf32>, vector<8x384xf32> -> vector<8x384xf32>
    %401 = vector.broadcast %2 : vector<1x384xf32> to vector<8x384xf32>
    %402 = arith.addf %400, %401 : vector<8x384xf32>
    %c0_118 = arith.constant 0 : index
    %c1152_119 = arith.constant 1152 : index
    %403 = vector.load %arg1[%c0_118, %c1152_119] : memref<128x1664xf32, #tpu.memory_space<vmem>>, vector<128x384xf32>
    %cst_120 = arith.constant dense<0.000000e+00> : vector<8x384xf32>
    %404 = tpu.matmul %361, %403, %cst_120 {dimension_numbers = #tpu.dot_dimension_numbers<[1], [0], [0], [1], [0, 0, 1, 1], [], []>} : vector<8x128xf32>, vector<128x384xf32>, vector<8x384xf32> -> vector<8x384xf32>
    %405 = vector.extract_strided_slice %402 {offsets = [0, 0], sizes = [8, 128], strides = [1, 1]} : vector<8x384xf32> to vector<8x128xf32>
    %406 = vector.extract_strided_slice %404 {offsets = [0, 0], sizes = [8, 128], strides = [1, 1]} : vector<8x384xf32> to vector<8x128xf32>
    %407 = arith.addf %405, %406 : vector<8x128xf32>
    %408 = arith.negf %407 : vector<8x128xf32>
    %409 = math.exp %408 : vector<8x128xf32>
    %cst_121 = arith.constant 1.000000e+00 : f32
    %410 = vector.broadcast %cst_121 : f32 to vector<8x128xf32>
    %411 = arith.addf %410, %409 : vector<8x128xf32>
    %412 = arith.divf %410, %411 : vector<8x128xf32>
    %413 = vector.extract_strided_slice %402 {offsets = [0, 128], sizes = [8, 128], strides = [1, 1]} : vector<8x384xf32> to vector<8x128xf32>
    %414 = vector.extract_strided_slice %404 {offsets = [0, 128], sizes = [8, 128], strides = [1, 1]} : vector<8x384xf32> to vector<8x128xf32>
    %415 = arith.addf %413, %414 : vector<8x128xf32>
    %416 = arith.negf %415 : vector<8x128xf32>
    %417 = math.exp %416 : vector<8x128xf32>
    %cst_122 = arith.constant 1.000000e+00 : f32
    %418 = vector.broadcast %cst_122 : f32 to vector<8x128xf32>
    %419 = arith.addf %418, %417 : vector<8x128xf32>
    %420 = arith.divf %418, %419 : vector<8x128xf32>
    %421 = vector.extract_strided_slice %402 {offsets = [0, 256], sizes = [8, 128], strides = [1, 1]} : vector<8x384xf32> to vector<8x128xf32>
    %422 = vector.extract_strided_slice %404 {offsets = [0, 256], sizes = [8, 128], strides = [1, 1]} : vector<8x384xf32> to vector<8x128xf32>
    %423 = vector.broadcast %3 : vector<1x128xf32> to vector<8x128xf32>
    %424 = arith.addf %422, %423 : vector<8x128xf32>
    %425 = arith.mulf %412, %424 : vector<8x128xf32>
    %426 = arith.addf %421, %425 : vector<8x128xf32>
    %427 = math.tanh %426 : vector<8x128xf32>
    %cst_123 = arith.constant 1.000000e+00 : f32
    %428 = vector.broadcast %cst_123 : f32 to vector<8x128xf32>
    %429 = arith.subf %428, %420 : vector<8x128xf32>
    %430 = arith.mulf %429, %427 : vector<8x128xf32>
    %431 = arith.mulf %420, %361 : vector<8x128xf32>
    %432 = arith.addf %430, %431 : vector<8x128xf32>
    %c6_i32 = arith.constant 6 : i32
    %433 = arith.index_cast %c6_i32 : i32 to index
    %c0_124 = arith.constant 0 : index
    %c0_125 = arith.constant 0 : index
    %434 = vector.load %arg0[%433, %c0_124, %c0_125] : memref<8x8x128xf32, #tpu.memory_space<vmem>>, vector<1x8x128xf32>
    %435 = vector.shape_cast %434 : vector<1x8x128xf32> to vector<8x128xf32>
    %c0_126 = arith.constant 0 : index
    %c0_127 = arith.constant 0 : index
    %436 = vector.load %arg1[%c0_126, %c0_127] : memref<128x1664xf32, #tpu.memory_space<vmem>>, vector<128x384xf32>
    %cst_128 = arith.constant dense<0.000000e+00> : vector<8x384xf32>
    %437 = tpu.matmul %435, %436, %cst_128 {dimension_numbers = #tpu.dot_dimension_numbers<[1], [0], [0], [1], [0, 0, 1, 1], [], []>} : vector<8x128xf32>, vector<128x384xf32>, vector<8x384xf32> -> vector<8x384xf32>
    %438 = vector.broadcast %0 : vector<1x384xf32> to vector<8x384xf32>
    %439 = arith.addf %437, %438 : vector<8x384xf32>
    %c0_129 = arith.constant 0 : index
    %c384_130 = arith.constant 384 : index
    %440 = vector.load %arg1[%c0_129, %c384_130] : memref<128x1664xf32, #tpu.memory_space<vmem>>, vector<128x384xf32>
    %cst_131 = arith.constant dense<0.000000e+00> : vector<8x384xf32>
    %441 = tpu.matmul %398, %440, %cst_131 {dimension_numbers = #tpu.dot_dimension_numbers<[1], [0], [0], [1], [0, 0, 1, 1], [], []>} : vector<8x128xf32>, vector<128x384xf32>, vector<8x384xf32> -> vector<8x384xf32>
    %442 = vector.extract_strided_slice %439 {offsets = [0, 0], sizes = [8, 128], strides = [1, 1]} : vector<8x384xf32> to vector<8x128xf32>
    %443 = vector.extract_strided_slice %441 {offsets = [0, 0], sizes = [8, 128], strides = [1, 1]} : vector<8x384xf32> to vector<8x128xf32>
    %444 = arith.addf %442, %443 : vector<8x128xf32>
    %445 = arith.negf %444 : vector<8x128xf32>
    %446 = math.exp %445 : vector<8x128xf32>
    %cst_132 = arith.constant 1.000000e+00 : f32
    %447 = vector.broadcast %cst_132 : f32 to vector<8x128xf32>
    %448 = arith.addf %447, %446 : vector<8x128xf32>
    %449 = arith.divf %447, %448 : vector<8x128xf32>
    %450 = vector.extract_strided_slice %439 {offsets = [0, 128], sizes = [8, 128], strides = [1, 1]} : vector<8x384xf32> to vector<8x128xf32>
    %451 = vector.extract_strided_slice %441 {offsets = [0, 128], sizes = [8, 128], strides = [1, 1]} : vector<8x384xf32> to vector<8x128xf32>
    %452 = arith.addf %450, %451 : vector<8x128xf32>
    %453 = arith.negf %452 : vector<8x128xf32>
    %454 = math.exp %453 : vector<8x128xf32>
    %cst_133 = arith.constant 1.000000e+00 : f32
    %455 = vector.broadcast %cst_133 : f32 to vector<8x128xf32>
    %456 = arith.addf %455, %454 : vector<8x128xf32>
    %457 = arith.divf %455, %456 : vector<8x128xf32>
    %458 = vector.extract_strided_slice %439 {offsets = [0, 256], sizes = [8, 128], strides = [1, 1]} : vector<8x384xf32> to vector<8x128xf32>
    %459 = vector.extract_strided_slice %441 {offsets = [0, 256], sizes = [8, 128], strides = [1, 1]} : vector<8x384xf32> to vector<8x128xf32>
    %460 = vector.broadcast %1 : vector<1x128xf32> to vector<8x128xf32>
    %461 = arith.addf %459, %460 : vector<8x128xf32>
    %462 = arith.mulf %449, %461 : vector<8x128xf32>
    %463 = arith.addf %458, %462 : vector<8x128xf32>
    %464 = math.tanh %463 : vector<8x128xf32>
    %cst_134 = arith.constant 1.000000e+00 : f32
    %465 = vector.broadcast %cst_134 : f32 to vector<8x128xf32>
    %466 = arith.subf %465, %457 : vector<8x128xf32>
    %467 = arith.mulf %466, %464 : vector<8x128xf32>
    %468 = arith.mulf %457, %398 : vector<8x128xf32>
    %469 = arith.addf %467, %468 : vector<8x128xf32>
    %c0_135 = arith.constant 0 : index
    %c768_136 = arith.constant 768 : index
    %470 = vector.load %arg1[%c0_135, %c768_136] : memref<128x1664xf32, #tpu.memory_space<vmem>>, vector<128x384xf32>
    %cst_137 = arith.constant dense<0.000000e+00> : vector<8x384xf32>
    %471 = tpu.matmul %469, %470, %cst_137 {dimension_numbers = #tpu.dot_dimension_numbers<[1], [0], [0], [1], [0, 0, 1, 1], [], []>} : vector<8x128xf32>, vector<128x384xf32>, vector<8x384xf32> -> vector<8x384xf32>
    %472 = vector.broadcast %2 : vector<1x384xf32> to vector<8x384xf32>
    %473 = arith.addf %471, %472 : vector<8x384xf32>
    %c0_138 = arith.constant 0 : index
    %c1152_139 = arith.constant 1152 : index
    %474 = vector.load %arg1[%c0_138, %c1152_139] : memref<128x1664xf32, #tpu.memory_space<vmem>>, vector<128x384xf32>
    %cst_140 = arith.constant dense<0.000000e+00> : vector<8x384xf32>
    %475 = tpu.matmul %432, %474, %cst_140 {dimension_numbers = #tpu.dot_dimension_numbers<[1], [0], [0], [1], [0, 0, 1, 1], [], []>} : vector<8x128xf32>, vector<128x384xf32>, vector<8x384xf32> -> vector<8x384xf32>
    %476 = vector.extract_strided_slice %473 {offsets = [0, 0], sizes = [8, 128], strides = [1, 1]} : vector<8x384xf32> to vector<8x128xf32>
    %477 = vector.extract_strided_slice %475 {offsets = [0, 0], sizes = [8, 128], strides = [1, 1]} : vector<8x384xf32> to vector<8x128xf32>
    %478 = arith.addf %476, %477 : vector<8x128xf32>
    %479 = arith.negf %478 : vector<8x128xf32>
    %480 = math.exp %479 : vector<8x128xf32>
    %cst_141 = arith.constant 1.000000e+00 : f32
    %481 = vector.broadcast %cst_141 : f32 to vector<8x128xf32>
    %482 = arith.addf %481, %480 : vector<8x128xf32>
    %483 = arith.divf %481, %482 : vector<8x128xf32>
    %484 = vector.extract_strided_slice %473 {offsets = [0, 128], sizes = [8, 128], strides = [1, 1]} : vector<8x384xf32> to vector<8x128xf32>
    %485 = vector.extract_strided_slice %475 {offsets = [0, 128], sizes = [8, 128], strides = [1, 1]} : vector<8x384xf32> to vector<8x128xf32>
    %486 = arith.addf %484, %485 : vector<8x128xf32>
    %487 = arith.negf %486 : vector<8x128xf32>
    %488 = math.exp %487 : vector<8x128xf32>
    %cst_142 = arith.constant 1.000000e+00 : f32
    %489 = vector.broadcast %cst_142 : f32 to vector<8x128xf32>
    %490 = arith.addf %489, %488 : vector<8x128xf32>
    %491 = arith.divf %489, %490 : vector<8x128xf32>
    %492 = vector.extract_strided_slice %473 {offsets = [0, 256], sizes = [8, 128], strides = [1, 1]} : vector<8x384xf32> to vector<8x128xf32>
    %493 = vector.extract_strided_slice %475 {offsets = [0, 256], sizes = [8, 128], strides = [1, 1]} : vector<8x384xf32> to vector<8x128xf32>
    %494 = vector.broadcast %3 : vector<1x128xf32> to vector<8x128xf32>
    %495 = arith.addf %493, %494 : vector<8x128xf32>
    %496 = arith.mulf %483, %495 : vector<8x128xf32>
    %497 = arith.addf %492, %496 : vector<8x128xf32>
    %498 = math.tanh %497 : vector<8x128xf32>
    %cst_143 = arith.constant 1.000000e+00 : f32
    %499 = vector.broadcast %cst_143 : f32 to vector<8x128xf32>
    %500 = arith.subf %499, %491 : vector<8x128xf32>
    %501 = arith.mulf %500, %498 : vector<8x128xf32>
    %502 = arith.mulf %491, %432 : vector<8x128xf32>
    %503 = arith.addf %501, %502 : vector<8x128xf32>
    %c7_i32 = arith.constant 7 : i32
    %504 = arith.index_cast %c7_i32 : i32 to index
    %c0_144 = arith.constant 0 : index
    %c0_145 = arith.constant 0 : index
    %505 = vector.load %arg0[%504, %c0_144, %c0_145] : memref<8x8x128xf32, #tpu.memory_space<vmem>>, vector<1x8x128xf32>
    %506 = vector.shape_cast %505 : vector<1x8x128xf32> to vector<8x128xf32>
    %c0_146 = arith.constant 0 : index
    %c0_147 = arith.constant 0 : index
    %507 = vector.load %arg1[%c0_146, %c0_147] : memref<128x1664xf32, #tpu.memory_space<vmem>>, vector<128x384xf32>
    %cst_148 = arith.constant dense<0.000000e+00> : vector<8x384xf32>
    %508 = tpu.matmul %506, %507, %cst_148 {dimension_numbers = #tpu.dot_dimension_numbers<[1], [0], [0], [1], [0, 0, 1, 1], [], []>} : vector<8x128xf32>, vector<128x384xf32>, vector<8x384xf32> -> vector<8x384xf32>
    %509 = vector.broadcast %0 : vector<1x384xf32> to vector<8x384xf32>
    %510 = arith.addf %508, %509 : vector<8x384xf32>
    %c0_149 = arith.constant 0 : index
    %c384_150 = arith.constant 384 : index
    %511 = vector.load %arg1[%c0_149, %c384_150] : memref<128x1664xf32, #tpu.memory_space<vmem>>, vector<128x384xf32>
    %cst_151 = arith.constant dense<0.000000e+00> : vector<8x384xf32>
    %512 = tpu.matmul %469, %511, %cst_151 {dimension_numbers = #tpu.dot_dimension_numbers<[1], [0], [0], [1], [0, 0, 1, 1], [], []>} : vector<8x128xf32>, vector<128x384xf32>, vector<8x384xf32> -> vector<8x384xf32>
    %513 = vector.extract_strided_slice %510 {offsets = [0, 0], sizes = [8, 128], strides = [1, 1]} : vector<8x384xf32> to vector<8x128xf32>
    %514 = vector.extract_strided_slice %512 {offsets = [0, 0], sizes = [8, 128], strides = [1, 1]} : vector<8x384xf32> to vector<8x128xf32>
    %515 = arith.addf %513, %514 : vector<8x128xf32>
    %516 = arith.negf %515 : vector<8x128xf32>
    %517 = math.exp %516 : vector<8x128xf32>
    %cst_152 = arith.constant 1.000000e+00 : f32
    %518 = vector.broadcast %cst_152 : f32 to vector<8x128xf32>
    %519 = arith.addf %518, %517 : vector<8x128xf32>
    %520 = arith.divf %518, %519 : vector<8x128xf32>
    %521 = vector.extract_strided_slice %510 {offsets = [0, 128], sizes = [8, 128], strides = [1, 1]} : vector<8x384xf32> to vector<8x128xf32>
    %522 = vector.extract_strided_slice %512 {offsets = [0, 128], sizes = [8, 128], strides = [1, 1]} : vector<8x384xf32> to vector<8x128xf32>
    %523 = arith.addf %521, %522 : vector<8x128xf32>
    %524 = arith.negf %523 : vector<8x128xf32>
    %525 = math.exp %524 : vector<8x128xf32>
    %cst_153 = arith.constant 1.000000e+00 : f32
    %526 = vector.broadcast %cst_153 : f32 to vector<8x128xf32>
    %527 = arith.addf %526, %525 : vector<8x128xf32>
    %528 = arith.divf %526, %527 : vector<8x128xf32>
    %529 = vector.extract_strided_slice %510 {offsets = [0, 256], sizes = [8, 128], strides = [1, 1]} : vector<8x384xf32> to vector<8x128xf32>
    %530 = vector.extract_strided_slice %512 {offsets = [0, 256], sizes = [8, 128], strides = [1, 1]} : vector<8x384xf32> to vector<8x128xf32>
    %531 = vector.broadcast %1 : vector<1x128xf32> to vector<8x128xf32>
    %532 = arith.addf %530, %531 : vector<8x128xf32>
    %533 = arith.mulf %520, %532 : vector<8x128xf32>
    %534 = arith.addf %529, %533 : vector<8x128xf32>
    %535 = math.tanh %534 : vector<8x128xf32>
    %cst_154 = arith.constant 1.000000e+00 : f32
    %536 = vector.broadcast %cst_154 : f32 to vector<8x128xf32>
    %537 = arith.subf %536, %528 : vector<8x128xf32>
    %538 = arith.mulf %537, %535 : vector<8x128xf32>
    %539 = arith.mulf %528, %469 : vector<8x128xf32>
    %540 = arith.addf %538, %539 : vector<8x128xf32>
    %c0_155 = arith.constant 0 : index
    %c768_156 = arith.constant 768 : index
    %541 = vector.load %arg1[%c0_155, %c768_156] : memref<128x1664xf32, #tpu.memory_space<vmem>>, vector<128x384xf32>
    %cst_157 = arith.constant dense<0.000000e+00> : vector<8x384xf32>
    %542 = tpu.matmul %540, %541, %cst_157 {dimension_numbers = #tpu.dot_dimension_numbers<[1], [0], [0], [1], [0, 0, 1, 1], [], []>} : vector<8x128xf32>, vector<128x384xf32>, vector<8x384xf32> -> vector<8x384xf32>
    %543 = vector.broadcast %2 : vector<1x384xf32> to vector<8x384xf32>
    %544 = arith.addf %542, %543 : vector<8x384xf32>
    %c0_158 = arith.constant 0 : index
    %c1152_159 = arith.constant 1152 : index
    %545 = vector.load %arg1[%c0_158, %c1152_159] : memref<128x1664xf32, #tpu.memory_space<vmem>>, vector<128x384xf32>
    %cst_160 = arith.constant dense<0.000000e+00> : vector<8x384xf32>
    %546 = tpu.matmul %503, %545, %cst_160 {dimension_numbers = #tpu.dot_dimension_numbers<[1], [0], [0], [1], [0, 0, 1, 1], [], []>} : vector<8x128xf32>, vector<128x384xf32>, vector<8x384xf32> -> vector<8x384xf32>
    %547 = vector.extract_strided_slice %544 {offsets = [0, 0], sizes = [8, 128], strides = [1, 1]} : vector<8x384xf32> to vector<8x128xf32>
    %548 = vector.extract_strided_slice %546 {offsets = [0, 0], sizes = [8, 128], strides = [1, 1]} : vector<8x384xf32> to vector<8x128xf32>
    %549 = arith.addf %547, %548 : vector<8x128xf32>
    %550 = arith.negf %549 : vector<8x128xf32>
    %551 = math.exp %550 : vector<8x128xf32>
    %cst_161 = arith.constant 1.000000e+00 : f32
    %552 = vector.broadcast %cst_161 : f32 to vector<8x128xf32>
    %553 = arith.addf %552, %551 : vector<8x128xf32>
    %554 = arith.divf %552, %553 : vector<8x128xf32>
    %555 = vector.extract_strided_slice %544 {offsets = [0, 128], sizes = [8, 128], strides = [1, 1]} : vector<8x384xf32> to vector<8x128xf32>
    %556 = vector.extract_strided_slice %546 {offsets = [0, 128], sizes = [8, 128], strides = [1, 1]} : vector<8x384xf32> to vector<8x128xf32>
    %557 = arith.addf %555, %556 : vector<8x128xf32>
    %558 = arith.negf %557 : vector<8x128xf32>
    %559 = math.exp %558 : vector<8x128xf32>
    %cst_162 = arith.constant 1.000000e+00 : f32
    %560 = vector.broadcast %cst_162 : f32 to vector<8x128xf32>
    %561 = arith.addf %560, %559 : vector<8x128xf32>
    %562 = arith.divf %560, %561 : vector<8x128xf32>
    %563 = vector.extract_strided_slice %544 {offsets = [0, 256], sizes = [8, 128], strides = [1, 1]} : vector<8x384xf32> to vector<8x128xf32>
    %564 = vector.extract_strided_slice %546 {offsets = [0, 256], sizes = [8, 128], strides = [1, 1]} : vector<8x384xf32> to vector<8x128xf32>
    %565 = vector.broadcast %3 : vector<1x128xf32> to vector<8x128xf32>
    %566 = arith.addf %564, %565 : vector<8x128xf32>
    %567 = arith.mulf %554, %566 : vector<8x128xf32>
    %568 = arith.addf %563, %567 : vector<8x128xf32>
    %569 = math.tanh %568 : vector<8x128xf32>
    %cst_163 = arith.constant 1.000000e+00 : f32
    %570 = vector.broadcast %cst_163 : f32 to vector<8x128xf32>
    %571 = arith.subf %570, %562 : vector<8x128xf32>
    %572 = arith.mulf %571, %569 : vector<8x128xf32>
    %573 = arith.mulf %562, %503 : vector<8x128xf32>
    %574 = arith.addf %572, %573 : vector<8x128xf32>
    %c8_i32 = arith.constant 8 : i32
    %c0_164 = arith.constant 0 : index
    %c1536 = arith.constant 1536 : index
    %575 = vector.load %arg1[%c0_164, %c1536] : memref<128x1664xf32, #tpu.memory_space<vmem>>, vector<128x128xf32>
    %cst_165 = arith.constant dense<0.000000e+00> : vector<8x128xf32>
    %576 = tpu.matmul %574, %575, %cst_165 {dimension_numbers = #tpu.dot_dimension_numbers<[1], [0], [0], [1], [0, 0, 1, 1], [], []>} : vector<8x128xf32>, vector<128x128xf32>, vector<8x128xf32> -> vector<8x128xf32>
    %577 = vector.broadcast %4 : vector<1x128xf32> to vector<8x128xf32>
    %578 = arith.addf %576, %577 : vector<8x128xf32>
    %cst_166 = arith.constant dense<0xFF800000> : vector<8xf32>
    %579 = vector.multi_reduction <maximumf>, %578, %cst_166 [1] : vector<8x128xf32> to vector<8xf32>
    %580 = vector.shape_cast %579 : vector<8xf32> to vector<8x1xf32>
    %581 = vector.broadcast %580 : vector<8x1xf32> to vector<8x128xf32>
    %582 = arith.subf %578, %581 : vector<8x128xf32>
    %583 = math.exp %582 : vector<8x128xf32>
    %cst_167 = arith.constant dense<0.000000e+00> : vector<8xf32>
    %584 = vector.multi_reduction <add>, %583, %cst_167 [1] : vector<8x128xf32> to vector<8xf32>
    %585 = vector.shape_cast %584 : vector<8xf32> to vector<8x1xf32>
    %586 = vector.broadcast %585 : vector<8x1xf32> to vector<8x128xf32>
    %587 = arith.divf %583, %586 : vector<8x128xf32>
    %c0_168 = arith.constant 0 : index
    %c0_169 = arith.constant 0 : index
    %588 = vector.load %arg3[%c0_168, %c0_169] : memref<8x128xf32, #tpu.memory_space<vmem>>, vector<8x128xf32>
    tpu.vector_store %arg3[%c0_168, %c0_169], %587 {strides = array<i32>} : memref<8x128xf32, #tpu.memory_space<vmem>>, vector<8x128xf32>,
    return
  }
}

</mosaic_0001>

<bundles_post_ra>
// kernel: gru_entry_classifier.1
= control target key start
LH: loop header
LB: loop body
LE: loop exit
PB: predicated region body
PF: predicated region fallthrough
CT: control target
= control target key end

     0   :  { %8 = vsyncpa [#allocation3], 0  ;;  %s7786_s12 = smov [#allocation2]   ;;  %s11790_s0 = inlined_call_operand.vmem [shape: f32[8,8,128], index: 0, kind: input, shape index: {}]   ;;  %s11791_s1 = inlined_call_operand.hbm [shape: f32[128,1664], index: 1, kind: input, shape index: {}]   ;;  %s11792_s2 = inlined_call_operand.vmem [shape: f32[1,1152], index: 2, kind: input, shape index: {}]   ;;  %s11793_s3 = inlined_call_operand.vmem [shape: f32[8,128], index: 3, kind: output, shape index: {}]  }
   0x1   :  { %s16_s13 = sshll.u32 %s7786_s12, 4  ;;  %s17_s13 = int_to_ptr.vmem [resolvable:$true] %s16_s13 }
   0x2   :  { %s7772_s14 = scalar_lea.vmem %s17_s13, 26624  ;;  %p7777_p1 = scmp.lt.s32.totalorder %s17_s13, %s17_s13 }
   0x3   :  { %p7773_p0 = scmp.ne.s32.totalorder %s17_s13, %s7772_s14  ;;  %p7778_p2 = scmp.lt.s32.totalorder %s7772_s14, %s7772_s14 }
   0x5   :  { %p7779_p3 = por %p7778_p2, %p7777_p1 }
   0x7   :  { %p7780_p4 = pnand %p7779_p3, %p7773_p0 }
   0x9   :  { %7783 = shalt.err (!%p7780_p4)
}
   0xa   :  { %s7787_s15 = smov 1664   ;;  %s7788_s16 = smov 104  }
   0xb   :  { %22 = dma.hbm_to_vmem [thread:$0]  %s11791_s1, 26624, %s17_s13, [#allocation3], %s7787_s15, %s7787_s15, %s7788_s16  }
   0xc   :  { %7784 = dma.done.wait [#allocation3], 26624  }
   0xd   :  { %7785 = vsyncadd [#allocation3], 4294940672  ;;  %v11886_v0 = vmov 0.0   ;;  %vm7790_vm0 = vmmov 0   ;;  %v7818_v1 = vld [vmem:[#allocation2 + $0x620] sm:$0xff]  ;;  %v7820_v2 = vld [vmem:[#allocation2 + $0x618] sm:$0xff] }
   0xe   :  { %5858 = vmatprep.subr.mxu1 %v11886_v0  ;;  %162 = vmatprep.mubr.f32.mxu0 %v11886_v0  ;;  %v7822_v3 = vld [vmem:[#allocation2 + $0x5b8] sm:$0xff]  ;;  %v7825_v4 = vld [vmem:[#allocation2 + $0x5b0] sm:$0xff]  ;;  %v7831_v6 = vld [vmem:[#allocation2 + $0x548] sm:$0xff] }
   0xf   :  { %5890 = vmatprep.mubr.msk.f32.mxu1 %vm7790_vm0, %v11886_v0  ;;  %98 = vmatprep.subr.mxu0 %v7818_v1  ;;  %v7828_v5 = vld [vmem:[#allocation2 + $0x550] sm:$0xff]  ;;  %v7834_v7 = vld [vmem:[#allocation2 + $0x4e8] sm:$0xff]  ;;  %v7837_v8 = vld [vmem:[#allocation2 + $0x4e0] sm:$0xff] }
  0x10   :  { %99 = vmatpush1.msra.mxu0 %v7820_v2  ;;  %v7840_v9 = vld [vmem:[#allocation2 + $0x480] sm:$0xff]  ;;  %v7843_v10 = vld [vmem:[#allocation2 + $0x478] sm:$0xff]  ;;  %v7849_v12 = vld [vmem:[#allocation2 + $0x410] sm:$0xff] }
  0x11   :  { %100 = vmatprep.subr.mxu0 %v7822_v3  ;;  %v7846_v11 = vld [vmem:[#allocation2 + $0x418] sm:$0xff]  ;;  %v7852_v13 = vld [vmem:[#allocation2 + $0x3b0] sm:$0xff]  ;;  %v7854_v14 = vld [vmem:[#allocation2 + $0x628] sm:$0xff] }
  0x12   :  { %101 = vmatpush1.msra.mxu0 %v7825_v4  ;;  %v7857_v15 = vld [vmem:[#allocation2 + $0x3a8] sm:$0xff]  ;;  %5859 = vmatpush3.msra.mxu1 %v7854_v14  ;;  %v7860_v16 = vld [vmem:[#allocation2 + $0x5c0] sm:$0xff]  ;;  %v7866_v18 = vld [vmem:[#allocation2 + $0x558] sm:$0xff] }
  0x13   :  { %102 = vmatprep.subr.mxu0 %v7828_v5  ;;  %v7863_v17 = vld [vmem:[#allocation2 + $0x348] sm:$0xff]  ;;  %5860 = vmatprep.subr.mxu1 %v11886_v0  ;;  %v7869_v19 = vld [vmem:[#allocation2 + $0x340] sm:$0xff]  ;;  %v7876_v21 = vld [vmem:[#allocation2 + $0x4f0] sm:$0xff] }
  0x14   :  { %103 = vmatpush1.msra.mxu0 %v7831_v6  ;;  %5861 = vmatpush3.msra.mxu1 %v7860_v16  ;;  %v7873_v20 = vld [vmem:[#allocation2 + $0x2e0] sm:$0xff]  ;;  %v7879_v22 = vld [vmem:[#allocation2 + $0x2d8] sm:$0xff]  ;;  %v7886_v24 = vld [vmem:[#allocation2 + $0x488] sm:$0xff] }
  0x15   :  { %104 = vmatprep.subr.mxu0 %v7834_v7  ;;  %5862 = vmatprep.subr.mxu1 %v11886_v0  ;;  %v7883_v23 = vld [vmem:[#allocation2 + $0x278] sm:$0xff]  ;;  %v7889_v25 = vld [vmem:[#allocation2 + $0x270] sm:$0xff]  ;;  %v7896_v27 = vld [vmem:[#allocation2 + $0x420] sm:$0xff] }
  0x16   :  { %105 = vmatpush1.msra.mxu0 %v7837_v8  ;;  %5863 = vmatpush3.msra.mxu1 %v7866_v18  ;;  %v7893_v26 = vld [vmem:[#allocation2 + $0x210] sm:$0xff]  ;;  %v7899_v28 = vld [vmem:[#allocation2 + $0x208] sm:$0xff]  ;;  %v7906_v30 = vld [vmem:[#allocation2 + $0x3b8] sm:$0xff] }
  0x17   :  { %106 = vmatprep.subr.mxu0 %v7840_v9  ;;  %5864 = vmatprep.subr.mxu1 %v11886_v0  ;;  %v7903_v29 = vld [vmem:[#allocation2 + $0x1a8] sm:$0xff]  ;;  %v7909_v31 = vld [vmem:[#allocation2 + $0x1a0] sm:$0xff]  ;;  %v7916_v33 = vld [vmem:[#allocation2 + $0x350] sm:$0xff] }
  0x18   :  { %107 = vmatpush1.msra.mxu0 %v7843_v10  ;;  %5865 = vmatpush3.msra.mxu1 %v7876_v21  ;;  %v7913_v32 = vld [vmem:[#allocation2 + $0x140] sm:$0xff]  ;;  %v7919_v34 = vld [vmem:[#allocation2 + $0x138] sm:$0xff]  ;;  %v7926_v36 = vld [vmem:[#allocation2 + $0x2e8] sm:$0xff] }
  0x19   :  { %108 = vmatprep.subr.mxu0 %v7846_v11  ;;  %5866 = vmatprep.subr.mxu1 %v11886_v0  ;;  %v7923_v35 = vld [vmem:[#allocation2 + $0xd8] sm:$0xff]  ;;  %v7929_v37 = vld [vmem:[#allocation2 + $0xd0] sm:$0xff]  ;;  %v7936_v39 = vld [vmem:[#allocation2 + $0x280] sm:$0xff] }
  0x1a   :  { %109 = vmatpush1.msra.mxu0 %v7849_v12  ;;  %5867 = vmatpush3.msra.mxu1 %v7886_v24  ;;  %v7933_v38 = vld [vmem:[#allocation2 + $0x70] sm:$0xff]  ;;  %v7939_v40 = vld [vmem:[#allocation2 + $0x68] sm:$0xff]  ;;  %v7946_v42 = vld [vmem:[#allocation2 + $0x218] sm:$0xff] }
  0x1b   :  { %110 = vmatprep.subr.mxu0 %v7852_v13  ;;  %5868 = vmatprep.subr.mxu1 %v11886_v0  ;;  %v7943_v41 = vld [vmem:[#allocation2 + $0x8] sm:$0xff]  ;;  %v7949_v43 = vld [vmem:[#allocation2] sm:$0xff]  ;;  %v7956_v45 = vld [vmem:[#allocation2 + $0x638] sm:$0xff] }
  0x1c   :  { %111 = vmatpush1.msra.mxu0 %v7857_v15  ;;  %5869 = vmatpush3.msra.mxu1 %v7896_v27  ;;  %12364 = vst [vmem:[#allocation5_spill] sm:$0xff] %v7943_v41  ;;  %12365 = vst [vmem:[#allocation6_spill] sm:$0xff] %v7949_v43  ;;  %v33_v44 = vld [vmem:[%s11790_s0] sm:$0xff]  ;;  %v7960_v46 = vld [vmem:[#allocation2 + $0x630] sm:$0xff] }
  0x1d   :  { %112 = vmatprep.subr.mxu0 %v7863_v17  ;;  %5870 = vmatprep.subr.mxu1 %v11886_v0  ;;  %12366 = vst [vmem:[#allocation7_spill] sm:$0xff] %v7956_v45  ;;  %12367 = vst [vmem:[#allocation8_spill] sm:$0xff] %v7960_v46  ;;  %v7963_v47 = vld [vmem:[#allocation2 + $0x1b0] sm:$0xff]  ;;  %v7970_v49 = vld [vmem:[#allocation2 + $0x5c8] sm:$0xff] }
  0x1e   :  { %113 = vmatpush1.msra.mxu0 %v7869_v19  ;;  %5871 = vmatpush3.msra.mxu1 %v7906_v30  ;;  %v7966_v48 = vld [vmem:[#allocation2 + $0x5d0] sm:$0xff]  ;;  %12369 = vst [vmem:[#allocation10_spill] sm:$0xff] %v7970_v49  ;;  %v7972_v50 = vld [vmem:[#allocation2 + $0x148] sm:$0xff]  ;;  %v7979_v52 = vld [vmem:[#allocation2 + $0x560] sm:$0xff] }
  0x1f   :  { %114 = vmatprep.subr.mxu0 %v7873_v20  ;;  %5872 = vmatprep.subr.mxu1 %v11886_v0  ;;  %12368 = vst [vmem:[#allocation9_spill] sm:$0xff] %v7966_v48  ;;  %v7975_v51 = vld [vmem:[#allocation2 + $0x568] sm:$0xff]  ;;  %12371 = vst [vmem:[#allocation12_spill] sm:$0xff] %v7979_v52  ;;  %v7982_v53 = vld [vmem:[#allocation2 + $0xe0] sm:$0xff] }
  0x20   :  { %115 = vmatpush1.msra.mxu0 %v7879_v22  ;;  %5873 = vmatpush3.msra.mxu1 %v7916_v33  ;;  %12370 = vst [vmem:[#allocation11_spill] sm:$0xff] %v7975_v51  ;;  %v7985_v54 = vld [vmem:[#allocation2 + $0x500] sm:$0xff]  ;;  %v7989_v55 = vld [vmem:[#allocation2 + $0x4f8] sm:$0xff]  ;;  %v7999_v58 = vld [vmem:[#allocation2 + $0x490] sm:$0xff] }
  0x21   :  { %116 = vmatprep.subr.mxu0 %v7883_v23  ;;  %5874 = vmatprep.subr.mxu1 %v11886_v0  ;;  %12372 = vst [vmem:[#allocation13_spill] sm:$0xff] %v7985_v54  ;;  %12373 = vst [vmem:[#allocation14_spill] sm:$0xff] %v7989_v55  ;;  %v7992_v56 = vld [vmem:[#allocation2 + $0x78] sm:$0xff]  ;;  %v8002_v59 = vld [vmem:[#allocation2 + $0x10] sm:$0xff] }
  0x22   :  { %117 = vmatpush1.msra.mxu0 %v7889_v25  ;;  %5875 = vmatpush3.msra.mxu1 %v7926_v36  ;;  %12374 = vst [vmem:[#allocation15_spill] sm:$0xff] %v7992_v56  ;;  %v7995_v57 = vld [vmem:[#allocation2 + $0x498] sm:$0xff]  ;;  %12376 = vst [vmem:[#allocation17_spill] sm:$0xff] %v7999_v58  ;;  %v8005_v60 = vld [vmem:[#allocation2 + $0x430] sm:$0xff] }
  0x23   :  { %118 = vmatprep.subr.mxu0 %v7893_v26  ;;  %5876 = vmatprep.subr.mxu1 %v11886_v0  ;;  %12375 = vst [vmem:[#allocation16_spill] sm:$0xff] %v7995_v57  ;;  %12377 = vst [vmem:[#allocation18_spill] sm:$0xff] %v8002_v59  ;;  %v8009_v61 = vld [vmem:[#allocation2 + $0x428] sm:$0xff]  ;;  %v8017_v63 = vld [vmem:[#allocation2 + $0x3c0] sm:$0xff] }
  0x24   :  { %119 = vmatpush1.msra.mxu0 %v7899_v28  ;;  %5877 = vmatpush3.msra.mxu1 %v7936_v39  ;;  %12378 = vst [vmem:[#allocation19_spill] sm:$0xff] %v8005_v60  ;;  %12379 = vst [vmem:[#allocation20_spill] sm:$0xff] %v8009_v61  ;;  %v8013_v62 = vld [vmem:[#allocation2 + $0x3c8] sm:$0xff] }
  0x25   :  { %120 = vmatprep.subr.mxu0 %v7903_v29  ;;  %5878 = vmatprep.subr.mxu1 %v11886_v0  ;;  %12380 = vst [vmem:[#allocation21_spill] sm:$0xff] %v8013_v62  ;;  %12381 = vst [vmem:[#allocation22_spill] sm:$0xff] %v8017_v63 }
  0x26   :  { %121 = vmatpush1.msra.mxu0 %v7909_v31  ;;  %5879 = vmatpush3.msra.mxu1 %v7946_v42 }
  0x27   :  { %122 = vmatprep.subr.mxu0 %v7913_v32  ;;  %5880 = vmatprep.subr.mxu1 %v11886_v0 }
  0x28   :  { %123 = vmatpush1.msra.mxu0 %v7919_v34  ;;  %5881 = vmatpush3.msra.mxu1 %v7963_v47 }
  0x29   :  { %124 = vmatprep.subr.mxu0 %v7923_v35  ;;  %5882 = vmatprep.subr.mxu1 %v11886_v0 }
  0x2a   :  { %125 = vmatpush1.msra.mxu0 %v7929_v37  ;;  %5883 = vmatpush3.msra.mxu1 %v7972_v50 }
  0x2b   :  { %126 = vmatprep.subr.mxu0 %v7933_v38  ;;  %5884 = vmatprep.subr.mxu1 %v11886_v0 }
  0x2c   :  { %127 = vmatpush1.msra.mxu0 %v7939_v40  ;;  %5885 = vmatpush3.msra.mxu1 %v7982_v53 }
  0x2d   :  { %128 = vmatprep.subr.mxu0 %v7943_v41  ;;  %5886 = vmatprep.subr.mxu1 %v11886_v0 }
  0x2e   :  { %129 = vmatpush1.msra.mxu0 %v7949_v43  ;;  %5887 = vmatpush3.msra.mxu1 %v7992_v56 }
  0x2f   :  { %163 = vmatmul.mubr.f32.vlgmr.msra.gmra.mxu0 %v33_v44  ;;  %287 = vmatprep.subr.mxu0 %v7956_v45 }
  0x30   :  { %288 = vmatpush1.msra.mxu0 %v7960_v46  ;;  %5888 = vmatprep.subr.mxu1 %v11886_v0 }
  0x31   :  { %289 = vmatprep.subr.mxu0 %v7966_v48  ;;  %5889 = vmatpush3.msra.mxu1 %v8002_v59 }
  0x32   :  { %290 = vmatpush1.msra.mxu0 %v7970_v49  ;;  %5893 = vmatprep.subr.mxu1 %v11886_v0 }
  0x33   :  { %291 = vmatprep.subr.mxu0 %v7975_v51  ;;  %5891 = vmatmul.mubr.f32.vlgmr.msra.gmra.mxu1 %v33_v44  ;;  %v8039_v44 = vld [vmem:[#allocation2 + $0x570] sm:$0xff]  ;;  %v8059_v51 = vld [vmem:[#allocation2 + $0x4a0] sm:$0xff] }
  0x34   :  { %292 = vmatpush1.msra.mxu0 %v7979_v52  ;;  %351 = vmatprep.mubr.f32.mxu0 %v11886_v0  ;;  %12388 = vst [vmem:[#allocation29_spill] sm:$0xff] %v8039_v44  ;;  %v8049_v52 = vld [vmem:[#allocation2 + $0x508] sm:$0xff]  ;;  %12394 = vst [vmem:[#allocation35_spill] sm:$0xff] %v8059_v51 }
  0x35   :  { %293 = vmatprep.subr.mxu0 %v7985_v54  ;;  %v8029_v54 = vld [vmem:[#allocation2 + $0x5d8] sm:$0xff]  ;;  %12391 = vst [vmem:[#allocation32_spill] sm:$0xff] %v8049_v52  ;;  %5925 = vmatprep.mubr.msk.f32.mxu1 %vm7790_vm0, %v11886_v0 }
  0x36   :  { %294 = vmatpush1.msra.mxu0 %v7989_v55  ;;  %v8020_v55 = vld [vmem:[#allocation2 + $0x640] sm:$0xff]  ;;  %12385 = vst [vmem:[#allocation26_spill] sm:$0xff] %v8029_v54 }
  0x37   :  { %295 = vmatprep.subr.mxu0 %v7995_v57  ;;  %12382 = vst [vmem:[#allocation23_spill] sm:$0xff] %v8020_v55  ;;  %v8023_v57 = vld [vmem:[#allocation2 + $0x360] sm:$0xff]  ;;  %5894 = vmatpush3.msra.mxu1 %v8020_v55 }
  0x38   :  { %296 = vmatpush1.msra.mxu0 %v7999_v58  ;;  %12383 = vst [vmem:[#allocation24_spill] sm:$0xff] %v8023_v57  ;;  %v8026_v58 = vld [vmem:[#allocation2 + $0x358] sm:$0xff]  ;;  %5895 = vmatprep.subr.mxu1 %v11886_v0 }
  0x39   :  { %297 = vmatprep.subr.mxu0 %v8005_v60  ;;  %12384 = vst [vmem:[#allocation25_spill] sm:$0xff] %v8026_v58  ;;  %v8032_v60 = vld [vmem:[#allocation2 + $0x2f8] sm:$0xff]  ;;  %5896 = vmatpush3.msra.mxu1 %v8029_v54 }
  0x3a   :  { %298 = vmatpush1.msra.mxu0 %v8009_v61  ;;  %12386 = vst [vmem:[#allocation27_spill] sm:$0xff] %v8032_v60  ;;  %v8036_v61 = vld [vmem:[#allocation2 + $0x2f0] sm:$0xff]  ;;  %5897 = vmatprep.subr.mxu1 %v11886_v0 }
  0x3b   :  { %299 = vmatprep.subr.mxu0 %v8013_v62  ;;  %12387 = vst [vmem:[#allocation28_spill] sm:$0xff] %v8036_v61  ;;  %v8042_v62 = vld [vmem:[#allocation2 + $0x290] sm:$0xff]  ;;  %5898 = vmatpush3.msra.mxu1 %v8039_v44  ;;  %v8069_v44 = vld [vmem:[#allocation2 + $0x438] sm:$0xff] }
  0x3c   :  { %300 = vmatpush1.msra.mxu0 %v8017_v63  ;;  %12389 = vst [vmem:[#allocation30_spill] sm:$0xff] %v8042_v62  ;;  %v8046_v63 = vld [vmem:[#allocation2 + $0x288] sm:$0xff]  ;;  %5899 = vmatprep.subr.mxu1 %v11886_v0  ;;  %12397 = vst [vmem:[#allocation38_spill] sm:$0xff] %v8069_v44 }
  0x3d   :  { %301 = vmatprep.subr.mxu0 %v8023_v57  ;;  %12390 = vst [vmem:[#allocation31_spill] sm:$0xff] %v8046_v63  ;;  %v8052_v57 = vld [vmem:[#allocation2 + $0x228] sm:$0xff]  ;;  %5900 = vmatpush3.msra.mxu1 %v8049_v52  ;;  %v8079_v52 = vld [vmem:[#allocation2 + $0x3d0] sm:$0xff] }
  0x3e   :  { %302 = vmatpush1.msra.mxu0 %v8026_v58  ;;  %12392 = vst [vmem:[#allocation33_spill] sm:$0xff] %v8052_v57  ;;  %v8056_v58 = vld [vmem:[#allocation2 + $0x220] sm:$0xff]  ;;  %5901 = vmatprep.subr.mxu1 %v11886_v0  ;;  %12400 = vst [vmem:[#allocation41_spill] sm:$0xff] %v8079_v52 }
  0x3f   :  { %303 = vmatprep.subr.mxu0 %v8032_v60  ;;  %12393 = vst [vmem:[#allocation34_spill] sm:$0xff] %v8056_v58  ;;  %v8062_v60 = vld [vmem:[#allocation2 + $0x1c0] sm:$0xff]  ;;  %5902 = vmatpush3.msra.mxu1 %v8059_v51  ;;  %v8089_v51 = vld [vmem:[#allocation2 + $0x368] sm:$0xff] }
  0x40   :  { %304 = vmatpush1.msra.mxu0 %v8036_v61  ;;  %12395 = vst [vmem:[#allocation36_spill] sm:$0xff] %v8062_v60  ;;  %v8066_v61 = vld [vmem:[#allocation2 + $0x1b8] sm:$0xff]  ;;  %5903 = vmatprep.subr.mxu1 %v11886_v0  ;;  %12403 = vst [vmem:[#allocation44_spill] sm:$0xff] %v8089_v51 }
  0x41   :  { %305 = vmatprep.subr.mxu0 %v8042_v62  ;;  %12396 = vst [vmem:[#allocation37_spill] sm:$0xff] %v8066_v61  ;;  %v8072_v62 = vld [vmem:[#allocation2 + $0x158] sm:$0xff]  ;;  %5904 = vmatpush3.msra.mxu1 %v8069_v44  ;;  %v8099_v44 = vld [vmem:[#allocation2 + $0x300] sm:$0xff] }
  0x42   :  { %306 = vmatpush1.msra.mxu0 %v8046_v63  ;;  %12398 = vst [vmem:[#allocation39_spill] sm:$0xff] %v8072_v62  ;;  %v8076_v63 = vld [vmem:[#allocation2 + $0x150] sm:$0xff]  ;;  %5905 = vmatprep.subr.mxu1 %v11886_v0  ;;  %12406 = vst [vmem:[#allocation47_spill] sm:$0xff] %v8099_v44 }
  0x43   :  { %307 = vmatprep.subr.mxu0 %v8052_v57  ;;  %12399 = vst [vmem:[#allocation40_spill] sm:$0xff] %v8076_v63  ;;  %v8082_v57 = vld [vmem:[#allocation2 + $0xf0] sm:$0xff]  ;;  %5906 = vmatpush3.msra.mxu1 %v8079_v52  ;;  %v8109_v52 = vld [vmem:[#allocation2 + $0x298] sm:$0xff] }
  0x44   :  { %308 = vmatpush1.msra.mxu0 %v8056_v58  ;;  %12401 = vst [vmem:[#allocation42_spill] sm:$0xff] %v8082_v57  ;;  %v8086_v58 = vld [vmem:[#allocation2 + $0xe8] sm:$0xff]  ;;  %5907 = vmatprep.subr.mxu1 %v11886_v0  ;;  %12409 = vst [vmem:[#allocation50_spill] sm:$0xff] %v8109_v52 }
  0x45   :  { %309 = vmatprep.subr.mxu0 %v8062_v60  ;;  %12402 = vst [vmem:[#allocation43_spill] sm:$0xff] %v8086_v58  ;;  %v8092_v60 = vld [vmem:[#allocation2 + $0x88] sm:$0xff]  ;;  %5908 = vmatpush3.msra.mxu1 %v8089_v51  ;;  %v8254_v51 = vld [vmem:[#allocation2 + $0x1d8] sm:$0xff] }
  0x46   :  { %310 = vmatpush1.msra.mxu0 %v8066_v61  ;;  %12404 = vst [vmem:[#allocation45_spill] sm:$0xff] %v8092_v60  ;;  %v8096_v61 = vld [vmem:[#allocation2 + $0x80] sm:$0xff]  ;;  %5909 = vmatprep.subr.mxu1 %v11886_v0  ;;  %12449 = vst [vmem:[#allocation90_spill] sm:$0xff] %v8254_v51 }
  0x47   :  { %311 = vmatprep.subr.mxu0 %v8072_v62  ;;  %12405 = vst [vmem:[#allocation46_spill] sm:$0xff] %v8096_v61  ;;  %v8102_v62 = vld [vmem:[#allocation2 + $0x20] sm:$0xff]  ;;  %5910 = vmatpush3.msra.mxu1 %v8099_v44  ;;  %v8167_v44 = vld [vmem:[#allocation2 + $0x588] sm:$0xff] }
  0x48   :  { %312 = vmatpush1.msra.mxu0 %v8076_v63  ;;  %12407 = vst [vmem:[#allocation48_spill] sm:$0xff] %v8102_v62  ;;  %v8106_v63 = vld [vmem:[#allocation2 + $0x18] sm:$0xff]  ;;  %5911 = vmatprep.subr.mxu1 %v11886_v0  ;;  %12423 = vst [vmem:[#allocation64_spill] sm:$0xff] %v8167_v44 }
  0x49   :  { %313 = vmatprep.subr.mxu0 %v8082_v57  ;;  %12408 = vst [vmem:[#allocation49_spill] sm:$0xff] %v8106_v63  ;;  %5912 = vmatpush3.msra.mxu1 %v8109_v52  ;;  %v8140_v57 = vld [vmem:[#allocation2 + $0x28] sm:$0xff]  ;;  %v8165_v52 = vld [vmem:[#allocation2 + $0x580] sm:$0xff] }
  0x4a   :  { %314 = vmatpush1.msra.mxu0 %v8086_v58  ;;  %v8115_v58 = vld [vmem:[#allocation2 + $0x230] sm:$0xff]  ;;  %5913 = vmatprep.subr.mxu1 %v11886_v0  ;;  %12415 = vst [vmem:[#allocation56_spill] sm:$0xff] %v8140_v57  ;;  %12422 = vst [vmem:[#allocation63_spill] sm:$0xff] %v8165_v52 }
  0x4b   :  { %315 = vmatprep.subr.mxu0 %v8092_v60  ;;  %12410 = vst [vmem:[#allocation51_spill] sm:$0xff] %v8115_v58  ;;  %v8121_v60 = vld [vmem:[#allocation2 + $0x1c8] sm:$0xff]  ;;  %5914 = vmatpush3.msra.mxu1 %v8115_v58  ;;  %v8161_v58 = vld [vmem:[#allocation2 + $0x5f0] sm:$0xff] }
  0x4c   :  { %316 = vmatpush1.msra.mxu0 %v8096_v61  ;;  %12411 = vst [vmem:[#allocation52_spill] sm:$0xff] %v8121_v60  ;;  %5915 = vmatprep.subr.mxu1 %v11886_v0  ;;  %v8136_v61 = vld [vmem:[#allocation2 + $0x90] sm:$0xff]  ;;  %12421 = vst [vmem:[#allocation62_spill] sm:$0xff] %v8161_v58 }
  0x4d   :  { %317 = vmatprep.subr.mxu0 %v8102_v62  ;;  %v8127_v62 = vld [vmem:[#allocation2 + $0x160] sm:$0xff]  ;;  %5916 = vmatpush3.msra.mxu1 %v8121_v60  ;;  %12414 = vst [vmem:[#allocation55_spill] sm:$0xff] %v8136_v61  ;;  %v8153_v60 = vld [vmem:[#allocation2 + $0x658] sm:$0xff] }
  0x4e   :  { %318 = vmatpush1.msra.mxu0 %v8106_v63  ;;  %12412 = vst [vmem:[#allocation53_spill] sm:$0xff] %v8127_v62  ;;  %5917 = vmatprep.subr.mxu1 %v11886_v0  ;;  %v8132_v63 = vld [vmem:[#allocation2 + $0xf8] sm:$0xff]  ;;  %12418 = vst [vmem:[#allocation59_spill] sm:$0xff] %v8153_v60 }
  0x4f   :  { %352 = vmatmul.mubr.f32.vlgmr.msra.gmra.mxu0 %v11886_v0  ;;  %12413 = vst [vmem:[#allocation54_spill] sm:$0xff] %v8132_v63  ;;  %5918 = vmatpush3.msra.mxu1 %v8127_v62  ;;  %v8149_v62 = vld [vmem:[#allocation2 + $0x650] sm:$0xff] }
  0x50   :  { %584 = vmatprep.mubr.f32.mxu0 %v11886_v0  ;;  %5919 = vmatprep.subr.mxu1 %v11886_v0  ;;  %12416 = vst [vmem:[#allocation57_spill] sm:$0xff] %v8149_v62 }
  0x51   :  { %5920 = vmatpush3.msra.mxu1 %v8132_v63  ;;  %v8151_v63 = vld [vmem:[#allocation2 + $0x648] sm:$0xff]  ;;  %520 = vmatprep.subr.mxu0 %v8149_v62  ;;  %v8171_v62 = vld [vmem:[#allocation2 + $0x578] sm:$0xff] }
  0x52   :  { %5921 = vmatprep.subr.mxu1 %v11886_v0  ;;  %12417 = vst [vmem:[#allocation58_spill] sm:$0xff] %v8151_v63  ;;  %521 = vmatpush1.msra.mxu0 %v8151_v63  ;;  %12424 = vst [vmem:[#allocation65_spill] sm:$0xff] %v8171_v62  ;;  %v8240_v63 = vld [vmem:[#allocation2 + $0x2b0] sm:$0xff] }
  0x53   :  { %5922 = vmatpush3.msra.mxu1 %v8136_v61  ;;  %v8157_v61 = vld [vmem:[#allocation2 + $0x5e8] sm:$0xff]  ;;  %12445 = vst [vmem:[#allocation86_spill] sm:$0xff] %v8240_v63 }
  0x54   :  { %5923 = vmatprep.subr.mxu1 %v11886_v0  ;;  %12419 = vst [vmem:[#allocation60_spill] sm:$0xff] %v8157_v61  ;;  %522 = vmatprep.subr.mxu0 %v8157_v61  ;;  %v8182_v61 = vld [vmem:[#allocation2 + $0x510] sm:$0xff] }
  0x55   :  { %5924 = vmatpush3.msra.mxu1 %v8140_v57  ;;  %v8159_v57 = vld [vmem:[#allocation2 + $0x5e0] sm:$0xff]  ;;  %12426 = vst [vmem:[#allocation67_spill] sm:$0xff] %v8182_v61 }
  0x56   :  { %5926 = vmatmul.mubr.f32.vlgmr.msra.gmra.mxu1 %v11886_v0  ;;  %5928 = vmatprep.subr.mxu1 %v11886_v0  ;;  %12420 = vst [vmem:[#allocation61_spill] sm:$0xff] %v8159_v57 }
  0x57   :  { %5960 = vmatprep.mubr.msk.f32.mxu1 %vm7790_vm0, %v11886_v0  ;;  %5929 = vmatpush3.msra.mxu1 %v8153_v60  ;;  %v8178_v60 = vld [vmem:[#allocation2 + $0x518] sm:$0xff] }
  0x58   :  { %5930 = vmatprep.subr.mxu1 %v11886_v0  ;;  %523 = vmatpush1.msra.mxu0 %v8159_v57  ;;  %12425 = vst [vmem:[#allocation66_spill] sm:$0xff] %v8178_v60  ;;  %v8188_v57 = vld [vmem:[#allocation2 + $0x4b0] sm:$0xff] }
  0x59   :  { %5931 = vmatpush3.msra.mxu1 %v8161_v58  ;;  %524 = vmatprep.subr.mxu0 %v8165_v52  ;;  %v8184_v58 = vld [vmem:[#allocation2 + $0x520] sm:$0xff]  ;;  %12428 = vst [vmem:[#allocation69_spill] sm:$0xff] %v8188_v57  ;;  %v8230_v52 = vld [vmem:[#allocation2 + $0x308] sm:$0xff] }
  0x5a   :  { %5932 = vmatprep.subr.mxu1 %v11886_v0  ;;  %525 = vmatpush1.msra.mxu0 %v8171_v62  ;;  %12427 = vst [vmem:[#allocation68_spill] sm:$0xff] %v8184_v58  ;;  %v8194_v62 = vld [vmem:[#allocation2 + $0x4b8] sm:$0xff]  ;;  %12441 = vst [vmem:[#allocation82_spill] sm:$0xff] %v8230_v52 }
  0x5b   :  { %5933 = vmatpush3.msra.mxu1 %v8167_v44  ;;  %526 = vmatprep.subr.mxu0 %v8178_v60  ;;  %v8192_v44 = vld [vmem:[#allocation2 + $0x4a8] sm:$0xff]  ;;  %12430 = vst [vmem:[#allocation71_spill] sm:$0xff] %v8194_v62 }
  0x5c   :  { %5934 = vmatprep.subr.mxu1 %v11886_v0  ;;  %527 = vmatpush1.msra.mxu0 %v8182_v61  ;;  %12429 = vst [vmem:[#allocation70_spill] sm:$0xff] %v8192_v44  ;;  %v8198_v60 = vld [vmem:[#allocation2 + $0x448] sm:$0xff]  ;;  %v8204_v61 = vld [vmem:[#allocation2 + $0x450] sm:$0xff] }
  0x5d   :  { %5935 = vmatpush3.msra.mxu1 %v8184_v58  ;;  %528 = vmatprep.subr.mxu0 %v8188_v57  ;;  %12431 = vst [vmem:[#allocation72_spill] sm:$0xff] %v8198_v60  ;;  %v8202_v58 = vld [vmem:[#allocation2 + $0x440] sm:$0xff]  ;;  %12433 = vst [vmem:[#allocation74_spill] sm:$0xff] %v8204_v61 }
  0x5e   :  { %5936 = vmatprep.subr.mxu1 %v11886_v0  ;;  %529 = vmatpush1.msra.mxu0 %v8192_v44  ;;  %12432 = vst [vmem:[#allocation73_spill] sm:$0xff] %v8202_v58  ;;  %v8208_v57 = vld [vmem:[#allocation2 + $0x3e0] sm:$0xff]  ;;  %v8214_v44 = vld [vmem:[#allocation2 + $0x3e8] sm:$0xff] }
  0x5f   :  { %5937 = vmatpush3.msra.mxu1 %v8194_v62  ;;  %530 = vmatprep.subr.mxu0 %v8198_v60  ;;  %12434 = vst [vmem:[#allocation75_spill] sm:$0xff] %v8208_v57  ;;  %v8212_v62 = vld [vmem:[#allocation2 + $0x3d8] sm:$0xff]  ;;  %12436 = vst [vmem:[#allocation77_spill] sm:$0xff] %v8214_v44 }
  0x60   :  { %5938 = vmatprep.subr.mxu1 %v11886_v0  ;;  %531 = vmatpush1.msra.mxu0 %v8202_v58  ;;  %12435 = vst [vmem:[#allocation76_spill] sm:$0xff] %v8212_v62  ;;  %v8218_v60 = vld [vmem:[#allocation2 + $0x378] sm:$0xff]  ;;  %v8224_v58 = vld [vmem:[#allocation2 + $0x380] sm:$0xff] }
  0x61   :  { %5939 = vmatpush3.msra.mxu1 %v8204_v61  ;;  %532 = vmatprep.subr.mxu0 %v8208_v57  ;;  %12437 = vst [vmem:[#allocation78_spill] sm:$0xff] %v8218_v60  ;;  %v8222_v61 = vld [vmem:[#allocation2 + $0x370] sm:$0xff]  ;;  %12439 = vst [vmem:[#allocation80_spill] sm:$0xff] %v8224_v58 }
  0x62   :  { %5940 = vmatprep.subr.mxu1 %v11886_v0  ;;  %533 = vmatpush1.msra.mxu0 %v8212_v62  ;;  %12438 = vst [vmem:[#allocation79_spill] sm:$0xff] %v8222_v61  ;;  %v8228_v57 = vld [vmem:[#allocation2 + $0x310] sm:$0xff]  ;;  %v8232_v62 = vld [vmem:[#allocation2 + $0x318] sm:$0xff] }
  0x63   :  { %5941 = vmatpush3.msra.mxu1 %v8214_v44  ;;  %534 = vmatprep.subr.mxu0 %v8218_v60  ;;  %12440 = vst [vmem:[#allocation81_spill] sm:$0xff] %v8228_v57  ;;  %12442 = vst [vmem:[#allocation83_spill] sm:$0xff] %v8232_v62  ;;  %v8236_v60 = vld [vmem:[#allocation2 + $0x2a8] sm:$0xff]  ;;  %v8238_v44 = vld [vmem:[#allocation2 + $0x2a0] sm:$0xff] }
  0x64   :  { %5942 = vmatprep.subr.mxu1 %v11886_v0  ;;  %535 = vmatpush1.msra.mxu0 %v8222_v61  ;;  %12443 = vst [vmem:[#allocation84_spill] sm:$0xff] %v8236_v60  ;;  %12444 = vst [vmem:[#allocation85_spill] sm:$0xff] %v8238_v44  ;;  %v8248_v61 = vld [vmem:[#allocation2 + $0x238] sm:$0xff] }
  0x65   :  { %5943 = vmatpush3.msra.mxu1 %v8224_v58  ;;  %536 = vmatprep.subr.mxu0 %v8228_v57  ;;  %v8244_v58 = vld [vmem:[#allocation2 + $0x240] sm:$0xff]  ;;  %12447 = vst [vmem:[#allocation88_spill] sm:$0xff] %v8248_v61  ;;  %v8250_v57 = vld [vmem:[#allocation2 + $0x248] sm:$0xff] }
  0x66   :  { %5944 = vmatprep.subr.mxu1 %v11886_v0  ;;  %537 = vmatpush1.msra.mxu0 %v8230_v52  ;;  %12446 = vst [vmem:[#allocation87_spill] sm:$0xff] %v8244_v58  ;;  %12448 = vst [vmem:[#allocation89_spill] sm:$0xff] %v8250_v57  ;;  %v8260_v52 = vld [vmem:[#allocation2 + $0x1e0] sm:$0xff] }
  0x67   :  { %5945 = vmatpush3.msra.mxu1 %v8232_v62  ;;  %538 = vmatprep.subr.mxu0 %v8236_v60  ;;  %v8258_v62 = vld [vmem:[#allocation2 + $0x1d0] sm:$0xff]  ;;  %12451 = vst [vmem:[#allocation92_spill] sm:$0xff] %v8260_v52 }
  0x68   :  { %5946 = vmatprep.subr.mxu1 %v11886_v0  ;;  %539 = vmatpush1.msra.mxu0 %v8238_v44  ;;  %12450 = vst [vmem:[#allocation91_spill] sm:$0xff] %v8258_v62  ;;  %v8264_v60 = vld [vmem:[#allocation2 + $0x170] sm:$0xff]  ;;  %v8270_v44 = vld [vmem:[#allocation2 + $0x178] sm:$0xff] }
  0x69   :  { %5947 = vmatpush3.msra.mxu1 %v8240_v63  ;;  %540 = vmatprep.subr.mxu0 %v8244_v58  ;;  %12452 = vst [vmem:[#allocation93_spill] sm:$0xff] %v8264_v60  ;;  %v8268_v63 = vld [vmem:[#allocation2 + $0x168] sm:$0xff]  ;;  %12454 = vst [vmem:[#allocation95_spill] sm:$0xff] %v8270_v44 }
  0x6a   :  { %5948 = vmatprep.subr.mxu1 %v11886_v0  ;;  %541 = vmatpush1.msra.mxu0 %v8248_v61  ;;  %12453 = vst [vmem:[#allocation94_spill] sm:$0xff] %v8268_v63  ;;  %v8274_v58 = vld [vmem:[#allocation2 + $0x108] sm:$0xff]  ;;  %v8280_v61 = vld [vmem:[#allocation2 + $0x110] sm:$0xff] }
  0x6b   :  { %5949 = vmatpush3.msra.mxu1 %v8250_v57  ;;  %542 = vmatprep.subr.mxu0 %v8254_v51  ;;  %12455 = vst [vmem:[#allocation96_spill] sm:$0xff] %v8274_v58  ;;  %v8278_v57 = vld [vmem:[#allocation2 + $0x100] sm:$0xff]  ;;  %12457 = vst [vmem:[#allocation98_spill] sm:$0xff] %v8280_v61 }
  0x6c   :  { %5950 = vmatprep.subr.mxu1 %v11886_v0  ;;  %543 = vmatpush1.msra.mxu0 %v8258_v62  ;;  %12456 = vst [vmem:[#allocation97_spill] sm:$0xff] %v8278_v57  ;;  %v8284_v51 = vld [vmem:[#allocation2 + $0xa0] sm:$0xff]  ;;  %v8290_v62 = vld [vmem:[#allocation2 + $0xa8] sm:$0xff] }
  0x6d   :  { %5951 = vmatpush3.msra.mxu1 %v8260_v52  ;;  %544 = vmatprep.subr.mxu0 %v8264_v60  ;;  %12458 = vst [vmem:[#allocation99_spill] sm:$0xff] %v8284_v51  ;;  %v8288_v52 = vld [vmem:[#allocation2 + $0x98] sm:$0xff]  ;;  %12460 = vst [vmem:[#allocation101_spill] sm:$0xff] %v8290_v62 }
  0x6e   :  { %5952 = vmatprep.subr.mxu1 %v11886_v0  ;;  %545 = vmatpush1.msra.mxu0 %v8268_v63  ;;  %12459 = vst [vmem:[#allocation100_spill] sm:$0xff] %v8288_v52  ;;  %v8294_v60 = vld [vmem:[#allocation2 + $0x38] sm:$0xff]  ;;  %v8300_v63 = vld [vmem:[#allocation2 + $0x40] sm:$0xff] }
  0x6f   :  { %5953 = vmatpush3.msra.mxu1 %v8270_v44  ;;  %546 = vmatprep.subr.mxu0 %v8274_v58  ;;  %12461 = vst [vmem:[#allocation102_spill] sm:$0xff] %v8294_v60  ;;  %v8298_v44 = vld [vmem:[#allocation2 + $0x30] sm:$0xff]  ;;  %12463 = vst [vmem:[#allocation104_spill] sm:$0xff] %v8300_v63  ;;  %v8304_v58 = vld [vmem:[#allocation2 + $0x668] sm:$0xff] }
  0x70   :  { %5954 = vmatprep.subr.mxu1 %v11886_v0  ;;  %547 = vmatpush1.msra.mxu0 %v8278_v57  ;;  %12462 = vst [vmem:[#allocation103_spill] sm:$0xff] %v8298_v44  ;;  %12464 = vst [vmem:[#allocation105_spill] sm:$0xff] %v8304_v58  ;;  %v83_v57 = vlaneseq }
  0x71   :  { %5955 = vmatpush3.msra.mxu1 %v8280_v61  ;;  %548 = vmatprep.subr.mxu0 %v8284_v51 }
  0x72   :  { %5956 = vmatprep.subr.mxu1 %v11886_v0  ;;  %549 = vmatpush1.msra.mxu0 %v8288_v52  ;;  %v8312_v52 = vshrl.u32 %v83_v57, 7 }
  0x73   :  { %5957 = vmatpush3.msra.mxu1 %v8290_v62  ;;  %550 = vmatprep.subr.mxu0 %v8294_v60  ;;  %v28_v60 = vld [vmem:[%s11792_s2] sm:$0x7] }
  0x74   :  { %5958 = vmatprep.subr.mxu1 %v11886_v0  ;;  %551 = vmatpush1.msra.mxu0 %v8298_v44  ;;  %12465 = vst [vmem:[#allocation106_spill] sm:$0xff] %v8312_v52  ;;  %v11894_v62 = vsub.s32 0, %v8312_v52 }
  0x75   :  { %5959 = vmatpush3.msra.mxu1 %v8300_v63  ;;  %709 = vmatprep.subr.mxu0 %v8304_v58  ;;  %v11900_v58 = vsub.s32 1, %v8312_v52 }
  0x76   :  { %5963 = vmatprep.subr.mxu1 %v11886_v0  ;;  %v8320_v44 = vrot.slane %v28_v60, %v11894_v62 }
  0x77   :  { %v8326_v57 = vrot.slane %v28_v60, %v11900_v58 }
  0x78   :  { %12466 = vst [vmem:[#allocation107_spill] sm:$0xff] %v8320_v44 }
  0x79   :  { %12467 = vst [vmem:[#allocation108_spill] sm:$0xff] %v8326_v57 }
  0xef   :  { %v164_v54 = vpop.f32.mrf.mxu0 }
  0xf0   :  { %v165_v0 = vadd.f32 %v164_v54, %v8320_v44  ;;  %v11905_v54 = vsub.s32 2, %v8312_v52  ;;  %v8343_v52 = vld [vmem:[#allocation2 + $0x660] sm:$0xff] }
  0xf1   :  { %v166_v63 = vpop.f32.mrf.mxu0 }
  0xf2   :  { %v167_v46 = vadd.f32 %v166_v63, %v8326_v57 }
  0xf3   :  { %v235_v51 = vpop.f32.mrf.mxu1 }
  0xf5   :  { %v5892_v61 = vpop.f32.mrf.mxu1 }
 0x10f   :  { %v353_v61 = vpop.f32.mrf.mxu0 }
 0x110   :  { %v428_v49 = vadd.f32 %v353_v61, %v165_v0  ;;  %v8333_v0 = vld [vmem:[%s11792_s2 + $0x3] ss:$0 sm:$0xff] }
 0x111   :  { %v355_v55 = vpop.f32.mrf.mxu0 }
 0x112   :  { %v5255_v48 = vmul.f32 -1.442695, %v428_v49  ;;  %v435_v45 = vadd.f32 %v355_v55, %v167_v46  ;;  %v8337_v49 = vrot.slane %v28_v60, %v11905_v54  ;;  %v8345_v60 = vld [vmem:[#allocation2 + $0x670] sm:$0xff]  ;;  %v8391_v54 = vld [vmem:[#allocation2 + $0x458] sm:$0xff] }
 0x113   :  { %12477 = vst [vmem:[#allocation117_spill] sm:$0xff] %v8391_v54 }
 0x114   :  { %7018 = vpow2.f32 %v5255_v48  ;;  %v5256_v59 = vmul.f32 -1.442695, %v435_v45  ;;  %v236_v48 = vadd.f32 %v235_v51, %v8337_v49  ;;  %v8351_v51 = vld [vmem:[#allocation2 + $0x5f8] sm:$0xff] }
 0x116   :  { %v424_v62 = vpop.f32.mrf.mxu1  ;;  %7020 = vpow2.f32 %v5256_v59 }
 0x117   :  { %v448_v45 = vadd.f32 %v8333_v0, %v424_v62  ;;  %v8353_v62 = vld [vmem:[#allocation2 + $0x608] sm:$0xff] }
 0x118   :  { %v5927_v43 = vpop.f32.mrf.mxu1 }
 0x121   :  { %v7019_v41 = vpop.eup %7018 }
 0x122   :  { %v432_v56 = vadd.f32 1.0, %v7019_v41 }
 0x123   :  { %v7021_v44 = vpop.eup %7020 }
 0x124   :  { %7022 = vrcp.f32 %v432_v56  ;;  %v439_v46 = vadd.f32 1.0, %v7021_v44  ;;  %v8347_v44 = vld [vmem:[#allocation2 + $0x600] sm:$0xff] }
 0x126   :  { %7024 = vrcp.f32 %v439_v46  ;;  %v12468_v46 = vmov 0.0  }
 0x131   :  { %v7023_v43 = vpop.eup %7022 }
 0x132   :  { %v449_v41 = vmul.f32 %v7023_v43, %v448_v45  ;;  %v8361_v45 = vld [vmem:[#allocation2 + $0x590] sm:$0xff]  ;;  %v8363_v43 = vld [vmem:[#allocation2 + $0x5a0] sm:$0xff] }
 0x133   :  { %v7025_v56 = vpop.eup %7024  ;;  %12469 = vst [vmem:[#allocation109_spill] sm:$0xff] %v8363_v43 }
 0x134   :  { %v450_v55 = vadd.f32 %v449_v41, %v236_v48  ;;  %v452_v59 = vsub.f32 1.0, %v7025_v56  ;;  %v454_v58 = vmul.f32 0.0, %v7025_v56  ;;  %v8367_v48 = vld [vmem:[#allocation2 + $0x530] sm:$0xff]  ;;  %v8371_v41 = vld [vmem:[#allocation2 + $0x528] sm:$0xff] }
 0x135   :  { %12470 = vst [vmem:[#allocation110_spill] sm:$0xff] %v8367_v48  ;;  %12471 = vst [vmem:[#allocation111_spill] sm:$0xff] %v8371_v41  ;;  %v8377_v56 = vld [vmem:[#allocation2 + $0x4c8] sm:$0xff] }
 0x136   :  { %7026 = vtanh.f32 %v450_v55  ;;  %v8373_v55 = vld [vmem:[#allocation2 + $0x538] sm:$0xff]  ;;  %12473 = vst [vmem:[#allocation113_spill] sm:$0xff] %v8377_v56 }
 0x137   :  { %12472 = vst [vmem:[#allocation112_spill] sm:$0xff] %v8373_v55 }
 0x143   :  { %v7027_v63 = vpop.eup %7026 }
 0x144   :  { %v453_v61 = vmul.f32 %v7027_v63, %v452_v59  ;;  %v8381_v59 = vld [vmem:[#allocation2 + $0x4c0] sm:$0xff]  ;;  %v8383_v63 = vld [vmem:[#allocation2 + $0x4d0] sm:$0xff] }
 0x145   :  { %12474 = vst [vmem:[#allocation114_spill] sm:$0xff] %v8381_v59  ;;  %12475 = vst [vmem:[#allocation115_spill] sm:$0xff] %v8383_v63 }
 0x146   :  { %v8341_v57 = vadd.f32 %v454_v58, %v453_v61  ;;  %v8357_v58 = vld [vmem:[#allocation2 + $0x598] sm:$0xff]  ;;  %v8387_v61 = vld [vmem:[#allocation2 + $0x460] sm:$0xff] }
 0x147   :  { %12476 = vst [vmem:[#allocation116_spill] sm:$0xff] %v8387_v61 }
 0x148   :  { %585 = vmatmul.mubr.f32.vlgmr.msra.gmra.mxu0 %v8341_v57  ;;  %5961 = vmatmul.mubr.f32.vlgmr.msra.gmra.mxu1 %v8341_v57 }
 0x149   :  { %710 = vmatpush1.msra.mxu0 %v8343_v52  ;;  %5964 = vmatpush3.msra.mxu1 %v8345_v60 }
 0x14a   :  { %711 = vmatprep.subr.mxu0 %v8347_v44  ;;  %5965 = vmatprep.subr.mxu1 %v12468_v46 }
 0x14b   :  { %712 = vmatpush1.msra.mxu0 %v8351_v51  ;;  %5966 = vmatpush3.msra.mxu1 %v8353_v62 }
 0x14c   :  { %713 = vmatprep.subr.mxu0 %v8357_v58  ;;  %5967 = vmatprep.subr.mxu1 %v12468_v46 }
 0x14d   :  { %714 = vmatpush1.msra.mxu0 %v8361_v45  ;;  %5968 = vmatpush3.msra.mxu1 %v8363_v43  ;;  %v8393_v43 = vld [vmem:[#allocation2 + $0x468] sm:$0xff] }
 0x14e   :  { %715 = vmatprep.subr.mxu0 %v8367_v48  ;;  %5969 = vmatprep.subr.mxu1 %v12468_v46  ;;  %12478 = vst [vmem:[#allocation118_spill] sm:$0xff] %v8393_v43  ;;  %v8397_v48 = vld [vmem:[#allocation2 + $0x3f8] sm:$0xff] }
 0x14f   :  { %716 = vmatpush1.msra.mxu0 %v8371_v41  ;;  %5970 = vmatpush3.msra.mxu1 %v8373_v55  ;;  %12479 = vst [vmem:[#allocation119_spill] sm:$0xff] %v8397_v48  ;;  %v8401_v55 = vld [vmem:[#allocation2 + $0x3f0] sm:$0xff]  ;;  %v8403_v41 = vld [vmem:[#allocation2 + $0x400] sm:$0xff] }
 0x150   :  { %717 = vmatprep.subr.mxu0 %v8377_v56  ;;  %5971 = vmatprep.subr.mxu1 %v12468_v46  ;;  %12480 = vst [vmem:[#allocation120_spill] sm:$0xff] %v8401_v55  ;;  %12481 = vst [vmem:[#allocation121_spill] sm:$0xff] %v8403_v41  ;;  %v8407_v56 = vld [vmem:[#allocation2 + $0x390] sm:$0xff] }
 0x151   :  { %718 = vmatpush1.msra.mxu0 %v8381_v59  ;;  %5972 = vmatpush3.msra.mxu1 %v8383_v63  ;;  %12482 = vst [vmem:[#allocation122_spill] sm:$0xff] %v8407_v56  ;;  %v8411_v63 = vld [vmem:[#allocation2 + $0x388] sm:$0xff]  ;;  %v8413_v59 = vld [vmem:[#allocation2 + $0x398] sm:$0xff] }
 0x152   :  { %719 = vmatprep.subr.mxu0 %v8387_v61  ;;  %5973 = vmatprep.subr.mxu1 %v12468_v46  ;;  %12483 = vst [vmem:[#allocation123_spill] sm:$0xff] %v8411_v63  ;;  %12484 = vst [vmem:[#allocation124_spill] sm:$0xff] %v8413_v59  ;;  %v8417_v61 = vld [vmem:[#allocation2 + $0x328] sm:$0xff] }
 0x153   :  { %720 = vmatpush1.msra.mxu0 %v8391_v54  ;;  %5974 = vmatpush3.msra.mxu1 %v8393_v43  ;;  %12485 = vst [vmem:[#allocation125_spill] sm:$0xff] %v8417_v61  ;;  %v8421_v43 = vld [vmem:[#allocation2 + $0x320] sm:$0xff]  ;;  %v8423_v54 = vld [vmem:[#allocation2 + $0x330] sm:$0xff] }
 0x154   :  { %721 = vmatprep.subr.mxu0 %v8397_v48  ;;  %5975 = vmatprep.subr.mxu1 %v12468_v46  ;;  %12486 = vst [vmem:[#allocation126_spill] sm:$0xff] %v8421_v43  ;;  %12487 = vst [vmem:[#allocation127_spill] sm:$0xff] %v8423_v54  ;;  %v8427_v48 = vld [vmem:[#allocation2 + $0x2c0] sm:$0xff] }
 0x155   :  { %722 = vmatpush1.msra.mxu0 %v8401_v55  ;;  %5976 = vmatpush3.msra.mxu1 %v8403_v41  ;;  %12488 = vst [vmem:[#allocation128_spill] sm:$0xff] %v8427_v48  ;;  %v8431_v41 = vld [vmem:[#allocation2 + $0x2b8] sm:$0xff]  ;;  %v8433_v55 = vld [vmem:[#allocation2 + $0x2c8] sm:$0xff] }
 0x156   :  { %723 = vmatprep.subr.mxu0 %v8407_v56  ;;  %5977 = vmatprep.subr.mxu1 %v12468_v46  ;;  %12489 = vst [vmem:[#allocation129_spill] sm:$0xff] %v8431_v41  ;;  %12490 = vst [vmem:[#allocation130_spill] sm:$0xff] %v8433_v55  ;;  %v8437_v56 = vld [vmem:[#allocation2 + $0x258] sm:$0xff] }
 0x157   :  { %724 = vmatpush1.msra.mxu0 %v8411_v63  ;;  %5978 = vmatpush3.msra.mxu1 %v8413_v59  ;;  %12491 = vst [vmem:[#allocation131_spill] sm:$0xff] %v8437_v56  ;;  %v8441_v59 = vld [vmem:[#allocation2 + $0x250] sm:$0xff]  ;;  %v8443_v63 = vld [vmem:[#allocation2 + $0x260] sm:$0xff] }
 0x158   :  { %725 = vmatprep.subr.mxu0 %v8417_v61  ;;  %5979 = vmatprep.subr.mxu1 %v12468_v46  ;;  %12492 = vst [vmem:[#allocation132_spill] sm:$0xff] %v8441_v59  ;;  %12493 = vst [vmem:[#allocation133_spill] sm:$0xff] %v8443_v63  ;;  %v8447_v61 = vld [vmem:[#allocation2 + $0x1f0] sm:$0xff] }
 0x159   :  { %726 = vmatpush1.msra.mxu0 %v8421_v43  ;;  %5980 = vmatpush3.msra.mxu1 %v8423_v54  ;;  %12494 = vst [vmem:[#allocation134_spill] sm:$0xff] %v8447_v61  ;;  %v8451_v54 = vld [vmem:[#allocation2 + $0x1e8] sm:$0xff]  ;;  %v8453_v43 = vld [vmem:[#allocation2 + $0x1f8] sm:$0xff] }
 0x15a   :  { %727 = vmatprep.subr.mxu0 %v8427_v48  ;;  %5981 = vmatprep.subr.mxu1 %v12468_v46  ;;  %12495 = vst [vmem:[#allocation135_spill] sm:$0xff] %v8451_v54  ;;  %12496 = vst [vmem:[#allocation136_spill] sm:$0xff] %v8453_v43  ;;  %v8457_v48 = vld [vmem:[#allocation2 + $0x188] sm:$0xff] }
 0x15b   :  { %728 = vmatpush1.msra.mxu0 %v8431_v41  ;;  %5982 = vmatpush3.msra.mxu1 %v8433_v55  ;;  %12497 = vst [vmem:[#allocation137_spill] sm:$0xff] %v8457_v48  ;;  %v8461_v55 = vld [vmem:[#allocation2 + $0x180] sm:$0xff]  ;;  %v8463_v41 = vld [vmem:[#allocation2 + $0x190] sm:$0xff] }
 0x15c   :  { %729 = vmatprep.subr.mxu0 %v8437_v56  ;;  %5983 = vmatprep.subr.mxu1 %v12468_v46  ;;  %12498 = vst [vmem:[#allocation138_spill] sm:$0xff] %v8463_v41  ;;  %v8467_v56 = vld [vmem:[#allocation2 + $0x120] sm:$0xff] }
 0x15d   :  { %730 = vmatpush1.msra.mxu0 %v8441_v59  ;;  %5984 = vmatpush3.msra.mxu1 %v8443_v63  ;;  %12499 = vst [vmem:[#allocation139_spill] sm:$0xff] %v8467_v56  ;;  %v8471_v63 = vld [vmem:[#allocation2 + $0x118] sm:$0xff]  ;;  %v8473_v59 = vld [vmem:[#allocation2 + $0x128] sm:$0xff] }
 0x15e   :  { %731 = vmatprep.subr.mxu0 %v8447_v61  ;;  %5985 = vmatprep.subr.mxu1 %v12468_v46  ;;  %v8477_v61 = vld [vmem:[#allocation2 + $0xb8] sm:$0xff] }
 0x15f   :  { %732 = vmatpush1.msra.mxu0 %v8451_v54  ;;  %5986 = vmatpush3.msra.mxu1 %v8453_v43  ;;  %v8481_v43 = vld [vmem:[#allocation2 + $0xb0] sm:$0xff]  ;;  %v8483_v54 = vld [vmem:[#allocation2 + $0xc0] sm:$0xff] }
 0x160   :  { %733 = vmatprep.subr.mxu0 %v8457_v48  ;;  %5987 = vmatprep.subr.mxu1 %v12468_v46  ;;  %v8487_v48 = vld [vmem:[#allocation2 + $0x50] sm:$0xff] }
 0x161   :  { %734 = vmatpush1.msra.mxu0 %v8461_v55  ;;  %5988 = vmatpush3.msra.mxu1 %v8463_v41  ;;  %v8491_v41 = vld [vmem:[#allocation2 + $0x48] sm:$0xff] }
 0x162   :  { %735 = vmatprep.subr.mxu0 %v8467_v56  ;;  %5989 = vmatprep.subr.mxu1 %v12468_v46  ;;  %v8495_v56 = vld [vmem:[#allocation2 + $0x58] sm:$0xff] }
 0x163   :  { %736 = vmatpush1.msra.mxu0 %v8471_v63  ;;  %5990 = vmatpush3.msra.mxu1 %v8473_v59 }
 0x164   :  { %737 = vmatprep.subr.mxu0 %v8477_v61  ;;  %5991 = vmatprep.subr.mxu1 %v12468_v46 }
 0x165   :  { %738 = vmatpush1.msra.mxu0 %v8481_v43  ;;  %5992 = vmatpush3.msra.mxu1 %v8483_v54 }
 0x166   :  { %739 = vmatprep.subr.mxu0 %v8487_v48  ;;  %5993 = vmatprep.subr.mxu1 %v12468_v46 }
 0x167   :  { %740 = vmatpush1.msra.mxu0 %v8491_v41  ;;  %773 = vmatprep.mubr.f32.mxu0 %v12468_v46 }
 0x168   :  { %5994 = vmatpush3.msra.mxu1 %v8495_v56  ;;  %774 = vmatmul.mubr.f32.vlgmr.msra.gmra.mxu0 %v12468_v46 }
 0x169   :  { %5995 = vmatprep.mubr.msk.f32.mxu1 %vm7790_vm0, %v12468_v46  ;;  %880 = vmatprep.subr.mxu0 %v7818_v1  ;;  %v12500_v1 = vld [vmem:[#allocation15_spill] sm:$0xff] }
 0x16a   :  { %5998 = vmatprep.subr.mxu1 %v12468_v46  ;;  %5996 = vmatmul.mubr.f32.vlgmr.msra.gmra.mxu1 %v12468_v46 }
 0x16b   :  { %881 = vmatpush1.msra.mxu0 %v7820_v2  ;;  %5999 = vmatpush3.msra.mxu1 %v7854_v14  ;;  %v5261_v2 = vld [vmem:[%s11790_s0 + $0x8] sm:$0xff]  ;;  %v12512_v14 = vld [vmem:[#allocation29_spill] sm:$0xff] }
 0x16c   :  { %882 = vmatprep.subr.mxu0 %v7822_v3  ;;  %6000 = vmatprep.subr.mxu1 %v12468_v46  ;;  %v12501_v3 = vld [vmem:[#allocation5_spill] sm:$0xff] }
 0x16d   :  { %883 = vmatpush1.msra.mxu0 %v7825_v4  ;;  %6001 = vmatpush3.msra.mxu1 %v7860_v16  ;;  %v12502_v4 = vld [vmem:[#allocation6_spill] sm:$0xff] }
 0x16e   :  { %884 = vmatprep.subr.mxu0 %v7828_v5  ;;  %6002 = vmatprep.subr.mxu1 %v12468_v46  ;;  %v12503_v5 = vld [vmem:[#allocation18_spill] sm:$0xff] }
 0x16f   :  { %885 = vmatpush1.msra.mxu0 %v7831_v6  ;;  %6003 = vmatpush3.msra.mxu1 %v7866_v18  ;;  %v12504_v6 = vld [vmem:[#allocation7_spill] sm:$0xff]  ;;  %v12514_v16 = vld [vmem:[#allocation14_spill] sm:$0xff]  ;;  %v12516_v18 = vld [vmem:[#allocation16_spill] sm:$0xff] }
 0x170   :  { %886 = vmatprep.subr.mxu0 %v7834_v7  ;;  %6004 = vmatprep.subr.mxu1 %v12468_v46  ;;  %v12505_v7 = vld [vmem:[#allocation8_spill] sm:$0xff] }
 0x171   :  { %887 = vmatpush1.msra.mxu0 %v7837_v8  ;;  %6005 = vmatpush3.msra.mxu1 %v7876_v21  ;;  %v12506_v8 = vld [vmem:[#allocation23_spill] sm:$0xff] }
 0x172   :  { %888 = vmatprep.subr.mxu0 %v7840_v9  ;;  %6006 = vmatprep.subr.mxu1 %v12468_v46  ;;  %v12507_v9 = vld [vmem:[#allocation9_spill] sm:$0xff]  ;;  %v12519_v21 = vld [vmem:[#allocation19_spill] sm:$0xff] }
 0x173   :  { %889 = vmatpush1.msra.mxu0 %v7843_v10  ;;  %6007 = vmatpush3.msra.mxu1 %v7886_v24  ;;  %v12508_v10 = vld [vmem:[#allocation10_spill] sm:$0xff]  ;;  %v12522_v24 = vld [vmem:[#allocation21_spill] sm:$0xff] }
 0x174   :  { %890 = vmatprep.subr.mxu0 %v7846_v11  ;;  %6008 = vmatprep.subr.mxu1 %v12468_v46  ;;  %v12509_v11 = vld [vmem:[#allocation26_spill] sm:$0xff] }
 0x175   :  { %891 = vmatpush1.msra.mxu0 %v7849_v12  ;;  %6009 = vmatpush3.msra.mxu1 %v7896_v27  ;;  %v12510_v12 = vld [vmem:[#allocation11_spill] sm:$0xff]  ;;  %v12525_v27 = vld [vmem:[#allocation24_spill] sm:$0xff] }
 0x176   :  { %892 = vmatprep.subr.mxu0 %v7852_v13  ;;  %6010 = vmatprep.subr.mxu1 %v12468_v46  ;;  %v12511_v13 = vld [vmem:[#allocation12_spill] sm:$0xff] }
 0x177   :  { %893 = vmatpush1.msra.mxu0 %v7857_v15  ;;  %6011 = vmatpush3.msra.mxu1 %v7906_v30  ;;  %v12513_v15 = vld [vmem:[#allocation13_spill] sm:$0xff]  ;;  %v12528_v30 = vld [vmem:[#allocation27_spill] sm:$0xff] }
 0x178   :  { %894 = vmatprep.subr.mxu0 %v7863_v17  ;;  %6012 = vmatprep.subr.mxu1 %v12468_v46  ;;  %v12515_v17 = vld [vmem:[#allocation32_spill] sm:$0xff] }
 0x179   :  { %895 = vmatpush1.msra.mxu0 %v7869_v19  ;;  %6013 = vmatpush3.msra.mxu1 %v7916_v33  ;;  %v12517_v19 = vld [vmem:[#allocation17_spill] sm:$0xff]  ;;  %v12531_v33 = vld [vmem:[#allocation30_spill] sm:$0xff] }
 0x17a   :  { %896 = vmatprep.subr.mxu0 %v7873_v20  ;;  %6014 = vmatprep.subr.mxu1 %v12468_v46  ;;  %v12518_v20 = vld [vmem:[#allocation35_spill] sm:$0xff] }
 0x17b   :  { %897 = vmatpush1.msra.mxu0 %v7879_v22  ;;  %6015 = vmatpush3.msra.mxu1 %v7926_v36  ;;  %v12520_v22 = vld [vmem:[#allocation20_spill] sm:$0xff]  ;;  %v12534_v36 = vld [vmem:[#allocation33_spill] sm:$0xff] }
 0x17c   :  { %898 = vmatprep.subr.mxu0 %v7883_v23  ;;  %6016 = vmatprep.subr.mxu1 %v12468_v46  ;;  %v12521_v23 = vld [vmem:[#allocation38_spill] sm:$0xff] }
 0x17d   :  { %899 = vmatpush1.msra.mxu0 %v7889_v25  ;;  %6017 = vmatpush3.msra.mxu1 %v7936_v39  ;;  %v12523_v25 = vld [vmem:[#allocation22_spill] sm:$0xff]  ;;  %v12537_v39 = vld [vmem:[#allocation36_spill] sm:$0xff] }
 0x17e   :  { %900 = vmatprep.subr.mxu0 %v7893_v26  ;;  %6018 = vmatprep.subr.mxu1 %v12468_v46  ;;  %v12524_v26 = vld [vmem:[#allocation41_spill] sm:$0xff] }
 0x17f   :  { %901 = vmatpush1.msra.mxu0 %v7899_v28  ;;  %6019 = vmatpush3.msra.mxu1 %v7946_v42  ;;  %v12526_v28 = vld [vmem:[#allocation25_spill] sm:$0xff]  ;;  %v12539_v42 = vld [vmem:[#allocation52_spill] sm:$0xff] }
 0x180   :  { %902 = vmatprep.subr.mxu0 %v7903_v29  ;;  %6020 = vmatprep.subr.mxu1 %v12468_v46  ;;  %v12527_v29 = vld [vmem:[#allocation44_spill] sm:$0xff] }
 0x181   :  { %903 = vmatpush1.msra.mxu0 %v7909_v31  ;;  %6021 = vmatpush3.msra.mxu1 %v7963_v47  ;;  %v12529_v31 = vld [vmem:[#allocation28_spill] sm:$0xff]  ;;  %v12540_v47 = vld [vmem:[#allocation39_spill] sm:$0xff] }
 0x182   :  { %904 = vmatprep.subr.mxu0 %v7913_v32  ;;  %6022 = vmatprep.subr.mxu1 %v12468_v46  ;;  %v12530_v32 = vld [vmem:[#allocation47_spill] sm:$0xff] }
 0x183   :  { %905 = vmatpush1.msra.mxu0 %v7919_v34  ;;  %6023 = vmatpush3.msra.mxu1 %v7972_v50  ;;  %v12532_v34 = vld [vmem:[#allocation31_spill] sm:$0xff]  ;;  %v12541_v50 = vld [vmem:[#allocation40_spill] sm:$0xff] }
 0x184   :  { %906 = vmatprep.subr.mxu0 %v7923_v35  ;;  %6024 = vmatprep.subr.mxu1 %v12468_v46  ;;  %v12533_v35 = vld [vmem:[#allocation50_spill] sm:$0xff] }
 0x185   :  { %907 = vmatpush1.msra.mxu0 %v7929_v37  ;;  %6025 = vmatpush3.msra.mxu1 %v7982_v53  ;;  %v12535_v37 = vld [vmem:[#allocation34_spill] sm:$0xff]  ;;  %v12542_v53 = vld [vmem:[#allocation53_spill] sm:$0xff] }
 0x186   :  { %908 = vmatprep.subr.mxu0 %v7933_v38  ;;  %6026 = vmatprep.subr.mxu1 %v12468_v46  ;;  %v12536_v38 = vld [vmem:[#allocation51_spill] sm:$0xff] }
 0x187   :  { %909 = vmatpush1.msra.mxu0 %v7939_v40  ;;  %6027 = vmatpush3.msra.mxu1 %v12500_v1  ;;  %v12538_v40 = vld [vmem:[#allocation37_spill] sm:$0xff]  ;;  %v12543_v1 = vld [vmem:[#allocation42_spill] sm:$0xff] }
 0x188   :  { %910 = vmatprep.subr.mxu0 %v12501_v3  ;;  %6028 = vmatprep.subr.mxu1 %v12468_v46  ;;  %v12545_v3 = vld [vmem:[#allocation54_spill] sm:$0xff] }
 0x189   :  { %911 = vmatpush1.msra.mxu0 %v12502_v4  ;;  %944 = vmatprep.mubr.f32.mxu0 %v12468_v46  ;;  %v12546_v4 = vld [vmem:[#allocation45_spill] sm:$0xff] }
 0x18a   :  { %6029 = vmatpush3.msra.mxu1 %v12503_v5  ;;  %945 = vmatmul.mubr.f32.vlgmr.msra.gmra.mxu0 %v5261_v2  ;;  %v12547_v5 = vld [vmem:[#allocation46_spill] sm:$0xff] }
 0x18b   :  { %6030 = vmatprep.mubr.msk.f32.mxu1 %vm7790_vm0, %v12468_v46  ;;  %1021 = vmatprep.subr.mxu0 %v12504_v6  ;;  %v12548_v6 = vld [vmem:[#allocation55_spill] sm:$0xff] }
 0x18c   :  { %6033 = vmatprep.subr.mxu1 %v12468_v46  ;;  %6031 = vmatmul.mubr.f32.vlgmr.msra.gmra.mxu1 %v5261_v2  ;;  %v12544_v2 = vld [vmem:[#allocation43_spill] sm:$0xff] }
 0x18d   :  { %1022 = vmatpush1.msra.mxu0 %v12505_v7  ;;  %6034 = vmatpush3.msra.mxu1 %v12506_v8  ;;  %v12549_v7 = vld [vmem:[#allocation48_spill] sm:$0xff]  ;;  %v12550_v8 = vld [vmem:[#allocation49_spill] sm:$0xff] }
 0x18e   :  { %1023 = vmatprep.subr.mxu0 %v12507_v9  ;;  %6035 = vmatprep.subr.mxu1 %v12468_v46  ;;  %v12551_v9 = vld [vmem:[#allocation56_spill] sm:$0xff] }
 0x18f   :  { %1024 = vmatpush1.msra.mxu0 %v12508_v10  ;;  %6036 = vmatpush3.msra.mxu1 %v12509_v11  ;;  %v12552_v10 = vld [vmem:[#allocation57_spill] sm:$0xff]  ;;  %v12553_v11 = vld [vmem:[#allocation58_spill] sm:$0xff] }
 0x190   :  { %1025 = vmatprep.subr.mxu0 %v12510_v12  ;;  %6037 = vmatprep.subr.mxu1 %v12468_v46  ;;  %v12554_v12 = vld [vmem:[#allocation59_spill] sm:$0xff] }
 0x191   :  { %1026 = vmatpush1.msra.mxu0 %v12511_v13  ;;  %6038 = vmatpush3.msra.mxu1 %v12512_v14  ;;  %v12555_v13 = vld [vmem:[#allocation60_spill] sm:$0xff]  ;;  %v12556_v14 = vld [vmem:[#allocation61_spill] sm:$0xff] }
 0x192   :  { %1027 = vmatprep.subr.mxu0 %v12513_v15  ;;  %6039 = vmatprep.subr.mxu1 %v12468_v46  ;;  %v12557_v15 = vld [vmem:[#allocation62_spill] sm:$0xff] }
 0x193   :  { %1028 = vmatpush1.msra.mxu0 %v12514_v16  ;;  %6040 = vmatpush3.msra.mxu1 %v12515_v17  ;;  %v12558_v16 = vld [vmem:[#allocation63_spill] sm:$0xff]  ;;  %v12559_v17 = vld [vmem:[#allocation65_spill] sm:$0xff] }
 0x194   :  { %1029 = vmatprep.subr.mxu0 %v12516_v18  ;;  %6041 = vmatprep.subr.mxu1 %v12468_v46  ;;  %v12560_v18 = vld [vmem:[#allocation64_spill] sm:$0xff] }
 0x195   :  { %1030 = vmatpush1.msra.mxu0 %v12517_v19  ;;  %6042 = vmatpush3.msra.mxu1 %v12518_v20  ;;  %v12561_v19 = vld [vmem:[#allocation66_spill] sm:$0xff]  ;;  %v12562_v20 = vld [vmem:[#allocation67_spill] sm:$0xff] }
 0x196   :  { %1031 = vmatprep.subr.mxu0 %v12519_v21  ;;  %6043 = vmatprep.subr.mxu1 %v12468_v46  ;;  %v12563_v21 = vld [vmem:[#allocation68_spill] sm:$0xff] }
 0x197   :  { %1032 = vmatpush1.msra.mxu0 %v12520_v22  ;;  %6044 = vmatpush3.msra.mxu1 %v12521_v23  ;;  %v12564_v22 = vld [vmem:[#allocation69_spill] sm:$0xff]  ;;  %v12565_v23 = vld [vmem:[#allocation70_spill] sm:$0xff] }
 0x198   :  { %1033 = vmatprep.subr.mxu0 %v12522_v24  ;;  %6045 = vmatprep.subr.mxu1 %v12468_v46  ;;  %v12566_v24 = vld [vmem:[#allocation71_spill] sm:$0xff] }
 0x199   :  { %1034 = vmatpush1.msra.mxu0 %v12523_v25  ;;  %6046 = vmatpush3.msra.mxu1 %v12524_v26  ;;  %v12567_v25 = vld [vmem:[#allocation72_spill] sm:$0xff]  ;;  %v12568_v26 = vld [vmem:[#allocation73_spill] sm:$0xff] }
 0x19a   :  { %1035 = vmatprep.subr.mxu0 %v12525_v27  ;;  %6047 = vmatprep.subr.mxu1 %v12468_v46  ;;  %v12569_v27 = vld [vmem:[#allocation74_spill] sm:$0xff] }
 0x19b   :  { %1036 = vmatpush1.msra.mxu0 %v12526_v28  ;;  %6048 = vmatpush3.msra.mxu1 %v12527_v29  ;;  %v12570_v28 = vld [vmem:[#allocation75_spill] sm:$0xff]  ;;  %v12571_v29 = vld [vmem:[#allocation76_spill] sm:$0xff] }
 0x19c   :  { %1037 = vmatprep.subr.mxu0 %v12528_v30  ;;  %6049 = vmatprep.subr.mxu1 %v12468_v46  ;;  %v12572_v30 = vld [vmem:[#allocation77_spill] sm:$0xff] }
 0x19d   :  { %1038 = vmatpush1.msra.mxu0 %v12529_v31  ;;  %6050 = vmatpush3.msra.mxu1 %v12530_v32  ;;  %v12573_v31 = vld [vmem:[#allocation78_spill] sm:$0xff]  ;;  %v12574_v32 = vld [vmem:[#allocation79_spill] sm:$0xff] }
 0x19e   :  { %1039 = vmatprep.subr.mxu0 %v12531_v33  ;;  %6051 = vmatprep.subr.mxu1 %v12468_v46  ;;  %v12575_v33 = vld [vmem:[#allocation80_spill] sm:$0xff] }
 0x19f   :  { %1040 = vmatpush1.msra.mxu0 %v12532_v34  ;;  %6052 = vmatpush3.msra.mxu1 %v12533_v35  ;;  %v12576_v34 = vld [vmem:[#allocation81_spill] sm:$0xff]  ;;  %v12577_v35 = vld [vmem:[#allocation82_spill] sm:$0xff] }
 0x1a0   :  { %1041 = vmatprep.subr.mxu0 %v12534_v36  ;;  %6053 = vmatprep.subr.mxu1 %v12468_v46  ;;  %v12578_v36 = vld [vmem:[#allocation83_spill] sm:$0xff] }
 0x1a1   :  { %1042 = vmatpush1.msra.mxu0 %v12535_v37  ;;  %6054 = vmatpush3.msra.mxu1 %v12536_v38  ;;  %v12579_v37 = vld [vmem:[#allocation84_spill] sm:$0xff]  ;;  %v12580_v38 = vld [vmem:[#allocation85_spill] sm:$0xff] }
 0x1a2   :  { %1043 = vmatprep.subr.mxu0 %v12537_v39  ;;  %6055 = vmatprep.subr.mxu1 %v12468_v46  ;;  %v12581_v39 = vld [vmem:[#allocation86_spill] sm:$0xff] }
 0x1a3   :  { %1044 = vmatpush1.msra.mxu0 %v12538_v40  ;;  %6056 = vmatpush3.msra.mxu1 %v12539_v42  ;;  %v12582_v40 = vld [vmem:[#allocation87_spill] sm:$0xff]  ;;  %v12583_v42 = vld [vmem:[#allocation88_spill] sm:$0xff] }
 0x1a4   :  { %1045 = vmatprep.subr.mxu0 %v12540_v47  ;;  %6057 = vmatprep.subr.mxu1 %v12468_v46  ;;  %v12584_v47 = vld [vmem:[#allocation89_spill] sm:$0xff] }
 0x1a5   :  { %1046 = vmatpush1.msra.mxu0 %v12541_v50  ;;  %6058 = vmatpush3.msra.mxu1 %v12542_v53  ;;  %v12585_v50 = vld [vmem:[#allocation90_spill] sm:$0xff]  ;;  %v12586_v53 = vld [vmem:[#allocation91_spill] sm:$0xff] }
 0x1a6   :  { %1047 = vmatprep.subr.mxu0 %v12543_v1  ;;  %6059 = vmatprep.subr.mxu1 %v12468_v46  ;;  %v12587_v1 = vld [vmem:[#allocation92_spill] sm:$0xff] }
 0x1a7   :  { %1048 = vmatpush1.msra.mxu0 %v12544_v2  ;;  %6060 = vmatpush3.msra.mxu1 %v12545_v3  ;;  %v12588_v2 = vld [vmem:[#allocation93_spill] sm:$0xff]  ;;  %v12589_v3 = vld [vmem:[#allocation94_spill] sm:$0xff] }
 0x1a8   :  { %1049 = vmatprep.subr.mxu0 %v12546_v4  ;;  %6061 = vmatprep.subr.mxu1 %v12468_v46  ;;  %v12590_v4 = vld [vmem:[#allocation95_spill] sm:$0xff] }
 0x1a9   :  { %1050 = vmatpush1.msra.mxu0 %v12547_v5  ;;  %6062 = vmatpush3.msra.mxu1 %v12548_v6  ;;  %v12591_v5 = vld [vmem:[#allocation96_spill] sm:$0xff]  ;;  %v12592_v6 = vld [vmem:[#allocation97_spill] sm:$0xff] }
 0x1aa   :  { %1051 = vmatprep.subr.mxu0 %v12549_v7  ;;  %6063 = vmatprep.subr.mxu1 %v12468_v46  ;;  %v12593_v7 = vld [vmem:[#allocation98_spill] sm:$0xff] }
 0x1ab   :  { %1052 = vmatpush1.msra.mxu0 %v12550_v8  ;;  %1085 = vmatprep.mubr.f32.mxu0 %v12468_v46  ;;  %v12594_v8 = vld [vmem:[#allocation99_spill] sm:$0xff] }
 0x1ac   :  { %6064 = vmatpush3.msra.mxu1 %v12551_v9  ;;  %6065 = vmatprep.mubr.msk.f32.mxu1 %vm7790_vm0, %v12468_v46  ;;  %v12595_v9 = vld [vmem:[#allocation100_spill] sm:$0xff] }
 0x1ad   :  { %1086 = vmatmul.mubr.f32.vlgmr.msra.gmra.mxu0 %v8341_v57  ;;  %6066 = vmatmul.mubr.f32.vlgmr.msra.gmra.mxu1 %v8341_v57 }
 0x1ae   :  { %1184 = vmatprep.subr.mxu0 %v12552_v10  ;;  %6068 = vmatprep.subr.mxu1 %v12468_v46  ;;  %v12596_v10 = vld [vmem:[#allocation101_spill] sm:$0xff] }
 0x1af   :  { %1185 = vmatpush1.msra.mxu0 %v12553_v11  ;;  %6069 = vmatpush3.msra.mxu1 %v12554_v12  ;;  %v12597_v11 = vld [vmem:[#allocation102_spill] sm:$0xff]  ;;  %v12598_v12 = vld [vmem:[#allocation103_spill] sm:$0xff] }
 0x1b0   :  { %1186 = vmatprep.subr.mxu0 %v12555_v13  ;;  %6070 = vmatprep.subr.mxu1 %v12468_v46  ;;  %v12599_v13 = vld [vmem:[#allocation104_spill] sm:$0xff] }
 0x1b1   :  { %1187 = vmatpush1.msra.mxu0 %v12556_v14  ;;  %6071 = vmatpush3.msra.mxu1 %v12557_v15  ;;  %v12600_v14 = vld [vmem:[#allocation105_spill] sm:$0xff] }
 0x1b2   :  { %1188 = vmatprep.subr.mxu0 %v12558_v16  ;;  %6072 = vmatprep.subr.mxu1 %v12468_v46 }
 0x1b3   :  { %1189 = vmatpush1.msra.mxu0 %v12559_v17  ;;  %6073 = vmatpush3.msra.mxu1 %v12560_v18  ;;  %v30_v17 = vld [vmem:[%s11792_s2 + $0x4] sm:$0x7] }
 0x1b4   :  { %1190 = vmatprep.subr.mxu0 %v12561_v19  ;;  %6074 = vmatprep.subr.mxu1 %v12468_v46  ;;  %v12601_v19 = vld [vmem:[#allocation106_spill] sm:$0xff] }
 0x1b5   :  { %1191 = vmatpush1.msra.mxu0 %v12562_v20  ;;  %6075 = vmatpush3.msra.mxu1 %v12563_v21  ;;  %v12602_v20 = vsub.s32 0, %v12601_v19 }
 0x1b6   :  { %1192 = vmatprep.subr.mxu0 %v12564_v22  ;;  %6076 = vmatprep.subr.mxu1 %v12468_v46 }
 0x1b7   :  { %1193 = vmatpush1.msra.mxu0 %v12565_v23  ;;  %6077 = vmatpush3.msra.mxu1 %v12566_v24  ;;  %v8719_v21 = vrot.slane %v30_v17, %v12602_v20 }
 0x1b8   :  { %1194 = vmatprep.subr.mxu0 %v12567_v25  ;;  %6078 = vmatprep.subr.mxu1 %v12468_v46 }
 0x1b9   :  { %1195 = vmatpush1.msra.mxu0 %v12568_v26  ;;  %6079 = vmatpush3.msra.mxu1 %v12569_v27  ;;  %12603 = vst [vmem:[#allocation15_spill] sm:$0xff] %v8719_v21 }
 0x1ba   :  { %1196 = vmatprep.subr.mxu0 %v12570_v28  ;;  %6080 = vmatprep.subr.mxu1 %v12468_v46 }
 0x1bb   :  { %1197 = vmatpush1.msra.mxu0 %v12571_v29  ;;  %6081 = vmatpush3.msra.mxu1 %v12572_v30 }
 0x1bc   :  { %1198 = vmatprep.subr.mxu0 %v12573_v31  ;;  %6082 = vmatprep.subr.mxu1 %v12468_v46  ;;  %v8725_v31 = vld [vmem:[%s11792_s2 + $0x7] ss:$0 sm:$0xff] }
 0x1bd   :  { %1199 = vmatpush1.msra.mxu0 %v12574_v32  ;;  %6083 = vmatpush3.msra.mxu1 %v12575_v33  ;;  %v12604_v32 = vsub.s32 2, %v12601_v19 }
 0x1be   :  { %1200 = vmatprep.subr.mxu0 %v12576_v34  ;;  %6084 = vmatprep.subr.mxu1 %v12468_v46 }
 0x1bf   :  { %1201 = vmatpush1.msra.mxu0 %v12577_v35  ;;  %6085 = vmatpush3.msra.mxu1 %v12578_v36  ;;  %v8729_v33 = vrot.slane %v30_v17, %v12604_v32 }
 0x1c0   :  { %1202 = vmatprep.subr.mxu0 %v12579_v37  ;;  %6086 = vmatprep.subr.mxu1 %v12468_v46 }
 0x1c1   :  { %1203 = vmatpush1.msra.mxu0 %v12580_v38  ;;  %6087 = vmatpush3.msra.mxu1 %v12581_v39 }
 0x1c2   :  { %1204 = vmatprep.subr.mxu0 %v12582_v40  ;;  %6088 = vmatprep.subr.mxu1 %v12468_v46 }
 0x1c3   :  { %1205 = vmatpush1.msra.mxu0 %v12583_v42  ;;  %6089 = vmatpush3.msra.mxu1 %v12584_v47 }
 0x1c4   :  { %1206 = vmatprep.subr.mxu0 %v12585_v50  ;;  %6090 = vmatprep.subr.mxu1 %v12468_v46 }
 0x1c5   :  { %1207 = vmatpush1.msra.mxu0 %v12586_v53  ;;  %6091 = vmatpush3.msra.mxu1 %v12587_v1  ;;  %v12605_v53 = vld [vmem:[#allocation107_spill] sm:$0xff] }
 0x1c6   :  { %1208 = vmatprep.subr.mxu0 %v12588_v2  ;;  %6092 = vmatprep.subr.mxu1 %v12468_v46 }
 0x1c7   :  { %1209 = vmatpush1.msra.mxu0 %v12589_v3  ;;  %6093 = vmatpush3.msra.mxu1 %v12590_v4 }
 0x1c8   :  { %1210 = vmatprep.subr.mxu0 %v12591_v5  ;;  %6094 = vmatprep.subr.mxu1 %v12468_v46 }
 0x1c9   :  { %1211 = vmatpush1.msra.mxu0 %v12592_v6  ;;  %6095 = vmatpush3.msra.mxu1 %v12593_v7 }
 0x1ca   :  { %1212 = vmatprep.subr.mxu0 %v12594_v8  ;;  %6096 = vmatprep.subr.mxu1 %v12468_v46  ;;  %v12606_v8 = vld [vmem:[#allocation108_spill] sm:$0xff] }
 0x1cb   :  { %1213 = vmatpush1.msra.mxu0 %v12595_v9  ;;  %6097 = vmatpush3.msra.mxu1 %v12596_v10 }
 0x1cc   :  { %1214 = vmatprep.subr.mxu0 %v12597_v11  ;;  %6098 = vmatprep.subr.mxu1 %v12468_v46 }
 0x1cd   :  { %1215 = vmatpush1.msra.mxu0 %v12598_v12  ;;  %6099 = vmatpush3.msra.mxu1 %v12599_v13 }
 0x1ce   :  { %1248 = vmatprep.mubr.f32.mxu0 %v12468_v46  ;;  %6100 = vmatprep.mubr.msk.f32.mxu1 %vm7790_vm0, %v12468_v46 }
 0x1cf   :  { %1325 = vmatprep.subr.mxu0 %v12600_v14  ;;  %6103 = vmatprep.subr.mxu1 %v12468_v46 }
 0x208   :  { %v657_v15 = vpop.f32.mrf.mxu1  ;;  %v586_v18 = vpop.f32.mrf.mxu0 }
 0x209   :  { %v587_v23 = vadd.f32 %v586_v18, %v8719_v21  ;;  %v658_v36 = vadd.f32 %v657_v15, %v8729_v33 }
 0x20a   :  { %v5962_v16 = vpop.f32.mrf.mxu1  ;;  %v588_v22 = vpop.f32.mrf.mxu0 }
 0x20b   :  { %v12607_v16 = vsub.s32 1, %v12601_v19 }
 0x20d   :  { %v8739_v18 = vrot.slane %v30_v17, %v12607_v16  ;;  %v12636_v16 = vld [vmem:[#allocation137_spill] sm:$0xff] }
 0x228   :  { %v775_v24 = vpop.f32.mrf.mxu0 }
 0x229   :  { %v850_v25 = vadd.f32 %v775_v24, %v587_v23 }
 0x22a   :  { %v846_v26 = vpop.f32.mrf.mxu1  ;;  %v777_v42 = vpop.f32.mrf.mxu0 }
 0x22b   :  { %v5258_v27 = vmul.f32 -1.442695, %v850_v25  ;;  %v870_v34 = vadd.f32 %v8725_v31, %v846_v26  ;;  %v589_v26 = vadd.f32 %v588_v22, %v8739_v18  ;;  %v12608_v22 = vld [vmem:[#allocation109_spill] sm:$0xff] }
 0x22c   :  { %v5997_v28 = vpop.f32.mrf.mxu1 }
 0x22d   :  { %7028 = vpow2.f32 %v5258_v27  ;;  %v857_v28 = vadd.f32 %v777_v42, %v589_v26  ;;  %v12620_v42 = vld [vmem:[#allocation121_spill] sm:$0xff]  ;;  %v8843_v26 = vld [vmem:[#allocation2 + $0x548] sm:$0xff] }
 0x23a   :  { %v7029_v29 = vpop.eup %7028 }
 0x23b   :  { %v854_v30 = vadd.f32 1.0, %v7029_v29  ;;  %v5259_v29 = vmul.f32 -1.442695, %v857_v28  ;;  %v8849_v28 = vld [vmem:[#allocation2 + $0x4e8] sm:$0xff] }
 0x23d   :  { %7030 = vrcp.f32 %v854_v30 }
 0x24a   :  { %v7031_v35 = vpop.eup %7030  ;;  %v946_v47 = vpop.f32.mrf.mxu0 }
 0x24b   :  { %v871_v37 = vmul.f32 %v7031_v35, %v870_v34  ;;  %v947_v1 = vadd.f32 %v946_v47, %v12605_v53  ;;  %v12621_v47 = vld [vmem:[#allocation122_spill] sm:$0xff] }
 0x24c   :  { %v1017_v38 = vpop.f32.mrf.mxu1  ;;  %v948_v50 = vpop.f32.mrf.mxu0 }
 0x24d   :  { %v8733_v39 = vadd.f32 %v871_v37, %v658_v36  ;;  %v949_v9 = vadd.f32 %v948_v50, %v12606_v8  ;;  %v1018_v24 = vadd.f32 %v1017_v38, %v8337_v49  ;;  %v12616_v36 = vld [vmem:[#allocation117_spill] sm:$0xff]  ;;  %v12617_v37 = vld [vmem:[#allocation118_spill] sm:$0xff]  ;;  %v12618_v38 = vld [vmem:[#allocation119_spill] sm:$0xff] }
 0x24e   :  { %v6032_v40 = vpop.f32.mrf.mxu1  ;;  %v12622_v50 = vld [vmem:[#allocation123_spill] sm:$0xff] }
 0x24f   :  { %v12619_v40 = vld [vmem:[#allocation120_spill] sm:$0xff] }
 0x26d   :  { %v1087_v2 = vpop.f32.mrf.mxu0  ;;  %v1158_v3 = vpop.f32.mrf.mxu1 }
 0x26e   :  { %v1162_v4 = vadd.f32 %v1087_v2, %v947_v1  ;;  %v1176_v20 = vadd.f32 %v8333_v0, %v1158_v3  ;;  %v12623_v1 = vld [vmem:[#allocation124_spill] sm:$0xff]  ;;  %v12625_v2 = vld [vmem:[#allocation126_spill] sm:$0xff]  ;;  %v12626_v3 = vld [vmem:[#allocation127_spill] sm:$0xff] }
 0x26f   :  { %v6067_v5 = vpop.f32.mrf.mxu1  ;;  %v1089_v7 = vpop.f32.mrf.mxu0 }
 0x270   :  { %v5262_v6 = vmul.f32 -1.442695, %v1162_v4  ;;  %v1169_v10 = vadd.f32 %v1089_v7, %v949_v9  ;;  %v12627_v4 = vld [vmem:[#allocation128_spill] sm:$0xff]  ;;  %v12628_v5 = vld [vmem:[#allocation129_spill] sm:$0xff]  ;;  %v12630_v7 = vld [vmem:[#allocation131_spill] sm:$0xff] }
 0x271   :  { %v12631_v9 = vld [vmem:[#allocation132_spill] sm:$0xff] }
 0x272   :  { %7032 = vpow2.f32 %v5262_v6  ;;  %v5263_v11 = vmul.f32 -1.442695, %v1169_v10  ;;  %v12629_v6 = vld [vmem:[#allocation130_spill] sm:$0xff]  ;;  %v12632_v10 = vld [vmem:[#allocation133_spill] sm:$0xff] }
 0x274   :  { %7034 = vpow2.f32 %v5263_v11 }
 0x27f   :  { %v7033_v12 = vpop.eup %7032 }
 0x280   :  { %v1166_v13 = vadd.f32 1.0, %v7033_v12  ;;  %v12633_v12 = vld [vmem:[#allocation134_spill] sm:$0xff] }
 0x281   :  { %v7035_v14 = vpop.eup %7034 }
 0x282   :  { %7036 = vrcp.f32 %v1166_v13  ;;  %v1173_v15 = vadd.f32 1.0, %v7035_v14  ;;  %v12634_v13 = vld [vmem:[#allocation135_spill] sm:$0xff]  ;;  %v12635_v14 = vld [vmem:[#allocation136_spill] sm:$0xff] }
 0x284   :  { %7038 = vrcp.f32 %v1173_v15 }
 0x28f   :  { %v7037_v23 = vpop.eup %7036 }
 0x290   :  { %v1177_v25 = vmul.f32 %v7037_v23, %v1176_v20  ;;  %v12637_v20 = vld [vmem:[#allocation138_spill] sm:$0xff] }
 0x291   :  { %v7039_v30 = vpop.eup %7038 }
 0x292   :  { %v1178_v27 = vadd.f32 %v1177_v25, %v1018_v24  ;;  %v1180_v32 = vsub.f32 1.0, %v7039_v30  ;;  %v1182_v17 = vmul.f32 %v7039_v30, %v8341_v57  ;;  %v12638_v24 = vld [vmem:[#allocation139_spill] sm:$0xff] }
 0x293   :  { %v8856_v30 = vld [vmem:[#allocation2 + $0x4f0] sm:$0xff] }
 0x294   :  { %7040 = vtanh.f32 %v1178_v27  ;;  %v8846_v27 = vld [vmem:[#allocation2 + $0x558] sm:$0xff] }
 0x295   :  { %7042 = vpow2.f32 %v5259_v29  ;;  %v8853_v29 = vld [vmem:[#allocation2 + $0x4e0] sm:$0xff] }
 0x2a1   :  { %v7041_v34 = vpop.eup %7040 }
 0x2a2   :  { %v1181_v19 = vmul.f32 %v7041_v34, %v1180_v32  ;;  %v7043_v0 = vpop.eup %7042  ;;  %v8859_v32 = vld [vmem:[#allocation2 + $0x480] sm:$0xff]  ;;  %v8863_v34 = vld [vmem:[#allocation2 + $0x478] sm:$0xff] }
 0x2a3   :  { %v861_v57 = vadd.f32 1.0, %v7043_v0  ;;  %v8873_v0 = vld [vmem:[#allocation2 + $0x410] sm:$0xff] }
 0x2a4   :  { %v8745_v35 = vadd.f32 %v1182_v17, %v1181_v19  ;;  %v8866_v19 = vld [vmem:[#allocation2 + $0x488] sm:$0xff]  ;;  %v8869_v17 = vld [vmem:[#allocation2 + $0x418] sm:$0xff] }
 0x2a5   :  { %7044 = vrcp.f32 %v861_v57  ;;  %v8876_v57 = vld [vmem:[#allocation2 + $0x420] sm:$0xff] }
 0x2a6   :  { %1249 = vmatmul.mubr.f32.vlgmr.msra.gmra.mxu0 %v8745_v35  ;;  %6101 = vmatmul.mubr.f32.vlgmr.msra.gmra.mxu1 %v8745_v35  ;;  %7046 = vtanh.f32 %v8733_v39  ;;  %v12624_v39 = vld [vmem:[#allocation125_spill] sm:$0xff] }
 0x2a7   :  { %1326 = vmatpush1.msra.mxu0 %v8343_v52  ;;  %6104 = vmatpush3.msra.mxu1 %v8345_v60  ;;  %v12609_v52 = vld [vmem:[#allocation110_spill] sm:$0xff]  ;;  %v12610_v60 = vld [vmem:[#allocation111_spill] sm:$0xff] }
 0x2a8   :  { %1327 = vmatprep.subr.mxu0 %v8347_v44  ;;  %6105 = vmatprep.subr.mxu1 %v12468_v46  ;;  %v12611_v44 = vld [vmem:[#allocation112_spill] sm:$0xff] }
 0x2a9   :  { %1328 = vmatpush1.msra.mxu0 %v8351_v51  ;;  %6106 = vmatpush3.msra.mxu1 %v8353_v62  ;;  %v12612_v51 = vld [vmem:[#allocation113_spill] sm:$0xff]  ;;  %v12613_v62 = vld [vmem:[#allocation114_spill] sm:$0xff] }
 0x2aa   :  { %1329 = vmatprep.subr.mxu0 %v8357_v58  ;;  %6107 = vmatprep.subr.mxu1 %v12468_v46  ;;  %v12614_v58 = vld [vmem:[#allocation115_spill] sm:$0xff] }
 0x2ab   :  { %1330 = vmatpush1.msra.mxu0 %v8361_v45  ;;  %6108 = vmatpush3.msra.mxu1 %v12608_v22  ;;  %v12615_v45 = vld [vmem:[#allocation116_spill] sm:$0xff]  ;;  %v8879_v22 = vld [vmem:[#allocation2 + $0x3b0] sm:$0xff] }
 0x2ac   :  { %1331 = vmatprep.subr.mxu0 %v12609_v52  ;;  %6109 = vmatprep.subr.mxu1 %v12468_v46  ;;  %v8883_v52 = vld [vmem:[#allocation2 + $0x3a8] sm:$0xff] }
 0x2ad   :  { %1332 = vmatpush1.msra.mxu0 %v12610_v60  ;;  %6110 = vmatpush3.msra.mxu1 %v12611_v44  ;;  %v8886_v60 = vld [vmem:[#allocation2 + $0x3b8] sm:$0xff]  ;;  %v8889_v44 = vld [vmem:[#allocation2 + $0x348] sm:$0xff] }
 0x2ae   :  { %1333 = vmatprep.subr.mxu0 %v12612_v51  ;;  %6111 = vmatprep.subr.mxu1 %v12468_v46  ;;  %v8893_v51 = vld [vmem:[#allocation2 + $0x340] sm:$0xff] }
 0x2af   :  { %1334 = vmatpush1.msra.mxu0 %v12613_v62  ;;  %6112 = vmatpush3.msra.mxu1 %v12614_v58  ;;  %v8896_v62 = vld [vmem:[#allocation2 + $0x350] sm:$0xff]  ;;  %v8899_v58 = vld [vmem:[#allocation2 + $0x2e0] sm:$0xff] }
 0x2b0   :  { %1335 = vmatprep.subr.mxu0 %v12615_v45  ;;  %6113 = vmatprep.subr.mxu1 %v12468_v46  ;;  %v8903_v45 = vld [vmem:[#allocation2 + $0x2d8] sm:$0xff] }
 0x2b1   :  { %1336 = vmatpush1.msra.mxu0 %v12616_v36  ;;  %6114 = vmatpush3.msra.mxu1 %v12617_v37  ;;  %v8906_v36 = vld [vmem:[#allocation2 + $0x2e8] sm:$0xff]  ;;  %v8909_v37 = vld [vmem:[#allocation2 + $0x278] sm:$0xff] }
 0x2b2   :  { %1337 = vmatprep.subr.mxu0 %v12618_v38  ;;  %6115 = vmatprep.subr.mxu1 %v12468_v46  ;;  %v7045_v11 = vpop.eup %7044  ;;  %v8913_v38 = vld [vmem:[#allocation2 + $0x270] sm:$0xff] }
 0x2b3   :  { %1338 = vmatpush1.msra.mxu0 %v12619_v40  ;;  %6116 = vmatpush3.msra.mxu1 %v12620_v42  ;;  %v7047_v15 = vpop.eup %7046  ;;  %v874_v23 = vsub.f32 1.0, %v7045_v11  ;;  %v8916_v40 = vld [vmem:[#allocation2 + $0x280] sm:$0xff]  ;;  %v8919_v42 = vld [vmem:[#allocation2 + $0x210] sm:$0xff] }
 0x2b4   :  { %1339 = vmatprep.subr.mxu0 %v12621_v47  ;;  %6117 = vmatprep.subr.mxu1 %v12468_v46  ;;  %v8923_v47 = vld [vmem:[#allocation2 + $0x208] sm:$0xff] }
 0x2b5   :  { %1340 = vmatpush1.msra.mxu0 %v12622_v50  ;;  %6118 = vmatpush3.msra.mxu1 %v12623_v1  ;;  %v875_v25 = vmul.f32 %v7047_v15, %v874_v23  ;;  %v8926_v50 = vld [vmem:[#allocation2 + $0x218] sm:$0xff]  ;;  %v8929_v1 = vld [vmem:[#allocation2 + $0x1a8] sm:$0xff]  ;;  %v8976_v15 = vld [vmem:[#allocation2] sm:$0xff] }
 0x2b6   :  { %1341 = vmatprep.subr.mxu0 %v12624_v39  ;;  %6119 = vmatprep.subr.mxu1 %v12468_v46  ;;  %v8933_v39 = vld [vmem:[#allocation2 + $0x1a0] sm:$0xff]  ;;  %12650 = vst [vmem:[#allocation29_spill] sm:$0xff] %v8976_v15  ;;  %v8989_v23 = vld [vmem:[#allocation2 + $0x630] sm:$0xff] }
 0x2b7   :  { %1342 = vmatpush1.msra.mxu0 %v12625_v2  ;;  %6120 = vmatpush3.msra.mxu1 %v12626_v3  ;;  %v8936_v2 = vld [vmem:[#allocation2 + $0x1b0] sm:$0xff]  ;;  %v8939_v3 = vld [vmem:[#allocation2 + $0x140] sm:$0xff]  ;;  %12653 = vst [vmem:[#allocation32_spill] sm:$0xff] %v8989_v23 }
 0x2b8   :  { %1343 = vmatprep.subr.mxu0 %v12627_v4  ;;  %6121 = vmatprep.subr.mxu1 %v12468_v46  ;;  %12639 = vst [vmem:[#allocation5_spill] sm:$0xff] %v8936_v2  ;;  %12640 = vst [vmem:[#allocation6_spill] sm:$0xff] %v8939_v3  ;;  %v8943_v4 = vld [vmem:[#allocation2 + $0x138] sm:$0xff] }
 0x2b9   :  { %1344 = vmatpush1.msra.mxu0 %v12628_v5  ;;  %6122 = vmatpush3.msra.mxu1 %v12629_v6  ;;  %12641 = vst [vmem:[#allocation18_spill] sm:$0xff] %v8943_v4  ;;  %v8946_v5 = vld [vmem:[#allocation2 + $0x148] sm:$0xff]  ;;  %v8949_v6 = vld [vmem:[#allocation2 + $0xd8] sm:$0xff] }
 0x2ba   :  { %1345 = vmatprep.subr.mxu0 %v12630_v7  ;;  %6123 = vmatprep.subr.mxu1 %v12468_v46  ;;  %12642 = vst [vmem:[#allocation7_spill] sm:$0xff] %v8946_v5  ;;  %12643 = vst [vmem:[#allocation8_spill] sm:$0xff] %v8949_v6  ;;  %v8953_v7 = vld [vmem:[#allocation2 + $0xd0] sm:$0xff] }
 0x2bb   :  { %1346 = vmatpush1.msra.mxu0 %v12631_v9  ;;  %6124 = vmatpush3.msra.mxu1 %v12632_v10  ;;  %12644 = vst [vmem:[#allocation23_spill] sm:$0xff] %v8953_v7  ;;  %v8956_v9 = vld [vmem:[#allocation2 + $0xe0] sm:$0xff]  ;;  %v8959_v10 = vld [vmem:[#allocation2 + $0x70] sm:$0xff] }
 0x2bc   :  { %1347 = vmatprep.subr.mxu0 %v12633_v12  ;;  %6125 = vmatprep.subr.mxu1 %v12468_v46  ;;  %12645 = vst [vmem:[#allocation9_spill] sm:$0xff] %v8956_v9  ;;  %12646 = vst [vmem:[#allocation10_spill] sm:$0xff] %v8959_v10  ;;  %v8966_v12 = vld [vmem:[#allocation2 + $0x78] sm:$0xff] }
 0x2bd   :  { %1348 = vmatpush1.msra.mxu0 %v12634_v13  ;;  %6126 = vmatpush3.msra.mxu1 %v12635_v14  ;;  %12648 = vst [vmem:[#allocation11_spill] sm:$0xff] %v8966_v12  ;;  %v5266_v13 = vld [vmem:[%s11790_s0 + $0x10] sm:$0xff]  ;;  %v8972_v14 = vld [vmem:[#allocation2 + $0x8] sm:$0xff] }
 0x2be   :  { %1349 = vmatprep.subr.mxu0 %v12636_v16  ;;  %6127 = vmatprep.subr.mxu1 %v12468_v46  ;;  %12649 = vst [vmem:[#allocation12_spill] sm:$0xff] %v8972_v14  ;;  %v8980_v16 = vld [vmem:[#allocation2 + $0x10] sm:$0xff] }
 0x2bf   :  { %1350 = vmatpush1.msra.mxu0 %v8461_v55  ;;  %6128 = vmatpush3.msra.mxu1 %v12637_v20  ;;  %v876_v55 = vmul.f32 0.0, %v7045_v11  ;;  %v8963_v11 = vld [vmem:[#allocation2 + $0x68] sm:$0xff]  ;;  %12651 = vst [vmem:[#allocation13_spill] sm:$0xff] %v8980_v16  ;;  %v8985_v20 = vld [vmem:[#allocation2 + $0x638] sm:$0xff] }
 0x2c0   :  { %1351 = vmatprep.subr.mxu0 %v12638_v24  ;;  %6129 = vmatprep.subr.mxu1 %v12468_v46  ;;  %12647 = vst [vmem:[#allocation26_spill] sm:$0xff] %v8963_v11  ;;  %12652 = vst [vmem:[#allocation14_spill] sm:$0xff] %v8985_v20  ;;  %v8992_v24 = vld [vmem:[#allocation2 + $0x640] sm:$0xff] }
 0x2c1   :  { %1352 = vmatpush1.msra.mxu0 %v8471_v63  ;;  %6130 = vmatpush3.msra.mxu1 %v8473_v59  ;;  %v8812_v63 = vadd.f32 %v876_v55, %v875_v25  ;;  %v8836_v59 = vld [vmem:[#allocation2 + $0x5c0] sm:$0xff]  ;;  %12654 = vst [vmem:[#allocation16_spill] sm:$0xff] %v8992_v24  ;;  %v8995_v25 = vld [vmem:[#allocation2 + $0x5d0] sm:$0xff]  ;;  %v8999_v55 = vld [vmem:[#allocation2 + $0x5c8] sm:$0xff] }
 0x2c2   :  { %1353 = vmatprep.subr.mxu0 %v8477_v61  ;;  %6131 = vmatprep.subr.mxu1 %v12468_v46  ;;  %v8839_v61 = vld [vmem:[#allocation2 + $0x550] sm:$0xff]  ;;  %12655 = vst [vmem:[#allocation17_spill] sm:$0xff] %v8995_v25  ;;  %12656 = vst [vmem:[#allocation35_spill] sm:$0xff] %v8999_v55 }
 0x2c3   :  { %1354 = vmatpush1.msra.mxu0 %v8481_v43  ;;  %6132 = vmatpush3.msra.mxu1 %v8483_v54  ;;  %v8819_v54 = vld [vmem:[#allocation2 + $0x620] sm:$0xff]  ;;  %v8823_v43 = vld [vmem:[#allocation2 + $0x618] sm:$0xff] }
 0x2c4   :  { %1355 = vmatprep.subr.mxu0 %v8487_v48  ;;  %6133 = vmatprep.subr.mxu1 %v12468_v46  ;;  %v8826_v48 = vld [vmem:[#allocation2 + $0x628] sm:$0xff] }
 0x2c5   :  { %1356 = vmatpush1.msra.mxu0 %v8491_v41  ;;  %1389 = vmatprep.mubr.f32.mxu0 %v12468_v46  ;;  %v8829_v41 = vld [vmem:[#allocation2 + $0x5b8] sm:$0xff] }
 0x2c6   :  { %6134 = vmatpush3.msra.mxu1 %v8495_v56  ;;  %6135 = vmatprep.mubr.msk.f32.mxu1 %vm7790_vm0, %v12468_v46  ;;  %v8833_v56 = vld [vmem:[#allocation2 + $0x5b0] sm:$0xff] }
 0x2c7   :  { %1390 = vmatmul.mubr.f32.vlgmr.msra.gmra.mxu0 %v8812_v63  ;;  %6136 = vmatmul.mubr.f32.vlgmr.msra.gmra.mxu1 %v8812_v63 }
 0x2c8   :  { %1490 = vmatprep.subr.mxu0 %v8819_v54  ;;  %6138 = vmatprep.subr.mxu1 %v12468_v46 }
 0x2c9   :  { %1491 = vmatpush1.msra.mxu0 %v8823_v43  ;;  %6139 = vmatpush3.msra.mxu1 %v8826_v48 }
 0x2ca   :  { %1492 = vmatprep.subr.mxu0 %v8829_v41  ;;  %6140 = vmatprep.subr.mxu1 %v12468_v46 }
 0x2cb   :  { %1493 = vmatpush1.msra.mxu0 %v8833_v56  ;;  %6141 = vmatpush3.msra.mxu1 %v8836_v59 }
 0x2cc   :  { %1494 = vmatprep.subr.mxu0 %v8839_v61  ;;  %6142 = vmatprep.subr.mxu1 %v12468_v46 }
 0x2cd   :  { %1495 = vmatpush1.msra.mxu0 %v8843_v26  ;;  %6143 = vmatpush3.msra.mxu1 %v8846_v27 }
 0x2ce   :  { %1496 = vmatprep.subr.mxu0 %v8849_v28  ;;  %6144 = vmatprep.subr.mxu1 %v12468_v46 }
 0x2cf   :  { %1497 = vmatpush1.msra.mxu0 %v8853_v29  ;;  %6145 = vmatpush3.msra.mxu1 %v8856_v30 }
 0x2d0   :  { %1498 = vmatprep.subr.mxu0 %v8859_v32  ;;  %6146 = vmatprep.subr.mxu1 %v12468_v46 }
 0x2d1   :  { %1499 = vmatpush1.msra.mxu0 %v8863_v34  ;;  %6147 = vmatpush3.msra.mxu1 %v8866_v19 }
 0x2d2   :  { %1500 = vmatprep.subr.mxu0 %v8869_v17  ;;  %6148 = vmatprep.subr.mxu1 %v12468_v46 }
 0x2d3   :  { %1501 = vmatpush1.msra.mxu0 %v8873_v0  ;;  %6149 = vmatpush3.msra.mxu1 %v8876_v57 }
 0x2d4   :  { %1502 = vmatprep.subr.mxu0 %v8879_v22  ;;  %6150 = vmatprep.subr.mxu1 %v12468_v46 }
 0x2d5   :  { %1503 = vmatpush1.msra.mxu0 %v8883_v52  ;;  %6151 = vmatpush3.msra.mxu1 %v8886_v60 }
 0x2d6   :  { %1504 = vmatprep.subr.mxu0 %v8889_v44  ;;  %6152 = vmatprep.subr.mxu1 %v12468_v46 }
 0x2d7   :  { %1505 = vmatpush1.msra.mxu0 %v8893_v51  ;;  %6153 = vmatpush3.msra.mxu1 %v8896_v62 }
 0x2d8   :  { %1506 = vmatprep.subr.mxu0 %v8899_v58  ;;  %6154 = vmatprep.subr.mxu1 %v12468_v46 }
 0x2d9   :  { %1507 = vmatpush1.msra.mxu0 %v8903_v45  ;;  %6155 = vmatpush3.msra.mxu1 %v8906_v36 }
 0x2da   :  { %1508 = vmatprep.subr.mxu0 %v8909_v37  ;;  %6156 = vmatprep.subr.mxu1 %v12468_v46 }
 0x2db   :  { %1509 = vmatpush1.msra.mxu0 %v8913_v38  ;;  %6157 = vmatpush3.msra.mxu1 %v8916_v40 }
 0x2dc   :  { %1510 = vmatprep.subr.mxu0 %v8919_v42  ;;  %6158 = vmatprep.subr.mxu1 %v12468_v46 }
 0x2dd   :  { %1511 = vmatpush1.msra.mxu0 %v8923_v47  ;;  %6159 = vmatpush3.msra.mxu1 %v8926_v50 }
 0x2de   :  { %1512 = vmatprep.subr.mxu0 %v8929_v1  ;;  %6160 = vmatprep.subr.mxu1 %v12468_v46 }
 0x2df   :  { %1513 = vmatpush1.msra.mxu0 %v8933_v39  ;;  %6161 = vmatpush3.msra.mxu1 %v8936_v2 }
 0x2e0   :  { %1514 = vmatprep.subr.mxu0 %v8939_v3  ;;  %6162 = vmatprep.subr.mxu1 %v12468_v46 }
 0x2e1   :  { %1515 = vmatpush1.msra.mxu0 %v8943_v4  ;;  %6163 = vmatpush3.msra.mxu1 %v8946_v5 }
 0x2e2   :  { %1516 = vmatprep.subr.mxu0 %v8949_v6  ;;  %6164 = vmatprep.subr.mxu1 %v12468_v46 }
 0x2e3   :  { %1517 = vmatpush1.msra.mxu0 %v8953_v7  ;;  %6165 = vmatpush3.msra.mxu1 %v8956_v9 }
 0x2e4   :  { %1518 = vmatprep.subr.mxu0 %v8959_v10  ;;  %6166 = vmatprep.subr.mxu1 %v12468_v46 }
 0x2e5   :  { %1519 = vmatpush1.msra.mxu0 %v8963_v11  ;;  %6167 = vmatpush3.msra.mxu1 %v8966_v12 }
 0x2e6   :  { %1520 = vmatprep.subr.mxu0 %v8972_v14  ;;  %6168 = vmatprep.subr.mxu1 %v12468_v46 }
 0x2e7   :  { %1521 = vmatpush1.msra.mxu0 %v8976_v15  ;;  %1554 = vmatprep.mubr.f32.mxu0 %v12468_v46 }
 0x2e8   :  { %6169 = vmatpush3.msra.mxu1 %v8980_v16  ;;  %1555 = vmatmul.mubr.f32.vlgmr.msra.gmra.mxu0 %v5266_v13 }
 0x2e9   :  { %6170 = vmatprep.mubr.msk.f32.mxu1 %vm7790_vm0, %v12468_v46  ;;  %1631 = vmatprep.subr.mxu0 %v8985_v20  ;;  %v9002_v20 = vld [vmem:[#allocation2 + $0x5d8] sm:$0xff] }
 0x2ea   :  { %6173 = vmatprep.subr.mxu1 %v12468_v46  ;;  %6171 = vmatmul.mubr.f32.vlgmr.msra.gmra.mxu1 %v5266_v13  ;;  %12657 = vst [vmem:[#allocation19_spill] sm:$0xff] %v9002_v20  ;;  %v9005_v13 = vld [vmem:[#allocation2 + $0x568] sm:$0xff] }
 0x2eb   :  { %1632 = vmatpush1.msra.mxu0 %v8989_v23  ;;  %6174 = vmatpush3.msra.mxu1 %v8992_v24  ;;  %12658 = vst [vmem:[#allocation20_spill] sm:$0xff] %v9005_v13  ;;  %v9009_v24 = vld [vmem:[#allocation2 + $0x560] sm:$0xff] }
 0x2ec   :  { %1633 = vmatprep.subr.mxu0 %v8995_v25  ;;  %6175 = vmatprep.subr.mxu1 %v12468_v46  ;;  %12659 = vst [vmem:[#allocation38_spill] sm:$0xff] %v9009_v24  ;;  %v9012_v25 = vld [vmem:[#allocation2 + $0x570] sm:$0xff]  ;;  %v9015_v23 = vld [vmem:[#allocation2 + $0x500] sm:$0xff] }
 0x2ed   :  { %1634 = vmatpush1.msra.mxu0 %v8999_v55  ;;  %6176 = vmatpush3.msra.mxu1 %v9002_v20  ;;  %12660 = vst [vmem:[#allocation21_spill] sm:$0xff] %v9012_v25  ;;  %12661 = vst [vmem:[#allocation22_spill] sm:$0xff] %v9015_v23  ;;  %v9019_v20 = vld [vmem:[#allocation2 + $0x4f8] sm:$0xff] }
 0x2ee   :  { %1635 = vmatprep.subr.mxu0 %v9005_v13  ;;  %6177 = vmatprep.subr.mxu1 %v12468_v46  ;;  %12662 = vst [vmem:[#allocation41_spill] sm:$0xff] %v9019_v20  ;;  %v9022_v13 = vld [vmem:[#allocation2 + $0x508] sm:$0xff]  ;;  %v9025_v55 = vld [vmem:[#allocation2 + $0x498] sm:$0xff] }
 0x2ef   :  { %1636 = vmatpush1.msra.mxu0 %v9009_v24  ;;  %6178 = vmatpush3.msra.mxu1 %v9012_v25  ;;  %12663 = vst [vmem:[#allocation24_spill] sm:$0xff] %v9022_v13  ;;  %12664 = vst [vmem:[#allocation25_spill] sm:$0xff] %v9025_v55  ;;  %v9029_v25 = vld [vmem:[#allocation2 + $0x490] sm:$0xff] }
 0x2f0   :  { %1637 = vmatprep.subr.mxu0 %v9015_v23  ;;  %6179 = vmatprep.subr.mxu1 %v12468_v46  ;;  %12665 = vst [vmem:[#allocation44_spill] sm:$0xff] %v9029_v25  ;;  %v9032_v23 = vld [vmem:[#allocation2 + $0x4a0] sm:$0xff]  ;;  %v9035_v24 = vld [vmem:[#allocation2 + $0x430] sm:$0xff] }
 0x2f1   :  { %1638 = vmatpush1.msra.mxu0 %v9019_v20  ;;  %6180 = vmatpush3.msra.mxu1 %v9022_v13  ;;  %12666 = vst [vmem:[#allocation27_spill] sm:$0xff] %v9032_v23  ;;  %12667 = vst [vmem:[#allocation28_spill] sm:$0xff] %v9035_v24  ;;  %v9039_v13 = vld [vmem:[#allocation2 + $0x428] sm:$0xff] }
 0x2f2   :  { %1639 = vmatprep.subr.mxu0 %v9025_v55  ;;  %6181 = vmatprep.subr.mxu1 %v12468_v46  ;;  %12668 = vst [vmem:[#allocation47_spill] sm:$0xff] %v9039_v13  ;;  %v9042_v55 = vld [vmem:[#allocation2 + $0x438] sm:$0xff]  ;;  %v9045_v20 = vld [vmem:[#allocation2 + $0x3c8] sm:$0xff] }
 0x2f3   :  { %1640 = vmatpush1.msra.mxu0 %v9029_v25  ;;  %6182 = vmatpush3.msra.mxu1 %v9032_v23  ;;  %12669 = vst [vmem:[#allocation30_spill] sm:$0xff] %v9042_v55  ;;  %12670 = vst [vmem:[#allocation31_spill] sm:$0xff] %v9045_v20  ;;  %v9049_v23 = vld [vmem:[#allocation2 + $0x3c0] sm:$0xff] }
 0x2f4   :  { %1641 = vmatprep.subr.mxu0 %v9035_v24  ;;  %6183 = vmatprep.subr.mxu1 %v12468_v46  ;;  %12671 = vst [vmem:[#allocation50_spill] sm:$0xff] %v9049_v23  ;;  %v9052_v24 = vld [vmem:[#allocation2 + $0x3d0] sm:$0xff]  ;;  %v9055_v25 = vld [vmem:[#allocation2 + $0x360] sm:$0xff] }
 0x2f5   :  { %1642 = vmatpush1.msra.mxu0 %v9039_v13  ;;  %6184 = vmatpush3.msra.mxu1 %v9042_v55  ;;  %12672 = vst [vmem:[#allocation33_spill] sm:$0xff] %v9052_v24  ;;  %12673 = vst [vmem:[#allocation34_spill] sm:$0xff] %v9055_v25  ;;  %v9059_v55 = vld [vmem:[#allocation2 + $0x358] sm:$0xff] }
 0x2f6   :  { %1643 = vmatprep.subr.mxu0 %v9045_v20  ;;  %6185 = vmatprep.subr.mxu1 %v12468_v46  ;;  %12674 = vst [vmem:[#allocation51_spill] sm:$0xff] %v9059_v55  ;;  %v9062_v20 = vld [vmem:[#allocation2 + $0x368] sm:$0xff]  ;;  %v9065_v13 = vld [vmem:[#allocation2 + $0x2f8] sm:$0xff] }
 0x2f7   :  { %1644 = vmatpush1.msra.mxu0 %v9049_v23  ;;  %6186 = vmatpush3.msra.mxu1 %v9052_v24  ;;  %12675 = vst [vmem:[#allocation36_spill] sm:$0xff] %v9062_v20  ;;  %12676 = vst [vmem:[#allocation37_spill] sm:$0xff] %v9065_v13  ;;  %v9069_v24 = vld [vmem:[#allocation2 + $0x2f0] sm:$0xff] }
 0x2f8   :  { %1645 = vmatprep.subr.mxu0 %v9055_v25  ;;  %6187 = vmatprep.subr.mxu1 %v12468_v46  ;;  %12677 = vst [vmem:[#allocation52_spill] sm:$0xff] %v9069_v24  ;;  %v9072_v25 = vld [vmem:[#allocation2 + $0x300] sm:$0xff]  ;;  %v9075_v23 = vld [vmem:[#allocation2 + $0x290] sm:$0xff] }
 0x2f9   :  { %1646 = vmatpush1.msra.mxu0 %v9059_v55  ;;  %6188 = vmatpush3.msra.mxu1 %v9062_v20  ;;  %12678 = vst [vmem:[#allocation39_spill] sm:$0xff] %v9072_v25  ;;  %12679 = vst [vmem:[#allocation40_spill] sm:$0xff] %v9075_v23  ;;  %v9079_v20 = vld [vmem:[#allocation2 + $0x288] sm:$0xff] }
 0x2fa   :  { %1647 = vmatprep.subr.mxu0 %v9065_v13  ;;  %6189 = vmatprep.subr.mxu1 %v12468_v46  ;;  %12680 = vst [vmem:[#allocation53_spill] sm:$0xff] %v9079_v20  ;;  %v9082_v13 = vld [vmem:[#allocation2 + $0x298] sm:$0xff]  ;;  %v9085_v55 = vld [vmem:[#allocation2 + $0x228] sm:$0xff] }
 0x2fb   :  { %1648 = vmatpush1.msra.mxu0 %v9069_v24  ;;  %6190 = vmatpush3.msra.mxu1 %v9072_v25  ;;  %12681 = vst [vmem:[#allocation42_spill] sm:$0xff] %v9082_v13  ;;  %12682 = vst [vmem:[#allocation43_spill] sm:$0xff] %v9085_v55  ;;  %v9089_v25 = vld [vmem:[#allocation2 + $0x220] sm:$0xff] }
 0x2fc   :  { %1649 = vmatprep.subr.mxu0 %v9075_v23  ;;  %6191 = vmatprep.subr.mxu1 %v12468_v46  ;;  %12683 = vst [vmem:[#allocation54_spill] sm:$0xff] %v9089_v25  ;;  %v9092_v23 = vld [vmem:[#allocation2 + $0x230] sm:$0xff]  ;;  %v9095_v24 = vld [vmem:[#allocation2 + $0x1c0] sm:$0xff] }
 0x2fd   :  { %1650 = vmatpush1.msra.mxu0 %v9079_v20  ;;  %6192 = vmatpush3.msra.mxu1 %v9082_v13  ;;  %12684 = vst [vmem:[#allocation45_spill] sm:$0xff] %v9092_v23  ;;  %12685 = vst [vmem:[#allocation46_spill] sm:$0xff] %v9095_v24  ;;  %v9099_v13 = vld [vmem:[#allocation2 + $0x1b8] sm:$0xff] }
 0x2fe   :  { %1651 = vmatprep.subr.mxu0 %v9085_v55  ;;  %6193 = vmatprep.subr.mxu1 %v12468_v46  ;;  %12686 = vst [vmem:[#allocation55_spill] sm:$0xff] %v9099_v13  ;;  %v9102_v55 = vld [vmem:[#allocation2 + $0x1c8] sm:$0xff]  ;;  %v9105_v20 = vld [vmem:[#allocation2 + $0x158] sm:$0xff] }
 0x2ff   :  { %1652 = vmatpush1.msra.mxu0 %v9089_v25  ;;  %6194 = vmatpush3.msra.mxu1 %v9092_v23  ;;  %12687 = vst [vmem:[#allocation48_spill] sm:$0xff] %v9102_v55  ;;  %12688 = vst [vmem:[#allocation49_spill] sm:$0xff] %v9105_v20  ;;  %v9109_v23 = vld [vmem:[#allocation2 + $0x150] sm:$0xff] }
 0x300   :  { %1653 = vmatprep.subr.mxu0 %v9095_v24  ;;  %6195 = vmatprep.subr.mxu1 %v12468_v46  ;;  %12689 = vst [vmem:[#allocation56_spill] sm:$0xff] %v9109_v23  ;;  %v9112_v24 = vld [vmem:[#allocation2 + $0x160] sm:$0xff]  ;;  %v9115_v25 = vld [vmem:[#allocation2 + $0xf0] sm:$0xff] }
 0x301   :  { %1654 = vmatpush1.msra.mxu0 %v9099_v13  ;;  %6196 = vmatpush3.msra.mxu1 %v9102_v55  ;;  %12690 = vst [vmem:[#allocation57_spill] sm:$0xff] %v9112_v24  ;;  %12691 = vst [vmem:[#allocation58_spill] sm:$0xff] %v9115_v25  ;;  %v9119_v55 = vld [vmem:[#allocation2 + $0xe8] sm:$0xff] }
 0x302   :  { %1655 = vmatprep.subr.mxu0 %v9105_v20  ;;  %6197 = vmatprep.subr.mxu1 %v12468_v46  ;;  %12692 = vst [vmem:[#allocation59_spill] sm:$0xff] %v9119_v55  ;;  %v9122_v20 = vld [vmem:[#allocation2 + $0xf8] sm:$0xff]  ;;  %v9125_v13 = vld [vmem:[#allocation2 + $0x88] sm:$0xff] }
 0x303   :  { %1656 = vmatpush1.msra.mxu0 %v9109_v23  ;;  %6198 = vmatpush3.msra.mxu1 %v9112_v24  ;;  %12693 = vst [vmem:[#allocation60_spill] sm:$0xff] %v9122_v20  ;;  %12694 = vst [vmem:[#allocation61_spill] sm:$0xff] %v9125_v13  ;;  %v9129_v24 = vld [vmem:[#allocation2 + $0x80] sm:$0xff] }
 0x304   :  { %1657 = vmatprep.subr.mxu0 %v9115_v25  ;;  %6199 = vmatprep.subr.mxu1 %v12468_v46  ;;  %12695 = vst [vmem:[#allocation62_spill] sm:$0xff] %v9129_v24  ;;  %v9132_v25 = vld [vmem:[#allocation2 + $0x90] sm:$0xff]  ;;  %v9135_v23 = vld [vmem:[#allocation2 + $0x20] sm:$0xff] }
 0x305   :  { %1658 = vmatpush1.msra.mxu0 %v9119_v55  ;;  %6200 = vmatpush3.msra.mxu1 %v9122_v20  ;;  %12696 = vst [vmem:[#allocation63_spill] sm:$0xff] %v9132_v25  ;;  %12697 = vst [vmem:[#allocation65_spill] sm:$0xff] %v9135_v23  ;;  %v9139_v20 = vld [vmem:[#allocation2 + $0x18] sm:$0xff]  ;;  %v9170_v55 = vld [vmem:[#allocation2 + $0x580] sm:$0xff] }
 0x306   :  { %1659 = vmatprep.subr.mxu0 %v9125_v13  ;;  %6201 = vmatprep.subr.mxu1 %v12468_v46  ;;  %12698 = vst [vmem:[#allocation64_spill] sm:$0xff] %v9139_v20  ;;  %v9143_v13 = vld [vmem:[#allocation2 + $0x28] sm:$0xff]  ;;  %12706 = vst [vmem:[#allocation73_spill] sm:$0xff] %v9170_v55 }
 0x307   :  { %1660 = vmatpush1.msra.mxu0 %v9129_v24  ;;  %6202 = vmatpush3.msra.mxu1 %v9132_v25  ;;  %12699 = vst [vmem:[#allocation66_spill] sm:$0xff] %v9143_v13  ;;  %v9157_v25 = vld [vmem:[#allocation2 + $0x658] sm:$0xff]  ;;  %v9164_v24 = vld [vmem:[#allocation2 + $0x5e0] sm:$0xff] }
 0x308   :  { %1661 = vmatprep.subr.mxu0 %v9135_v23  ;;  %6203 = vmatprep.subr.mxu1 %v12468_v46  ;;  %v9150_v23 = vld [vmem:[#allocation2 + $0x650] sm:$0xff]  ;;  %12702 = vst [vmem:[#allocation69_spill] sm:$0xff] %v9157_v25  ;;  %12704 = vst [vmem:[#allocation71_spill] sm:$0xff] %v9164_v24 }
 0x309   :  { %1662 = vmatpush1.msra.mxu0 %v9139_v20  ;;  %1695 = vmatprep.mubr.f32.mxu0 %v12468_v46  ;;  %12700 = vst [vmem:[#allocation67_spill] sm:$0xff] %v9150_v23  ;;  %v9154_v20 = vld [vmem:[#allocation2 + $0x648] sm:$0xff] }
 0x30a   :  { %6204 = vmatpush3.msra.mxu1 %v9143_v13  ;;  %6205 = vmatprep.mubr.msk.f32.mxu1 %vm7790_vm0, %v12468_v46  ;;  %12701 = vst [vmem:[#allocation68_spill] sm:$0xff] %v9154_v20  ;;  %v9160_v13 = vld [vmem:[#allocation2 + $0x5e8] sm:$0xff] }
 0x30b   :  { %1696 = vmatmul.mubr.f32.vlgmr.msra.gmra.mxu0 %v8745_v35  ;;  %6206 = vmatmul.mubr.f32.vlgmr.msra.gmra.mxu1 %v8745_v35  ;;  %12703 = vst [vmem:[#allocation70_spill] sm:$0xff] %v9160_v13 }
 0x30c   :  { %1794 = vmatprep.subr.mxu0 %v9150_v23  ;;  %6208 = vmatprep.subr.mxu1 %v12468_v46  ;;  %v9167_v23 = vld [vmem:[#allocation2 + $0x5f0] sm:$0xff] }
 0x30d   :  { %1795 = vmatpush1.msra.mxu0 %v9154_v20  ;;  %6209 = vmatpush3.msra.mxu1 %v9157_v25  ;;  %12705 = vst [vmem:[#allocation72_spill] sm:$0xff] %v9167_v23  ;;  %v9174_v25 = vld [vmem:[#allocation2 + $0x578] sm:$0xff] }
 0x30e   :  { %1796 = vmatprep.subr.mxu0 %v9160_v13  ;;  %6210 = vmatprep.subr.mxu1 %v12468_v46  ;;  %12707 = vst [vmem:[#allocation74_spill] sm:$0xff] %v9174_v25  ;;  %v9177_v13 = vld [vmem:[#allocation2 + $0x588] sm:$0xff]  ;;  %v9180_v20 = vld [vmem:[#allocation2 + $0x518] sm:$0xff] }
 0x30f   :  { %1797 = vmatpush1.msra.mxu0 %v9164_v24  ;;  %6211 = vmatpush3.msra.mxu1 %v9167_v23  ;;  %12708 = vst [vmem:[#allocation75_spill] sm:$0xff] %v9177_v13  ;;  %12709 = vst [vmem:[#allocation76_spill] sm:$0xff] %v9180_v20  ;;  %v9184_v23 = vld [vmem:[#allocation2 + $0x510] sm:$0xff] }
 0x310   :  { %1798 = vmatprep.subr.mxu0 %v9170_v55  ;;  %6212 = vmatprep.subr.mxu1 %v12468_v46  ;;  %12710 = vst [vmem:[#allocation77_spill] sm:$0xff] %v9184_v23  ;;  %v9187_v55 = vld [vmem:[#allocation2 + $0x520] sm:$0xff]  ;;  %v9190_v24 = vld [vmem:[#allocation2 + $0x4b0] sm:$0xff] }
 0x311   :  { %1799 = vmatpush1.msra.mxu0 %v9174_v25  ;;  %6213 = vmatpush3.msra.mxu1 %v9177_v13  ;;  %12711 = vst [vmem:[#allocation78_spill] sm:$0xff] %v9187_v55  ;;  %12712 = vst [vmem:[#allocation79_spill] sm:$0xff] %v9190_v24  ;;  %v9194_v13 = vld [vmem:[#allocation2 + $0x4a8] sm:$0xff] }
 0x312   :  { %1800 = vmatprep.subr.mxu0 %v9180_v20  ;;  %6214 = vmatprep.subr.mxu1 %v12468_v46  ;;  %12713 = vst [vmem:[#allocation80_spill] sm:$0xff] %v9194_v13  ;;  %v9197_v20 = vld [vmem:[#allocation2 + $0x4b8] sm:$0xff]  ;;  %v9200_v25 = vld [vmem:[#allocation2 + $0x448] sm:$0xff] }
 0x313   :  { %1801 = vmatpush1.msra.mxu0 %v9184_v23  ;;  %6215 = vmatpush3.msra.mxu1 %v9187_v55  ;;  %12714 = vst [vmem:[#allocation81_spill] sm:$0xff] %v9197_v20  ;;  %12715 = vst [vmem:[#allocation82_spill] sm:$0xff] %v9200_v25  ;;  %v9204_v55 = vld [vmem:[#allocation2 + $0x440] sm:$0xff] }
 0x314   :  { %1802 = vmatprep.subr.mxu0 %v9190_v24  ;;  %6216 = vmatprep.subr.mxu1 %v12468_v46  ;;  %12716 = vst [vmem:[#allocation83_spill] sm:$0xff] %v9204_v55  ;;  %v9207_v24 = vld [vmem:[#allocation2 + $0x450] sm:$0xff]  ;;  %v9210_v23 = vld [vmem:[#allocation2 + $0x3e0] sm:$0xff] }
 0x315   :  { %1803 = vmatpush1.msra.mxu0 %v9194_v13  ;;  %6217 = vmatpush3.msra.mxu1 %v9197_v20  ;;  %12717 = vst [vmem:[#allocation84_spill] sm:$0xff] %v9207_v24  ;;  %12718 = vst [vmem:[#allocation85_spill] sm:$0xff] %v9210_v23  ;;  %v9214_v20 = vld [vmem:[#allocation2 + $0x3d8] sm:$0xff] }
 0x316   :  { %1804 = vmatprep.subr.mxu0 %v9200_v25  ;;  %6218 = vmatprep.subr.mxu1 %v12468_v46  ;;  %12719 = vst [vmem:[#allocation86_spill] sm:$0xff] %v9214_v20  ;;  %v9217_v25 = vld [vmem:[#allocation2 + $0x3e8] sm:$0xff]  ;;  %v9220_v13 = vld [vmem:[#allocation2 + $0x378] sm:$0xff] }
 0x317   :  { %1805 = vmatpush1.msra.mxu0 %v9204_v55  ;;  %6219 = vmatpush3.msra.mxu1 %v9207_v24  ;;  %12720 = vst [vmem:[#allocation87_spill] sm:$0xff] %v9217_v25  ;;  %12721 = vst [vmem:[#allocation88_spill] sm:$0xff] %v9220_v13  ;;  %v9224_v24 = vld [vmem:[#allocation2 + $0x370] sm:$0xff] }
 0x318   :  { %1806 = vmatprep.subr.mxu0 %v9210_v23  ;;  %6220 = vmatprep.subr.mxu1 %v12468_v46  ;;  %12722 = vst [vmem:[#allocation89_spill] sm:$0xff] %v9224_v24  ;;  %v9227_v23 = vld [vmem:[#allocation2 + $0x380] sm:$0xff]  ;;  %v9230_v55 = vld [vmem:[#allocation2 + $0x310] sm:$0xff] }
 0x319   :  { %1807 = vmatpush1.msra.mxu0 %v9214_v20  ;;  %6221 = vmatpush3.msra.mxu1 %v9217_v25  ;;  %12723 = vst [vmem:[#allocation90_spill] sm:$0xff] %v9227_v23  ;;  %12724 = vst [vmem:[#allocation91_spill] sm:$0xff] %v9230_v55  ;;  %v9234_v25 = vld [vmem:[#allocation2 + $0x308] sm:$0xff] }
 0x31a   :  { %1808 = vmatprep.subr.mxu0 %v9220_v13  ;;  %6222 = vmatprep.subr.mxu1 %v12468_v46  ;;  %12725 = vst [vmem:[#allocation92_spill] sm:$0xff] %v9234_v25  ;;  %v9237_v13 = vld [vmem:[#allocation2 + $0x318] sm:$0xff]  ;;  %v9240_v20 = vld [vmem:[#allocation2 + $0x2a8] sm:$0xff] }
 0x31b   :  { %1809 = vmatpush1.msra.mxu0 %v9224_v24  ;;  %6223 = vmatpush3.msra.mxu1 %v9227_v23  ;;  %12726 = vst [vmem:[#allocation93_spill] sm:$0xff] %v9237_v13  ;;  %12727 = vst [vmem:[#allocation94_spill] sm:$0xff] %v9240_v20  ;;  %v9244_v23 = vld [vmem:[#allocation2 + $0x2a0] sm:$0xff] }
 0x31c   :  { %1810 = vmatprep.subr.mxu0 %v9230_v55  ;;  %6224 = vmatprep.subr.mxu1 %v12468_v46  ;;  %12728 = vst [vmem:[#allocation95_spill] sm:$0xff] %v9244_v23  ;;  %v9247_v55 = vld [vmem:[#allocation2 + $0x2b0] sm:$0xff]  ;;  %v9250_v24 = vld [vmem:[#allocation2 + $0x240] sm:$0xff] }
 0x31d   :  { %1811 = vmatpush1.msra.mxu0 %v9234_v25  ;;  %6225 = vmatpush3.msra.mxu1 %v9237_v13  ;;  %12729 = vst [vmem:[#allocation96_spill] sm:$0xff] %v9247_v55  ;;  %12730 = vst [vmem:[#allocation97_spill] sm:$0xff] %v9250_v24  ;;  %v9254_v13 = vld [vmem:[#allocation2 + $0x238] sm:$0xff] }
 0x31e   :  { %1812 = vmatprep.subr.mxu0 %v9240_v20  ;;  %6226 = vmatprep.subr.mxu1 %v12468_v46  ;;  %12731 = vst [vmem:[#allocation98_spill] sm:$0xff] %v9254_v13  ;;  %v9257_v20 = vld [vmem:[#allocation2 + $0x248] sm:$0xff]  ;;  %v9260_v25 = vld [vmem:[#allocation2 + $0x1d8] sm:$0xff] }
 0x31f   :  { %1813 = vmatpush1.msra.mxu0 %v9244_v23  ;;  %6227 = vmatpush3.msra.mxu1 %v9247_v55  ;;  %12732 = vst [vmem:[#allocation99_spill] sm:$0xff] %v9257_v20  ;;  %12733 = vst [vmem:[#allocation100_spill] sm:$0xff] %v9260_v25  ;;  %v9264_v55 = vld [vmem:[#allocation2 + $0x1d0] sm:$0xff] }
 0x320   :  { %1814 = vmatprep.subr.mxu0 %v9250_v24  ;;  %6228 = vmatprep.subr.mxu1 %v12468_v46  ;;  %12734 = vst [vmem:[#allocation101_spill] sm:$0xff] %v9264_v55  ;;  %v9267_v24 = vld [vmem:[#allocation2 + $0x1e0] sm:$0xff]  ;;  %v9270_v23 = vld [vmem:[#allocation2 + $0x170] sm:$0xff] }
 0x321   :  { %1815 = vmatpush1.msra.mxu0 %v9254_v13  ;;  %6229 = vmatpush3.msra.mxu1 %v9257_v20  ;;  %12735 = vst [vmem:[#allocation102_spill] sm:$0xff] %v9267_v24  ;;  %12736 = vst [vmem:[#allocation103_spill] sm:$0xff] %v9270_v23  ;;  %v9274_v20 = vld [vmem:[#allocation2 + $0x168] sm:$0xff] }
 0x322   :  { %1816 = vmatprep.subr.mxu0 %v9260_v25  ;;  %6230 = vmatprep.subr.mxu1 %v12468_v46  ;;  %12737 = vst [vmem:[#allocation104_spill] sm:$0xff] %v9274_v20  ;;  %v9277_v25 = vld [vmem:[#allocation2 + $0x178] sm:$0xff]  ;;  %v9280_v13 = vld [vmem:[#allocation2 + $0x108] sm:$0xff] }
 0x323   :  { %1817 = vmatpush1.msra.mxu0 %v9264_v55  ;;  %6231 = vmatpush3.msra.mxu1 %v9267_v24  ;;  %12738 = vst [vmem:[#allocation105_spill] sm:$0xff] %v9277_v25  ;;  %12739 = vst [vmem:[#allocation106_spill] sm:$0xff] %v9280_v13  ;;  %v9284_v24 = vld [vmem:[#allocation2 + $0x100] sm:$0xff] }
 0x324   :  { %1818 = vmatprep.subr.mxu0 %v9270_v23  ;;  %6232 = vmatprep.subr.mxu1 %v12468_v46  ;;  %12740 = vst [vmem:[#allocation107_spill] sm:$0xff] %v9284_v24  ;;  %v9287_v23 = vld [vmem:[#allocation2 + $0x110] sm:$0xff]  ;;  %v9290_v55 = vld [vmem:[#allocation2 + $0xa0] sm:$0xff] }
 0x325   :  { %1819 = vmatpush1.msra.mxu0 %v9274_v20  ;;  %6233 = vmatpush3.msra.mxu1 %v9277_v25  ;;  %12741 = vst [vmem:[#allocation108_spill] sm:$0xff] %v9287_v23  ;;  %12742 = vst [vmem:[#allocation109_spill] sm:$0xff] %v9290_v55  ;;  %v9294_v25 = vld [vmem:[#allocation2 + $0x98] sm:$0xff] }
 0x326   :  { %1820 = vmatprep.subr.mxu0 %v9280_v13  ;;  %6234 = vmatprep.subr.mxu1 %v12468_v46  ;;  %12743 = vst [vmem:[#allocation110_spill] sm:$0xff] %v9294_v25  ;;  %v9297_v13 = vld [vmem:[#allocation2 + $0xa8] sm:$0xff]  ;;  %v9300_v20 = vld [vmem:[#allocation2 + $0x38] sm:$0xff] }
 0x327   :  { %1821 = vmatpush1.msra.mxu0 %v9284_v24  ;;  %6235 = vmatpush3.msra.mxu1 %v9287_v23  ;;  %12744 = vst [vmem:[#allocation111_spill] sm:$0xff] %v9297_v13  ;;  %12745 = vst [vmem:[#allocation112_spill] sm:$0xff] %v9300_v20  ;;  %v9304_v23 = vld [vmem:[#allocation2 + $0x30] sm:$0xff] }
 0x328   :  { %1822 = vmatprep.subr.mxu0 %v9290_v55  ;;  %6236 = vmatprep.subr.mxu1 %v12468_v46  ;;  %12746 = vst [vmem:[#allocation113_spill] sm:$0xff] %v9304_v23  ;;  %v9307_v55 = vld [vmem:[#allocation2 + $0x40] sm:$0xff] }
 0x329   :  { %1823 = vmatpush1.msra.mxu0 %v9294_v25  ;;  %6237 = vmatpush3.msra.mxu1 %v9297_v13  ;;  %12747 = vst [vmem:[#allocation114_spill] sm:$0xff] %v9307_v55  ;;  %v9313_v13 = vld [vmem:[#allocation2 + $0x668] sm:$0xff] }
 0x32a   :  { %1824 = vmatprep.subr.mxu0 %v9300_v20  ;;  %6238 = vmatprep.subr.mxu1 %v12468_v46  ;;  %12748 = vst [vmem:[#allocation115_spill] sm:$0xff] %v9313_v13 }
 0x32b   :  { %1825 = vmatpush1.msra.mxu0 %v9304_v23  ;;  %6239 = vmatpush3.msra.mxu1 %v9307_v55 }
 0x32c   :  { %1858 = vmatprep.mubr.f32.mxu0 %v12468_v46  ;;  %6240 = vmatprep.mubr.msk.f32.mxu1 %vm7790_vm0, %v12468_v46 }
 0x32d   :  { %1935 = vmatprep.subr.mxu0 %v9313_v13  ;;  %6243 = vmatprep.subr.mxu1 %v12468_v46 }
 0x366   :  { %v1321_v20 = vpop.f32.mrf.mxu1  ;;  %v1250_v24 = vpop.f32.mrf.mxu0 }
 0x367   :  { %v1251_v23 = vadd.f32 %v1250_v24, %v8719_v21  ;;  %v1322_v6 = vadd.f32 %v1321_v20, %v8729_v33 }
 0x368   :  { %v6102_v25 = vpop.f32.mrf.mxu1  ;;  %v1252_v16 = vpop.f32.mrf.mxu0 }
 0x387   :  { %v1391_v15 = vpop.f32.mrf.mxu0  ;;  %v1462_v14 = vpop.f32.mrf.mxu1 }
 0x388   :  { %v1466_v55 = vadd.f32 %v1391_v15, %v1251_v23  ;;  %v1480_v7 = vadd.f32 %v8725_v31, %v1462_v14 }
 0x389   :  { %v6137_v12 = vpop.f32.mrf.mxu1  ;;  %v1393_v24 = vpop.f32.mrf.mxu0 }
 0x38a   :  { %v5264_v11 = vmul.f32 -1.442695, %v1466_v55 }
 0x38c   :  { %7048 = vpow2.f32 %v5264_v11 }
 0x399   :  { %v7049_v10 = vpop.eup %7048 }
 0x39a   :  { %v1470_v9 = vadd.f32 1.0, %v7049_v10 }
 0x39c   :  { %7050 = vrcp.f32 %v1470_v9 }
 0x3a8   :  { %v1556_v21 = vpop.f32.mrf.mxu0 }
 0x3a9   :  { %v7051_v13 = vpop.eup %7050  ;;  %v1557_v12 = vadd.f32 %v1556_v21, %v12605_v53  ;;  %v9327_v21 = vld [vmem:[%s11792_s2 + $0x3] ss:$0 sm:$0xff] }
 0x3aa   :  { %v1481_v5 = vmul.f32 %v7051_v13, %v1480_v7  ;;  %v1627_v25 = vpop.f32.mrf.mxu1  ;;  %v1558_v2 = vpop.f32.mrf.mxu0 }
 0x3ab   :  { %v1559_v31 = vadd.f32 %v1558_v2, %v12606_v8 }
 0x3ac   :  { %v9320_v4 = vadd.f32 %v1481_v5, %v1322_v6  ;;  %v6172_v3 = vpop.f32.mrf.mxu1 }
 0x3cb   :  { %v1697_v15 = vpop.f32.mrf.mxu0  ;;  %v1768_v11 = vpop.f32.mrf.mxu1 }
 0x3cc   :  { %v1772_v23 = vadd.f32 %v1697_v15, %v1557_v12  ;;  %v1786_v13 = vadd.f32 %v9327_v21, %v1768_v11  ;;  %v1628_v15 = vadd.f32 %v1627_v25, %v8337_v49  ;;  %v9337_v25 = vld [vmem:[#allocation2 + $0x660] sm:$0xff] }
 0x3cd   :  { %v6207_v10 = vpop.f32.mrf.mxu1  ;;  %v1699_v55 = vpop.f32.mrf.mxu0  ;;  %v9343_v11 = vld [vmem:[#allocation2 + $0x600] sm:$0xff] }
 0x3ce   :  { %v5267_v9 = vmul.f32 -1.442695, %v1772_v23  ;;  %v1779_v14 = vadd.f32 %v1699_v55, %v1559_v31  ;;  %v1253_v23 = vadd.f32 %v1252_v16, %v8739_v18  ;;  %v9340_v16 = vld [vmem:[#allocation2 + $0x670] sm:$0xff] }
 0x3d0   :  { %7052 = vpow2.f32 %v5267_v9  ;;  %v5268_v7 = vmul.f32 -1.442695, %v1779_v14  ;;  %v1473_v9 = vadd.f32 %v1393_v24, %v1253_v23  ;;  %v9363_v23 = vld [vmem:[#allocation2 + $0x530] sm:$0xff] }
 0x3d2   :  { %7054 = vpow2.f32 %v5268_v7  ;;  %v5265_v55 = vmul.f32 -1.442695, %v1473_v9  ;;  %v9370_v9 = vld [vmem:[#allocation2 + $0x538] sm:$0xff] }
 0x3d3   :  { %12749 = vst [vmem:[#allocation116_spill] sm:$0xff] %v9370_v9 }
 0x3dd   :  { %v7053_v5 = vpop.eup %7052 }
 0x3de   :  { %v1776_v6 = vadd.f32 1.0, %v7053_v5 }
 0x3df   :  { %v7055_v3 = vpop.eup %7054 }
 0x3e0   :  { %7056 = vrcp.f32 %v1776_v6  ;;  %v1783_v20 = vadd.f32 1.0, %v7055_v3 }
 0x3e2   :  { %7058 = vrcp.f32 %v1783_v20  ;;  %v9350_v20 = vld [vmem:[#allocation2 + $0x608] sm:$0xff] }
 0x3ed   :  { %v7057_v12 = vpop.eup %7056 }
 0x3ee   :  { %v1787_v2 = vmul.f32 %v7057_v12, %v1786_v13  ;;  %v9353_v13 = vld [vmem:[#allocation2 + $0x598] sm:$0xff] }
 0x3ef   :  { %v7059_v31 = vpop.eup %7058 }
 0x3f0   :  { %v1788_v10 = vadd.f32 %v1787_v2, %v1628_v15  ;;  %v1790_v14 = vsub.f32 1.0, %v7059_v31  ;;  %v1792_v6 = vmul.f32 %v7059_v31, %v8745_v35  ;;  %v9347_v35 = vld [vmem:[#allocation2 + $0x5f8] sm:$0xff]  ;;  %v9357_v15 = vld [vmem:[#allocation2 + $0x590] sm:$0xff]  ;;  %v9360_v2 = vld [vmem:[#allocation2 + $0x5a0] sm:$0xff] }
 0x3f1   :  { %v9377_v31 = vld [vmem:[#allocation2 + $0x4c0] sm:$0xff] }
 0x3f2   :  { %7060 = vtanh.f32 %v1788_v10  ;;  %v9367_v10 = vld [vmem:[#allocation2 + $0x528] sm:$0xff]  ;;  %12751 = vst [vmem:[#allocation118_spill] sm:$0xff] %v9377_v31 }
 0x3f3   :  { %7062 = vpow2.f32 %v5265_v55  ;;  %v9373_v55 = vld [vmem:[#allocation2 + $0x4c8] sm:$0xff] }
 0x3f4   :  { %12750 = vst [vmem:[#allocation117_spill] sm:$0xff] %v9373_v55 }
 0x3ff   :  { %v7061_v7 = vpop.eup %7060 }
 0x400   :  { %v1791_v5 = vmul.f32 %v7061_v7, %v1790_v14  ;;  %v7063_v24 = vpop.eup %7062  ;;  %v9380_v14 = vld [vmem:[#allocation2 + $0x4d0] sm:$0xff]  ;;  %v9383_v7 = vld [vmem:[#allocation2 + $0x460] sm:$0xff] }
 0x401   :  { %v1477_v12 = vadd.f32 1.0, %v7063_v24  ;;  %12752 = vst [vmem:[#allocation119_spill] sm:$0xff] %v9380_v14  ;;  %12753 = vst [vmem:[#allocation120_spill] sm:$0xff] %v9383_v7  ;;  %v9394_v24 = vld [vmem:[#allocation2 + $0x3f8] sm:$0xff] }
 0x402   :  { %v9333_v3 = vadd.f32 %v1792_v6, %v1791_v5  ;;  %v9388_v5 = vld [vmem:[#allocation2 + $0x458] sm:$0xff]  ;;  %v9391_v6 = vld [vmem:[#allocation2 + $0x468] sm:$0xff]  ;;  %12756 = vst [vmem:[#allocation123_spill] sm:$0xff] %v9394_v24 }
 0x403   :  { %7064 = vrcp.f32 %v1477_v12  ;;  %12754 = vst [vmem:[#allocation121_spill] sm:$0xff] %v9388_v5  ;;  %12755 = vst [vmem:[#allocation122_spill] sm:$0xff] %v9391_v6  ;;  %v9398_v12 = vld [vmem:[#allocation2 + $0x3f0] sm:$0xff] }
 0x404   :  { %1859 = vmatmul.mubr.f32.vlgmr.msra.gmra.mxu0 %v9333_v3  ;;  %6241 = vmatmul.mubr.f32.vlgmr.msra.gmra.mxu1 %v9333_v3  ;;  %7066 = vtanh.f32 %v9320_v4  ;;  %12757 = vst [vmem:[#allocation124_spill] sm:$0xff] %v9398_v12  ;;  %v9404_v4 = vld [vmem:[#allocation2 + $0x390] sm:$0xff] }
 0x405   :  { %1936 = vmatpush1.msra.mxu0 %v9337_v25  ;;  %6244 = vmatpush3.msra.mxu1 %v9340_v16  ;;  %12759 = vst [vmem:[#allocation126_spill] sm:$0xff] %v9404_v4 }
 0x406   :  { %1937 = vmatprep.subr.mxu0 %v9343_v11  ;;  %6245 = vmatprep.subr.mxu1 %v12468_v46 }
 0x407   :  { %1938 = vmatpush1.msra.mxu0 %v9347_v35  ;;  %6246 = vmatpush3.msra.mxu1 %v9350_v20 }
 0x408   :  { %1939 = vmatprep.subr.mxu0 %v9353_v13  ;;  %6247 = vmatprep.subr.mxu1 %v12468_v46 }
 0x409   :  { %1940 = vmatpush1.msra.mxu0 %v9357_v15  ;;  %6248 = vmatpush3.msra.mxu1 %v9360_v2 }
 0x40a   :  { %1941 = vmatprep.subr.mxu0 %v9363_v23  ;;  %6249 = vmatprep.subr.mxu1 %v12468_v46 }
 0x40b   :  { %1942 = vmatpush1.msra.mxu0 %v9367_v10  ;;  %6250 = vmatpush3.msra.mxu1 %v9370_v9  ;;  %v9485_v9 = vld [vmem:[#allocation2 + $0x50] sm:$0xff] }
 0x40c   :  { %1943 = vmatprep.subr.mxu0 %v9373_v55  ;;  %6251 = vmatprep.subr.mxu1 %v12468_v46  ;;  %v9474_v55 = vld [vmem:[#allocation2 + $0xb8] sm:$0xff] }
 0x40d   :  { %1944 = vmatpush1.msra.mxu0 %v9377_v31  ;;  %6252 = vmatpush3.msra.mxu1 %v9380_v14  ;;  %v9454_v14 = vld [vmem:[#allocation2 + $0x188] sm:$0xff]  ;;  %v9464_v31 = vld [vmem:[#allocation2 + $0x120] sm:$0xff] }
 0x40e   :  { %1945 = vmatprep.subr.mxu0 %v9383_v7  ;;  %6253 = vmatprep.subr.mxu1 %v12468_v46  ;;  %v9401_v7 = vld [vmem:[#allocation2 + $0x400] sm:$0xff]  ;;  %12774 = vst [vmem:[#allocation141_spill] sm:$0xff] %v9454_v14  ;;  %12777 = vst [vmem:[#allocation144_spill] sm:$0xff] %v9464_v31 }
 0x40f   :  { %1946 = vmatpush1.msra.mxu0 %v9388_v5  ;;  %6254 = vmatpush3.msra.mxu1 %v9391_v6  ;;  %12758 = vst [vmem:[#allocation125_spill] sm:$0xff] %v9401_v7  ;;  %v9408_v6 = vld [vmem:[#allocation2 + $0x388] sm:$0xff] }
 0x410   :  { %1947 = vmatprep.subr.mxu0 %v9394_v24  ;;  %6255 = vmatprep.subr.mxu1 %v12468_v46  ;;  %12760 = vst [vmem:[#allocation127_spill] sm:$0xff] %v9408_v6  ;;  %v9411_v24 = vld [vmem:[#allocation2 + $0x398] sm:$0xff]  ;;  %v9414_v5 = vld [vmem:[#allocation2 + $0x328] sm:$0xff] }
 0x411   :  { %1948 = vmatpush1.msra.mxu0 %v9398_v12  ;;  %6256 = vmatpush3.msra.mxu1 %v9401_v7  ;;  %12761 = vst [vmem:[#allocation128_spill] sm:$0xff] %v9411_v24  ;;  %12762 = vst [vmem:[#allocation129_spill] sm:$0xff] %v9414_v5  ;;  %v9418_v7 = vld [vmem:[#allocation2 + $0x320] sm:$0xff] }
 0x412   :  { %1949 = vmatprep.subr.mxu0 %v9404_v4  ;;  %6257 = vmatprep.subr.mxu1 %v12468_v46  ;;  %12763 = vst [vmem:[#allocation130_spill] sm:$0xff] %v9418_v7  ;;  %v9421_v4 = vld [vmem:[#allocation2 + $0x330] sm:$0xff]  ;;  %v9424_v12 = vld [vmem:[#allocation2 + $0x2c0] sm:$0xff] }
 0x413   :  { %1950 = vmatpush1.msra.mxu0 %v9408_v6  ;;  %6258 = vmatpush3.msra.mxu1 %v9411_v24  ;;  %12764 = vst [vmem:[#allocation131_spill] sm:$0xff] %v9421_v4  ;;  %12765 = vst [vmem:[#allocation132_spill] sm:$0xff] %v9424_v12  ;;  %v9428_v24 = vld [vmem:[#allocation2 + $0x2b8] sm:$0xff] }
 0x414   :  { %1951 = vmatprep.subr.mxu0 %v9414_v5  ;;  %6259 = vmatprep.subr.mxu1 %v12468_v46  ;;  %12766 = vst [vmem:[#allocation133_spill] sm:$0xff] %v9428_v24  ;;  %v9431_v5 = vld [vmem:[#allocation2 + $0x2c8] sm:$0xff]  ;;  %v9434_v6 = vld [vmem:[#allocation2 + $0x258] sm:$0xff] }
 0x415   :  { %1952 = vmatpush1.msra.mxu0 %v9418_v7  ;;  %6260 = vmatpush3.msra.mxu1 %v9421_v4  ;;  %12767 = vst [vmem:[#allocation134_spill] sm:$0xff] %v9431_v5  ;;  %12768 = vst [vmem:[#allocation135_spill] sm:$0xff] %v9434_v6  ;;  %v9438_v4 = vld [vmem:[#allocation2 + $0x250] sm:$0xff]  ;;  %v7065_v7 = vpop.eup %7064 }
 0x416   :  { %1953 = vmatprep.subr.mxu0 %v9424_v12  ;;  %6261 = vmatprep.subr.mxu1 %v12468_v46  ;;  %12769 = vst [vmem:[#allocation136_spill] sm:$0xff] %v9438_v4  ;;  %v9441_v12 = vld [vmem:[#allocation2 + $0x260] sm:$0xff] }
 0x417   :  { %1954 = vmatpush1.msra.mxu0 %v9428_v24  ;;  %6262 = vmatpush3.msra.mxu1 %v9431_v5  ;;  %12770 = vst [vmem:[#allocation137_spill] sm:$0xff] %v9441_v12  ;;  %v9444_v24 = vld [vmem:[#allocation2 + $0x1f0] sm:$0xff]  ;;  %v9448_v5 = vld [vmem:[#allocation2 + $0x1e8] sm:$0xff] }
 0x418   :  { %1955 = vmatprep.subr.mxu0 %v9434_v6  ;;  %6263 = vmatprep.subr.mxu1 %v12468_v46  ;;  %12771 = vst [vmem:[#allocation138_spill] sm:$0xff] %v9444_v24  ;;  %12772 = vst [vmem:[#allocation139_spill] sm:$0xff] %v9448_v5  ;;  %v9451_v6 = vld [vmem:[#allocation2 + $0x1f8] sm:$0xff] }
 0x419   :  { %1956 = vmatpush1.msra.mxu0 %v9438_v4  ;;  %6264 = vmatpush3.msra.mxu1 %v9441_v12  ;;  %12773 = vst [vmem:[#allocation140_spill] sm:$0xff] %v9451_v6  ;;  %v7067_v4 = vpop.eup %7066  ;;  %v9458_v12 = vld [vmem:[#allocation2 + $0x180] sm:$0xff] }
 0x41a   :  { %1957 = vmatprep.subr.mxu0 %v9444_v24  ;;  %6265 = vmatprep.subr.mxu1 %v12468_v46  ;;  %12775 = vst [vmem:[#allocation142_spill] sm:$0xff] %v9458_v12  ;;  %v9461_v24 = vld [vmem:[#allocation2 + $0x190] sm:$0xff] }
 0x41b   :  { %1958 = vmatpush1.msra.mxu0 %v9448_v5  ;;  %6266 = vmatpush3.msra.mxu1 %v9451_v6  ;;  %12776 = vst [vmem:[#allocation143_spill] sm:$0xff] %v9461_v24  ;;  %v1484_v5 = vsub.f32 1.0, %v7065_v7  ;;  %v9468_v6 = vld [vmem:[#allocation2 + $0x118] sm:$0xff] }
 0x41c   :  { %1959 = vmatprep.subr.mxu0 %v9454_v14  ;;  %6267 = vmatprep.subr.mxu1 %v12468_v46  ;;  %12778 = vst [vmem:[#allocation145_spill] sm:$0xff] %v9468_v6  ;;  %v9471_v14 = vld [vmem:[#allocation2 + $0x128] sm:$0xff] }
 0x41d   :  { %1960 = vmatpush1.msra.mxu0 %v9458_v12  ;;  %6268 = vmatpush3.msra.mxu1 %v9461_v24  ;;  %v1485_v12 = vmul.f32 %v7067_v4, %v1484_v5  ;;  %v9478_v24 = vld [vmem:[#allocation2 + $0xb0] sm:$0xff]  ;;  %v9489_v5 = vld [vmem:[#allocation2 + $0x48] sm:$0xff] }
 0x41e   :  { %1961 = vmatprep.subr.mxu0 %v9464_v31  ;;  %6269 = vmatprep.subr.mxu1 %v12468_v46  ;;  %12779 = vst [vmem:[#allocation146_spill] sm:$0xff] %v9478_v24  ;;  %v9481_v31 = vld [vmem:[#allocation2 + $0xc0] sm:$0xff] }
 0x41f   :  { %1962 = vmatpush1.msra.mxu0 %v9468_v6  ;;  %6270 = vmatpush3.msra.mxu1 %v9471_v14  ;;  %v1486_v6 = vmul.f32 %v7065_v7, %v8812_v63  ;;  %v12780_v63 = vld [vmem:[#allocation5_spill] sm:$0xff]  ;;  %v12815_v7 = vld [vmem:[#allocation51_spill] sm:$0xff] }
 0x420   :  { %1963 = vmatprep.subr.mxu0 %v9474_v55  ;;  %6271 = vmatprep.subr.mxu1 %v12468_v46 }
 0x421   :  { %1964 = vmatpush1.msra.mxu0 %v9478_v24  ;;  %6272 = vmatpush3.msra.mxu1 %v9481_v31  ;;  %v9493_v4 = vadd.f32 %v1486_v6, %v1485_v12  ;;  %v9495_v24 = vld [vmem:[#allocation2 + $0x58] sm:$0xff]  ;;  %v12817_v12 = vld [vmem:[#allocation37_spill] sm:$0xff] }
 0x422   :  { %1965 = vmatprep.subr.mxu0 %v9485_v9  ;;  %6273 = vmatprep.subr.mxu1 %v12468_v46  ;;  %v12816_v6 = vld [vmem:[#allocation36_spill] sm:$0xff] }
 0x423   :  { %1966 = vmatpush1.msra.mxu0 %v9489_v5  ;;  %1999 = vmatprep.mubr.f32.mxu0 %v12468_v46 }
 0x424   :  { %6274 = vmatpush3.msra.mxu1 %v9495_v24  ;;  %6275 = vmatprep.mubr.msk.f32.mxu1 %vm7790_vm0, %v12468_v46 }
 0x425   :  { %2000 = vmatmul.mubr.f32.vlgmr.msra.gmra.mxu0 %v9493_v4  ;;  %6276 = vmatmul.mubr.f32.vlgmr.msra.gmra.mxu1 %v9493_v4 }
 0x426   :  { %2100 = vmatprep.subr.mxu0 %v8819_v54  ;;  %6278 = vmatprep.subr.mxu1 %v12468_v46  ;;  %v12781_v54 = vld [vmem:[#allocation6_spill] sm:$0xff] }
 0x427   :  { %2101 = vmatpush1.msra.mxu0 %v8823_v43  ;;  %6279 = vmatpush3.msra.mxu1 %v8826_v48  ;;  %v12782_v43 = vld [vmem:[#allocation18_spill] sm:$0xff]  ;;  %v12783_v48 = vld [vmem:[#allocation7_spill] sm:$0xff] }
 0x428   :  { %2102 = vmatprep.subr.mxu0 %v8829_v41  ;;  %6280 = vmatprep.subr.mxu1 %v12468_v46  ;;  %v12784_v41 = vld [vmem:[#allocation8_spill] sm:$0xff] }
 0x429   :  { %2103 = vmatpush1.msra.mxu0 %v8833_v56  ;;  %6281 = vmatpush3.msra.mxu1 %v8836_v59  ;;  %v12785_v56 = vld [vmem:[#allocation23_spill] sm:$0xff]  ;;  %v12786_v59 = vld [vmem:[#allocation9_spill] sm:$0xff] }
 0x42a   :  { %2104 = vmatprep.subr.mxu0 %v8839_v61  ;;  %6282 = vmatprep.subr.mxu1 %v12468_v46  ;;  %v12787_v61 = vld [vmem:[#allocation10_spill] sm:$0xff] }
 0x42b   :  { %2105 = vmatpush1.msra.mxu0 %v8843_v26  ;;  %6283 = vmatpush3.msra.mxu1 %v8846_v27  ;;  %v12788_v26 = vld [vmem:[#allocation26_spill] sm:$0xff]  ;;  %v12789_v27 = vld [vmem:[#allocation11_spill] sm:$0xff] }
 0x42c   :  { %2106 = vmatprep.subr.mxu0 %v8849_v28  ;;  %6284 = vmatprep.subr.mxu1 %v12468_v46  ;;  %v5271_v28 = vld [vmem:[%s11790_s0 + $0x18] sm:$0xff] }
 0x42d   :  { %2107 = vmatpush1.msra.mxu0 %v8853_v29  ;;  %6285 = vmatpush3.msra.mxu1 %v8856_v30  ;;  %v12790_v29 = vld [vmem:[#allocation12_spill] sm:$0xff]  ;;  %v12791_v30 = vld [vmem:[#allocation29_spill] sm:$0xff] }
 0x42e   :  { %2108 = vmatprep.subr.mxu0 %v8859_v32  ;;  %6286 = vmatprep.subr.mxu1 %v12468_v46  ;;  %v12792_v32 = vld [vmem:[#allocation13_spill] sm:$0xff] }
 0x42f   :  { %2109 = vmatpush1.msra.mxu0 %v8863_v34  ;;  %6287 = vmatpush3.msra.mxu1 %v8866_v19  ;;  %v12793_v34 = vld [vmem:[#allocation14_spill] sm:$0xff]  ;;  %v12794_v19 = vld [vmem:[#allocation32_spill] sm:$0xff] }
 0x430   :  { %2110 = vmatprep.subr.mxu0 %v8869_v17  ;;  %6288 = vmatprep.subr.mxu1 %v12468_v46  ;;  %v12795_v17 = vld [vmem:[#allocation16_spill] sm:$0xff] }
 0x431   :  { %2111 = vmatpush1.msra.mxu0 %v8873_v0  ;;  %6289 = vmatpush3.msra.mxu1 %v8876_v57  ;;  %v12796_v0 = vld [vmem:[#allocation17_spill] sm:$0xff]  ;;  %v12797_v57 = vld [vmem:[#allocation35_spill] sm:$0xff] }
 0x432   :  { %2112 = vmatprep.subr.mxu0 %v8879_v22  ;;  %6290 = vmatprep.subr.mxu1 %v12468_v46  ;;  %v12798_v22 = vld [vmem:[#allocation19_spill] sm:$0xff] }
 0x433   :  { %2113 = vmatpush1.msra.mxu0 %v8883_v52  ;;  %6291 = vmatpush3.msra.mxu1 %v8886_v60  ;;  %v12799_v52 = vld [vmem:[#allocation20_spill] sm:$0xff]  ;;  %v12800_v60 = vld [vmem:[#allocation38_spill] sm:$0xff] }
 0x434   :  { %2114 = vmatprep.subr.mxu0 %v8889_v44  ;;  %6292 = vmatprep.subr.mxu1 %v12468_v46  ;;  %v12801_v44 = vld [vmem:[#allocation21_spill] sm:$0xff] }
 0x435   :  { %2115 = vmatpush1.msra.mxu0 %v8893_v51  ;;  %6293 = vmatpush3.msra.mxu1 %v8896_v62  ;;  %v12802_v51 = vld [vmem:[#allocation22_spill] sm:$0xff]  ;;  %v12803_v62 = vld [vmem:[#allocation41_spill] sm:$0xff] }
 0x436   :  { %2116 = vmatprep.subr.mxu0 %v8899_v58  ;;  %6294 = vmatprep.subr.mxu1 %v12468_v46  ;;  %v12804_v58 = vld [vmem:[#allocation24_spill] sm:$0xff] }
 0x437   :  { %2117 = vmatpush1.msra.mxu0 %v8903_v45  ;;  %6295 = vmatpush3.msra.mxu1 %v8906_v36  ;;  %v12805_v45 = vld [vmem:[#allocation25_spill] sm:$0xff]  ;;  %v12806_v36 = vld [vmem:[#allocation44_spill] sm:$0xff] }
 0x438   :  { %2118 = vmatprep.subr.mxu0 %v8909_v37  ;;  %6296 = vmatprep.subr.mxu1 %v12468_v46  ;;  %v12807_v37 = vld [vmem:[#allocation27_spill] sm:$0xff] }
 0x439   :  { %2119 = vmatpush1.msra.mxu0 %v8913_v38  ;;  %6297 = vmatpush3.msra.mxu1 %v8916_v40  ;;  %v12808_v38 = vld [vmem:[#allocation28_spill] sm:$0xff]  ;;  %v12809_v40 = vld [vmem:[#allocation47_spill] sm:$0xff] }
 0x43a   :  { %2120 = vmatprep.subr.mxu0 %v8919_v42  ;;  %6298 = vmatprep.subr.mxu1 %v12468_v46  ;;  %v12810_v42 = vld [vmem:[#allocation30_spill] sm:$0xff] }
 0x43b   :  { %2121 = vmatpush1.msra.mxu0 %v8923_v47  ;;  %6299 = vmatpush3.msra.mxu1 %v8926_v50  ;;  %v12811_v47 = vld [vmem:[#allocation31_spill] sm:$0xff]  ;;  %v12812_v50 = vld [vmem:[#allocation50_spill] sm:$0xff] }
 0x43c   :  { %2122 = vmatprep.subr.mxu0 %v8929_v1  ;;  %6300 = vmatprep.subr.mxu1 %v12468_v46  ;;  %v12813_v1 = vld [vmem:[#allocation33_spill] sm:$0xff] }
 0x43d   :  { %2123 = vmatpush1.msra.mxu0 %v8933_v39  ;;  %6301 = vmatpush3.msra.mxu1 %v12780_v63  ;;  %v12814_v39 = vld [vmem:[#allocation34_spill] sm:$0xff]  ;;  %v12818_v63 = vld [vmem:[#allocation52_spill] sm:$0xff] }
 0x43e   :  { %2124 = vmatprep.subr.mxu0 %v12781_v54  ;;  %6302 = vmatprep.subr.mxu1 %v12468_v46  ;;  %v12819_v54 = vld [vmem:[#allocation39_spill] sm:$0xff] }
 0x43f   :  { %2125 = vmatpush1.msra.mxu0 %v12782_v43  ;;  %6303 = vmatpush3.msra.mxu1 %v12783_v48  ;;  %v12820_v43 = vld [vmem:[#allocation40_spill] sm:$0xff]  ;;  %v12821_v48 = vld [vmem:[#allocation53_spill] sm:$0xff] }
 0x440   :  { %2126 = vmatprep.subr.mxu0 %v12784_v41  ;;  %6304 = vmatprep.subr.mxu1 %v12468_v46  ;;  %v12822_v41 = vld [vmem:[#allocation42_spill] sm:$0xff] }
 0x441   :  { %2127 = vmatpush1.msra.mxu0 %v12785_v56  ;;  %6305 = vmatpush3.msra.mxu1 %v12786_v59  ;;  %v12823_v56 = vld [vmem:[#allocation43_spill] sm:$0xff]  ;;  %v12824_v59 = vld [vmem:[#allocation54_spill] sm:$0xff] }
 0x442   :  { %2128 = vmatprep.subr.mxu0 %v12787_v61  ;;  %6306 = vmatprep.subr.mxu1 %v12468_v46  ;;  %v12825_v61 = vld [vmem:[#allocation45_spill] sm:$0xff] }
 0x443   :  { %2129 = vmatpush1.msra.mxu0 %v12788_v26  ;;  %6307 = vmatpush3.msra.mxu1 %v12789_v27  ;;  %v12826_v26 = vld [vmem:[#allocation46_spill] sm:$0xff]  ;;  %v12827_v27 = vld [vmem:[#allocation55_spill] sm:$0xff] }
 0x444   :  { %2130 = vmatprep.subr.mxu0 %v12790_v29  ;;  %6308 = vmatprep.subr.mxu1 %v12468_v46  ;;  %v12829_v29 = vld [vmem:[#allocation49_spill] sm:$0xff] }
 0x445   :  { %2131 = vmatpush1.msra.mxu0 %v12791_v30  ;;  %2164 = vmatprep.mubr.f32.mxu0 %v12468_v46  ;;  %v12830_v30 = vld [vmem:[#allocation56_spill] sm:$0xff] }
 0x446   :  { %6309 = vmatpush3.msra.mxu1 %v12792_v32  ;;  %2165 = vmatmul.mubr.f32.vlgmr.msra.gmra.mxu0 %v5271_v28  ;;  %v12831_v32 = vld [vmem:[#allocation57_spill] sm:$0xff] }
 0x447   :  { %6310 = vmatprep.mubr.msk.f32.mxu1 %vm7790_vm0, %v12468_v46  ;;  %2241 = vmatprep.subr.mxu0 %v12793_v34  ;;  %v12832_v34 = vld [vmem:[#allocation58_spill] sm:$0xff] }
 0x448   :  { %6313 = vmatprep.subr.mxu1 %v12468_v46  ;;  %6311 = vmatmul.mubr.f32.vlgmr.msra.gmra.mxu1 %v5271_v28  ;;  %v12828_v28 = vld [vmem:[#allocation48_spill] sm:$0xff] }
 0x449   :  { %2242 = vmatpush1.msra.mxu0 %v12794_v19  ;;  %6314 = vmatpush3.msra.mxu1 %v12795_v17  ;;  %v12833_v19 = vld [vmem:[#allocation59_spill] sm:$0xff]  ;;  %v12834_v17 = vld [vmem:[#allocation60_spill] sm:$0xff] }
 0x44a   :  { %2243 = vmatprep.subr.mxu0 %v12796_v0  ;;  %6315 = vmatprep.subr.mxu1 %v12468_v46  ;;  %v12835_v0 = vld [vmem:[#allocation61_spill] sm:$0xff] }
 0x44b   :  { %2244 = vmatpush1.msra.mxu0 %v12797_v57  ;;  %6316 = vmatpush3.msra.mxu1 %v12798_v22  ;;  %v12836_v57 = vld [vmem:[#allocation62_spill] sm:$0xff]  ;;  %v12837_v22 = vld [vmem:[#allocation63_spill] sm:$0xff] }
 0x44c   :  { %2245 = vmatprep.subr.mxu0 %v12799_v52  ;;  %6317 = vmatprep.subr.mxu1 %v12468_v46  ;;  %v12838_v52 = vld [vmem:[#allocation65_spill] sm:$0xff] }
 0x44d   :  { %2246 = vmatpush1.msra.mxu0 %v12800_v60  ;;  %6318 = vmatpush3.msra.mxu1 %v12801_v44  ;;  %v12839_v60 = vld [vmem:[#allocation64_spill] sm:$0xff]  ;;  %v12840_v44 = vld [vmem:[#allocation66_spill] sm:$0xff] }
 0x44e   :  { %2247 = vmatprep.subr.mxu0 %v12802_v51  ;;  %6319 = vmatprep.subr.mxu1 %v12468_v46  ;;  %v12841_v51 = vld [vmem:[#allocation67_spill] sm:$0xff] }
 0x44f   :  { %2248 = vmatpush1.msra.mxu0 %v12803_v62  ;;  %6320 = vmatpush3.msra.mxu1 %v12804_v58  ;;  %v12842_v62 = vld [vmem:[#allocation68_spill] sm:$0xff]  ;;  %v12843_v58 = vld [vmem:[#allocation69_spill] sm:$0xff] }
 0x450   :  { %2249 = vmatprep.subr.mxu0 %v12805_v45  ;;  %6321 = vmatprep.subr.mxu1 %v12468_v46  ;;  %v12844_v45 = vld [vmem:[#allocation70_spill] sm:$0xff] }
 0x451   :  { %2250 = vmatpush1.msra.mxu0 %v12806_v36  ;;  %6322 = vmatpush3.msra.mxu1 %v12807_v37  ;;  %v12845_v36 = vld [vmem:[#allocation71_spill] sm:$0xff]  ;;  %v12846_v37 = vld [vmem:[#allocation72_spill] sm:$0xff] }
 0x452   :  { %2251 = vmatprep.subr.mxu0 %v12808_v38  ;;  %6323 = vmatprep.subr.mxu1 %v12468_v46  ;;  %v12847_v38 = vld [vmem:[#allocation73_spill] sm:$0xff] }
 0x453   :  { %2252 = vmatpush1.msra.mxu0 %v12809_v40  ;;  %6324 = vmatpush3.msra.mxu1 %v12810_v42  ;;  %v12848_v40 = vld [vmem:[#allocation74_spill] sm:$0xff]  ;;  %v12849_v42 = vld [vmem:[#allocation75_spill] sm:$0xff] }
 0x454   :  { %2253 = vmatprep.subr.mxu0 %v12811_v47  ;;  %6325 = vmatprep.subr.mxu1 %v12468_v46  ;;  %v12850_v47 = vld [vmem:[#allocation76_spill] sm:$0xff] }
 0x455   :  { %2254 = vmatpush1.msra.mxu0 %v12812_v50  ;;  %6326 = vmatpush3.msra.mxu1 %v12813_v1  ;;  %v12851_v50 = vld [vmem:[#allocation77_spill] sm:$0xff]  ;;  %v12852_v1 = vld [vmem:[#allocation78_spill] sm:$0xff] }
 0x456   :  { %2255 = vmatprep.subr.mxu0 %v12814_v39  ;;  %6327 = vmatprep.subr.mxu1 %v12468_v46  ;;  %v12853_v39 = vld [vmem:[#allocation79_spill] sm:$0xff] }
 0x457   :  { %2256 = vmatpush1.msra.mxu0 %v12815_v7  ;;  %6328 = vmatpush3.msra.mxu1 %v12816_v6  ;;  %v12854_v7 = vld [vmem:[#allocation80_spill] sm:$0xff]  ;;  %v12855_v6 = vld [vmem:[#allocation81_spill] sm:$0xff] }
 0x458   :  { %2257 = vmatprep.subr.mxu0 %v12817_v12  ;;  %6329 = vmatprep.subr.mxu1 %v12468_v46  ;;  %v12856_v12 = vld [vmem:[#allocation82_spill] sm:$0xff] }
 0x459   :  { %2258 = vmatpush1.msra.mxu0 %v12818_v63  ;;  %6330 = vmatpush3.msra.mxu1 %v12819_v54  ;;  %v12857_v63 = vld [vmem:[#allocation83_spill] sm:$0xff]  ;;  %v12858_v54 = vld [vmem:[#allocation84_spill] sm:$0xff] }
 0x45a   :  { %2259 = vmatprep.subr.mxu0 %v12820_v43  ;;  %6331 = vmatprep.subr.mxu1 %v12468_v46  ;;  %v12859_v43 = vld [vmem:[#allocation85_spill] sm:$0xff] }
 0x45b   :  { %2260 = vmatpush1.msra.mxu0 %v12821_v48  ;;  %6332 = vmatpush3.msra.mxu1 %v12822_v41  ;;  %v12860_v48 = vld [vmem:[#allocation86_spill] sm:$0xff]  ;;  %v12861_v41 = vld [vmem:[#allocation87_spill] sm:$0xff] }
 0x45c   :  { %2261 = vmatprep.subr.mxu0 %v12823_v56  ;;  %6333 = vmatprep.subr.mxu1 %v12468_v46  ;;  %v12862_v56 = vld [vmem:[#allocation88_spill] sm:$0xff] }
 0x45d   :  { %2262 = vmatpush1.msra.mxu0 %v12824_v59  ;;  %6334 = vmatpush3.msra.mxu1 %v12825_v61  ;;  %v12863_v59 = vld [vmem:[#allocation89_spill] sm:$0xff]  ;;  %v12864_v61 = vld [vmem:[#allocation90_spill] sm:$0xff] }
 0x45e   :  { %2263 = vmatprep.subr.mxu0 %v12826_v26  ;;  %6335 = vmatprep.subr.mxu1 %v12468_v46  ;;  %v12865_v26 = vld [vmem:[#allocation91_spill] sm:$0xff] }
 0x45f   :  { %2264 = vmatpush1.msra.mxu0 %v12827_v27  ;;  %6336 = vmatpush3.msra.mxu1 %v12828_v28  ;;  %v12866_v27 = vld [vmem:[#allocation92_spill] sm:$0xff]  ;;  %v12867_v28 = vld [vmem:[#allocation93_spill] sm:$0xff] }
 0x460   :  { %2265 = vmatprep.subr.mxu0 %v12829_v29  ;;  %6337 = vmatprep.subr.mxu1 %v12468_v46  ;;  %v12868_v29 = vld [vmem:[#allocation94_spill] sm:$0xff] }
 0x461   :  { %2266 = vmatpush1.msra.mxu0 %v12830_v30  ;;  %6338 = vmatpush3.msra.mxu1 %v12831_v32  ;;  %v12869_v30 = vld [vmem:[#allocation95_spill] sm:$0xff]  ;;  %v12870_v32 = vld [vmem:[#allocation96_spill] sm:$0xff] }
 0x462   :  { %2267 = vmatprep.subr.mxu0 %v12832_v34  ;;  %6339 = vmatprep.subr.mxu1 %v12468_v46  ;;  %v12871_v34 = vld [vmem:[#allocation97_spill] sm:$0xff] }
 0x463   :  { %2268 = vmatpush1.msra.mxu0 %v12833_v19  ;;  %6340 = vmatpush3.msra.mxu1 %v12834_v17  ;;  %v12872_v19 = vld [vmem:[#allocation98_spill] sm:$0xff]  ;;  %v12873_v17 = vld [vmem:[#allocation99_spill] sm:$0xff] }
 0x464   :  { %2269 = vmatprep.subr.mxu0 %v12835_v0  ;;  %6341 = vmatprep.subr.mxu1 %v12468_v46  ;;  %v12874_v0 = vld [vmem:[#allocation100_spill] sm:$0xff] }
 0x465   :  { %2270 = vmatpush1.msra.mxu0 %v12836_v57  ;;  %6342 = vmatpush3.msra.mxu1 %v12837_v22  ;;  %v12875_v57 = vld [vmem:[#allocation101_spill] sm:$0xff]  ;;  %v12876_v22 = vld [vmem:[#allocation102_spill] sm:$0xff] }
 0x466   :  { %2271 = vmatprep.subr.mxu0 %v12838_v52  ;;  %6343 = vmatprep.subr.mxu1 %v12468_v46  ;;  %v12877_v52 = vld [vmem:[#allocation103_spill] sm:$0xff] }
 0x467   :  { %2272 = vmatpush1.msra.mxu0 %v12839_v60  ;;  %2305 = vmatprep.mubr.f32.mxu0 %v12468_v46  ;;  %v12878_v60 = vld [vmem:[#allocation104_spill] sm:$0xff] }
 0x468   :  { %6344 = vmatpush3.msra.mxu1 %v12840_v44  ;;  %6345 = vmatprep.mubr.msk.f32.mxu1 %vm7790_vm0, %v12468_v46  ;;  %v12879_v44 = vld [vmem:[#allocation105_spill] sm:$0xff] }
 0x469   :  { %2306 = vmatmul.mubr.f32.vlgmr.msra.gmra.mxu0 %v9333_v3  ;;  %6346 = vmatmul.mubr.f32.vlgmr.msra.gmra.mxu1 %v9333_v3 }
 0x46a   :  { %2404 = vmatprep.subr.mxu0 %v12841_v51  ;;  %6348 = vmatprep.subr.mxu1 %v12468_v46  ;;  %v12880_v51 = vld [vmem:[#allocation106_spill] sm:$0xff] }
 0x46b   :  { %2405 = vmatpush1.msra.mxu0 %v12842_v62  ;;  %6349 = vmatpush3.msra.mxu1 %v12843_v58  ;;  %v12881_v62 = vld [vmem:[#allocation107_spill] sm:$0xff]  ;;  %v12882_v58 = vld [vmem:[#allocation108_spill] sm:$0xff] }
 0x46c   :  { %2406 = vmatprep.subr.mxu0 %v12844_v45  ;;  %6350 = vmatprep.subr.mxu1 %v12468_v46  ;;  %v12883_v45 = vld [vmem:[#allocation109_spill] sm:$0xff] }
 0x46d   :  { %2407 = vmatpush1.msra.mxu0 %v12845_v36  ;;  %6351 = vmatpush3.msra.mxu1 %v12846_v37  ;;  %v12884_v36 = vld [vmem:[#allocation110_spill] sm:$0xff]  ;;  %v12885_v37 = vld [vmem:[#allocation111_spill] sm:$0xff] }
 0x46e   :  { %2408 = vmatprep.subr.mxu0 %v12847_v38  ;;  %6352 = vmatprep.subr.mxu1 %v12468_v46  ;;  %v12886_v38 = vld [vmem:[#allocation112_spill] sm:$0xff] }
 0x46f   :  { %2409 = vmatpush1.msra.mxu0 %v12848_v40  ;;  %6353 = vmatpush3.msra.mxu1 %v12849_v42  ;;  %v12887_v40 = vld [vmem:[#allocation113_spill] sm:$0xff]  ;;  %v12888_v42 = vld [vmem:[#allocation114_spill] sm:$0xff] }
 0x470   :  { %2410 = vmatprep.subr.mxu0 %v12850_v47  ;;  %6354 = vmatprep.subr.mxu1 %v12468_v46  ;;  %v12889_v47 = vld [vmem:[#allocation115_spill] sm:$0xff] }
 0x471   :  { %2411 = vmatpush1.msra.mxu0 %v12851_v50  ;;  %6355 = vmatpush3.msra.mxu1 %v12852_v1 }
 0x472   :  { %2412 = vmatprep.subr.mxu0 %v12853_v39  ;;  %6356 = vmatprep.subr.mxu1 %v12468_v46 }
 0x473   :  { %2413 = vmatpush1.msra.mxu0 %v12854_v7  ;;  %6357 = vmatpush3.msra.mxu1 %v12855_v6  ;;  %v12890_v6 = vld [vmem:[#allocation15_spill] sm:$0xff] }
 0x474   :  { %2414 = vmatprep.subr.mxu0 %v12856_v12  ;;  %6358 = vmatprep.subr.mxu1 %v12468_v46 }
 0x475   :  { %2415 = vmatpush1.msra.mxu0 %v12857_v63  ;;  %6359 = vmatpush3.msra.mxu1 %v12858_v54 }
 0x476   :  { %2416 = vmatprep.subr.mxu0 %v12859_v43  ;;  %6360 = vmatprep.subr.mxu1 %v12468_v46 }
 0x477   :  { %2417 = vmatpush1.msra.mxu0 %v12860_v48  ;;  %6361 = vmatpush3.msra.mxu1 %v12861_v41 }
 0x478   :  { %2418 = vmatprep.subr.mxu0 %v12862_v56  ;;  %6362 = vmatprep.subr.mxu1 %v12468_v46 }
 0x479   :  { %2419 = vmatpush1.msra.mxu0 %v12863_v59  ;;  %6363 = vmatpush3.msra.mxu1 %v12864_v61  ;;  %v9714_v61 = vld [vmem:[%s11792_s2 + $0x7] ss:$0 sm:$0xff] }
 0x47a   :  { %2420 = vmatprep.subr.mxu0 %v12865_v26  ;;  %6364 = vmatprep.subr.mxu1 %v12468_v46 }
 0x47b   :  { %2421 = vmatpush1.msra.mxu0 %v12866_v27  ;;  %6365 = vmatpush3.msra.mxu1 %v12867_v28 }
 0x47c   :  { %2422 = vmatprep.subr.mxu0 %v12868_v29  ;;  %6366 = vmatprep.subr.mxu1 %v12468_v46 }
 0x47d   :  { %2423 = vmatpush1.msra.mxu0 %v12869_v30  ;;  %6367 = vmatpush3.msra.mxu1 %v12870_v32 }
 0x47e   :  { %2424 = vmatprep.subr.mxu0 %v12871_v34  ;;  %6368 = vmatprep.subr.mxu1 %v12468_v46 }
 0x47f   :  { %2425 = vmatpush1.msra.mxu0 %v12872_v19  ;;  %6369 = vmatpush3.msra.mxu1 %v12873_v17 }
 0x480   :  { %2426 = vmatprep.subr.mxu0 %v12874_v0  ;;  %6370 = vmatprep.subr.mxu1 %v12468_v46 }
 0x481   :  { %2427 = vmatpush1.msra.mxu0 %v12875_v57  ;;  %6371 = vmatpush3.msra.mxu1 %v12876_v22 }
 0x482   :  { %2428 = vmatprep.subr.mxu0 %v12877_v52  ;;  %6372 = vmatprep.subr.mxu1 %v12468_v46 }
 0x483   :  { %2429 = vmatpush1.msra.mxu0 %v12878_v60  ;;  %6373 = vmatpush3.msra.mxu1 %v12879_v44 }
 0x484   :  { %2430 = vmatprep.subr.mxu0 %v12880_v51  ;;  %6374 = vmatprep.subr.mxu1 %v12468_v46 }
 0x485   :  { %2431 = vmatpush1.msra.mxu0 %v12881_v62  ;;  %6375 = vmatpush3.msra.mxu1 %v12882_v58 }
 0x486   :  { %2432 = vmatprep.subr.mxu0 %v12883_v45  ;;  %6376 = vmatprep.subr.mxu1 %v12468_v46 }
 0x487   :  { %2433 = vmatpush1.msra.mxu0 %v12884_v36  ;;  %6377 = vmatpush3.msra.mxu1 %v12885_v37 }
 0x488   :  { %2434 = vmatprep.subr.mxu0 %v12886_v38  ;;  %6378 = vmatprep.subr.mxu1 %v12468_v46 }
 0x489   :  { %2435 = vmatpush1.msra.mxu0 %v12887_v40  ;;  %6379 = vmatpush3.msra.mxu1 %v12888_v42 }
 0x48a   :  { %2468 = vmatprep.mubr.f32.mxu0 %v12468_v46  ;;  %6380 = vmatprep.mubr.msk.f32.mxu1 %vm7790_vm0, %v12468_v46 }
 0x48b   :  { %2545 = vmatprep.subr.mxu0 %v12889_v47  ;;  %6383 = vmatprep.subr.mxu1 %v12468_v46 }
 0x4c4   :  { %v1931_v50 = vpop.f32.mrf.mxu1  ;;  %v1860_v39 = vpop.f32.mrf.mxu0 }
 0x4c5   :  { %v1861_v12 = vadd.f32 %v1860_v39, %v12890_v6  ;;  %v1932_v28 = vadd.f32 %v1931_v50, %v8729_v33 }
 0x4c6   :  { %v6242_v1 = vpop.f32.mrf.mxu1  ;;  %v1862_v7 = vpop.f32.mrf.mxu0 }
 0x4e5   :  { %v2001_v63 = vpop.f32.mrf.mxu0  ;;  %v2072_v54 = vpop.f32.mrf.mxu1 }
 0x4e6   :  { %v2076_v43 = vadd.f32 %v2001_v63, %v1861_v12  ;;  %v2090_v26 = vadd.f32 %v9714_v61, %v2072_v54  ;;  %v1863_v12 = vadd.f32 %v1862_v7, %v8739_v18  ;;  %v12901_v7 = vld [vmem:[#allocation126_spill] sm:$0xff] }
 0x4e7   :  { %v6277_v48 = vpop.f32.mrf.mxu1  ;;  %v2003_v19 = vpop.f32.mrf.mxu0 }
 0x4e8   :  { %v5269_v41 = vmul.f32 -1.442695, %v2076_v43  ;;  %v2083_v54 = vadd.f32 %v2003_v19, %v1863_v12  ;;  %v12907_v19 = vld [vmem:[#allocation132_spill] sm:$0xff]  ;;  %v9825_v12 = vld [vmem:[#allocation2 + $0x548] sm:$0xff] }
 0x4ea   :  { %7068 = vpow2.f32 %v5269_v41  ;;  %v5270_v43 = vmul.f32 -1.442695, %v2083_v54  ;;  %v9831_v54 = vld [vmem:[#allocation2 + $0x4e8] sm:$0xff] }
 0x4f7   :  { %v7069_v56 = vpop.eup %7068 }
 0x4f8   :  { %v2080_v59 = vadd.f32 1.0, %v7069_v56 }
 0x4fa   :  { %7070 = vrcp.f32 %v2080_v59 }
 0x506   :  { %v2166_v17 = vpop.f32.mrf.mxu0 }
 0x507   :  { %v7071_v27 = vpop.eup %7070  ;;  %v2167_v57 = vadd.f32 %v2166_v17, %v12605_v53  ;;  %v12908_v17 = vld [vmem:[#allocation133_spill] sm:$0xff] }
 0x508   :  { %v2091_v29 = vmul.f32 %v7071_v27, %v2090_v26  ;;  %v2237_v30 = vpop.f32.mrf.mxu1  ;;  %v2168_v0 = vpop.f32.mrf.mxu0 }
 0x509   :  { %v2169_v58 = vadd.f32 %v2168_v0, %v12606_v8  ;;  %v2238_v1 = vadd.f32 %v2237_v30, %v8337_v49  ;;  %v12904_v30 = vld [vmem:[#allocation129_spill] sm:$0xff]  ;;  %v12909_v0 = vld [vmem:[#allocation134_spill] sm:$0xff] }
 0x50a   :  { %v9718_v32 = vadd.f32 %v2091_v29, %v1932_v28  ;;  %v6312_v34 = vpop.f32.mrf.mxu1  ;;  %v12902_v28 = vld [vmem:[#allocation127_spill] sm:$0xff]  ;;  %v12903_v29 = vld [vmem:[#allocation128_spill] sm:$0xff] }
 0x50b   :  { %v12906_v34 = vld [vmem:[#allocation131_spill] sm:$0xff] }
 0x529   :  { %v2307_v22 = vpop.f32.mrf.mxu0  ;;  %v2378_v52 = vpop.f32.mrf.mxu1 }
 0x52a   :  { %v2382_v60 = vadd.f32 %v2307_v22, %v2167_v57  ;;  %v2396_v47 = vadd.f32 %v9327_v21, %v2378_v52  ;;  %v12910_v57 = vld [vmem:[#allocation135_spill] sm:$0xff]  ;;  %v12911_v22 = vld [vmem:[#allocation136_spill] sm:$0xff]  ;;  %v12912_v52 = vld [vmem:[#allocation137_spill] sm:$0xff] }
 0x52b   :  { %v6347_v44 = vpop.f32.mrf.mxu1  ;;  %v2309_v62 = vpop.f32.mrf.mxu0 }
 0x52c   :  { %v5272_v51 = vmul.f32 -1.442695, %v2382_v60  ;;  %v2389_v45 = vadd.f32 %v2309_v62, %v2169_v58  ;;  %v12913_v44 = vld [vmem:[#allocation138_spill] sm:$0xff]  ;;  %v12915_v62 = vld [vmem:[#allocation140_spill] sm:$0xff] }
 0x52e   :  { %7072 = vpow2.f32 %v5272_v51  ;;  %v5273_v36 = vmul.f32 -1.442695, %v2389_v45  ;;  %v12914_v51 = vld [vmem:[#allocation139_spill] sm:$0xff]  ;;  %v12916_v45 = vld [vmem:[#allocation141_spill] sm:$0xff] }
 0x530   :  { %7074 = vpow2.f32 %v5273_v36  ;;  %v12917_v36 = vld [vmem:[#allocation142_spill] sm:$0xff] }
 0x53b   :  { %v7073_v37 = vpop.eup %7072 }
 0x53c   :  { %v2386_v38 = vadd.f32 1.0, %v7073_v37  ;;  %v12918_v37 = vld [vmem:[#allocation143_spill] sm:$0xff] }
 0x53d   :  { %v7075_v40 = vpop.eup %7074 }
 0x53e   :  { %7076 = vrcp.f32 %v2386_v38  ;;  %v2393_v42 = vadd.f32 1.0, %v7075_v40  ;;  %v12919_v40 = vld [vmem:[#allocation144_spill] sm:$0xff] }
 0x540   :  { %7078 = vrcp.f32 %v2393_v42  ;;  %v12920_v42 = vld [vmem:[#allocation145_spill] sm:$0xff] }
 0x54b   :  { %v7077_v50 = vpop.eup %7076 }
 0x54c   :  { %v2397_v39 = vmul.f32 %v7077_v50, %v2396_v47  ;;  %v12921_v50 = vld [vmem:[#allocation146_spill] sm:$0xff] }
 0x54d   :  { %v7079_v48 = vpop.eup %7078 }
 0x54e   :  { %v2398_v63 = vadd.f32 %v2397_v39, %v2238_v1  ;;  %v2400_v41 = vsub.f32 1.0, %v7079_v48  ;;  %v2402_v26 = vmul.f32 %v7079_v48, %v9333_v3  ;;  %v9821_v39 = vld [vmem:[#allocation2 + $0x550] sm:$0xff] }
 0x54f   :  { %v9838_v48 = vld [vmem:[#allocation2 + $0x4f0] sm:$0xff] }
 0x550   :  { %7080 = vtanh.f32 %v2398_v63  ;;  %v9828_v63 = vld [vmem:[#allocation2 + $0x558] sm:$0xff] }
 0x551   :  { %7082 = vpow2.f32 %v5270_v43  ;;  %v9835_v43 = vld [vmem:[#allocation2 + $0x4e0] sm:$0xff] }
 0x55d   :  { %v7081_v56 = vpop.eup %7080 }
 0x55e   :  { %v2401_v59 = vmul.f32 %v7081_v56, %v2400_v41  ;;  %v7083_v21 = vpop.eup %7082  ;;  %v9841_v41 = vld [vmem:[#allocation2 + $0x480] sm:$0xff]  ;;  %v9845_v56 = vld [vmem:[#allocation2 + $0x478] sm:$0xff] }
 0x55f   :  { %v2087_v3 = vadd.f32 1.0, %v7083_v21  ;;  %v9855_v21 = vld [vmem:[#allocation2 + $0x410] sm:$0xff] }
 0x560   :  { %v9726_v27 = vadd.f32 %v2402_v26, %v2401_v59  ;;  %v9848_v59 = vld [vmem:[#allocation2 + $0x488] sm:$0xff]  ;;  %v9851_v26 = vld [vmem:[#allocation2 + $0x418] sm:$0xff] }
 0x561   :  { %7084 = vrcp.f32 %v2087_v3  ;;  %v9858_v3 = vld [vmem:[#allocation2 + $0x420] sm:$0xff] }
 0x562   :  { %2469 = vmatmul.mubr.f32.vlgmr.msra.gmra.mxu0 %v9726_v27  ;;  %6381 = vmatmul.mubr.f32.vlgmr.msra.gmra.mxu1 %v9726_v27  ;;  %7086 = vtanh.f32 %v9718_v32  ;;  %v12905_v32 = vld [vmem:[#allocation130_spill] sm:$0xff] }
 0x563   :  { %2546 = vmatpush1.msra.mxu0 %v9337_v25  ;;  %6384 = vmatpush3.msra.mxu1 %v9340_v16  ;;  %v12891_v25 = vld [vmem:[#allocation116_spill] sm:$0xff]  ;;  %v12892_v16 = vld [vmem:[#allocation117_spill] sm:$0xff] }
 0x564   :  { %2547 = vmatprep.subr.mxu0 %v9343_v11  ;;  %6385 = vmatprep.subr.mxu1 %v12468_v46  ;;  %v12893_v11 = vld [vmem:[#allocation118_spill] sm:$0xff] }
 0x565   :  { %2548 = vmatpush1.msra.mxu0 %v9347_v35  ;;  %6386 = vmatpush3.msra.mxu1 %v9350_v20  ;;  %v12894_v35 = vld [vmem:[#allocation119_spill] sm:$0xff]  ;;  %v12895_v20 = vld [vmem:[#allocation120_spill] sm:$0xff] }
 0x566   :  { %2549 = vmatprep.subr.mxu0 %v9353_v13  ;;  %6387 = vmatprep.subr.mxu1 %v12468_v46  ;;  %v12896_v13 = vld [vmem:[#allocation121_spill] sm:$0xff] }
 0x567   :  { %2550 = vmatpush1.msra.mxu0 %v9357_v15  ;;  %6388 = vmatpush3.msra.mxu1 %v9360_v2  ;;  %v12897_v15 = vld [vmem:[#allocation122_spill] sm:$0xff]  ;;  %v12898_v2 = vld [vmem:[#allocation123_spill] sm:$0xff] }
 0x568   :  { %2551 = vmatprep.subr.mxu0 %v9363_v23  ;;  %6389 = vmatprep.subr.mxu1 %v12468_v46  ;;  %v12899_v23 = vld [vmem:[#allocation124_spill] sm:$0xff] }
 0x569   :  { %2552 = vmatpush1.msra.mxu0 %v9367_v10  ;;  %6390 = vmatpush3.msra.mxu1 %v12891_v25  ;;  %v12900_v10 = vld [vmem:[#allocation125_spill] sm:$0xff]  ;;  %v9861_v25 = vld [vmem:[#allocation2 + $0x3b0] sm:$0xff] }
 0x56a   :  { %2553 = vmatprep.subr.mxu0 %v12892_v16  ;;  %6391 = vmatprep.subr.mxu1 %v12468_v46  ;;  %v9865_v16 = vld [vmem:[#allocation2 + $0x3a8] sm:$0xff] }
 0x56b   :  { %2554 = vmatpush1.msra.mxu0 %v12893_v11  ;;  %6392 = vmatpush3.msra.mxu1 %v12894_v35  ;;  %v9868_v11 = vld [vmem:[#allocation2 + $0x3b8] sm:$0xff]  ;;  %v9871_v35 = vld [vmem:[#allocation2 + $0x348] sm:$0xff] }
 0x56c   :  { %2555 = vmatprep.subr.mxu0 %v12895_v20  ;;  %6393 = vmatprep.subr.mxu1 %v12468_v46  ;;  %v9875_v20 = vld [vmem:[#allocation2 + $0x340] sm:$0xff] }
 0x56d   :  { %2556 = vmatpush1.msra.mxu0 %v12896_v13  ;;  %6394 = vmatpush3.msra.mxu1 %v12897_v15  ;;  %v9878_v13 = vld [vmem:[#allocation2 + $0x350] sm:$0xff]  ;;  %v9881_v15 = vld [vmem:[#allocation2 + $0x2e0] sm:$0xff] }
 0x56e   :  { %2557 = vmatprep.subr.mxu0 %v12898_v2  ;;  %6395 = vmatprep.subr.mxu1 %v12468_v46  ;;  %v7085_v60 = vpop.eup %7084  ;;  %v9885_v2 = vld [vmem:[#allocation2 + $0x2d8] sm:$0xff] }
 0x56f   :  { %2558 = vmatpush1.msra.mxu0 %v12899_v23  ;;  %6396 = vmatpush3.msra.mxu1 %v12900_v10  ;;  %v7087_v58 = vpop.eup %7086  ;;  %v2094_v38 = vsub.f32 1.0, %v7085_v60  ;;  %v2096_v1 = vmul.f32 %v7085_v60, %v9493_v4  ;;  %v9818_v4 = vld [vmem:[#allocation2 + $0x5c0] sm:$0xff]  ;;  %v9888_v23 = vld [vmem:[#allocation2 + $0x2e8] sm:$0xff]  ;;  %v9891_v10 = vld [vmem:[#allocation2 + $0x278] sm:$0xff] }
 0x570   :  { %2559 = vmatprep.subr.mxu0 %v12901_v7  ;;  %6397 = vmatprep.subr.mxu1 %v12468_v46  ;;  %v9895_v7 = vld [vmem:[#allocation2 + $0x270] sm:$0xff] }
 0x571   :  { %2560 = vmatpush1.msra.mxu0 %v12902_v28  ;;  %6398 = vmatpush3.msra.mxu1 %v12903_v29  ;;  %v2095_v47 = vmul.f32 %v7087_v58, %v2094_v38  ;;  %v9898_v28 = vld [vmem:[#allocation2 + $0x280] sm:$0xff]  ;;  %v9901_v29 = vld [vmem:[#allocation2 + $0x210] sm:$0xff]  ;;  %v9948_v58 = vld [vmem:[#allocation2 + $0x78] sm:$0xff] }
 0x572   :  { %2561 = vmatprep.subr.mxu0 %v12904_v30  ;;  %6399 = vmatprep.subr.mxu1 %v12468_v46  ;;  %v9905_v30 = vld [vmem:[#allocation2 + $0x208] sm:$0xff]  ;;  %v9935_v60 = vld [vmem:[#allocation2 + $0xd0] sm:$0xff]  ;;  %12931 = vst [vmem:[#allocation11_spill] sm:$0xff] %v9948_v58 }
 0x573   :  { %2562 = vmatpush1.msra.mxu0 %v12905_v32  ;;  %6400 = vmatpush3.msra.mxu1 %v12906_v34  ;;  %v9908_v32 = vld [vmem:[#allocation2 + $0x218] sm:$0xff]  ;;  %v9911_v34 = vld [vmem:[#allocation2 + $0x1a8] sm:$0xff]  ;;  %12927 = vst [vmem:[#allocation23_spill] sm:$0xff] %v9935_v60  ;;  %v9962_v38 = vld [vmem:[#allocation2 + $0x10] sm:$0xff] }
 0x574   :  { %2563 = vmatprep.subr.mxu0 %v12907_v19  ;;  %6401 = vmatprep.subr.mxu1 %v12468_v46  ;;  %v9915_v19 = vld [vmem:[#allocation2 + $0x1a0] sm:$0xff]  ;;  %12934 = vst [vmem:[#allocation13_spill] sm:$0xff] %v9962_v38 }
 0x575   :  { %2564 = vmatpush1.msra.mxu0 %v12908_v17  ;;  %6402 = vmatpush3.msra.mxu1 %v12909_v0  ;;  %v9918_v17 = vld [vmem:[#allocation2 + $0x1b0] sm:$0xff]  ;;  %v9921_v0 = vld [vmem:[#allocation2 + $0x140] sm:$0xff] }
 0x576   :  { %2565 = vmatprep.subr.mxu0 %v12910_v57  ;;  %6403 = vmatprep.subr.mxu1 %v12468_v46  ;;  %12922 = vst [vmem:[#allocation5_spill] sm:$0xff] %v9918_v17  ;;  %12923 = vst [vmem:[#allocation6_spill] sm:$0xff] %v9921_v0  ;;  %v9925_v57 = vld [vmem:[#allocation2 + $0x138] sm:$0xff] }
 0x577   :  { %2566 = vmatpush1.msra.mxu0 %v12911_v22  ;;  %6404 = vmatpush3.msra.mxu1 %v12912_v52  ;;  %12924 = vst [vmem:[#allocation18_spill] sm:$0xff] %v9925_v57  ;;  %v9928_v22 = vld [vmem:[#allocation2 + $0x148] sm:$0xff]  ;;  %v9931_v52 = vld [vmem:[#allocation2 + $0xd8] sm:$0xff] }
 0x578   :  { %2567 = vmatprep.subr.mxu0 %v12913_v44  ;;  %6405 = vmatprep.subr.mxu1 %v12468_v46  ;;  %12925 = vst [vmem:[#allocation7_spill] sm:$0xff] %v9928_v22  ;;  %12926 = vst [vmem:[#allocation8_spill] sm:$0xff] %v9931_v52  ;;  %v9938_v44 = vld [vmem:[#allocation2 + $0xe0] sm:$0xff] }
 0x579   :  { %2568 = vmatpush1.msra.mxu0 %v12914_v51  ;;  %6406 = vmatpush3.msra.mxu1 %v12915_v62  ;;  %12928 = vst [vmem:[#allocation9_spill] sm:$0xff] %v9938_v44  ;;  %v9941_v51 = vld [vmem:[#allocation2 + $0x70] sm:$0xff]  ;;  %v9945_v62 = vld [vmem:[#allocation2 + $0x68] sm:$0xff] }
 0x57a   :  { %2569 = vmatprep.subr.mxu0 %v12916_v45  ;;  %6407 = vmatprep.subr.mxu1 %v12468_v46  ;;  %12929 = vst [vmem:[#allocation10_spill] sm:$0xff] %v9941_v51  ;;  %12930 = vst [vmem:[#allocation26_spill] sm:$0xff] %v9945_v62  ;;  %v5276_v45 = vld [vmem:[%s11790_s0 + $0x20] sm:$0xff] }
 0x57b   :  { %2570 = vmatpush1.msra.mxu0 %v12917_v36  ;;  %6408 = vmatpush3.msra.mxu1 %v12918_v37  ;;  %v9954_v36 = vld [vmem:[#allocation2 + $0x8] sm:$0xff]  ;;  %v9958_v37 = vld [vmem:[#allocation2] sm:$0xff] }
 0x57c   :  { %2571 = vmatprep.subr.mxu0 %v12919_v40  ;;  %6409 = vmatprep.subr.mxu1 %v12468_v46  ;;  %12932 = vst [vmem:[#allocation12_spill] sm:$0xff] %v9954_v36  ;;  %12933 = vst [vmem:[#allocation29_spill] sm:$0xff] %v9958_v37  ;;  %v9967_v40 = vld [vmem:[#allocation2 + $0x638] sm:$0xff] }
 0x57d   :  { %2572 = vmatpush1.msra.mxu0 %v12920_v42  ;;  %6410 = vmatpush3.msra.mxu1 %v9471_v14  ;;  %v9794_v14 = vadd.f32 %v2096_v1, %v2095_v47  ;;  %12935 = vst [vmem:[#allocation14_spill] sm:$0xff] %v9967_v40  ;;  %v9971_v42 = vld [vmem:[#allocation2 + $0x630] sm:$0xff]  ;;  %v9974_v47 = vld [vmem:[#allocation2 + $0x640] sm:$0xff]  ;;  %v9981_v1 = vld [vmem:[#allocation2 + $0x5c8] sm:$0xff] }
 0x57e   :  { %2573 = vmatprep.subr.mxu0 %v9474_v55  ;;  %6411 = vmatprep.subr.mxu1 %v12468_v46  ;;  %v9801_v55 = vld [vmem:[#allocation2 + $0x620] sm:$0xff]  ;;  %12936 = vst [vmem:[#allocation32_spill] sm:$0xff] %v9971_v42  ;;  %12937 = vst [vmem:[#allocation16_spill] sm:$0xff] %v9974_v47 }
 0x57f   :  { %2574 = vmatpush1.msra.mxu0 %v12921_v50  ;;  %6412 = vmatpush3.msra.mxu1 %v9481_v31  ;;  %v9808_v31 = vld [vmem:[#allocation2 + $0x628] sm:$0xff]  ;;  %v9977_v50 = vld [vmem:[#allocation2 + $0x5d0] sm:$0xff]  ;;  %12939 = vst [vmem:[#allocation35_spill] sm:$0xff] %v9981_v1 }
 0x580   :  { %2575 = vmatprep.subr.mxu0 %v9485_v9  ;;  %6413 = vmatprep.subr.mxu1 %v12468_v46  ;;  %v9805_v9 = vld [vmem:[#allocation2 + $0x618] sm:$0xff]  ;;  %12938 = vst [vmem:[#allocation17_spill] sm:$0xff] %v9977_v50 }
 0x581   :  { %2576 = vmatpush1.msra.mxu0 %v9489_v5  ;;  %2609 = vmatprep.mubr.f32.mxu0 %v12468_v46  ;;  %v9815_v5 = vld [vmem:[#allocation2 + $0x5b0] sm:$0xff] }
 0x582   :  { %6414 = vmatpush3.msra.mxu1 %v9495_v24  ;;  %6415 = vmatprep.mubr.msk.f32.mxu1 %vm7790_vm0, %v12468_v46  ;;  %v9811_v24 = vld [vmem:[#allocation2 + $0x5b8] sm:$0xff] }
 0x583   :  { %2610 = vmatmul.mubr.f32.vlgmr.msra.gmra.mxu0 %v9794_v14  ;;  %6416 = vmatmul.mubr.f32.vlgmr.msra.gmra.mxu1 %v9794_v14 }
 0x584   :  { %2710 = vmatprep.subr.mxu0 %v9801_v55  ;;  %6418 = vmatprep.subr.mxu1 %v12468_v46 }
 0x585   :  { %2711 = vmatpush1.msra.mxu0 %v9805_v9  ;;  %6419 = vmatpush3.msra.mxu1 %v9808_v31 }
 0x586   :  { %2712 = vmatprep.subr.mxu0 %v9811_v24  ;;  %6420 = vmatprep.subr.mxu1 %v12468_v46 }
 0x587   :  { %2713 = vmatpush1.msra.mxu0 %v9815_v5  ;;  %6421 = vmatpush3.msra.mxu1 %v9818_v4 }
 0x588   :  { %2714 = vmatprep.subr.mxu0 %v9821_v39  ;;  %6422 = vmatprep.subr.mxu1 %v12468_v46 }
 0x589   :  { %2715 = vmatpush1.msra.mxu0 %v9825_v12  ;;  %6423 = vmatpush3.msra.mxu1 %v9828_v63 }
 0x58a   :  { %2716 = vmatprep.subr.mxu0 %v9831_v54  ;;  %6424 = vmatprep.subr.mxu1 %v12468_v46 }
 0x58b   :  { %2717 = vmatpush1.msra.mxu0 %v9835_v43  ;;  %6425 = vmatpush3.msra.mxu1 %v9838_v48 }
 0x58c   :  { %2718 = vmatprep.subr.mxu0 %v9841_v41  ;;  %6426 = vmatprep.subr.mxu1 %v12468_v46 }
 0x58d   :  { %2719 = vmatpush1.msra.mxu0 %v9845_v56  ;;  %6427 = vmatpush3.msra.mxu1 %v9848_v59 }
 0x58e   :  { %2720 = vmatprep.subr.mxu0 %v9851_v26  ;;  %6428 = vmatprep.subr.mxu1 %v12468_v46 }
 0x58f   :  { %2721 = vmatpush1.msra.mxu0 %v9855_v21  ;;  %6429 = vmatpush3.msra.mxu1 %v9858_v3 }
 0x590   :  { %2722 = vmatprep.subr.mxu0 %v9861_v25  ;;  %6430 = vmatprep.subr.mxu1 %v12468_v46 }
 0x591   :  { %2723 = vmatpush1.msra.mxu0 %v9865_v16  ;;  %6431 = vmatpush3.msra.mxu1 %v9868_v11 }
 0x592   :  { %2724 = vmatprep.subr.mxu0 %v9871_v35  ;;  %6432 = vmatprep.subr.mxu1 %v12468_v46 }
 0x593   :  { %2725 = vmatpush1.msra.mxu0 %v9875_v20  ;;  %6433 = vmatpush3.msra.mxu1 %v9878_v13 }
 0x594   :  { %2726 = vmatprep.subr.mxu0 %v9881_v15  ;;  %6434 = vmatprep.subr.mxu1 %v12468_v46 }
 0x595   :  { %2727 = vmatpush1.msra.mxu0 %v9885_v2  ;;  %6435 = vmatpush3.msra.mxu1 %v9888_v23 }
 0x596   :  { %2728 = vmatprep.subr.mxu0 %v9891_v10  ;;  %6436 = vmatprep.subr.mxu1 %v12468_v46 }
 0x597   :  { %2729 = vmatpush1.msra.mxu0 %v9895_v7  ;;  %6437 = vmatpush3.msra.mxu1 %v9898_v28 }
 0x598   :  { %2730 = vmatprep.subr.mxu0 %v9901_v29  ;;  %6438 = vmatprep.subr.mxu1 %v12468_v46 }
 0x599   :  { %2731 = vmatpush1.msra.mxu0 %v9905_v30  ;;  %6439 = vmatpush3.msra.mxu1 %v9908_v32 }
 0x59a   :  { %2732 = vmatprep.subr.mxu0 %v9911_v34  ;;  %6440 = vmatprep.subr.mxu1 %v12468_v46 }
 0x59b   :  { %2733 = vmatpush1.msra.mxu0 %v9915_v19  ;;  %6441 = vmatpush3.msra.mxu1 %v9918_v17 }
 0x59c   :  { %2734 = vmatprep.subr.mxu0 %v9921_v0  ;;  %6442 = vmatprep.subr.mxu1 %v12468_v46 }
 0x59d   :  { %2735 = vmatpush1.msra.mxu0 %v9925_v57  ;;  %6443 = vmatpush3.msra.mxu1 %v9928_v22 }
 0x59e   :  { %2736 = vmatprep.subr.mxu0 %v9931_v52  ;;  %6444 = vmatprep.subr.mxu1 %v12468_v46 }
 0x59f   :  { %2737 = vmatpush1.msra.mxu0 %v9935_v60  ;;  %6445 = vmatpush3.msra.mxu1 %v9938_v44 }
 0x5a0   :  { %2738 = vmatprep.subr.mxu0 %v9941_v51  ;;  %6446 = vmatprep.subr.mxu1 %v12468_v46 }
 0x5a1   :  { %2739 = vmatpush1.msra.mxu0 %v9945_v62  ;;  %6447 = vmatpush3.msra.mxu1 %v9948_v58 }
 0x5a2   :  { %2740 = vmatprep.subr.mxu0 %v9954_v36  ;;  %6448 = vmatprep.subr.mxu1 %v12468_v46 }
 0x5a3   :  { %2741 = vmatpush1.msra.mxu0 %v9958_v37  ;;  %2774 = vmatprep.mubr.f32.mxu0 %v12468_v46 }
 0x5a4   :  { %6449 = vmatpush3.msra.mxu1 %v9962_v38  ;;  %2775 = vmatmul.mubr.f32.vlgmr.msra.gmra.mxu0 %v5276_v45 }
 0x5a5   :  { %6450 = vmatprep.mubr.msk.f32.mxu1 %vm7790_vm0, %v12468_v46  ;;  %2851 = vmatprep.subr.mxu0 %v9967_v40  ;;  %v9984_v40 = vld [vmem:[#allocation2 + $0x5d8] sm:$0xff] }
 0x5a6   :  { %6453 = vmatprep.subr.mxu1 %v12468_v46  ;;  %6451 = vmatmul.mubr.f32.vlgmr.msra.gmra.mxu1 %v5276_v45  ;;  %12940 = vst [vmem:[#allocation19_spill] sm:$0xff] %v9984_v40  ;;  %v9987_v45 = vld [vmem:[#allocation2 + $0x568] sm:$0xff] }
 0x5a7   :  { %2852 = vmatpush1.msra.mxu0 %v9971_v42  ;;  %6454 = vmatpush3.msra.mxu1 %v9974_v47  ;;  %12941 = vst [vmem:[#allocation20_spill] sm:$0xff] %v9987_v45  ;;  %v9991_v47 = vld [vmem:[#allocation2 + $0x560] sm:$0xff] }
 0x5a8   :  { %2853 = vmatprep.subr.mxu0 %v9977_v50  ;;  %6455 = vmatprep.subr.mxu1 %v12468_v46  ;;  %12942 = vst [vmem:[#allocation38_spill] sm:$0xff] %v9991_v47  ;;  %v9994_v50 = vld [vmem:[#allocation2 + $0x570] sm:$0xff]  ;;  %v9997_v42 = vld [vmem:[#allocation2 + $0x500] sm:$0xff] }
 0x5a9   :  { %2854 = vmatpush1.msra.mxu0 %v9981_v1  ;;  %6456 = vmatpush3.msra.mxu1 %v9984_v40  ;;  %12943 = vst [vmem:[#allocation21_spill] sm:$0xff] %v9994_v50  ;;  %12944 = vst [vmem:[#allocation22_spill] sm:$0xff] %v9997_v42  ;;  %v10001_v40 = vld [vmem:[#allocation2 + $0x4f8] sm:$0xff] }
 0x5aa   :  { %2855 = vmatprep.subr.mxu0 %v9987_v45  ;;  %6457 = vmatprep.subr.mxu1 %v12468_v46  ;;  %12945 = vst [vmem:[#allocation41_spill] sm:$0xff] %v10001_v40  ;;  %v10004_v45 = vld [vmem:[#allocation2 + $0x508] sm:$0xff]  ;;  %v10007_v1 = vld [vmem:[#allocation2 + $0x498] sm:$0xff] }
 0x5ab   :  { %2856 = vmatpush1.msra.mxu0 %v9991_v47  ;;  %6458 = vmatpush3.msra.mxu1 %v9994_v50  ;;  %12946 = vst [vmem:[#allocation24_spill] sm:$0xff] %v10004_v45  ;;  %12947 = vst [vmem:[#allocation25_spill] sm:$0xff] %v10007_v1  ;;  %v10011_v50 = vld [vmem:[#allocation2 + $0x490] sm:$0xff] }
 0x5ac   :  { %2857 = vmatprep.subr.mxu0 %v9997_v42  ;;  %6459 = vmatprep.subr.mxu1 %v12468_v46  ;;  %12948 = vst [vmem:[#allocation44_spill] sm:$0xff] %v10011_v50  ;;  %v10014_v42 = vld [vmem:[#allocation2 + $0x4a0] sm:$0xff]  ;;  %v10017_v47 = vld [vmem:[#allocation2 + $0x430] sm:$0xff] }
 0x5ad   :  { %2858 = vmatpush1.msra.mxu0 %v10001_v40  ;;  %6460 = vmatpush3.msra.mxu1 %v10004_v45  ;;  %12949 = vst [vmem:[#allocation27_spill] sm:$0xff] %v10014_v42  ;;  %12950 = vst [vmem:[#allocation28_spill] sm:$0xff] %v10017_v47  ;;  %v10021_v45 = vld [vmem:[#allocation2 + $0x428] sm:$0xff] }
 0x5ae   :  { %2859 = vmatprep.subr.mxu0 %v10007_v1  ;;  %6461 = vmatprep.subr.mxu1 %v12468_v46  ;;  %12951 = vst [vmem:[#allocation47_spill] sm:$0xff] %v10021_v45  ;;  %v10024_v1 = vld [vmem:[#allocation2 + $0x438] sm:$0xff]  ;;  %v10027_v40 = vld [vmem:[#allocation2 + $0x3c8] sm:$0xff] }
 0x5af   :  { %2860 = vmatpush1.msra.mxu0 %v10011_v50  ;;  %6462 = vmatpush3.msra.mxu1 %v10014_v42  ;;  %12952 = vst [vmem:[#allocation30_spill] sm:$0xff] %v10024_v1  ;;  %12953 = vst [vmem:[#allocation31_spill] sm:$0xff] %v10027_v40  ;;  %v10031_v42 = vld [vmem:[#allocation2 + $0x3c0] sm:$0xff] }
 0x5b0   :  { %2861 = vmatprep.subr.mxu0 %v10017_v47  ;;  %6463 = vmatprep.subr.mxu1 %v12468_v46  ;;  %12954 = vst [vmem:[#allocation50_spill] sm:$0xff] %v10031_v42  ;;  %v10034_v47 = vld [vmem:[#allocation2 + $0x3d0] sm:$0xff]  ;;  %v10037_v50 = vld [vmem:[#allocation2 + $0x360] sm:$0xff] }
 0x5b1   :  { %2862 = vmatpush1.msra.mxu0 %v10021_v45  ;;  %6464 = vmatpush3.msra.mxu1 %v10024_v1  ;;  %12955 = vst [vmem:[#allocation33_spill] sm:$0xff] %v10034_v47  ;;  %12956 = vst [vmem:[#allocation34_spill] sm:$0xff] %v10037_v50  ;;  %v10041_v1 = vld [vmem:[#allocation2 + $0x358] sm:$0xff] }
 0x5b2   :  { %2863 = vmatprep.subr.mxu0 %v10027_v40  ;;  %6465 = vmatprep.subr.mxu1 %v12468_v46  ;;  %12957 = vst [vmem:[#allocation51_spill] sm:$0xff] %v10041_v1  ;;  %v10044_v40 = vld [vmem:[#allocation2 + $0x368] sm:$0xff]  ;;  %v10047_v45 = vld [vmem:[#allocation2 + $0x2f8] sm:$0xff] }
 0x5b3   :  { %2864 = vmatpush1.msra.mxu0 %v10031_v42  ;;  %6466 = vmatpush3.msra.mxu1 %v10034_v47  ;;  %12958 = vst [vmem:[#allocation36_spill] sm:$0xff] %v10044_v40  ;;  %12959 = vst [vmem:[#allocation37_spill] sm:$0xff] %v10047_v45  ;;  %v10051_v47 = vld [vmem:[#allocation2 + $0x2f0] sm:$0xff] }
 0x5b4   :  { %2865 = vmatprep.subr.mxu0 %v10037_v50  ;;  %6467 = vmatprep.subr.mxu1 %v12468_v46  ;;  %12960 = vst [vmem:[#allocation52_spill] sm:$0xff] %v10051_v47  ;;  %v10054_v50 = vld [vmem:[#allocation2 + $0x300] sm:$0xff]  ;;  %v10057_v42 = vld [vmem:[#allocation2 + $0x290] sm:$0xff] }
 0x5b5   :  { %2866 = vmatpush1.msra.mxu0 %v10041_v1  ;;  %6468 = vmatpush3.msra.mxu1 %v10044_v40  ;;  %12961 = vst [vmem:[#allocation39_spill] sm:$0xff] %v10054_v50  ;;  %12962 = vst [vmem:[#allocation40_spill] sm:$0xff] %v10057_v42  ;;  %v10061_v40 = vld [vmem:[#allocation2 + $0x288] sm:$0xff] }
 0x5b6   :  { %2867 = vmatprep.subr.mxu0 %v10047_v45  ;;  %6469 = vmatprep.subr.mxu1 %v12468_v46  ;;  %12963 = vst [vmem:[#allocation53_spill] sm:$0xff] %v10061_v40  ;;  %v10064_v45 = vld [vmem:[#allocation2 + $0x298] sm:$0xff]  ;;  %v10067_v1 = vld [vmem:[#allocation2 + $0x228] sm:$0xff] }
 0x5b7   :  { %2868 = vmatpush1.msra.mxu0 %v10051_v47  ;;  %6470 = vmatpush3.msra.mxu1 %v10054_v50  ;;  %12964 = vst [vmem:[#allocation42_spill] sm:$0xff] %v10064_v45  ;;  %12965 = vst [vmem:[#allocation43_spill] sm:$0xff] %v10067_v1  ;;  %v10071_v50 = vld [vmem:[#allocation2 + $0x220] sm:$0xff] }
 0x5b8   :  { %2869 = vmatprep.subr.mxu0 %v10057_v42  ;;  %6471 = vmatprep.subr.mxu1 %v12468_v46  ;;  %12966 = vst [vmem:[#allocation54_spill] sm:$0xff] %v10071_v50  ;;  %v10074_v42 = vld [vmem:[#allocation2 + $0x230] sm:$0xff]  ;;  %v10077_v47 = vld [vmem:[#allocation2 + $0x1c0] sm:$0xff] }
 0x5b9   :  { %2870 = vmatpush1.msra.mxu0 %v10061_v40  ;;  %6472 = vmatpush3.msra.mxu1 %v10064_v45  ;;  %12967 = vst [vmem:[#allocation45_spill] sm:$0xff] %v10074_v42  ;;  %12968 = vst [vmem:[#allocation46_spill] sm:$0xff] %v10077_v47  ;;  %v10081_v45 = vld [vmem:[#allocation2 + $0x1b8] sm:$0xff] }
 0x5ba   :  { %2871 = vmatprep.subr.mxu0 %v10067_v1  ;;  %6473 = vmatprep.subr.mxu1 %v12468_v46  ;;  %12969 = vst [vmem:[#allocation55_spill] sm:$0xff] %v10081_v45  ;;  %v10084_v1 = vld [vmem:[#allocation2 + $0x1c8] sm:$0xff]  ;;  %v10087_v40 = vld [vmem:[#allocation2 + $0x158] sm:$0xff] }
 0x5bb   :  { %2872 = vmatpush1.msra.mxu0 %v10071_v50  ;;  %6474 = vmatpush3.msra.mxu1 %v10074_v42  ;;  %12970 = vst [vmem:[#allocation48_spill] sm:$0xff] %v10084_v1  ;;  %12971 = vst [vmem:[#allocation49_spill] sm:$0xff] %v10087_v40  ;;  %v10091_v42 = vld [vmem:[#allocation2 + $0x150] sm:$0xff] }
 0x5bc   :  { %2873 = vmatprep.subr.mxu0 %v10077_v47  ;;  %6475 = vmatprep.subr.mxu1 %v12468_v46  ;;  %12972 = vst [vmem:[#allocation56_spill] sm:$0xff] %v10091_v42  ;;  %v10094_v47 = vld [vmem:[#allocation2 + $0x160] sm:$0xff]  ;;  %v10097_v50 = vld [vmem:[#allocation2 + $0xf0] sm:$0xff] }
 0x5bd   :  { %2874 = vmatpush1.msra.mxu0 %v10081_v45  ;;  %6476 = vmatpush3.msra.mxu1 %v10084_v1  ;;  %12973 = vst [vmem:[#allocation57_spill] sm:$0xff] %v10094_v47  ;;  %12974 = vst [vmem:[#allocation58_spill] sm:$0xff] %v10097_v50  ;;  %v10101_v1 = vld [vmem:[#allocation2 + $0xe8] sm:$0xff] }
 0x5be   :  { %2875 = vmatprep.subr.mxu0 %v10087_v40  ;;  %6477 = vmatprep.subr.mxu1 %v12468_v46  ;;  %12975 = vst [vmem:[#allocation59_spill] sm:$0xff] %v10101_v1  ;;  %v10104_v40 = vld [vmem:[#allocation2 + $0xf8] sm:$0xff]  ;;  %v10107_v45 = vld [vmem:[#allocation2 + $0x88] sm:$0xff] }
 0x5bf   :  { %2876 = vmatpush1.msra.mxu0 %v10091_v42  ;;  %6478 = vmatpush3.msra.mxu1 %v10094_v47  ;;  %12976 = vst [vmem:[#allocation60_spill] sm:$0xff] %v10104_v40  ;;  %12977 = vst [vmem:[#allocation61_spill] sm:$0xff] %v10107_v45  ;;  %v10111_v47 = vld [vmem:[#allocation2 + $0x80] sm:$0xff] }
 0x5c0   :  { %2877 = vmatprep.subr.mxu0 %v10097_v50  ;;  %6479 = vmatprep.subr.mxu1 %v12468_v46  ;;  %12978 = vst [vmem:[#allocation62_spill] sm:$0xff] %v10111_v47  ;;  %v10114_v50 = vld [vmem:[#allocation2 + $0x90] sm:$0xff]  ;;  %v10117_v42 = vld [vmem:[#allocation2 + $0x20] sm:$0xff] }
 0x5c1   :  { %2878 = vmatpush1.msra.mxu0 %v10101_v1  ;;  %6480 = vmatpush3.msra.mxu1 %v10104_v40  ;;  %12979 = vst [vmem:[#allocation63_spill] sm:$0xff] %v10114_v50  ;;  %12980 = vst [vmem:[#allocation65_spill] sm:$0xff] %v10117_v42  ;;  %v10121_v40 = vld [vmem:[#allocation2 + $0x18] sm:$0xff]  ;;  %v10152_v1 = vld [vmem:[#allocation2 + $0x580] sm:$0xff] }
 0x5c2   :  { %2879 = vmatprep.subr.mxu0 %v10107_v45  ;;  %6481 = vmatprep.subr.mxu1 %v12468_v46  ;;  %12981 = vst [vmem:[#allocation64_spill] sm:$0xff] %v10121_v40  ;;  %v10125_v45 = vld [vmem:[#allocation2 + $0x28] sm:$0xff]  ;;  %12989 = vst [vmem:[#allocation73_spill] sm:$0xff] %v10152_v1 }
 0x5c3   :  { %2880 = vmatpush1.msra.mxu0 %v10111_v47  ;;  %6482 = vmatpush3.msra.mxu1 %v10114_v50  ;;  %12982 = vst [vmem:[#allocation66_spill] sm:$0xff] %v10125_v45  ;;  %v10139_v50 = vld [vmem:[#allocation2 + $0x658] sm:$0xff]  ;;  %v10146_v47 = vld [vmem:[#allocation2 + $0x5e0] sm:$0xff] }
 0x5c4   :  { %2881 = vmatprep.subr.mxu0 %v10117_v42  ;;  %6483 = vmatprep.subr.mxu1 %v12468_v46  ;;  %v10132_v42 = vld [vmem:[#allocation2 + $0x650] sm:$0xff]  ;;  %12985 = vst [vmem:[#allocation69_spill] sm:$0xff] %v10139_v50  ;;  %12987 = vst [vmem:[#allocation71_spill] sm:$0xff] %v10146_v47 }
 0x5c5   :  { %2882 = vmatpush1.msra.mxu0 %v10121_v40  ;;  %2915 = vmatprep.mubr.f32.mxu0 %v12468_v46  ;;  %12983 = vst [vmem:[#allocation67_spill] sm:$0xff] %v10132_v42  ;;  %v10136_v40 = vld [vmem:[#allocation2 + $0x648] sm:$0xff] }
 0x5c6   :  { %6484 = vmatpush3.msra.mxu1 %v10125_v45  ;;  %6485 = vmatprep.mubr.msk.f32.mxu1 %vm7790_vm0, %v12468_v46  ;;  %12984 = vst [vmem:[#allocation68_spill] sm:$0xff] %v10136_v40  ;;  %v10142_v45 = vld [vmem:[#allocation2 + $0x5e8] sm:$0xff] }
 0x5c7   :  { %2916 = vmatmul.mubr.f32.vlgmr.msra.gmra.mxu0 %v9726_v27  ;;  %6486 = vmatmul.mubr.f32.vlgmr.msra.gmra.mxu1 %v9726_v27  ;;  %12986 = vst [vmem:[#allocation70_spill] sm:$0xff] %v10142_v45 }
 0x5c8   :  { %3014 = vmatprep.subr.mxu0 %v10132_v42  ;;  %6488 = vmatprep.subr.mxu1 %v12468_v46  ;;  %v10149_v42 = vld [vmem:[#allocation2 + $0x5f0] sm:$0xff] }
 0x5c9   :  { %3015 = vmatpush1.msra.mxu0 %v10136_v40  ;;  %6489 = vmatpush3.msra.mxu1 %v10139_v50  ;;  %12988 = vst [vmem:[#allocation72_spill] sm:$0xff] %v10149_v42  ;;  %v10156_v50 = vld [vmem:[#allocation2 + $0x578] sm:$0xff] }
 0x5ca   :  { %3016 = vmatprep.subr.mxu0 %v10142_v45  ;;  %6490 = vmatprep.subr.mxu1 %v12468_v46  ;;  %12990 = vst [vmem:[#allocation74_spill] sm:$0xff] %v10156_v50  ;;  %v10159_v45 = vld [vmem:[#allocation2 + $0x588] sm:$0xff]  ;;  %v10162_v40 = vld [vmem:[#allocation2 + $0x518] sm:$0xff] }
 0x5cb   :  { %3017 = vmatpush1.msra.mxu0 %v10146_v47  ;;  %6491 = vmatpush3.msra.mxu1 %v10149_v42  ;;  %12991 = vst [vmem:[#allocation75_spill] sm:$0xff] %v10159_v45  ;;  %12992 = vst [vmem:[#allocation76_spill] sm:$0xff] %v10162_v40  ;;  %v10166_v42 = vld [vmem:[#allocation2 + $0x510] sm:$0xff] }
 0x5cc   :  { %3018 = vmatprep.subr.mxu0 %v10152_v1  ;;  %6492 = vmatprep.subr.mxu1 %v12468_v46  ;;  %12993 = vst [vmem:[#allocation77_spill] sm:$0xff] %v10166_v42  ;;  %v10169_v1 = vld [vmem:[#allocation2 + $0x520] sm:$0xff]  ;;  %v10172_v47 = vld [vmem:[#allocation2 + $0x4b0] sm:$0xff] }
 0x5cd   :  { %3019 = vmatpush1.msra.mxu0 %v10156_v50  ;;  %6493 = vmatpush3.msra.mxu1 %v10159_v45  ;;  %12994 = vst [vmem:[#allocation78_spill] sm:$0xff] %v10169_v1  ;;  %12995 = vst [vmem:[#allocation79_spill] sm:$0xff] %v10172_v47  ;;  %v10176_v45 = vld [vmem:[#allocation2 + $0x4a8] sm:$0xff] }
 0x5ce   :  { %3020 = vmatprep.subr.mxu0 %v10162_v40  ;;  %6494 = vmatprep.subr.mxu1 %v12468_v46  ;;  %12996 = vst [vmem:[#allocation80_spill] sm:$0xff] %v10176_v45  ;;  %v10179_v40 = vld [vmem:[#allocation2 + $0x4b8] sm:$0xff]  ;;  %v10182_v50 = vld [vmem:[#allocation2 + $0x448] sm:$0xff] }
 0x5cf   :  { %3021 = vmatpush1.msra.mxu0 %v10166_v42  ;;  %6495 = vmatpush3.msra.mxu1 %v10169_v1  ;;  %12997 = vst [vmem:[#allocation81_spill] sm:$0xff] %v10179_v40  ;;  %12998 = vst [vmem:[#allocation82_spill] sm:$0xff] %v10182_v50  ;;  %v10186_v1 = vld [vmem:[#allocation2 + $0x440] sm:$0xff] }
 0x5d0   :  { %3022 = vmatprep.subr.mxu0 %v10172_v47  ;;  %6496 = vmatprep.subr.mxu1 %v12468_v46  ;;  %12999 = vst [vmem:[#allocation83_spill] sm:$0xff] %v10186_v1  ;;  %v10189_v47 = vld [vmem:[#allocation2 + $0x450] sm:$0xff]  ;;  %v10192_v42 = vld [vmem:[#allocation2 + $0x3e0] sm:$0xff] }
 0x5d1   :  { %3023 = vmatpush1.msra.mxu0 %v10176_v45  ;;  %6497 = vmatpush3.msra.mxu1 %v10179_v40  ;;  %13000 = vst [vmem:[#allocation84_spill] sm:$0xff] %v10189_v47  ;;  %13001 = vst [vmem:[#allocation85_spill] sm:$0xff] %v10192_v42  ;;  %v10196_v40 = vld [vmem:[#allocation2 + $0x3d8] sm:$0xff] }
 0x5d2   :  { %3024 = vmatprep.subr.mxu0 %v10182_v50  ;;  %6498 = vmatprep.subr.mxu1 %v12468_v46  ;;  %13002 = vst [vmem:[#allocation86_spill] sm:$0xff] %v10196_v40  ;;  %v10199_v50 = vld [vmem:[#allocation2 + $0x3e8] sm:$0xff]  ;;  %v10202_v45 = vld [vmem:[#allocation2 + $0x378] sm:$0xff] }
 0x5d3   :  { %3025 = vmatpush1.msra.mxu0 %v10186_v1  ;;  %6499 = vmatpush3.msra.mxu1 %v10189_v47  ;;  %13003 = vst [vmem:[#allocation87_spill] sm:$0xff] %v10199_v50  ;;  %13004 = vst [vmem:[#allocation88_spill] sm:$0xff] %v10202_v45  ;;  %v10206_v47 = vld [vmem:[#allocation2 + $0x370] sm:$0xff] }
 0x5d4   :  { %3026 = vmatprep.subr.mxu0 %v10192_v42  ;;  %6500 = vmatprep.subr.mxu1 %v12468_v46  ;;  %13005 = vst [vmem:[#allocation89_spill] sm:$0xff] %v10206_v47  ;;  %v10209_v42 = vld [vmem:[#allocation2 + $0x380] sm:$0xff]  ;;  %v10212_v1 = vld [vmem:[#allocation2 + $0x310] sm:$0xff] }
 0x5d5   :  { %3027 = vmatpush1.msra.mxu0 %v10196_v40  ;;  %6501 = vmatpush3.msra.mxu1 %v10199_v50  ;;  %13006 = vst [vmem:[#allocation90_spill] sm:$0xff] %v10209_v42  ;;  %13007 = vst [vmem:[#allocation91_spill] sm:$0xff] %v10212_v1  ;;  %v10216_v50 = vld [vmem:[#allocation2 + $0x308] sm:$0xff] }
 0x5d6   :  { %3028 = vmatprep.subr.mxu0 %v10202_v45  ;;  %6502 = vmatprep.subr.mxu1 %v12468_v46  ;;  %13008 = vst [vmem:[#allocation92_spill] sm:$0xff] %v10216_v50  ;;  %v10219_v45 = vld [vmem:[#allocation2 + $0x318] sm:$0xff]  ;;  %v10222_v40 = vld [vmem:[#allocation2 + $0x2a8] sm:$0xff] }
 0x5d7   :  { %3029 = vmatpush1.msra.mxu0 %v10206_v47  ;;  %6503 = vmatpush3.msra.mxu1 %v10209_v42  ;;  %13009 = vst [vmem:[#allocation93_spill] sm:$0xff] %v10219_v45  ;;  %13010 = vst [vmem:[#allocation94_spill] sm:$0xff] %v10222_v40  ;;  %v10226_v42 = vld [vmem:[#allocation2 + $0x2a0] sm:$0xff] }
 0x5d8   :  { %3030 = vmatprep.subr.mxu0 %v10212_v1  ;;  %6504 = vmatprep.subr.mxu1 %v12468_v46  ;;  %13011 = vst [vmem:[#allocation95_spill] sm:$0xff] %v10226_v42  ;;  %v10229_v1 = vld [vmem:[#allocation2 + $0x2b0] sm:$0xff]  ;;  %v10232_v47 = vld [vmem:[#allocation2 + $0x240] sm:$0xff] }
 0x5d9   :  { %3031 = vmatpush1.msra.mxu0 %v10216_v50  ;;  %6505 = vmatpush3.msra.mxu1 %v10219_v45  ;;  %13012 = vst [vmem:[#allocation96_spill] sm:$0xff] %v10229_v1  ;;  %13013 = vst [vmem:[#allocation97_spill] sm:$0xff] %v10232_v47  ;;  %v10236_v45 = vld [vmem:[#allocation2 + $0x238] sm:$0xff] }
 0x5da   :  { %3032 = vmatprep.subr.mxu0 %v10222_v40  ;;  %6506 = vmatprep.subr.mxu1 %v12468_v46  ;;  %13014 = vst [vmem:[#allocation98_spill] sm:$0xff] %v10236_v45  ;;  %v10239_v40 = vld [vmem:[#allocation2 + $0x248] sm:$0xff]  ;;  %v10242_v50 = vld [vmem:[#allocation2 + $0x1d8] sm:$0xff] }
 0x5db   :  { %3033 = vmatpush1.msra.mxu0 %v10226_v42  ;;  %6507 = vmatpush3.msra.mxu1 %v10229_v1  ;;  %13015 = vst [vmem:[#allocation99_spill] sm:$0xff] %v10239_v40  ;;  %13016 = vst [vmem:[#allocation100_spill] sm:$0xff] %v10242_v50  ;;  %v10246_v1 = vld [vmem:[#allocation2 + $0x1d0] sm:$0xff] }
 0x5dc   :  { %3034 = vmatprep.subr.mxu0 %v10232_v47  ;;  %6508 = vmatprep.subr.mxu1 %v12468_v46  ;;  %13017 = vst [vmem:[#allocation101_spill] sm:$0xff] %v10246_v1  ;;  %v10249_v47 = vld [vmem:[#allocation2 + $0x1e0] sm:$0xff]  ;;  %v10252_v42 = vld [vmem:[#allocation2 + $0x170] sm:$0xff] }
 0x5dd   :  { %3035 = vmatpush1.msra.mxu0 %v10236_v45  ;;  %6509 = vmatpush3.msra.mxu1 %v10239_v40  ;;  %13018 = vst [vmem:[#allocation102_spill] sm:$0xff] %v10249_v47  ;;  %13019 = vst [vmem:[#allocation103_spill] sm:$0xff] %v10252_v42  ;;  %v10256_v40 = vld [vmem:[#allocation2 + $0x168] sm:$0xff] }
 0x5de   :  { %3036 = vmatprep.subr.mxu0 %v10242_v50  ;;  %6510 = vmatprep.subr.mxu1 %v12468_v46  ;;  %13020 = vst [vmem:[#allocation104_spill] sm:$0xff] %v10256_v40  ;;  %v10259_v50 = vld [vmem:[#allocation2 + $0x178] sm:$0xff]  ;;  %v10262_v45 = vld [vmem:[#allocation2 + $0x108] sm:$0xff] }
 0x5df   :  { %3037 = vmatpush1.msra.mxu0 %v10246_v1  ;;  %6511 = vmatpush3.msra.mxu1 %v10249_v47  ;;  %13021 = vst [vmem:[#allocation105_spill] sm:$0xff] %v10259_v50  ;;  %13022 = vst [vmem:[#allocation106_spill] sm:$0xff] %v10262_v45  ;;  %v10266_v47 = vld [vmem:[#allocation2 + $0x100] sm:$0xff] }
 0x5e0   :  { %3038 = vmatprep.subr.mxu0 %v10252_v42  ;;  %6512 = vmatprep.subr.mxu1 %v12468_v46  ;;  %13023 = vst [vmem:[#allocation107_spill] sm:$0xff] %v10266_v47  ;;  %v10269_v42 = vld [vmem:[#allocation2 + $0x110] sm:$0xff]  ;;  %v10272_v1 = vld [vmem:[#allocation2 + $0xa0] sm:$0xff] }
 0x5e1   :  { %3039 = vmatpush1.msra.mxu0 %v10256_v40  ;;  %6513 = vmatpush3.msra.mxu1 %v10259_v50  ;;  %13024 = vst [vmem:[#allocation108_spill] sm:$0xff] %v10269_v42  ;;  %13025 = vst [vmem:[#allocation109_spill] sm:$0xff] %v10272_v1  ;;  %v10276_v50 = vld [vmem:[#allocation2 + $0x98] sm:$0xff] }
 0x5e2   :  { %3040 = vmatprep.subr.mxu0 %v10262_v45  ;;  %6514 = vmatprep.subr.mxu1 %v12468_v46  ;;  %13026 = vst [vmem:[#allocation110_spill] sm:$0xff] %v10276_v50  ;;  %v10279_v45 = vld [vmem:[#allocation2 + $0xa8] sm:$0xff]  ;;  %v10282_v40 = vld [vmem:[#allocation2 + $0x38] sm:$0xff] }
 0x5e3   :  { %3041 = vmatpush1.msra.mxu0 %v10266_v47  ;;  %6515 = vmatpush3.msra.mxu1 %v10269_v42  ;;  %13027 = vst [vmem:[#allocation111_spill] sm:$0xff] %v10279_v45  ;;  %13028 = vst [vmem:[#allocation112_spill] sm:$0xff] %v10282_v40  ;;  %v10286_v42 = vld [vmem:[#allocation2 + $0x30] sm:$0xff] }
 0x5e4   :  { %3042 = vmatprep.subr.mxu0 %v10272_v1  ;;  %6516 = vmatprep.subr.mxu1 %v12468_v46  ;;  %13029 = vst [vmem:[#allocation113_spill] sm:$0xff] %v10286_v42  ;;  %v10289_v1 = vld [vmem:[#allocation2 + $0x40] sm:$0xff] }
 0x5e5   :  { %3043 = vmatpush1.msra.mxu0 %v10276_v50  ;;  %6517 = vmatpush3.msra.mxu1 %v10279_v45  ;;  %13030 = vst [vmem:[#allocation114_spill] sm:$0xff] %v10289_v1  ;;  %v10295_v45 = vld [vmem:[#allocation2 + $0x668] sm:$0xff] }
 0x5e6   :  { %3044 = vmatprep.subr.mxu0 %v10282_v40  ;;  %6518 = vmatprep.subr.mxu1 %v12468_v46  ;;  %13031 = vst [vmem:[#allocation115_spill] sm:$0xff] %v10295_v45 }
 0x5e7   :  { %3045 = vmatpush1.msra.mxu0 %v10286_v42  ;;  %6519 = vmatpush3.msra.mxu1 %v10289_v1 }
 0x5e8   :  { %3078 = vmatprep.mubr.f32.mxu0 %v12468_v46  ;;  %6520 = vmatprep.mubr.msk.f32.mxu1 %vm7790_vm0, %v12468_v46 }
 0x5e9   :  { %3155 = vmatprep.subr.mxu0 %v10295_v45  ;;  %6523 = vmatprep.subr.mxu1 %v12468_v46 }
 0x622   :  { %v2541_v40 = vpop.f32.mrf.mxu1  ;;  %v2470_v47 = vpop.f32.mrf.mxu0 }
 0x623   :  { %v2471_v42 = vadd.f32 %v2470_v47, %v12890_v6  ;;  %v2542_v52 = vadd.f32 %v2541_v40, %v8729_v33 }
 0x624   :  { %v6382_v50 = vpop.f32.mrf.mxu1  ;;  %v2472_v38 = vpop.f32.mrf.mxu0 }
 0x643   :  { %v2611_v37 = vpop.f32.mrf.mxu0  ;;  %v2682_v36 = vpop.f32.mrf.mxu1 }
 0x644   :  { %v2686_v1 = vadd.f32 %v2611_v37, %v2471_v42  ;;  %v2700_v60 = vadd.f32 %v9714_v61, %v2682_v36 }
 0x645   :  { %v6417_v58 = vpop.f32.mrf.mxu1  ;;  %v2613_v47 = vpop.f32.mrf.mxu0 }
 0x646   :  { %v5274_v62 = vmul.f32 -1.442695, %v2686_v1 }
 0x648   :  { %7088 = vpow2.f32 %v5274_v62 }
 0x655   :  { %v7089_v51 = vpop.eup %7088 }
 0x656   :  { %v2690_v44 = vadd.f32 1.0, %v7089_v51 }
 0x658   :  { %7090 = vrcp.f32 %v2690_v44 }
 0x664   :  { %v2776_v6 = vpop.f32.mrf.mxu0 }
 0x665   :  { %v7091_v45 = vpop.eup %7090  ;;  %v2777_v58 = vadd.f32 %v2776_v6, %v12605_v53  ;;  %v10309_v6 = vld [vmem:[%s11792_s2 + $0x3] ss:$0 sm:$0xff] }
 0x666   :  { %v2701_v22 = vmul.f32 %v7091_v45, %v2700_v60  ;;  %v2847_v50 = vpop.f32.mrf.mxu1  ;;  %v2778_v17 = vpop.f32.mrf.mxu0 }
 0x667   :  { %v2779_v61 = vadd.f32 %v2778_v17, %v12606_v8 }
 0x668   :  { %v10302_v57 = vadd.f32 %v2701_v22, %v2542_v52  ;;  %v6452_v0 = vpop.f32.mrf.mxu1 }
 0x687   :  { %v2917_v37 = vpop.f32.mrf.mxu0  ;;  %v2988_v62 = vpop.f32.mrf.mxu1 }
 0x688   :  { %v2992_v42 = vadd.f32 %v2917_v37, %v2777_v58  ;;  %v3006_v45 = vadd.f32 %v10309_v6, %v2988_v62  ;;  %v2848_v37 = vadd.f32 %v2847_v50, %v8337_v49  ;;  %v10319_v50 = vld [vmem:[#allocation2 + $0x660] sm:$0xff] }
 0x689   :  { %v6487_v51 = vpop.f32.mrf.mxu1  ;;  %v2919_v1 = vpop.f32.mrf.mxu0  ;;  %v10325_v62 = vld [vmem:[#allocation2 + $0x600] sm:$0xff] }
 0x68a   :  { %v5277_v44 = vmul.f32 -1.442695, %v2992_v42  ;;  %v2999_v36 = vadd.f32 %v2919_v1, %v2779_v61  ;;  %v2473_v42 = vadd.f32 %v2472_v38, %v8739_v18  ;;  %v10322_v38 = vld [vmem:[#allocation2 + $0x670] sm:$0xff] }
 0x68c   :  { %7092 = vpow2.f32 %v5277_v44  ;;  %v5278_v60 = vmul.f32 -1.442695, %v2999_v36  ;;  %v2693_v44 = vadd.f32 %v2613_v47, %v2473_v42  ;;  %v10345_v42 = vld [vmem:[#allocation2 + $0x530] sm:$0xff] }
 0x68e   :  { %7094 = vpow2.f32 %v5278_v60  ;;  %v5275_v1 = vmul.f32 -1.442695, %v2693_v44  ;;  %v10352_v44 = vld [vmem:[#allocation2 + $0x538] sm:$0xff] }
 0x68f   :  { %13032 = vst [vmem:[#allocation116_spill] sm:$0xff] %v10352_v44 }
 0x699   :  { %v7093_v22 = vpop.eup %7092 }
 0x69a   :  { %v2996_v52 = vadd.f32 1.0, %v7093_v22 }
 0x69b   :  { %v7095_v0 = vpop.eup %7094 }
 0x69c   :  { %7096 = vrcp.f32 %v2996_v52  ;;  %v3003_v40 = vadd.f32 1.0, %v7095_v0 }
 0x69e   :  { %7098 = vrcp.f32 %v3003_v40  ;;  %v10332_v40 = vld [vmem:[#allocation2 + $0x608] sm:$0xff] }
 0x6a9   :  { %v7097_v58 = vpop.eup %7096 }
 0x6aa   :  { %v3007_v17 = vmul.f32 %v7097_v58, %v3006_v45  ;;  %v10335_v45 = vld [vmem:[#allocation2 + $0x598] sm:$0xff] }
 0x6ab   :  { %v7099_v61 = vpop.eup %7098 }
 0x6ac   :  { %v3008_v51 = vadd.f32 %v3007_v17, %v2848_v37  ;;  %v3010_v36 = vsub.f32 1.0, %v7099_v61  ;;  %v3012_v52 = vmul.f32 %v7099_v61, %v9726_v27  ;;  %v10329_v27 = vld [vmem:[#allocation2 + $0x5f8] sm:$0xff]  ;;  %v10339_v37 = vld [vmem:[#allocation2 + $0x590] sm:$0xff]  ;;  %v10342_v17 = vld [vmem:[#allocation2 + $0x5a0] sm:$0xff] }
 0x6ad   :  { %v10359_v61 = vld [vmem:[#allocation2 + $0x4c0] sm:$0xff] }
 0x6ae   :  { %7100 = vtanh.f32 %v3008_v51  ;;  %v10349_v51 = vld [vmem:[#allocation2 + $0x528] sm:$0xff]  ;;  %13034 = vst [vmem:[#allocation118_spill] sm:$0xff] %v10359_v61 }
 0x6af   :  { %7102 = vpow2.f32 %v5275_v1  ;;  %v10355_v1 = vld [vmem:[#allocation2 + $0x4c8] sm:$0xff] }
 0x6b0   :  { %13033 = vst [vmem:[#allocation117_spill] sm:$0xff] %v10355_v1 }
 0x6bb   :  { %v7101_v60 = vpop.eup %7100 }
 0x6bc   :  { %v3011_v22 = vmul.f32 %v7101_v60, %v3010_v36  ;;  %v7103_v47 = vpop.eup %7102  ;;  %v10362_v36 = vld [vmem:[#allocation2 + $0x4d0] sm:$0xff]  ;;  %v10365_v60 = vld [vmem:[#allocation2 + $0x460] sm:$0xff] }
 0x6bd   :  { %v2697_v58 = vadd.f32 1.0, %v7103_v47  ;;  %13035 = vst [vmem:[#allocation119_spill] sm:$0xff] %v10362_v36  ;;  %13036 = vst [vmem:[#allocation120_spill] sm:$0xff] %v10365_v60  ;;  %v10376_v47 = vld [vmem:[#allocation2 + $0x3f8] sm:$0xff] }
 0x6be   :  { %v10315_v0 = vadd.f32 %v3012_v52, %v3011_v22  ;;  %v10370_v22 = vld [vmem:[#allocation2 + $0x458] sm:$0xff]  ;;  %v10373_v52 = vld [vmem:[#allocation2 + $0x468] sm:$0xff]  ;;  %13039 = vst [vmem:[#allocation123_spill] sm:$0xff] %v10376_v47 }
 0x6bf   :  { %7104 = vrcp.f32 %v2697_v58  ;;  %13037 = vst [vmem:[#allocation121_spill] sm:$0xff] %v10370_v22  ;;  %13038 = vst [vmem:[#allocation122_spill] sm:$0xff] %v10373_v52  ;;  %v10380_v58 = vld [vmem:[#allocation2 + $0x3f0] sm:$0xff] }
 0x6c0   :  { %3079 = vmatmul.mubr.f32.vlgmr.msra.gmra.mxu0 %v10315_v0  ;;  %6521 = vmatmul.mubr.f32.vlgmr.msra.gmra.mxu1 %v10315_v0  ;;  %7106 = vtanh.f32 %v10302_v57  ;;  %13040 = vst [vmem:[#allocation124_spill] sm:$0xff] %v10380_v58  ;;  %v10386_v57 = vld [vmem:[#allocation2 + $0x390] sm:$0xff] }
 0x6c1   :  { %3156 = vmatpush1.msra.mxu0 %v10319_v50  ;;  %6524 = vmatpush3.msra.mxu1 %v10322_v38  ;;  %13042 = vst [vmem:[#allocation126_spill] sm:$0xff] %v10386_v57 }
 0x6c2   :  { %3157 = vmatprep.subr.mxu0 %v10325_v62  ;;  %6525 = vmatprep.subr.mxu1 %v12468_v46 }
 0x6c3   :  { %3158 = vmatpush1.msra.mxu0 %v10329_v27  ;;  %6526 = vmatpush3.msra.mxu1 %v10332_v40 }
 0x6c4   :  { %3159 = vmatprep.subr.mxu0 %v10335_v45  ;;  %6527 = vmatprep.subr.mxu1 %v12468_v46 }
 0x6c5   :  { %3160 = vmatpush1.msra.mxu0 %v10339_v37  ;;  %6528 = vmatpush3.msra.mxu1 %v10342_v17 }
 0x6c6   :  { %3161 = vmatprep.subr.mxu0 %v10345_v42  ;;  %6529 = vmatprep.subr.mxu1 %v12468_v46 }
 0x6c7   :  { %3162 = vmatpush1.msra.mxu0 %v10349_v51  ;;  %6530 = vmatpush3.msra.mxu1 %v10352_v44  ;;  %v10467_v44 = vld [vmem:[#allocation2 + $0x50] sm:$0xff] }
 0x6c8   :  { %3163 = vmatprep.subr.mxu0 %v10355_v1  ;;  %6531 = vmatprep.subr.mxu1 %v12468_v46  ;;  %v10456_v1 = vld [vmem:[#allocation2 + $0xb8] sm:$0xff] }
 0x6c9   :  { %3164 = vmatpush1.msra.mxu0 %v10359_v61  ;;  %6532 = vmatpush3.msra.mxu1 %v10362_v36  ;;  %v10436_v36 = vld [vmem:[#allocation2 + $0x188] sm:$0xff]  ;;  %v10446_v61 = vld [vmem:[#allocation2 + $0x120] sm:$0xff] }
 0x6ca   :  { %3165 = vmatprep.subr.mxu0 %v10365_v60  ;;  %6533 = vmatprep.subr.mxu1 %v12468_v46  ;;  %v10383_v60 = vld [vmem:[#allocation2 + $0x400] sm:$0xff]  ;;  %13057 = vst [vmem:[#allocation141_spill] sm:$0xff] %v10436_v36  ;;  %13060 = vst [vmem:[#allocation144_spill] sm:$0xff] %v10446_v61 }
 0x6cb   :  { %3166 = vmatpush1.msra.mxu0 %v10370_v22  ;;  %6534 = vmatpush3.msra.mxu1 %v10373_v52  ;;  %13041 = vst [vmem:[#allocation125_spill] sm:$0xff] %v10383_v60  ;;  %v10390_v52 = vld [vmem:[#allocation2 + $0x388] sm:$0xff] }
 0x6cc   :  { %3167 = vmatprep.subr.mxu0 %v10376_v47  ;;  %6535 = vmatprep.subr.mxu1 %v12468_v46  ;;  %13043 = vst [vmem:[#allocation127_spill] sm:$0xff] %v10390_v52  ;;  %v10393_v47 = vld [vmem:[#allocation2 + $0x398] sm:$0xff]  ;;  %v10396_v22 = vld [vmem:[#allocation2 + $0x328] sm:$0xff] }
 0x6cd   :  { %3168 = vmatpush1.msra.mxu0 %v10380_v58  ;;  %6536 = vmatpush3.msra.mxu1 %v10383_v60  ;;  %13044 = vst [vmem:[#allocation128_spill] sm:$0xff] %v10393_v47  ;;  %13045 = vst [vmem:[#allocation129_spill] sm:$0xff] %v10396_v22  ;;  %v10400_v60 = vld [vmem:[#allocation2 + $0x320] sm:$0xff] }
 0x6ce   :  { %3169 = vmatprep.subr.mxu0 %v10386_v57  ;;  %6537 = vmatprep.subr.mxu1 %v12468_v46  ;;  %13046 = vst [vmem:[#allocation130_spill] sm:$0xff] %v10400_v60  ;;  %v10403_v57 = vld [vmem:[#allocation2 + $0x330] sm:$0xff]  ;;  %v10406_v58 = vld [vmem:[#allocation2 + $0x2c0] sm:$0xff] }
 0x6cf   :  { %3170 = vmatpush1.msra.mxu0 %v10390_v52  ;;  %6538 = vmatpush3.msra.mxu1 %v10393_v47  ;;  %13047 = vst [vmem:[#allocation131_spill] sm:$0xff] %v10403_v57  ;;  %13048 = vst [vmem:[#allocation132_spill] sm:$0xff] %v10406_v58  ;;  %v10410_v47 = vld [vmem:[#allocation2 + $0x2b8] sm:$0xff] }
 0x6d0   :  { %3171 = vmatprep.subr.mxu0 %v10396_v22  ;;  %6539 = vmatprep.subr.mxu1 %v12468_v46  ;;  %13049 = vst [vmem:[#allocation133_spill] sm:$0xff] %v10410_v47  ;;  %v10413_v22 = vld [vmem:[#allocation2 + $0x2c8] sm:$0xff]  ;;  %v10416_v52 = vld [vmem:[#allocation2 + $0x258] sm:$0xff] }
 0x6d1   :  { %3172 = vmatpush1.msra.mxu0 %v10400_v60  ;;  %6540 = vmatpush3.msra.mxu1 %v10403_v57  ;;  %13050 = vst [vmem:[#allocation134_spill] sm:$0xff] %v10413_v22  ;;  %13051 = vst [vmem:[#allocation135_spill] sm:$0xff] %v10416_v52  ;;  %v10420_v57 = vld [vmem:[#allocation2 + $0x250] sm:$0xff]  ;;  %v7105_v60 = vpop.eup %7104 }
 0x6d2   :  { %3173 = vmatprep.subr.mxu0 %v10406_v58  ;;  %6541 = vmatprep.subr.mxu1 %v12468_v46  ;;  %13052 = vst [vmem:[#allocation136_spill] sm:$0xff] %v10420_v57  ;;  %v10423_v58 = vld [vmem:[#allocation2 + $0x260] sm:$0xff] }
 0x6d3   :  { %3174 = vmatpush1.msra.mxu0 %v10410_v47  ;;  %6542 = vmatpush3.msra.mxu1 %v10413_v22  ;;  %13053 = vst [vmem:[#allocation137_spill] sm:$0xff] %v10423_v58  ;;  %v10426_v47 = vld [vmem:[#allocation2 + $0x1f0] sm:$0xff]  ;;  %v10430_v22 = vld [vmem:[#allocation2 + $0x1e8] sm:$0xff] }
 0x6d4   :  { %3175 = vmatprep.subr.mxu0 %v10416_v52  ;;  %6543 = vmatprep.subr.mxu1 %v12468_v46  ;;  %13054 = vst [vmem:[#allocation138_spill] sm:$0xff] %v10426_v47  ;;  %13055 = vst [vmem:[#allocation139_spill] sm:$0xff] %v10430_v22  ;;  %v10433_v52 = vld [vmem:[#allocation2 + $0x1f8] sm:$0xff] }
 0x6d5   :  { %3176 = vmatpush1.msra.mxu0 %v10420_v57  ;;  %6544 = vmatpush3.msra.mxu1 %v10423_v58  ;;  %13056 = vst [vmem:[#allocation140_spill] sm:$0xff] %v10433_v52  ;;  %v7107_v57 = vpop.eup %7106  ;;  %v10440_v58 = vld [vmem:[#allocation2 + $0x180] sm:$0xff] }
 0x6d6   :  { %3177 = vmatprep.subr.mxu0 %v10426_v47  ;;  %6545 = vmatprep.subr.mxu1 %v12468_v46  ;;  %13058 = vst [vmem:[#allocation142_spill] sm:$0xff] %v10440_v58  ;;  %v10443_v47 = vld [vmem:[#allocation2 + $0x190] sm:$0xff] }
 0x6d7   :  { %3178 = vmatpush1.msra.mxu0 %v10430_v22  ;;  %6546 = vmatpush3.msra.mxu1 %v10433_v52  ;;  %13059 = vst [vmem:[#allocation143_spill] sm:$0xff] %v10443_v47  ;;  %v2704_v22 = vsub.f32 1.0, %v7105_v60  ;;  %v10450_v52 = vld [vmem:[#allocation2 + $0x118] sm:$0xff] }
 0x6d8   :  { %3179 = vmatprep.subr.mxu0 %v10436_v36  ;;  %6547 = vmatprep.subr.mxu1 %v12468_v46  ;;  %13061 = vst [vmem:[#allocation145_spill] sm:$0xff] %v10450_v52  ;;  %v10453_v36 = vld [vmem:[#allocation2 + $0x128] sm:$0xff] }
 0x6d9   :  { %3180 = vmatpush1.msra.mxu0 %v10440_v58  ;;  %6548 = vmatpush3.msra.mxu1 %v10443_v47  ;;  %v2705_v58 = vmul.f32 %v7107_v57, %v2704_v22  ;;  %v10460_v47 = vld [vmem:[#allocation2 + $0xb0] sm:$0xff]  ;;  %v10471_v22 = vld [vmem:[#allocation2 + $0x48] sm:$0xff] }
 0x6da   :  { %3181 = vmatprep.subr.mxu0 %v10446_v61  ;;  %6549 = vmatprep.subr.mxu1 %v12468_v46  ;;  %13062 = vst [vmem:[#allocation146_spill] sm:$0xff] %v10460_v47  ;;  %v10463_v61 = vld [vmem:[#allocation2 + $0xc0] sm:$0xff] }
 0x6db   :  { %3182 = vmatpush1.msra.mxu0 %v10450_v52  ;;  %6550 = vmatpush3.msra.mxu1 %v10453_v36  ;;  %v2706_v52 = vmul.f32 %v7105_v60, %v9794_v14  ;;  %v13063_v14 = vld [vmem:[#allocation5_spill] sm:$0xff]  ;;  %v13098_v60 = vld [vmem:[#allocation51_spill] sm:$0xff] }
 0x6dc   :  { %3183 = vmatprep.subr.mxu0 %v10456_v1  ;;  %6551 = vmatprep.subr.mxu1 %v12468_v46 }
 0x6dd   :  { %3184 = vmatpush1.msra.mxu0 %v10460_v47  ;;  %6552 = vmatpush3.msra.mxu1 %v10463_v61  ;;  %v10475_v57 = vadd.f32 %v2706_v52, %v2705_v58  ;;  %v10477_v47 = vld [vmem:[#allocation2 + $0x58] sm:$0xff]  ;;  %v13100_v58 = vld [vmem:[#allocation37_spill] sm:$0xff] }
 0x6de   :  { %3185 = vmatprep.subr.mxu0 %v10467_v44  ;;  %6553 = vmatprep.subr.mxu1 %v12468_v46  ;;  %v13099_v52 = vld [vmem:[#allocation36_spill] sm:$0xff] }
 0x6df   :  { %3186 = vmatpush1.msra.mxu0 %v10471_v22  ;;  %3219 = vmatprep.mubr.f32.mxu0 %v12468_v46 }
 0x6e0   :  { %6554 = vmatpush3.msra.mxu1 %v10477_v47  ;;  %6555 = vmatprep.mubr.msk.f32.mxu1 %vm7790_vm0, %v12468_v46 }
 0x6e1   :  { %3220 = vmatmul.mubr.f32.vlgmr.msra.gmra.mxu0 %v10475_v57  ;;  %6556 = vmatmul.mubr.f32.vlgmr.msra.gmra.mxu1 %v10475_v57 }
 0x6e2   :  { %3320 = vmatprep.subr.mxu0 %v9801_v55  ;;  %6558 = vmatprep.subr.mxu1 %v12468_v46  ;;  %v13064_v55 = vld [vmem:[#allocation6_spill] sm:$0xff] }
 0x6e3   :  { %3321 = vmatpush1.msra.mxu0 %v9805_v9  ;;  %6559 = vmatpush3.msra.mxu1 %v9808_v31  ;;  %v13065_v9 = vld [vmem:[#allocation18_spill] sm:$0xff]  ;;  %v13066_v31 = vld [vmem:[#allocation7_spill] sm:$0xff] }
 0x6e4   :  { %3322 = vmatprep.subr.mxu0 %v9811_v24  ;;  %6560 = vmatprep.subr.mxu1 %v12468_v46  ;;  %v13067_v24 = vld [vmem:[#allocation8_spill] sm:$0xff] }
 0x6e5   :  { %3323 = vmatpush1.msra.mxu0 %v9815_v5  ;;  %6561 = vmatpush3.msra.mxu1 %v9818_v4  ;;  %v13068_v5 = vld [vmem:[#allocation23_spill] sm:$0xff]  ;;  %v13069_v4 = vld [vmem:[#allocation9_spill] sm:$0xff] }
 0x6e6   :  { %3324 = vmatprep.subr.mxu0 %v9821_v39  ;;  %6562 = vmatprep.subr.mxu1 %v12468_v46  ;;  %v13070_v39 = vld [vmem:[#allocation10_spill] sm:$0xff] }
 0x6e7   :  { %3325 = vmatpush1.msra.mxu0 %v9825_v12  ;;  %6563 = vmatpush3.msra.mxu1 %v9828_v63  ;;  %v13071_v12 = vld [vmem:[#allocation26_spill] sm:$0xff]  ;;  %v13072_v63 = vld [vmem:[#allocation11_spill] sm:$0xff] }
 0x6e8   :  { %3326 = vmatprep.subr.mxu0 %v9831_v54  ;;  %6564 = vmatprep.subr.mxu1 %v12468_v46  ;;  %v5281_v54 = vld [vmem:[%s11790_s0 + $0x28] sm:$0xff] }
 0x6e9   :  { %3327 = vmatpush1.msra.mxu0 %v9835_v43  ;;  %6565 = vmatpush3.msra.mxu1 %v9838_v48  ;;  %v13073_v43 = vld [vmem:[#allocation12_spill] sm:$0xff]  ;;  %v13074_v48 = vld [vmem:[#allocation29_spill] sm:$0xff] }
 0x6ea   :  { %3328 = vmatprep.subr.mxu0 %v9841_v41  ;;  %6566 = vmatprep.subr.mxu1 %v12468_v46  ;;  %v13075_v41 = vld [vmem:[#allocation13_spill] sm:$0xff] }
 0x6eb   :  { %3329 = vmatpush1.msra.mxu0 %v9845_v56  ;;  %6567 = vmatpush3.msra.mxu1 %v9848_v59  ;;  %v13076_v56 = vld [vmem:[#allocation14_spill] sm:$0xff]  ;;  %v13077_v59 = vld [vmem:[#allocation32_spill] sm:$0xff] }
 0x6ec   :  { %3330 = vmatprep.subr.mxu0 %v9851_v26  ;;  %6568 = vmatprep.subr.mxu1 %v12468_v46  ;;  %v13078_v26 = vld [vmem:[#allocation16_spill] sm:$0xff] }
 0x6ed   :  { %3331 = vmatpush1.msra.mxu0 %v9855_v21  ;;  %6569 = vmatpush3.msra.mxu1 %v9858_v3  ;;  %v13079_v21 = vld [vmem:[#allocation17_spill] sm:$0xff]  ;;  %v13080_v3 = vld [vmem:[#allocation35_spill] sm:$0xff] }
 0x6ee   :  { %3332 = vmatprep.subr.mxu0 %v9861_v25  ;;  %6570 = vmatprep.subr.mxu1 %v12468_v46  ;;  %v13081_v25 = vld [vmem:[#allocation19_spill] sm:$0xff] }
 0x6ef   :  { %3333 = vmatpush1.msra.mxu0 %v9865_v16  ;;  %6571 = vmatpush3.msra.mxu1 %v9868_v11  ;;  %v13082_v16 = vld [vmem:[#allocation20_spill] sm:$0xff]  ;;  %v13083_v11 = vld [vmem:[#allocation38_spill] sm:$0xff] }
 0x6f0   :  { %3334 = vmatprep.subr.mxu0 %v9871_v35  ;;  %6572 = vmatprep.subr.mxu1 %v12468_v46  ;;  %v13084_v35 = vld [vmem:[#allocation21_spill] sm:$0xff] }
 0x6f1   :  { %3335 = vmatpush1.msra.mxu0 %v9875_v20  ;;  %6573 = vmatpush3.msra.mxu1 %v9878_v13  ;;  %v13085_v20 = vld [vmem:[#allocation22_spill] sm:$0xff]  ;;  %v13086_v13 = vld [vmem:[#allocation41_spill] sm:$0xff] }
 0x6f2   :  { %3336 = vmatprep.subr.mxu0 %v9881_v15  ;;  %6574 = vmatprep.subr.mxu1 %v12468_v46  ;;  %v13087_v15 = vld [vmem:[#allocation24_spill] sm:$0xff] }
 0x6f3   :  { %3337 = vmatpush1.msra.mxu0 %v9885_v2  ;;  %6575 = vmatpush3.msra.mxu1 %v9888_v23  ;;  %v13088_v2 = vld [vmem:[#allocation25_spill] sm:$0xff]  ;;  %v13089_v23 = vld [vmem:[#allocation44_spill] sm:$0xff] }
 0x6f4   :  { %3338 = vmatprep.subr.mxu0 %v9891_v10  ;;  %6576 = vmatprep.subr.mxu1 %v12468_v46  ;;  %v13090_v10 = vld [vmem:[#allocation27_spill] sm:$0xff] }
 0x6f5   :  { %3339 = vmatpush1.msra.mxu0 %v9895_v7  ;;  %6577 = vmatpush3.msra.mxu1 %v9898_v28  ;;  %v13091_v7 = vld [vmem:[#allocation28_spill] sm:$0xff]  ;;  %v13092_v28 = vld [vmem:[#allocation47_spill] sm:$0xff] }
 0x6f6   :  { %3340 = vmatprep.subr.mxu0 %v9901_v29  ;;  %6578 = vmatprep.subr.mxu1 %v12468_v46  ;;  %v13093_v29 = vld [vmem:[#allocation30_spill] sm:$0xff] }
 0x6f7   :  { %3341 = vmatpush1.msra.mxu0 %v9905_v30  ;;  %6579 = vmatpush3.msra.mxu1 %v9908_v32  ;;  %v13094_v30 = vld [vmem:[#allocation31_spill] sm:$0xff]  ;;  %v13095_v32 = vld [vmem:[#allocation50_spill] sm:$0xff] }
 0x6f8   :  { %3342 = vmatprep.subr.mxu0 %v9911_v34  ;;  %6580 = vmatprep.subr.mxu1 %v12468_v46  ;;  %v13096_v34 = vld [vmem:[#allocation33_spill] sm:$0xff] }
 0x6f9   :  { %3343 = vmatpush1.msra.mxu0 %v9915_v19  ;;  %6581 = vmatpush3.msra.mxu1 %v13063_v14  ;;  %v13097_v19 = vld [vmem:[#allocation34_spill] sm:$0xff]  ;;  %v13101_v14 = vld [vmem:[#allocation52_spill] sm:$0xff] }
 0x6fa   :  { %3344 = vmatprep.subr.mxu0 %v13064_v55  ;;  %6582 = vmatprep.subr.mxu1 %v12468_v46  ;;  %v13102_v55 = vld [vmem:[#allocation39_spill] sm:$0xff] }
 0x6fb   :  { %3345 = vmatpush1.msra.mxu0 %v13065_v9  ;;  %6583 = vmatpush3.msra.mxu1 %v13066_v31  ;;  %v13103_v9 = vld [vmem:[#allocation40_spill] sm:$0xff]  ;;  %v13104_v31 = vld [vmem:[#allocation53_spill] sm:$0xff] }
 0x6fc   :  { %3346 = vmatprep.subr.mxu0 %v13067_v24  ;;  %6584 = vmatprep.subr.mxu1 %v12468_v46  ;;  %v13105_v24 = vld [vmem:[#allocation42_spill] sm:$0xff] }
 0x6fd   :  { %3347 = vmatpush1.msra.mxu0 %v13068_v5  ;;  %6585 = vmatpush3.msra.mxu1 %v13069_v4  ;;  %v13106_v5 = vld [vmem:[#allocation43_spill] sm:$0xff]  ;;  %v13107_v4 = vld [vmem:[#allocation54_spill] sm:$0xff] }
 0x6fe   :  { %3348 = vmatprep.subr.mxu0 %v13070_v39  ;;  %6586 = vmatprep.subr.mxu1 %v12468_v46  ;;  %v13108_v39 = vld [vmem:[#allocation45_spill] sm:$0xff] }
 0x6ff   :  { %3349 = vmatpush1.msra.mxu0 %v13071_v12  ;;  %6587 = vmatpush3.msra.mxu1 %v13072_v63  ;;  %v13109_v12 = vld [vmem:[#allocation46_spill] sm:$0xff]  ;;  %v13110_v63 = vld [vmem:[#allocation55_spill] sm:$0xff] }
 0x700   :  { %3350 = vmatprep.subr.mxu0 %v13073_v43  ;;  %6588 = vmatprep.subr.mxu1 %v12468_v46  ;;  %v13112_v43 = vld [vmem:[#allocation49_spill] sm:$0xff] }
 0x701   :  { %3351 = vmatpush1.msra.mxu0 %v13074_v48  ;;  %3384 = vmatprep.mubr.f32.mxu0 %v12468_v46  ;;  %v13113_v48 = vld [vmem:[#allocation56_spill] sm:$0xff] }
 0x702   :  { %6589 = vmatpush3.msra.mxu1 %v13075_v41  ;;  %3385 = vmatmul.mubr.f32.vlgmr.msra.gmra.mxu0 %v5281_v54  ;;  %v13114_v41 = vld [vmem:[#allocation57_spill] sm:$0xff] }
 0x703   :  { %6590 = vmatprep.mubr.msk.f32.mxu1 %vm7790_vm0, %v12468_v46  ;;  %3461 = vmatprep.subr.mxu0 %v13076_v56  ;;  %v13115_v56 = vld [vmem:[#allocation58_spill] sm:$0xff] }
 0x704   :  { %6593 = vmatprep.subr.mxu1 %v12468_v46  ;;  %6591 = vmatmul.mubr.f32.vlgmr.msra.gmra.mxu1 %v5281_v54  ;;  %v13111_v54 = vld [vmem:[#allocation48_spill] sm:$0xff] }
 0x705   :  { %3462 = vmatpush1.msra.mxu0 %v13077_v59  ;;  %6594 = vmatpush3.msra.mxu1 %v13078_v26  ;;  %v13116_v59 = vld [vmem:[#allocation59_spill] sm:$0xff]  ;;  %v13117_v26 = vld [vmem:[#allocation60_spill] sm:$0xff] }
 0x706   :  { %3463 = vmatprep.subr.mxu0 %v13079_v21  ;;  %6595 = vmatprep.subr.mxu1 %v12468_v46  ;;  %v13118_v21 = vld [vmem:[#allocation61_spill] sm:$0xff] }
 0x707   :  { %3464 = vmatpush1.msra.mxu0 %v13080_v3  ;;  %6596 = vmatpush3.msra.mxu1 %v13081_v25  ;;  %v13119_v3 = vld [vmem:[#allocation62_spill] sm:$0xff]  ;;  %v13120_v25 = vld [vmem:[#allocation63_spill] sm:$0xff] }
 0x708   :  { %3465 = vmatprep.subr.mxu0 %v13082_v16  ;;  %6597 = vmatprep.subr.mxu1 %v12468_v46  ;;  %v13121_v16 = vld [vmem:[#allocation65_spill] sm:$0xff] }
 0x709   :  { %3466 = vmatpush1.msra.mxu0 %v13083_v11  ;;  %6598 = vmatpush3.msra.mxu1 %v13084_v35  ;;  %v13122_v11 = vld [vmem:[#allocation64_spill] sm:$0xff]  ;;  %v13123_v35 = vld [vmem:[#allocation66_spill] sm:$0xff] }
 0x70a   :  { %3467 = vmatprep.subr.mxu0 %v13085_v20  ;;  %6599 = vmatprep.subr.mxu1 %v12468_v46  ;;  %v13124_v20 = vld [vmem:[#allocation67_spill] sm:$0xff] }
 0x70b   :  { %3468 = vmatpush1.msra.mxu0 %v13086_v13  ;;  %6600 = vmatpush3.msra.mxu1 %v13087_v15  ;;  %v13125_v13 = vld [vmem:[#allocation68_spill] sm:$0xff]  ;;  %v13126_v15 = vld [vmem:[#allocation69_spill] sm:$0xff] }
 0x70c   :  { %3469 = vmatprep.subr.mxu0 %v13088_v2  ;;  %6601 = vmatprep.subr.mxu1 %v12468_v46  ;;  %v13127_v2 = vld [vmem:[#allocation70_spill] sm:$0xff] }
 0x70d   :  { %3470 = vmatpush1.msra.mxu0 %v13089_v23  ;;  %6602 = vmatpush3.msra.mxu1 %v13090_v10  ;;  %v13128_v23 = vld [vmem:[#allocation71_spill] sm:$0xff]  ;;  %v13129_v10 = vld [vmem:[#allocation72_spill] sm:$0xff] }
 0x70e   :  { %3471 = vmatprep.subr.mxu0 %v13091_v7  ;;  %6603 = vmatprep.subr.mxu1 %v12468_v46  ;;  %v13130_v7 = vld [vmem:[#allocation73_spill] sm:$0xff] }
 0x70f   :  { %3472 = vmatpush1.msra.mxu0 %v13092_v28  ;;  %6604 = vmatpush3.msra.mxu1 %v13093_v29  ;;  %v13131_v28 = vld [vmem:[#allocation74_spill] sm:$0xff]  ;;  %v13132_v29 = vld [vmem:[#allocation75_spill] sm:$0xff] }
 0x710   :  { %3473 = vmatprep.subr.mxu0 %v13094_v30  ;;  %6605 = vmatprep.subr.mxu1 %v12468_v46  ;;  %v13133_v30 = vld [vmem:[#allocation76_spill] sm:$0xff] }
 0x711   :  { %3474 = vmatpush1.msra.mxu0 %v13095_v32  ;;  %6606 = vmatpush3.msra.mxu1 %v13096_v34  ;;  %v13134_v32 = vld [vmem:[#allocation77_spill] sm:$0xff]  ;;  %v13135_v34 = vld [vmem:[#allocation78_spill] sm:$0xff] }
 0x712   :  { %3475 = vmatprep.subr.mxu0 %v13097_v19  ;;  %6607 = vmatprep.subr.mxu1 %v12468_v46  ;;  %v13136_v19 = vld [vmem:[#allocation79_spill] sm:$0xff] }
 0x713   :  { %3476 = vmatpush1.msra.mxu0 %v13098_v60  ;;  %6608 = vmatpush3.msra.mxu1 %v13099_v52  ;;  %v13137_v60 = vld [vmem:[#allocation80_spill] sm:$0xff]  ;;  %v13138_v52 = vld [vmem:[#allocation81_spill] sm:$0xff] }
 0x714   :  { %3477 = vmatprep.subr.mxu0 %v13100_v58  ;;  %6609 = vmatprep.subr.mxu1 %v12468_v46  ;;  %v13139_v58 = vld [vmem:[#allocation82_spill] sm:$0xff] }
 0x715   :  { %3478 = vmatpush1.msra.mxu0 %v13101_v14  ;;  %6610 = vmatpush3.msra.mxu1 %v13102_v55  ;;  %v13140_v14 = vld [vmem:[#allocation83_spill] sm:$0xff]  ;;  %v13141_v55 = vld [vmem:[#allocation84_spill] sm:$0xff] }
 0x716   :  { %3479 = vmatprep.subr.mxu0 %v13103_v9  ;;  %6611 = vmatprep.subr.mxu1 %v12468_v46  ;;  %v13142_v9 = vld [vmem:[#allocation85_spill] sm:$0xff] }
 0x717   :  { %3480 = vmatpush1.msra.mxu0 %v13104_v31  ;;  %6612 = vmatpush3.msra.mxu1 %v13105_v24  ;;  %v13143_v31 = vld [vmem:[#allocation86_spill] sm:$0xff]  ;;  %v13144_v24 = vld [vmem:[#allocation87_spill] sm:$0xff] }
 0x718   :  { %3481 = vmatprep.subr.mxu0 %v13106_v5  ;;  %6613 = vmatprep.subr.mxu1 %v12468_v46  ;;  %v13145_v5 = vld [vmem:[#allocation88_spill] sm:$0xff] }
 0x719   :  { %3482 = vmatpush1.msra.mxu0 %v13107_v4  ;;  %6614 = vmatpush3.msra.mxu1 %v13108_v39  ;;  %v13146_v4 = vld [vmem:[#allocation89_spill] sm:$0xff]  ;;  %v13147_v39 = vld [vmem:[#allocation90_spill] sm:$0xff] }
 0x71a   :  { %3483 = vmatprep.subr.mxu0 %v13109_v12  ;;  %6615 = vmatprep.subr.mxu1 %v12468_v46  ;;  %v13148_v12 = vld [vmem:[#allocation91_spill] sm:$0xff] }
 0x71b   :  { %3484 = vmatpush1.msra.mxu0 %v13110_v63  ;;  %6616 = vmatpush3.msra.mxu1 %v13111_v54  ;;  %v13149_v63 = vld [vmem:[#allocation92_spill] sm:$0xff]  ;;  %v13150_v54 = vld [vmem:[#allocation93_spill] sm:$0xff] }
 0x71c   :  { %3485 = vmatprep.subr.mxu0 %v13112_v43  ;;  %6617 = vmatprep.subr.mxu1 %v12468_v46  ;;  %v13151_v43 = vld [vmem:[#allocation94_spill] sm:$0xff] }
 0x71d   :  { %3486 = vmatpush1.msra.mxu0 %v13113_v48  ;;  %6618 = vmatpush3.msra.mxu1 %v13114_v41  ;;  %v13152_v48 = vld [vmem:[#allocation95_spill] sm:$0xff]  ;;  %v13153_v41 = vld [vmem:[#allocation96_spill] sm:$0xff] }
 0x71e   :  { %3487 = vmatprep.subr.mxu0 %v13115_v56  ;;  %6619 = vmatprep.subr.mxu1 %v12468_v46  ;;  %v13154_v56 = vld [vmem:[#allocation97_spill] sm:$0xff] }
 0x71f   :  { %3488 = vmatpush1.msra.mxu0 %v13116_v59  ;;  %6620 = vmatpush3.msra.mxu1 %v13117_v26  ;;  %v13155_v59 = vld [vmem:[#allocation98_spill] sm:$0xff]  ;;  %v13156_v26 = vld [vmem:[#allocation99_spill] sm:$0xff] }
 0x720   :  { %3489 = vmatprep.subr.mxu0 %v13118_v21  ;;  %6621 = vmatprep.subr.mxu1 %v12468_v46  ;;  %v13157_v21 = vld [vmem:[#allocation100_spill] sm:$0xff] }
 0x721   :  { %3490 = vmatpush1.msra.mxu0 %v13119_v3  ;;  %6622 = vmatpush3.msra.mxu1 %v13120_v25  ;;  %v13158_v3 = vld [vmem:[#allocation101_spill] sm:$0xff]  ;;  %v13159_v25 = vld [vmem:[#allocation102_spill] sm:$0xff] }
 0x722   :  { %3491 = vmatprep.subr.mxu0 %v13121_v16  ;;  %6623 = vmatprep.subr.mxu1 %v12468_v46  ;;  %v13160_v16 = vld [vmem:[#allocation103_spill] sm:$0xff] }
 0x723   :  { %3492 = vmatpush1.msra.mxu0 %v13122_v11  ;;  %3525 = vmatprep.mubr.f32.mxu0 %v12468_v46  ;;  %v13161_v11 = vld [vmem:[#allocation104_spill] sm:$0xff] }
 0x724   :  { %6624 = vmatpush3.msra.mxu1 %v13123_v35  ;;  %6625 = vmatprep.mubr.msk.f32.mxu1 %vm7790_vm0, %v12468_v46  ;;  %v13162_v35 = vld [vmem:[#allocation105_spill] sm:$0xff] }
 0x725   :  { %3526 = vmatmul.mubr.f32.vlgmr.msra.gmra.mxu0 %v10315_v0  ;;  %6626 = vmatmul.mubr.f32.vlgmr.msra.gmra.mxu1 %v10315_v0 }
 0x726   :  { %3624 = vmatprep.subr.mxu0 %v13124_v20  ;;  %6628 = vmatprep.subr.mxu1 %v12468_v46  ;;  %v13163_v20 = vld [vmem:[#allocation106_spill] sm:$0xff] }
 0x727   :  { %3625 = vmatpush1.msra.mxu0 %v13125_v13  ;;  %6629 = vmatpush3.msra.mxu1 %v13126_v15  ;;  %v13164_v13 = vld [vmem:[#allocation107_spill] sm:$0xff]  ;;  %v13165_v15 = vld [vmem:[#allocation108_spill] sm:$0xff] }
 0x728   :  { %3626 = vmatprep.subr.mxu0 %v13127_v2  ;;  %6630 = vmatprep.subr.mxu1 %v12468_v46  ;;  %v13166_v2 = vld [vmem:[#allocation109_spill] sm:$0xff] }
 0x729   :  { %3627 = vmatpush1.msra.mxu0 %v13128_v23  ;;  %6631 = vmatpush3.msra.mxu1 %v13129_v10  ;;  %v13167_v23 = vld [vmem:[#allocation110_spill] sm:$0xff]  ;;  %v13168_v10 = vld [vmem:[#allocation111_spill] sm:$0xff] }
 0x72a   :  { %3628 = vmatprep.subr.mxu0 %v13130_v7  ;;  %6632 = vmatprep.subr.mxu1 %v12468_v46  ;;  %v13169_v7 = vld [vmem:[#allocation112_spill] sm:$0xff] }
 0x72b   :  { %3629 = vmatpush1.msra.mxu0 %v13131_v28  ;;  %6633 = vmatpush3.msra.mxu1 %v13132_v29  ;;  %v13170_v28 = vld [vmem:[#allocation113_spill] sm:$0xff]  ;;  %v13171_v29 = vld [vmem:[#allocation114_spill] sm:$0xff] }
 0x72c   :  { %3630 = vmatprep.subr.mxu0 %v13133_v30  ;;  %6634 = vmatprep.subr.mxu1 %v12468_v46  ;;  %v13172_v30 = vld [vmem:[#allocation115_spill] sm:$0xff] }
 0x72d   :  { %3631 = vmatpush1.msra.mxu0 %v13134_v32  ;;  %6635 = vmatpush3.msra.mxu1 %v13135_v34 }
 0x72e   :  { %3632 = vmatprep.subr.mxu0 %v13136_v19  ;;  %6636 = vmatprep.subr.mxu1 %v12468_v46 }
 0x72f   :  { %3633 = vmatpush1.msra.mxu0 %v13137_v60  ;;  %6637 = vmatpush3.msra.mxu1 %v13138_v52  ;;  %v13173_v52 = vld [vmem:[#allocation15_spill] sm:$0xff] }
 0x730   :  { %3634 = vmatprep.subr.mxu0 %v13139_v58  ;;  %6638 = vmatprep.subr.mxu1 %v12468_v46 }
 0x731   :  { %3635 = vmatpush1.msra.mxu0 %v13140_v14  ;;  %6639 = vmatpush3.msra.mxu1 %v13141_v55 }
 0x732   :  { %3636 = vmatprep.subr.mxu0 %v13142_v9  ;;  %6640 = vmatprep.subr.mxu1 %v12468_v46 }
 0x733   :  { %3637 = vmatpush1.msra.mxu0 %v13143_v31  ;;  %6641 = vmatpush3.msra.mxu1 %v13144_v24 }
 0x734   :  { %3638 = vmatprep.subr.mxu0 %v13145_v5  ;;  %6642 = vmatprep.subr.mxu1 %v12468_v46 }
 0x735   :  { %3639 = vmatpush1.msra.mxu0 %v13146_v4  ;;  %6643 = vmatpush3.msra.mxu1 %v13147_v39  ;;  %v10696_v39 = vld [vmem:[%s11792_s2 + $0x7] ss:$0 sm:$0xff] }
 0x736   :  { %3640 = vmatprep.subr.mxu0 %v13148_v12  ;;  %6644 = vmatprep.subr.mxu1 %v12468_v46 }
 0x737   :  { %3641 = vmatpush1.msra.mxu0 %v13149_v63  ;;  %6645 = vmatpush3.msra.mxu1 %v13150_v54 }
 0x738   :  { %3642 = vmatprep.subr.mxu0 %v13151_v43  ;;  %6646 = vmatprep.subr.mxu1 %v12468_v46 }
 0x739   :  { %3643 = vmatpush1.msra.mxu0 %v13152_v48  ;;  %6647 = vmatpush3.msra.mxu1 %v13153_v41 }
 0x73a   :  { %3644 = vmatprep.subr.mxu0 %v13154_v56  ;;  %6648 = vmatprep.subr.mxu1 %v12468_v46 }
 0x73b   :  { %3645 = vmatpush1.msra.mxu0 %v13155_v59  ;;  %6649 = vmatpush3.msra.mxu1 %v13156_v26 }
 0x73c   :  { %3646 = vmatprep.subr.mxu0 %v13157_v21  ;;  %6650 = vmatprep.subr.mxu1 %v12468_v46 }
 0x73d   :  { %3647 = vmatpush1.msra.mxu0 %v13158_v3  ;;  %6651 = vmatpush3.msra.mxu1 %v13159_v25 }
 0x73e   :  { %3648 = vmatprep.subr.mxu0 %v13160_v16  ;;  %6652 = vmatprep.subr.mxu1 %v12468_v46 }
 0x73f   :  { %3649 = vmatpush1.msra.mxu0 %v13161_v11  ;;  %6653 = vmatpush3.msra.mxu1 %v13162_v35 }
 0x740   :  { %3650 = vmatprep.subr.mxu0 %v13163_v20  ;;  %6654 = vmatprep.subr.mxu1 %v12468_v46 }
 0x741   :  { %3651 = vmatpush1.msra.mxu0 %v13164_v13  ;;  %6655 = vmatpush3.msra.mxu1 %v13165_v15 }
 0x742   :  { %3652 = vmatprep.subr.mxu0 %v13166_v2  ;;  %6656 = vmatprep.subr.mxu1 %v12468_v46 }
 0x743   :  { %3653 = vmatpush1.msra.mxu0 %v13167_v23  ;;  %6657 = vmatpush3.msra.mxu1 %v13168_v10 }
 0x744   :  { %3654 = vmatprep.subr.mxu0 %v13169_v7  ;;  %6658 = vmatprep.subr.mxu1 %v12468_v46 }
 0x745   :  { %3655 = vmatpush1.msra.mxu0 %v13170_v28  ;;  %6659 = vmatpush3.msra.mxu1 %v13171_v29 }
 0x746   :  { %3688 = vmatprep.mubr.f32.mxu0 %v12468_v46  ;;  %6660 = vmatprep.mubr.msk.f32.mxu1 %vm7790_vm0, %v12468_v46 }
 0x747   :  { %3765 = vmatprep.subr.mxu0 %v13172_v30  ;;  %6663 = vmatprep.subr.mxu1 %v12468_v46 }
 0x780   :  { %v3151_v32 = vpop.f32.mrf.mxu1  ;;  %v3080_v19 = vpop.f32.mrf.mxu0 }
 0x781   :  { %v3081_v58 = vadd.f32 %v3080_v19, %v13173_v52  ;;  %v3152_v54 = vadd.f32 %v3151_v32, %v8729_v33 }
 0x782   :  { %v6522_v34 = vpop.f32.mrf.mxu1  ;;  %v3082_v60 = vpop.f32.mrf.mxu0 }
 0x7a1   :  { %v3221_v14 = vpop.f32.mrf.mxu0  ;;  %v3292_v55 = vpop.f32.mrf.mxu1 }
 0x7a2   :  { %v3296_v9 = vadd.f32 %v3221_v14, %v3081_v58  ;;  %v3310_v12 = vadd.f32 %v10696_v39, %v3292_v55  ;;  %v3083_v58 = vadd.f32 %v3082_v60, %v8739_v18  ;;  %v13184_v60 = vld [vmem:[#allocation126_spill] sm:$0xff] }
 0x7a3   :  { %v6557_v31 = vpop.f32.mrf.mxu1  ;;  %v3223_v59 = vpop.f32.mrf.mxu0 }
 0x7a4   :  { %v5279_v24 = vmul.f32 -1.442695, %v3296_v9  ;;  %v3303_v55 = vadd.f32 %v3223_v59, %v3083_v58  ;;  %v13190_v59 = vld [vmem:[#allocation132_spill] sm:$0xff]  ;;  %v10807_v58 = vld [vmem:[#allocation2 + $0x548] sm:$0xff] }
 0x7a6   :  { %7108 = vpow2.f32 %v5279_v24  ;;  %v5280_v9 = vmul.f32 -1.442695, %v3303_v55  ;;  %v10813_v55 = vld [vmem:[#allocation2 + $0x4e8] sm:$0xff] }
 0x7b3   :  { %v7109_v5 = vpop.eup %7108 }
 0x7b4   :  { %v3300_v4 = vadd.f32 1.0, %v7109_v5 }
 0x7b6   :  { %7110 = vrcp.f32 %v3300_v4 }
 0x7c2   :  { %v3386_v26 = vpop.f32.mrf.mxu0 }
 0x7c3   :  { %v7111_v63 = vpop.eup %7110  ;;  %v3387_v3 = vadd.f32 %v3386_v26, %v12605_v53  ;;  %v13191_v26 = vld [vmem:[#allocation133_spill] sm:$0xff] }
 0x7c4   :  { %v3311_v43 = vmul.f32 %v7111_v63, %v3310_v12  ;;  %v3457_v48 = vpop.f32.mrf.mxu1  ;;  %v3388_v21 = vpop.f32.mrf.mxu0 }
 0x7c5   :  { %v3389_v15 = vadd.f32 %v3388_v21, %v12606_v8  ;;  %v3458_v34 = vadd.f32 %v3457_v48, %v8337_v49  ;;  %v13187_v48 = vld [vmem:[#allocation129_spill] sm:$0xff]  ;;  %v13192_v21 = vld [vmem:[#allocation134_spill] sm:$0xff] }
 0x7c6   :  { %v10700_v41 = vadd.f32 %v3311_v43, %v3152_v54  ;;  %v6592_v56 = vpop.f32.mrf.mxu1  ;;  %v13185_v54 = vld [vmem:[#allocation127_spill] sm:$0xff]  ;;  %v13186_v43 = vld [vmem:[#allocation128_spill] sm:$0xff] }
 0x7c7   :  { %v13189_v56 = vld [vmem:[#allocation131_spill] sm:$0xff] }
 0x7e5   :  { %v3527_v25 = vpop.f32.mrf.mxu0  ;;  %v3598_v16 = vpop.f32.mrf.mxu1 }
 0x7e6   :  { %v3602_v11 = vadd.f32 %v3527_v25, %v3387_v3  ;;  %v3616_v30 = vadd.f32 %v10309_v6, %v3598_v16  ;;  %v13193_v3 = vld [vmem:[#allocation135_spill] sm:$0xff]  ;;  %v13194_v25 = vld [vmem:[#allocation136_spill] sm:$0xff]  ;;  %v13195_v16 = vld [vmem:[#allocation137_spill] sm:$0xff] }
 0x7e7   :  { %v6627_v35 = vpop.f32.mrf.mxu1  ;;  %v3529_v13 = vpop.f32.mrf.mxu0 }
 0x7e8   :  { %v5282_v20 = vmul.f32 -1.442695, %v3602_v11  ;;  %v3609_v2 = vadd.f32 %v3529_v13, %v3389_v15  ;;  %v13196_v35 = vld [vmem:[#allocation138_spill] sm:$0xff]  ;;  %v13198_v13 = vld [vmem:[#allocation140_spill] sm:$0xff] }
 0x7ea   :  { %7112 = vpow2.f32 %v5282_v20  ;;  %v5283_v23 = vmul.f32 -1.442695, %v3609_v2  ;;  %v13197_v20 = vld [vmem:[#allocation139_spill] sm:$0xff]  ;;  %v13199_v2 = vld [vmem:[#allocation141_spill] sm:$0xff] }
 0x7ec   :  { %7114 = vpow2.f32 %v5283_v23  ;;  %v13200_v23 = vld [vmem:[#allocation142_spill] sm:$0xff] }
 0x7f7   :  { %v7113_v10 = vpop.eup %7112 }
 0x7f8   :  { %v3606_v7 = vadd.f32 1.0, %v7113_v10  ;;  %v13201_v10 = vld [vmem:[#allocation143_spill] sm:$0xff] }
 0x7f9   :  { %v7115_v28 = vpop.eup %7114 }
 0x7fa   :  { %7116 = vrcp.f32 %v3606_v7  ;;  %v3613_v29 = vadd.f32 1.0, %v7115_v28  ;;  %v13202_v28 = vld [vmem:[#allocation144_spill] sm:$0xff] }
 0x7fc   :  { %7118 = vrcp.f32 %v3613_v29  ;;  %v13203_v29 = vld [vmem:[#allocation145_spill] sm:$0xff] }
 0x807   :  { %v7117_v32 = vpop.eup %7116 }
 0x808   :  { %v3617_v19 = vmul.f32 %v7117_v32, %v3616_v30  ;;  %v13204_v32 = vld [vmem:[#allocation146_spill] sm:$0xff] }
 0x809   :  { %v7119_v31 = vpop.eup %7118 }
 0x80a   :  { %v3618_v14 = vadd.f32 %v3617_v19, %v3458_v34  ;;  %v3620_v24 = vsub.f32 1.0, %v7119_v31  ;;  %v3622_v12 = vmul.f32 %v7119_v31, %v10315_v0  ;;  %v10803_v19 = vld [vmem:[#allocation2 + $0x550] sm:$0xff] }
 0x80b   :  { %v10820_v31 = vld [vmem:[#allocation2 + $0x4f0] sm:$0xff] }
 0x80c   :  { %7120 = vtanh.f32 %v3618_v14  ;;  %v10810_v14 = vld [vmem:[#allocation2 + $0x558] sm:$0xff] }
 0x80d   :  { %7122 = vpow2.f32 %v5280_v9  ;;  %v10817_v9 = vld [vmem:[#allocation2 + $0x4e0] sm:$0xff] }
 0x819   :  { %v7121_v5 = vpop.eup %7120 }
 0x81a   :  { %v3621_v4 = vmul.f32 %v7121_v5, %v3620_v24  ;;  %v7123_v6 = vpop.eup %7122  ;;  %v10823_v24 = vld [vmem:[#allocation2 + $0x480] sm:$0xff]  ;;  %v10827_v5 = vld [vmem:[#allocation2 + $0x478] sm:$0xff] }
 0x81b   :  { %v3307_v0 = vadd.f32 1.0, %v7123_v6  ;;  %v10837_v6 = vld [vmem:[#allocation2 + $0x410] sm:$0xff] }
 0x81c   :  { %v10708_v63 = vadd.f32 %v3622_v12, %v3621_v4  ;;  %v10830_v4 = vld [vmem:[#allocation2 + $0x488] sm:$0xff]  ;;  %v10833_v12 = vld [vmem:[#allocation2 + $0x418] sm:$0xff] }
 0x81d   :  { %7124 = vrcp.f32 %v3307_v0  ;;  %v10840_v0 = vld [vmem:[#allocation2 + $0x420] sm:$0xff] }
 0x81e   :  { %3689 = vmatmul.mubr.f32.vlgmr.msra.gmra.mxu0 %v10708_v63  ;;  %6661 = vmatmul.mubr.f32.vlgmr.msra.gmra.mxu1 %v10708_v63  ;;  %7126 = vtanh.f32 %v10700_v41  ;;  %v13188_v41 = vld [vmem:[#allocation130_spill] sm:$0xff] }
 0x81f   :  { %3766 = vmatpush1.msra.mxu0 %v10319_v50  ;;  %6664 = vmatpush3.msra.mxu1 %v10322_v38  ;;  %v13174_v50 = vld [vmem:[#allocation116_spill] sm:$0xff]  ;;  %v13175_v38 = vld [vmem:[#allocation117_spill] sm:$0xff] }
 0x820   :  { %3767 = vmatprep.subr.mxu0 %v10325_v62  ;;  %6665 = vmatprep.subr.mxu1 %v12468_v46  ;;  %v13176_v62 = vld [vmem:[#allocation118_spill] sm:$0xff] }
 0x821   :  { %3768 = vmatpush1.msra.mxu0 %v10329_v27  ;;  %6666 = vmatpush3.msra.mxu1 %v10332_v40  ;;  %v13177_v27 = vld [vmem:[#allocation119_spill] sm:$0xff]  ;;  %v13178_v40 = vld [vmem:[#allocation120_spill] sm:$0xff] }
 0x822   :  { %3769 = vmatprep.subr.mxu0 %v10335_v45  ;;  %6667 = vmatprep.subr.mxu1 %v12468_v46  ;;  %v13179_v45 = vld [vmem:[#allocation121_spill] sm:$0xff] }
 0x823   :  { %3770 = vmatpush1.msra.mxu0 %v10339_v37  ;;  %6668 = vmatpush3.msra.mxu1 %v10342_v17  ;;  %v13180_v37 = vld [vmem:[#allocation122_spill] sm:$0xff]  ;;  %v13181_v17 = vld [vmem:[#allocation123_spill] sm:$0xff] }
 0x824   :  { %3771 = vmatprep.subr.mxu0 %v10345_v42  ;;  %6669 = vmatprep.subr.mxu1 %v12468_v46  ;;  %v13182_v42 = vld [vmem:[#allocation124_spill] sm:$0xff] }
 0x825   :  { %3772 = vmatpush1.msra.mxu0 %v10349_v51  ;;  %6670 = vmatpush3.msra.mxu1 %v13174_v50  ;;  %v13183_v51 = vld [vmem:[#allocation125_spill] sm:$0xff]  ;;  %v10843_v50 = vld [vmem:[#allocation2 + $0x3b0] sm:$0xff] }
 0x826   :  { %3773 = vmatprep.subr.mxu0 %v13175_v38  ;;  %6671 = vmatprep.subr.mxu1 %v12468_v46  ;;  %v10847_v38 = vld [vmem:[#allocation2 + $0x3a8] sm:$0xff] }
 0x827   :  { %3774 = vmatpush1.msra.mxu0 %v13176_v62  ;;  %6672 = vmatpush3.msra.mxu1 %v13177_v27  ;;  %v10850_v62 = vld [vmem:[#allocation2 + $0x3b8] sm:$0xff]  ;;  %v10853_v27 = vld [vmem:[#allocation2 + $0x348] sm:$0xff] }
 0x828   :  { %3775 = vmatprep.subr.mxu0 %v13178_v40  ;;  %6673 = vmatprep.subr.mxu1 %v12468_v46  ;;  %v10857_v40 = vld [vmem:[#allocation2 + $0x340] sm:$0xff] }
 0x829   :  { %3776 = vmatpush1.msra.mxu0 %v13179_v45  ;;  %6674 = vmatpush3.msra.mxu1 %v13180_v37  ;;  %v10860_v45 = vld [vmem:[#allocation2 + $0x350] sm:$0xff]  ;;  %v10863_v37 = vld [vmem:[#allocation2 + $0x2e0] sm:$0xff] }
 0x82a   :  { %3777 = vmatprep.subr.mxu0 %v13181_v17  ;;  %6675 = vmatprep.subr.mxu1 %v12468_v46  ;;  %v7125_v11 = vpop.eup %7124  ;;  %v10867_v17 = vld [vmem:[#allocation2 + $0x2d8] sm:$0xff] }
 0x82b   :  { %3778 = vmatpush1.msra.mxu0 %v13182_v42  ;;  %6676 = vmatpush3.msra.mxu1 %v13183_v51  ;;  %v7127_v15 = vpop.eup %7126  ;;  %v3314_v7 = vsub.f32 1.0, %v7125_v11  ;;  %v3316_v34 = vmul.f32 %v7125_v11, %v10475_v57  ;;  %v10800_v57 = vld [vmem:[#allocation2 + $0x5c0] sm:$0xff]  ;;  %v10870_v42 = vld [vmem:[#allocation2 + $0x2e8] sm:$0xff]  ;;  %v10873_v51 = vld [vmem:[#allocation2 + $0x278] sm:$0xff] }
 0x82c   :  { %3779 = vmatprep.subr.mxu0 %v13184_v60  ;;  %6677 = vmatprep.subr.mxu1 %v12468_v46  ;;  %v10877_v60 = vld [vmem:[#allocation2 + $0x270] sm:$0xff] }
 0x82d   :  { %3780 = vmatpush1.msra.mxu0 %v13185_v54  ;;  %6678 = vmatpush3.msra.mxu1 %v13186_v43  ;;  %v3315_v30 = vmul.f32 %v7127_v15, %v3314_v7  ;;  %v10880_v54 = vld [vmem:[#allocation2 + $0x280] sm:$0xff]  ;;  %v10883_v43 = vld [vmem:[#allocation2 + $0x210] sm:$0xff]  ;;  %v10930_v15 = vld [vmem:[#allocation2 + $0x78] sm:$0xff] }
 0x82e   :  { %3781 = vmatprep.subr.mxu0 %v13187_v48  ;;  %6679 = vmatprep.subr.mxu1 %v12468_v46  ;;  %v10887_v48 = vld [vmem:[#allocation2 + $0x208] sm:$0xff]  ;;  %v10917_v11 = vld [vmem:[#allocation2 + $0xd0] sm:$0xff]  ;;  %13214 = vst [vmem:[#allocation11_spill] sm:$0xff] %v10930_v15 }
 0x82f   :  { %3782 = vmatpush1.msra.mxu0 %v13188_v41  ;;  %6680 = vmatpush3.msra.mxu1 %v13189_v56  ;;  %v10890_v41 = vld [vmem:[#allocation2 + $0x218] sm:$0xff]  ;;  %v10893_v56 = vld [vmem:[#allocation2 + $0x1a8] sm:$0xff]  ;;  %13210 = vst [vmem:[#allocation23_spill] sm:$0xff] %v10917_v11  ;;  %v10944_v7 = vld [vmem:[#allocation2 + $0x10] sm:$0xff] }
 0x830   :  { %3783 = vmatprep.subr.mxu0 %v13190_v59  ;;  %6681 = vmatprep.subr.mxu1 %v12468_v46  ;;  %v10897_v59 = vld [vmem:[#allocation2 + $0x1a0] sm:$0xff]  ;;  %13217 = vst [vmem:[#allocation13_spill] sm:$0xff] %v10944_v7 }
 0x831   :  { %3784 = vmatpush1.msra.mxu0 %v13191_v26  ;;  %6682 = vmatpush3.msra.mxu1 %v13192_v21  ;;  %v10900_v26 = vld [vmem:[#allocation2 + $0x1b0] sm:$0xff]  ;;  %v10903_v21 = vld [vmem:[#allocation2 + $0x140] sm:$0xff] }
 0x832   :  { %3785 = vmatprep.subr.mxu0 %v13193_v3  ;;  %6683 = vmatprep.subr.mxu1 %v12468_v46  ;;  %13205 = vst [vmem:[#allocation5_spill] sm:$0xff] %v10900_v26  ;;  %13206 = vst [vmem:[#allocation6_spill] sm:$0xff] %v10903_v21  ;;  %v10907_v3 = vld [vmem:[#allocation2 + $0x138] sm:$0xff] }
 0x833   :  { %3786 = vmatpush1.msra.mxu0 %v13194_v25  ;;  %6684 = vmatpush3.msra.mxu1 %v13195_v16  ;;  %13207 = vst [vmem:[#allocation18_spill] sm:$0xff] %v10907_v3  ;;  %v10910_v25 = vld [vmem:[#allocation2 + $0x148] sm:$0xff]  ;;  %v10913_v16 = vld [vmem:[#allocation2 + $0xd8] sm:$0xff] }
 0x834   :  { %3787 = vmatprep.subr.mxu0 %v13196_v35  ;;  %6685 = vmatprep.subr.mxu1 %v12468_v46  ;;  %13208 = vst [vmem:[#allocation7_spill] sm:$0xff] %v10910_v25  ;;  %13209 = vst [vmem:[#allocation8_spill] sm:$0xff] %v10913_v16  ;;  %v10920_v35 = vld [vmem:[#allocation2 + $0xe0] sm:$0xff] }
 0x835   :  { %3788 = vmatpush1.msra.mxu0 %v13197_v20  ;;  %6686 = vmatpush3.msra.mxu1 %v13198_v13  ;;  %13211 = vst [vmem:[#allocation9_spill] sm:$0xff] %v10920_v35  ;;  %v10923_v20 = vld [vmem:[#allocation2 + $0x70] sm:$0xff]  ;;  %v10927_v13 = vld [vmem:[#allocation2 + $0x68] sm:$0xff] }
 0x836   :  { %3789 = vmatprep.subr.mxu0 %v13199_v2  ;;  %6687 = vmatprep.subr.mxu1 %v12468_v46  ;;  %13212 = vst [vmem:[#allocation10_spill] sm:$0xff] %v10923_v20  ;;  %13213 = vst [vmem:[#allocation26_spill] sm:$0xff] %v10927_v13  ;;  %v5286_v2 = vld [vmem:[%s11790_s0 + $0x30] sm:$0xff] }
 0x837   :  { %3790 = vmatpush1.msra.mxu0 %v13200_v23  ;;  %6688 = vmatpush3.msra.mxu1 %v13201_v10  ;;  %v10936_v23 = vld [vmem:[#allocation2 + $0x8] sm:$0xff]  ;;  %v10940_v10 = vld [vmem:[#allocation2] sm:$0xff] }
 0x838   :  { %3791 = vmatprep.subr.mxu0 %v13202_v28  ;;  %6689 = vmatprep.subr.mxu1 %v12468_v46  ;;  %13215 = vst [vmem:[#allocation12_spill] sm:$0xff] %v10936_v23  ;;  %13216 = vst [vmem:[#allocation29_spill] sm:$0xff] %v10940_v10  ;;  %v10949_v28 = vld [vmem:[#allocation2 + $0x638] sm:$0xff] }
 0x839   :  { %3792 = vmatpush1.msra.mxu0 %v13203_v29  ;;  %6690 = vmatpush3.msra.mxu1 %v10453_v36  ;;  %v10776_v36 = vadd.f32 %v3316_v34, %v3315_v30  ;;  %13218 = vst [vmem:[#allocation14_spill] sm:$0xff] %v10949_v28  ;;  %v10953_v29 = vld [vmem:[#allocation2 + $0x630] sm:$0xff]  ;;  %v10956_v30 = vld [vmem:[#allocation2 + $0x640] sm:$0xff]  ;;  %v10963_v34 = vld [vmem:[#allocation2 + $0x5c8] sm:$0xff] }
 0x83a   :  { %3793 = vmatprep.subr.mxu0 %v10456_v1  ;;  %6691 = vmatprep.subr.mxu1 %v12468_v46  ;;  %v10783_v1 = vld [vmem:[#allocation2 + $0x620] sm:$0xff]  ;;  %13219 = vst [vmem:[#allocation32_spill] sm:$0xff] %v10953_v29  ;;  %13220 = vst [vmem:[#allocation16_spill] sm:$0xff] %v10956_v30 }
 0x83b   :  { %3794 = vmatpush1.msra.mxu0 %v13204_v32  ;;  %6692 = vmatpush3.msra.mxu1 %v10463_v61  ;;  %v10790_v61 = vld [vmem:[#allocation2 + $0x628] sm:$0xff]  ;;  %v10959_v32 = vld [vmem:[#allocation2 + $0x5d0] sm:$0xff]  ;;  %13222 = vst [vmem:[#allocation35_spill] sm:$0xff] %v10963_v34 }
 0x83c   :  { %3795 = vmatprep.subr.mxu0 %v10467_v44  ;;  %6693 = vmatprep.subr.mxu1 %v12468_v46  ;;  %v10787_v44 = vld [vmem:[#allocation2 + $0x618] sm:$0xff]  ;;  %13221 = vst [vmem:[#allocation17_spill] sm:$0xff] %v10959_v32 }
 0x83d   :  { %3796 = vmatpush1.msra.mxu0 %v10471_v22  ;;  %3829 = vmatprep.mubr.f32.mxu0 %v12468_v46  ;;  %v10797_v22 = vld [vmem:[#allocation2 + $0x5b0] sm:$0xff] }
 0x83e   :  { %6694 = vmatpush3.msra.mxu1 %v10477_v47  ;;  %6695 = vmatprep.mubr.msk.f32.mxu1 %vm7790_vm0, %v12468_v46  ;;  %v10793_v47 = vld [vmem:[#allocation2 + $0x5b8] sm:$0xff] }
 0x83f   :  { %3830 = vmatmul.mubr.f32.vlgmr.msra.gmra.mxu0 %v10776_v36  ;;  %6696 = vmatmul.mubr.f32.vlgmr.msra.gmra.mxu1 %v10776_v36 }
 0x840   :  { %3930 = vmatprep.subr.mxu0 %v10783_v1  ;;  %6698 = vmatprep.subr.mxu1 %v12468_v46 }
 0x841   :  { %3931 = vmatpush1.msra.mxu0 %v10787_v44  ;;  %6699 = vmatpush3.msra.mxu1 %v10790_v61 }
 0x842   :  { %3932 = vmatprep.subr.mxu0 %v10793_v47  ;;  %6700 = vmatprep.subr.mxu1 %v12468_v46 }
 0x843   :  { %3933 = vmatpush1.msra.mxu0 %v10797_v22  ;;  %6701 = vmatpush3.msra.mxu1 %v10800_v57 }
 0x844   :  { %3934 = vmatprep.subr.mxu0 %v10803_v19  ;;  %6702 = vmatprep.subr.mxu1 %v12468_v46 }
 0x845   :  { %3935 = vmatpush1.msra.mxu0 %v10807_v58  ;;  %6703 = vmatpush3.msra.mxu1 %v10810_v14 }
 0x846   :  { %3936 = vmatprep.subr.mxu0 %v10813_v55  ;;  %6704 = vmatprep.subr.mxu1 %v12468_v46 }
 0x847   :  { %3937 = vmatpush1.msra.mxu0 %v10817_v9  ;;  %6705 = vmatpush3.msra.mxu1 %v10820_v31 }
 0x848   :  { %3938 = vmatprep.subr.mxu0 %v10823_v24  ;;  %6706 = vmatprep.subr.mxu1 %v12468_v46 }
 0x849   :  { %3939 = vmatpush1.msra.mxu0 %v10827_v5  ;;  %6707 = vmatpush3.msra.mxu1 %v10830_v4 }
 0x84a   :  { %3940 = vmatprep.subr.mxu0 %v10833_v12  ;;  %6708 = vmatprep.subr.mxu1 %v12468_v46 }
 0x84b   :  { %3941 = vmatpush1.msra.mxu0 %v10837_v6  ;;  %6709 = vmatpush3.msra.mxu1 %v10840_v0 }
 0x84c   :  { %3942 = vmatprep.subr.mxu0 %v10843_v50  ;;  %6710 = vmatprep.subr.mxu1 %v12468_v46 }
 0x84d   :  { %3943 = vmatpush1.msra.mxu0 %v10847_v38  ;;  %6711 = vmatpush3.msra.mxu1 %v10850_v62 }
 0x84e   :  { %3944 = vmatprep.subr.mxu0 %v10853_v27  ;;  %6712 = vmatprep.subr.mxu1 %v12468_v46 }
 0x84f   :  { %3945 = vmatpush1.msra.mxu0 %v10857_v40  ;;  %6713 = vmatpush3.msra.mxu1 %v10860_v45 }
 0x850   :  { %3946 = vmatprep.subr.mxu0 %v10863_v37  ;;  %6714 = vmatprep.subr.mxu1 %v12468_v46 }
 0x851   :  { %3947 = vmatpush1.msra.mxu0 %v10867_v17  ;;  %6715 = vmatpush3.msra.mxu1 %v10870_v42 }
 0x852   :  { %3948 = vmatprep.subr.mxu0 %v10873_v51  ;;  %6716 = vmatprep.subr.mxu1 %v12468_v46 }
 0x853   :  { %3949 = vmatpush1.msra.mxu0 %v10877_v60  ;;  %6717 = vmatpush3.msra.mxu1 %v10880_v54 }
 0x854   :  { %3950 = vmatprep.subr.mxu0 %v10883_v43  ;;  %6718 = vmatprep.subr.mxu1 %v12468_v46 }
 0x855   :  { %3951 = vmatpush1.msra.mxu0 %v10887_v48  ;;  %6719 = vmatpush3.msra.mxu1 %v10890_v41 }
 0x856   :  { %3952 = vmatprep.subr.mxu0 %v10893_v56  ;;  %6720 = vmatprep.subr.mxu1 %v12468_v46 }
 0x857   :  { %3953 = vmatpush1.msra.mxu0 %v10897_v59  ;;  %6721 = vmatpush3.msra.mxu1 %v10900_v26 }
 0x858   :  { %3954 = vmatprep.subr.mxu0 %v10903_v21  ;;  %6722 = vmatprep.subr.mxu1 %v12468_v46 }
 0x859   :  { %3955 = vmatpush1.msra.mxu0 %v10907_v3  ;;  %6723 = vmatpush3.msra.mxu1 %v10910_v25 }
 0x85a   :  { %3956 = vmatprep.subr.mxu0 %v10913_v16  ;;  %6724 = vmatprep.subr.mxu1 %v12468_v46 }
 0x85b   :  { %3957 = vmatpush1.msra.mxu0 %v10917_v11  ;;  %6725 = vmatpush3.msra.mxu1 %v10920_v35 }
 0x85c   :  { %3958 = vmatprep.subr.mxu0 %v10923_v20  ;;  %6726 = vmatprep.subr.mxu1 %v12468_v46 }
 0x85d   :  { %3959 = vmatpush1.msra.mxu0 %v10927_v13  ;;  %6727 = vmatpush3.msra.mxu1 %v10930_v15 }
 0x85e   :  { %3960 = vmatprep.subr.mxu0 %v10936_v23  ;;  %6728 = vmatprep.subr.mxu1 %v12468_v46 }
 0x85f   :  { %3961 = vmatpush1.msra.mxu0 %v10940_v10  ;;  %3994 = vmatprep.mubr.f32.mxu0 %v12468_v46 }
 0x860   :  { %6729 = vmatpush3.msra.mxu1 %v10944_v7  ;;  %3995 = vmatmul.mubr.f32.vlgmr.msra.gmra.mxu0 %v5286_v2 }
 0x861   :  { %6730 = vmatprep.mubr.msk.f32.mxu1 %vm7790_vm0, %v12468_v46  ;;  %4071 = vmatprep.subr.mxu0 %v10949_v28  ;;  %v10966_v28 = vld [vmem:[#allocation2 + $0x5d8] sm:$0xff] }
 0x862   :  { %6733 = vmatprep.subr.mxu1 %v12468_v46  ;;  %6731 = vmatmul.mubr.f32.vlgmr.msra.gmra.mxu1 %v5286_v2  ;;  %13223 = vst [vmem:[#allocation19_spill] sm:$0xff] %v10966_v28  ;;  %v10969_v2 = vld [vmem:[#allocation2 + $0x568] sm:$0xff] }
 0x863   :  { %4072 = vmatpush1.msra.mxu0 %v10953_v29  ;;  %6734 = vmatpush3.msra.mxu1 %v10956_v30  ;;  %13224 = vst [vmem:[#allocation20_spill] sm:$0xff] %v10969_v2  ;;  %v10973_v30 = vld [vmem:[#allocation2 + $0x560] sm:$0xff] }
 0x864   :  { %4073 = vmatprep.subr.mxu0 %v10959_v32  ;;  %6735 = vmatprep.subr.mxu1 %v12468_v46  ;;  %13225 = vst [vmem:[#allocation38_spill] sm:$0xff] %v10973_v30  ;;  %v10976_v32 = vld [vmem:[#allocation2 + $0x570] sm:$0xff]  ;;  %v10979_v29 = vld [vmem:[#allocation2 + $0x500] sm:$0xff] }
 0x865   :  { %4074 = vmatpush1.msra.mxu0 %v10963_v34  ;;  %6736 = vmatpush3.msra.mxu1 %v10966_v28  ;;  %13226 = vst [vmem:[#allocation21_spill] sm:$0xff] %v10976_v32  ;;  %13227 = vst [vmem:[#allocation22_spill] sm:$0xff] %v10979_v29  ;;  %v10983_v28 = vld [vmem:[#allocation2 + $0x4f8] sm:$0xff] }
 0x866   :  { %4075 = vmatprep.subr.mxu0 %v10969_v2  ;;  %6737 = vmatprep.subr.mxu1 %v12468_v46  ;;  %13228 = vst [vmem:[#allocation41_spill] sm:$0xff] %v10983_v28  ;;  %v10986_v2 = vld [vmem:[#allocation2 + $0x508] sm:$0xff]  ;;  %v10989_v34 = vld [vmem:[#allocation2 + $0x498] sm:$0xff] }
 0x867   :  { %4076 = vmatpush1.msra.mxu0 %v10973_v30  ;;  %6738 = vmatpush3.msra.mxu1 %v10976_v32  ;;  %13229 = vst [vmem:[#allocation24_spill] sm:$0xff] %v10986_v2  ;;  %13230 = vst [vmem:[#allocation25_spill] sm:$0xff] %v10989_v34  ;;  %v10993_v32 = vld [vmem:[#allocation2 + $0x490] sm:$0xff] }
 0x868   :  { %4077 = vmatprep.subr.mxu0 %v10979_v29  ;;  %6739 = vmatprep.subr.mxu1 %v12468_v46  ;;  %13231 = vst [vmem:[#allocation44_spill] sm:$0xff] %v10993_v32  ;;  %v10996_v29 = vld [vmem:[#allocation2 + $0x4a0] sm:$0xff]  ;;  %v10999_v30 = vld [vmem:[#allocation2 + $0x430] sm:$0xff] }
 0x869   :  { %4078 = vmatpush1.msra.mxu0 %v10983_v28  ;;  %6740 = vmatpush3.msra.mxu1 %v10986_v2  ;;  %13232 = vst [vmem:[#allocation27_spill] sm:$0xff] %v10996_v29  ;;  %13233 = vst [vmem:[#allocation28_spill] sm:$0xff] %v10999_v30  ;;  %v11003_v2 = vld [vmem:[#allocation2 + $0x428] sm:$0xff] }
 0x86a   :  { %4079 = vmatprep.subr.mxu0 %v10989_v34  ;;  %6741 = vmatprep.subr.mxu1 %v12468_v46  ;;  %13234 = vst [vmem:[#allocation47_spill] sm:$0xff] %v11003_v2  ;;  %v11006_v34 = vld [vmem:[#allocation2 + $0x438] sm:$0xff]  ;;  %v11009_v28 = vld [vmem:[#allocation2 + $0x3c8] sm:$0xff] }
 0x86b   :  { %4080 = vmatpush1.msra.mxu0 %v10993_v32  ;;  %6742 = vmatpush3.msra.mxu1 %v10996_v29  ;;  %13235 = vst [vmem:[#allocation30_spill] sm:$0xff] %v11006_v34  ;;  %13236 = vst [vmem:[#allocation31_spill] sm:$0xff] %v11009_v28  ;;  %v11013_v29 = vld [vmem:[#allocation2 + $0x3c0] sm:$0xff] }
 0x86c   :  { %4081 = vmatprep.subr.mxu0 %v10999_v30  ;;  %6743 = vmatprep.subr.mxu1 %v12468_v46  ;;  %13237 = vst [vmem:[#allocation50_spill] sm:$0xff] %v11013_v29  ;;  %v11016_v30 = vld [vmem:[#allocation2 + $0x3d0] sm:$0xff]  ;;  %v11019_v32 = vld [vmem:[#allocation2 + $0x360] sm:$0xff] }
 0x86d   :  { %4082 = vmatpush1.msra.mxu0 %v11003_v2  ;;  %6744 = vmatpush3.msra.mxu1 %v11006_v34  ;;  %13238 = vst [vmem:[#allocation33_spill] sm:$0xff] %v11016_v30  ;;  %13239 = vst [vmem:[#allocation34_spill] sm:$0xff] %v11019_v32  ;;  %v11023_v34 = vld [vmem:[#allocation2 + $0x358] sm:$0xff] }
 0x86e   :  { %4083 = vmatprep.subr.mxu0 %v11009_v28  ;;  %6745 = vmatprep.subr.mxu1 %v12468_v46  ;;  %13240 = vst [vmem:[#allocation51_spill] sm:$0xff] %v11023_v34  ;;  %v11026_v28 = vld [vmem:[#allocation2 + $0x368] sm:$0xff]  ;;  %v11029_v2 = vld [vmem:[#allocation2 + $0x2f8] sm:$0xff] }
 0x86f   :  { %4084 = vmatpush1.msra.mxu0 %v11013_v29  ;;  %6746 = vmatpush3.msra.mxu1 %v11016_v30  ;;  %13241 = vst [vmem:[#allocation36_spill] sm:$0xff] %v11026_v28  ;;  %13242 = vst [vmem:[#allocation37_spill] sm:$0xff] %v11029_v2  ;;  %v11033_v30 = vld [vmem:[#allocation2 + $0x2f0] sm:$0xff] }
 0x870   :  { %4085 = vmatprep.subr.mxu0 %v11019_v32  ;;  %6747 = vmatprep.subr.mxu1 %v12468_v46  ;;  %13243 = vst [vmem:[#allocation52_spill] sm:$0xff] %v11033_v30  ;;  %v11036_v32 = vld [vmem:[#allocation2 + $0x300] sm:$0xff]  ;;  %v11039_v29 = vld [vmem:[#allocation2 + $0x290] sm:$0xff] }
 0x871   :  { %4086 = vmatpush1.msra.mxu0 %v11023_v34  ;;  %6748 = vmatpush3.msra.mxu1 %v11026_v28  ;;  %13244 = vst [vmem:[#allocation39_spill] sm:$0xff] %v11036_v32  ;;  %13245 = vst [vmem:[#allocation40_spill] sm:$0xff] %v11039_v29  ;;  %v11043_v28 = vld [vmem:[#allocation2 + $0x288] sm:$0xff] }
 0x872   :  { %4087 = vmatprep.subr.mxu0 %v11029_v2  ;;  %6749 = vmatprep.subr.mxu1 %v12468_v46  ;;  %13246 = vst [vmem:[#allocation53_spill] sm:$0xff] %v11043_v28  ;;  %v11046_v2 = vld [vmem:[#allocation2 + $0x298] sm:$0xff]  ;;  %v11049_v34 = vld [vmem:[#allocation2 + $0x228] sm:$0xff] }
 0x873   :  { %4088 = vmatpush1.msra.mxu0 %v11033_v30  ;;  %6750 = vmatpush3.msra.mxu1 %v11036_v32  ;;  %13247 = vst [vmem:[#allocation42_spill] sm:$0xff] %v11046_v2  ;;  %13248 = vst [vmem:[#allocation43_spill] sm:$0xff] %v11049_v34  ;;  %v11053_v32 = vld [vmem:[#allocation2 + $0x220] sm:$0xff] }
 0x874   :  { %4089 = vmatprep.subr.mxu0 %v11039_v29  ;;  %6751 = vmatprep.subr.mxu1 %v12468_v46  ;;  %13249 = vst [vmem:[#allocation54_spill] sm:$0xff] %v11053_v32  ;;  %v11056_v29 = vld [vmem:[#allocation2 + $0x230] sm:$0xff]  ;;  %v11059_v30 = vld [vmem:[#allocation2 + $0x1c0] sm:$0xff] }
 0x875   :  { %4090 = vmatpush1.msra.mxu0 %v11043_v28  ;;  %6752 = vmatpush3.msra.mxu1 %v11046_v2  ;;  %13250 = vst [vmem:[#allocation45_spill] sm:$0xff] %v11056_v29  ;;  %13251 = vst [vmem:[#allocation46_spill] sm:$0xff] %v11059_v30  ;;  %v11063_v2 = vld [vmem:[#allocation2 + $0x1b8] sm:$0xff] }
 0x876   :  { %4091 = vmatprep.subr.mxu0 %v11049_v34  ;;  %6753 = vmatprep.subr.mxu1 %v12468_v46  ;;  %13252 = vst [vmem:[#allocation55_spill] sm:$0xff] %v11063_v2  ;;  %v11066_v34 = vld [vmem:[#allocation2 + $0x1c8] sm:$0xff]  ;;  %v11069_v28 = vld [vmem:[#allocation2 + $0x158] sm:$0xff] }
 0x877   :  { %4092 = vmatpush1.msra.mxu0 %v11053_v32  ;;  %6754 = vmatpush3.msra.mxu1 %v11056_v29  ;;  %13253 = vst [vmem:[#allocation48_spill] sm:$0xff] %v11066_v34  ;;  %13254 = vst [vmem:[#allocation49_spill] sm:$0xff] %v11069_v28  ;;  %v11073_v29 = vld [vmem:[#allocation2 + $0x150] sm:$0xff] }
 0x878   :  { %4093 = vmatprep.subr.mxu0 %v11059_v30  ;;  %6755 = vmatprep.subr.mxu1 %v12468_v46  ;;  %13255 = vst [vmem:[#allocation56_spill] sm:$0xff] %v11073_v29  ;;  %v11076_v30 = vld [vmem:[#allocation2 + $0x160] sm:$0xff]  ;;  %v11079_v32 = vld [vmem:[#allocation2 + $0xf0] sm:$0xff] }
 0x879   :  { %4094 = vmatpush1.msra.mxu0 %v11063_v2  ;;  %6756 = vmatpush3.msra.mxu1 %v11066_v34  ;;  %13256 = vst [vmem:[#allocation57_spill] sm:$0xff] %v11076_v30  ;;  %13257 = vst [vmem:[#allocation58_spill] sm:$0xff] %v11079_v32  ;;  %v11083_v34 = vld [vmem:[#allocation2 + $0xe8] sm:$0xff] }
 0x87a   :  { %4095 = vmatprep.subr.mxu0 %v11069_v28  ;;  %6757 = vmatprep.subr.mxu1 %v12468_v46  ;;  %13258 = vst [vmem:[#allocation59_spill] sm:$0xff] %v11083_v34  ;;  %v11086_v28 = vld [vmem:[#allocation2 + $0xf8] sm:$0xff]  ;;  %v11089_v2 = vld [vmem:[#allocation2 + $0x88] sm:$0xff] }
 0x87b   :  { %4096 = vmatpush1.msra.mxu0 %v11073_v29  ;;  %6758 = vmatpush3.msra.mxu1 %v11076_v30  ;;  %13259 = vst [vmem:[#allocation60_spill] sm:$0xff] %v11086_v28  ;;  %13260 = vst [vmem:[#allocation61_spill] sm:$0xff] %v11089_v2  ;;  %v11093_v30 = vld [vmem:[#allocation2 + $0x80] sm:$0xff] }
 0x87c   :  { %4097 = vmatprep.subr.mxu0 %v11079_v32  ;;  %6759 = vmatprep.subr.mxu1 %v12468_v46  ;;  %13261 = vst [vmem:[#allocation62_spill] sm:$0xff] %v11093_v30  ;;  %v11096_v32 = vld [vmem:[#allocation2 + $0x90] sm:$0xff]  ;;  %v11099_v29 = vld [vmem:[#allocation2 + $0x20] sm:$0xff] }
 0x87d   :  { %4098 = vmatpush1.msra.mxu0 %v11083_v34  ;;  %6760 = vmatpush3.msra.mxu1 %v11086_v28  ;;  %13262 = vst [vmem:[#allocation63_spill] sm:$0xff] %v11096_v32  ;;  %13263 = vst [vmem:[#allocation65_spill] sm:$0xff] %v11099_v29  ;;  %v11103_v28 = vld [vmem:[#allocation2 + $0x18] sm:$0xff]  ;;  %v11134_v34 = vld [vmem:[#allocation2 + $0x580] sm:$0xff] }
 0x87e   :  { %4099 = vmatprep.subr.mxu0 %v11089_v2  ;;  %6761 = vmatprep.subr.mxu1 %v12468_v46  ;;  %13264 = vst [vmem:[#allocation64_spill] sm:$0xff] %v11103_v28  ;;  %v11107_v2 = vld [vmem:[#allocation2 + $0x28] sm:$0xff]  ;;  %13272 = vst [vmem:[#allocation73_spill] sm:$0xff] %v11134_v34 }
 0x87f   :  { %4100 = vmatpush1.msra.mxu0 %v11093_v30  ;;  %6762 = vmatpush3.msra.mxu1 %v11096_v32  ;;  %13265 = vst [vmem:[#allocation66_spill] sm:$0xff] %v11107_v2  ;;  %v11121_v32 = vld [vmem:[#allocation2 + $0x658] sm:$0xff]  ;;  %v11128_v30 = vld [vmem:[#allocation2 + $0x5e0] sm:$0xff] }
 0x880   :  { %4101 = vmatprep.subr.mxu0 %v11099_v29  ;;  %6763 = vmatprep.subr.mxu1 %v12468_v46  ;;  %v11114_v29 = vld [vmem:[#allocation2 + $0x650] sm:$0xff]  ;;  %13268 = vst [vmem:[#allocation69_spill] sm:$0xff] %v11121_v32  ;;  %13270 = vst [vmem:[#allocation71_spill] sm:$0xff] %v11128_v30 }
 0x881   :  { %4102 = vmatpush1.msra.mxu0 %v11103_v28  ;;  %4135 = vmatprep.mubr.f32.mxu0 %v12468_v46  ;;  %13266 = vst [vmem:[#allocation67_spill] sm:$0xff] %v11114_v29  ;;  %v11118_v28 = vld [vmem:[#allocation2 + $0x648] sm:$0xff] }
 0x882   :  { %6764 = vmatpush3.msra.mxu1 %v11107_v2  ;;  %6765 = vmatprep.mubr.msk.f32.mxu1 %vm7790_vm0, %v12468_v46  ;;  %13267 = vst [vmem:[#allocation68_spill] sm:$0xff] %v11118_v28  ;;  %v11124_v2 = vld [vmem:[#allocation2 + $0x5e8] sm:$0xff] }
 0x883   :  { %4136 = vmatmul.mubr.f32.vlgmr.msra.gmra.mxu0 %v10708_v63  ;;  %6766 = vmatmul.mubr.f32.vlgmr.msra.gmra.mxu1 %v10708_v63  ;;  %13269 = vst [vmem:[#allocation70_spill] sm:$0xff] %v11124_v2 }
 0x884   :  { %4234 = vmatprep.subr.mxu0 %v11114_v29  ;;  %6768 = vmatprep.subr.mxu1 %v12468_v46  ;;  %v11131_v29 = vld [vmem:[#allocation2 + $0x5f0] sm:$0xff] }
 0x885   :  { %4235 = vmatpush1.msra.mxu0 %v11118_v28  ;;  %6769 = vmatpush3.msra.mxu1 %v11121_v32  ;;  %13271 = vst [vmem:[#allocation72_spill] sm:$0xff] %v11131_v29  ;;  %v11138_v32 = vld [vmem:[#allocation2 + $0x578] sm:$0xff] }
 0x886   :  { %4236 = vmatprep.subr.mxu0 %v11124_v2  ;;  %6770 = vmatprep.subr.mxu1 %v12468_v46  ;;  %13273 = vst [vmem:[#allocation74_spill] sm:$0xff] %v11138_v32  ;;  %v11141_v2 = vld [vmem:[#allocation2 + $0x588] sm:$0xff]  ;;  %v11144_v28 = vld [vmem:[#allocation2 + $0x518] sm:$0xff] }
 0x887   :  { %4237 = vmatpush1.msra.mxu0 %v11128_v30  ;;  %6771 = vmatpush3.msra.mxu1 %v11131_v29  ;;  %13274 = vst [vmem:[#allocation75_spill] sm:$0xff] %v11141_v2  ;;  %13275 = vst [vmem:[#allocation76_spill] sm:$0xff] %v11144_v28  ;;  %v11148_v29 = vld [vmem:[#allocation2 + $0x510] sm:$0xff] }
 0x888   :  { %4238 = vmatprep.subr.mxu0 %v11134_v34  ;;  %6772 = vmatprep.subr.mxu1 %v12468_v46  ;;  %13276 = vst [vmem:[#allocation77_spill] sm:$0xff] %v11148_v29  ;;  %v11151_v34 = vld [vmem:[#allocation2 + $0x520] sm:$0xff]  ;;  %v11154_v30 = vld [vmem:[#allocation2 + $0x4b0] sm:$0xff] }
 0x889   :  { %4239 = vmatpush1.msra.mxu0 %v11138_v32  ;;  %6773 = vmatpush3.msra.mxu1 %v11141_v2  ;;  %13277 = vst [vmem:[#allocation78_spill] sm:$0xff] %v11151_v34  ;;  %13278 = vst [vmem:[#allocation79_spill] sm:$0xff] %v11154_v30  ;;  %v11158_v2 = vld [vmem:[#allocation2 + $0x4a8] sm:$0xff] }
 0x88a   :  { %4240 = vmatprep.subr.mxu0 %v11144_v28  ;;  %6774 = vmatprep.subr.mxu1 %v12468_v46  ;;  %13279 = vst [vmem:[#allocation80_spill] sm:$0xff] %v11158_v2  ;;  %v11161_v28 = vld [vmem:[#allocation2 + $0x4b8] sm:$0xff]  ;;  %v11164_v32 = vld [vmem:[#allocation2 + $0x448] sm:$0xff] }
 0x88b   :  { %4241 = vmatpush1.msra.mxu0 %v11148_v29  ;;  %6775 = vmatpush3.msra.mxu1 %v11151_v34  ;;  %13280 = vst [vmem:[#allocation81_spill] sm:$0xff] %v11161_v28  ;;  %13281 = vst [vmem:[#allocation82_spill] sm:$0xff] %v11164_v32  ;;  %v11168_v34 = vld [vmem:[#allocation2 + $0x440] sm:$0xff] }
 0x88c   :  { %4242 = vmatprep.subr.mxu0 %v11154_v30  ;;  %6776 = vmatprep.subr.mxu1 %v12468_v46  ;;  %13282 = vst [vmem:[#allocation83_spill] sm:$0xff] %v11168_v34  ;;  %v11171_v30 = vld [vmem:[#allocation2 + $0x450] sm:$0xff]  ;;  %v11174_v29 = vld [vmem:[#allocation2 + $0x3e0] sm:$0xff] }
 0x88d   :  { %4243 = vmatpush1.msra.mxu0 %v11158_v2  ;;  %6777 = vmatpush3.msra.mxu1 %v11161_v28  ;;  %13283 = vst [vmem:[#allocation84_spill] sm:$0xff] %v11171_v30  ;;  %13284 = vst [vmem:[#allocation85_spill] sm:$0xff] %v11174_v29  ;;  %v11178_v28 = vld [vmem:[#allocation2 + $0x3d8] sm:$0xff] }
 0x88e   :  { %4244 = vmatprep.subr.mxu0 %v11164_v32  ;;  %6778 = vmatprep.subr.mxu1 %v12468_v46  ;;  %13285 = vst [vmem:[#allocation86_spill] sm:$0xff] %v11178_v28  ;;  %v11181_v32 = vld [vmem:[#allocation2 + $0x3e8] sm:$0xff]  ;;  %v11184_v2 = vld [vmem:[#allocation2 + $0x378] sm:$0xff] }
 0x88f   :  { %4245 = vmatpush1.msra.mxu0 %v11168_v34  ;;  %6779 = vmatpush3.msra.mxu1 %v11171_v30  ;;  %13286 = vst [vmem:[#allocation87_spill] sm:$0xff] %v11181_v32  ;;  %13287 = vst [vmem:[#allocation88_spill] sm:$0xff] %v11184_v2  ;;  %v11188_v30 = vld [vmem:[#allocation2 + $0x370] sm:$0xff] }
 0x890   :  { %4246 = vmatprep.subr.mxu0 %v11174_v29  ;;  %6780 = vmatprep.subr.mxu1 %v12468_v46  ;;  %13288 = vst [vmem:[#allocation89_spill] sm:$0xff] %v11188_v30  ;;  %v11191_v29 = vld [vmem:[#allocation2 + $0x380] sm:$0xff]  ;;  %v11194_v34 = vld [vmem:[#allocation2 + $0x310] sm:$0xff] }
 0x891   :  { %4247 = vmatpush1.msra.mxu0 %v11178_v28  ;;  %6781 = vmatpush3.msra.mxu1 %v11181_v32  ;;  %13289 = vst [vmem:[#allocation90_spill] sm:$0xff] %v11191_v29  ;;  %13290 = vst [vmem:[#allocation91_spill] sm:$0xff] %v11194_v34  ;;  %v11198_v32 = vld [vmem:[#allocation2 + $0x308] sm:$0xff] }
 0x892   :  { %4248 = vmatprep.subr.mxu0 %v11184_v2  ;;  %6782 = vmatprep.subr.mxu1 %v12468_v46  ;;  %13291 = vst [vmem:[#allocation92_spill] sm:$0xff] %v11198_v32  ;;  %v11201_v2 = vld [vmem:[#allocation2 + $0x318] sm:$0xff]  ;;  %v11204_v28 = vld [vmem:[#allocation2 + $0x2a8] sm:$0xff] }
 0x893   :  { %4249 = vmatpush1.msra.mxu0 %v11188_v30  ;;  %6783 = vmatpush3.msra.mxu1 %v11191_v29  ;;  %13292 = vst [vmem:[#allocation93_spill] sm:$0xff] %v11201_v2  ;;  %13293 = vst [vmem:[#allocation94_spill] sm:$0xff] %v11204_v28  ;;  %v11208_v29 = vld [vmem:[#allocation2 + $0x2a0] sm:$0xff] }
 0x894   :  { %4250 = vmatprep.subr.mxu0 %v11194_v34  ;;  %6784 = vmatprep.subr.mxu1 %v12468_v46  ;;  %13294 = vst [vmem:[#allocation95_spill] sm:$0xff] %v11208_v29  ;;  %v11211_v34 = vld [vmem:[#allocation2 + $0x2b0] sm:$0xff]  ;;  %v11214_v30 = vld [vmem:[#allocation2 + $0x240] sm:$0xff] }
 0x895   :  { %4251 = vmatpush1.msra.mxu0 %v11198_v32  ;;  %6785 = vmatpush3.msra.mxu1 %v11201_v2  ;;  %13295 = vst [vmem:[#allocation96_spill] sm:$0xff] %v11211_v34  ;;  %13296 = vst [vmem:[#allocation97_spill] sm:$0xff] %v11214_v30  ;;  %v11218_v2 = vld [vmem:[#allocation2 + $0x238] sm:$0xff] }
 0x896   :  { %4252 = vmatprep.subr.mxu0 %v11204_v28  ;;  %6786 = vmatprep.subr.mxu1 %v12468_v46  ;;  %13297 = vst [vmem:[#allocation98_spill] sm:$0xff] %v11218_v2  ;;  %v11221_v28 = vld [vmem:[#allocation2 + $0x248] sm:$0xff]  ;;  %v11224_v32 = vld [vmem:[#allocation2 + $0x1d8] sm:$0xff] }
 0x897   :  { %4253 = vmatpush1.msra.mxu0 %v11208_v29  ;;  %6787 = vmatpush3.msra.mxu1 %v11211_v34  ;;  %13298 = vst [vmem:[#allocation99_spill] sm:$0xff] %v11221_v28  ;;  %13299 = vst [vmem:[#allocation100_spill] sm:$0xff] %v11224_v32  ;;  %v11228_v34 = vld [vmem:[#allocation2 + $0x1d0] sm:$0xff] }
 0x898   :  { %4254 = vmatprep.subr.mxu0 %v11214_v30  ;;  %6788 = vmatprep.subr.mxu1 %v12468_v46  ;;  %13300 = vst [vmem:[#allocation101_spill] sm:$0xff] %v11228_v34  ;;  %v11231_v30 = vld [vmem:[#allocation2 + $0x1e0] sm:$0xff]  ;;  %v11234_v29 = vld [vmem:[#allocation2 + $0x170] sm:$0xff] }
 0x899   :  { %4255 = vmatpush1.msra.mxu0 %v11218_v2  ;;  %6789 = vmatpush3.msra.mxu1 %v11221_v28  ;;  %13301 = vst [vmem:[#allocation102_spill] sm:$0xff] %v11231_v30  ;;  %13302 = vst [vmem:[#allocation103_spill] sm:$0xff] %v11234_v29  ;;  %v11238_v28 = vld [vmem:[#allocation2 + $0x168] sm:$0xff] }
 0x89a   :  { %4256 = vmatprep.subr.mxu0 %v11224_v32  ;;  %6790 = vmatprep.subr.mxu1 %v12468_v46  ;;  %13303 = vst [vmem:[#allocation104_spill] sm:$0xff] %v11238_v28  ;;  %v11241_v32 = vld [vmem:[#allocation2 + $0x178] sm:$0xff]  ;;  %v11244_v2 = vld [vmem:[#allocation2 + $0x108] sm:$0xff] }
 0x89b   :  { %4257 = vmatpush1.msra.mxu0 %v11228_v34  ;;  %6791 = vmatpush3.msra.mxu1 %v11231_v30  ;;  %13304 = vst [vmem:[#allocation105_spill] sm:$0xff] %v11241_v32  ;;  %13305 = vst [vmem:[#allocation106_spill] sm:$0xff] %v11244_v2  ;;  %v11248_v30 = vld [vmem:[#allocation2 + $0x100] sm:$0xff] }
 0x89c   :  { %4258 = vmatprep.subr.mxu0 %v11234_v29  ;;  %6792 = vmatprep.subr.mxu1 %v12468_v46  ;;  %13306 = vst [vmem:[#allocation107_spill] sm:$0xff] %v11248_v30  ;;  %v11251_v29 = vld [vmem:[#allocation2 + $0x110] sm:$0xff]  ;;  %v11254_v34 = vld [vmem:[#allocation2 + $0xa0] sm:$0xff] }
 0x89d   :  { %4259 = vmatpush1.msra.mxu0 %v11238_v28  ;;  %6793 = vmatpush3.msra.mxu1 %v11241_v32  ;;  %13307 = vst [vmem:[#allocation108_spill] sm:$0xff] %v11251_v29  ;;  %13308 = vst [vmem:[#allocation109_spill] sm:$0xff] %v11254_v34  ;;  %v11258_v32 = vld [vmem:[#allocation2 + $0x98] sm:$0xff] }
 0x89e   :  { %4260 = vmatprep.subr.mxu0 %v11244_v2  ;;  %6794 = vmatprep.subr.mxu1 %v12468_v46  ;;  %13309 = vst [vmem:[#allocation110_spill] sm:$0xff] %v11258_v32  ;;  %v11261_v2 = vld [vmem:[#allocation2 + $0xa8] sm:$0xff]  ;;  %v11264_v28 = vld [vmem:[#allocation2 + $0x38] sm:$0xff] }
 0x89f   :  { %4261 = vmatpush1.msra.mxu0 %v11248_v30  ;;  %6795 = vmatpush3.msra.mxu1 %v11251_v29  ;;  %13310 = vst [vmem:[#allocation111_spill] sm:$0xff] %v11261_v2  ;;  %13311 = vst [vmem:[#allocation112_spill] sm:$0xff] %v11264_v28  ;;  %v11268_v29 = vld [vmem:[#allocation2 + $0x30] sm:$0xff] }
 0x8a0   :  { %4262 = vmatprep.subr.mxu0 %v11254_v34  ;;  %6796 = vmatprep.subr.mxu1 %v12468_v46  ;;  %13312 = vst [vmem:[#allocation113_spill] sm:$0xff] %v11268_v29  ;;  %v11271_v34 = vld [vmem:[#allocation2 + $0x40] sm:$0xff] }
 0x8a1   :  { %4263 = vmatpush1.msra.mxu0 %v11258_v32  ;;  %6797 = vmatpush3.msra.mxu1 %v11261_v2  ;;  %13313 = vst [vmem:[#allocation114_spill] sm:$0xff] %v11271_v34  ;;  %v11277_v2 = vld [vmem:[#allocation2 + $0x668] sm:$0xff] }
 0x8a2   :  { %4264 = vmatprep.subr.mxu0 %v11264_v28  ;;  %6798 = vmatprep.subr.mxu1 %v12468_v46  ;;  %13314 = vst [vmem:[#allocation115_spill] sm:$0xff] %v11277_v2 }
 0x8a3   :  { %4265 = vmatpush1.msra.mxu0 %v11268_v29  ;;  %6799 = vmatpush3.msra.mxu1 %v11271_v34 }
 0x8a4   :  { %4298 = vmatprep.mubr.f32.mxu0 %v12468_v46  ;;  %6800 = vmatprep.mubr.msk.f32.mxu1 %vm7790_vm0, %v12468_v46 }
 0x8a5   :  { %4375 = vmatprep.subr.mxu0 %v11277_v2  ;;  %6803 = vmatprep.subr.mxu1 %v12468_v46 }
 0x8de   :  { %v3761_v28 = vpop.f32.mrf.mxu1  ;;  %v3690_v30 = vpop.f32.mrf.mxu0 }
 0x8df   :  { %v3691_v29 = vadd.f32 %v3690_v30, %v13173_v52  ;;  %v3762_v16 = vadd.f32 %v3761_v28, %v8729_v33 }
 0x8e0   :  { %v6662_v32 = vpop.f32.mrf.mxu1  ;;  %v3692_v7 = vpop.f32.mrf.mxu0 }
 0x8ff   :  { %v3831_v10 = vpop.f32.mrf.mxu0  ;;  %v3902_v23 = vpop.f32.mrf.mxu1 }
 0x900   :  { %v3906_v34 = vadd.f32 %v3831_v10, %v3691_v29  ;;  %v3920_v11 = vadd.f32 %v10696_v39, %v3902_v23 }
 0x901   :  { %v6697_v15 = vpop.f32.mrf.mxu1  ;;  %v3833_v30 = vpop.f32.mrf.mxu0 }
 0x902   :  { %v5284_v13 = vmul.f32 -1.442695, %v3906_v34 }
 0x904   :  { %7128 = vpow2.f32 %v5284_v13 }
 0x911   :  { %v7129_v20 = vpop.eup %7128 }
 0x912   :  { %v3910_v35 = vadd.f32 1.0, %v7129_v20 }
 0x914   :  { %7130 = vrcp.f32 %v3910_v35 }
 0x920   :  { %v3996_v52 = vpop.f32.mrf.mxu0 }
 0x921   :  { %v7131_v2 = vpop.eup %7130  ;;  %v3997_v15 = vadd.f32 %v3996_v52, %v12605_v53  ;;  %v11291_v52 = vld [vmem:[%s11792_s2 + $0x3] ss:$0 sm:$0xff] }
 0x922   :  { %v3921_v25 = vmul.f32 %v7131_v2, %v3920_v11  ;;  %v4067_v32 = vpop.f32.mrf.mxu1  ;;  %v3998_v26 = vpop.f32.mrf.mxu0 }
 0x923   :  { %v3999_v39 = vadd.f32 %v3998_v26, %v12606_v8 }
 0x924   :  { %v11284_v3 = vadd.f32 %v3921_v25, %v3762_v16  ;;  %v6732_v21 = vpop.f32.mrf.mxu1 }
 0x943   :  { %v4137_v10 = vpop.f32.mrf.mxu0  ;;  %v4208_v13 = vpop.f32.mrf.mxu1 }
 0x944   :  { %v4212_v29 = vadd.f32 %v4137_v10, %v3997_v15  ;;  %v4226_v2 = vadd.f32 %v11291_v52, %v4208_v13  ;;  %v4068_v10 = vadd.f32 %v4067_v32, %v8337_v49  ;;  %v11301_v32 = vld [vmem:[#allocation2 + $0x660] sm:$0xff] }
 0x945   :  { %v6767_v20 = vpop.f32.mrf.mxu1  ;;  %v4139_v34 = vpop.f32.mrf.mxu0  ;;  %v11307_v13 = vld [vmem:[#allocation2 + $0x600] sm:$0xff] }
 0x946   :  { %v5287_v35 = vmul.f32 -1.442695, %v4212_v29  ;;  %v4219_v23 = vadd.f32 %v4139_v34, %v3999_v39  ;;  %v3693_v29 = vadd.f32 %v3692_v7, %v8739_v18  ;;  %v11304_v7 = vld [vmem:[#allocation2 + $0x670] sm:$0xff] }
 0x948   :  { %7132 = vpow2.f32 %v5287_v35  ;;  %v5288_v11 = vmul.f32 -1.442695, %v4219_v23  ;;  %v3913_v35 = vadd.f32 %v3833_v30, %v3693_v29  ;;  %v11327_v29 = vld [vmem:[#allocation2 + $0x530] sm:$0xff] }
 0x94a   :  { %7134 = vpow2.f32 %v5288_v11  ;;  %v5285_v34 = vmul.f32 -1.442695, %v3913_v35  ;;  %v11334_v35 = vld [vmem:[#allocation2 + $0x538] sm:$0xff] }
 0x94b   :  { %13315 = vst [vmem:[#allocation116_spill] sm:$0xff] %v11334_v35 }
 0x955   :  { %v7133_v25 = vpop.eup %7132 }
 0x956   :  { %v4216_v16 = vadd.f32 1.0, %v7133_v25 }
 0x957   :  { %v7135_v21 = vpop.eup %7134 }
 0x958   :  { %7136 = vrcp.f32 %v4216_v16  ;;  %v4223_v28 = vadd.f32 1.0, %v7135_v21 }
 0x95a   :  { %7138 = vrcp.f32 %v4223_v28  ;;  %v11314_v28 = vld [vmem:[#allocation2 + $0x608] sm:$0xff] }
 0x965   :  { %v7137_v15 = vpop.eup %7136 }
 0x966   :  { %v4227_v26 = vmul.f32 %v7137_v15, %v4226_v2  ;;  %v11317_v2 = vld [vmem:[#allocation2 + $0x598] sm:$0xff] }
 0x967   :  { %v7139_v39 = vpop.eup %7138 }
 0x968   :  { %v4228_v20 = vadd.f32 %v4227_v26, %v4068_v10  ;;  %v4230_v23 = vsub.f32 1.0, %v7139_v39  ;;  %v4232_v16 = vmul.f32 %v7139_v39, %v10708_v63  ;;  %v11311_v63 = vld [vmem:[#allocation2 + $0x5f8] sm:$0xff]  ;;  %v11321_v10 = vld [vmem:[#allocation2 + $0x590] sm:$0xff]  ;;  %v11324_v26 = vld [vmem:[#allocation2 + $0x5a0] sm:$0xff] }
 0x969   :  { %v11341_v39 = vld [vmem:[#allocation2 + $0x4c0] sm:$0xff] }
 0x96a   :  { %7140 = vtanh.f32 %v4228_v20  ;;  %v11331_v20 = vld [vmem:[#allocation2 + $0x528] sm:$0xff]  ;;  %13317 = vst [vmem:[#allocation118_spill] sm:$0xff] %v11341_v39 }
 0x96b   :  { %7142 = vpow2.f32 %v5285_v34  ;;  %v11337_v34 = vld [vmem:[#allocation2 + $0x4c8] sm:$0xff] }
 0x96c   :  { %13316 = vst [vmem:[#allocation117_spill] sm:$0xff] %v11337_v34 }
 0x977   :  { %v7141_v11 = vpop.eup %7140 }
 0x978   :  { %v4231_v25 = vmul.f32 %v7141_v11, %v4230_v23  ;;  %v7143_v30 = vpop.eup %7142  ;;  %v11344_v23 = vld [vmem:[#allocation2 + $0x4d0] sm:$0xff]  ;;  %v11347_v11 = vld [vmem:[#allocation2 + $0x460] sm:$0xff] }
 0x979   :  { %v3917_v15 = vadd.f32 1.0, %v7143_v30  ;;  %13318 = vst [vmem:[#allocation119_spill] sm:$0xff] %v11344_v23  ;;  %13319 = vst [vmem:[#allocation120_spill] sm:$0xff] %v11347_v11  ;;  %v11358_v30 = vld [vmem:[#allocation2 + $0x3f8] sm:$0xff] }
 0x97a   :  { %v11297_v21 = vadd.f32 %v4232_v16, %v4231_v25  ;;  %v11352_v25 = vld [vmem:[#allocation2 + $0x458] sm:$0xff]  ;;  %v11355_v16 = vld [vmem:[#allocation2 + $0x468] sm:$0xff]  ;;  %13322 = vst [vmem:[#allocation123_spill] sm:$0xff] %v11358_v30 }
 0x97b   :  { %7144 = vrcp.f32 %v3917_v15  ;;  %13320 = vst [vmem:[#allocation121_spill] sm:$0xff] %v11352_v25  ;;  %13321 = vst [vmem:[#allocation122_spill] sm:$0xff] %v11355_v16  ;;  %v11362_v15 = vld [vmem:[#allocation2 + $0x3f0] sm:$0xff] }
 0x97c   :  { %4299 = vmatmul.mubr.f32.vlgmr.msra.gmra.mxu0 %v11297_v21  ;;  %6801 = vmatmul.mubr.f32.vlgmr.msra.gmra.mxu1 %v11297_v21  ;;  %7146 = vtanh.f32 %v11284_v3  ;;  %13323 = vst [vmem:[#allocation124_spill] sm:$0xff] %v11362_v15  ;;  %v11368_v3 = vld [vmem:[#allocation2 + $0x390] sm:$0xff] }
 0x97d   :  { %4376 = vmatpush1.msra.mxu0 %v11301_v32  ;;  %6804 = vmatpush3.msra.mxu1 %v11304_v7  ;;  %13325 = vst [vmem:[#allocation126_spill] sm:$0xff] %v11368_v3 }
 0x97e   :  { %4377 = vmatprep.subr.mxu0 %v11307_v13  ;;  %6805 = vmatprep.subr.mxu1 %v12468_v46 }
 0x97f   :  { %4378 = vmatpush1.msra.mxu0 %v11311_v63  ;;  %6806 = vmatpush3.msra.mxu1 %v11314_v28 }
 0x980   :  { %4379 = vmatprep.subr.mxu0 %v11317_v2  ;;  %6807 = vmatprep.subr.mxu1 %v12468_v46 }
 0x981   :  { %4380 = vmatpush1.msra.mxu0 %v11321_v10  ;;  %6808 = vmatpush3.msra.mxu1 %v11324_v26 }
 0x982   :  { %4381 = vmatprep.subr.mxu0 %v11327_v29  ;;  %6809 = vmatprep.subr.mxu1 %v12468_v46 }
 0x983   :  { %4382 = vmatpush1.msra.mxu0 %v11331_v20  ;;  %6810 = vmatpush3.msra.mxu1 %v11334_v35  ;;  %v11449_v35 = vld [vmem:[#allocation2 + $0x50] sm:$0xff] }
 0x984   :  { %4383 = vmatprep.subr.mxu0 %v11337_v34  ;;  %6811 = vmatprep.subr.mxu1 %v12468_v46  ;;  %v11438_v34 = vld [vmem:[#allocation2 + $0xb8] sm:$0xff] }
 0x985   :  { %4384 = vmatpush1.msra.mxu0 %v11341_v39  ;;  %6812 = vmatpush3.msra.mxu1 %v11344_v23  ;;  %v11418_v23 = vld [vmem:[#allocation2 + $0x188] sm:$0xff]  ;;  %v11428_v39 = vld [vmem:[#allocation2 + $0x120] sm:$0xff] }
 0x986   :  { %4385 = vmatprep.subr.mxu0 %v11347_v11  ;;  %6813 = vmatprep.subr.mxu1 %v12468_v46  ;;  %v11365_v11 = vld [vmem:[#allocation2 + $0x400] sm:$0xff]  ;;  %13340 = vst [vmem:[#allocation141_spill] sm:$0xff] %v11418_v23  ;;  %13343 = vst [vmem:[#allocation144_spill] sm:$0xff] %v11428_v39 }
 0x987   :  { %4386 = vmatpush1.msra.mxu0 %v11352_v25  ;;  %6814 = vmatpush3.msra.mxu1 %v11355_v16  ;;  %13324 = vst [vmem:[#allocation125_spill] sm:$0xff] %v11365_v11  ;;  %v11372_v16 = vld [vmem:[#allocation2 + $0x388] sm:$0xff] }
 0x988   :  { %4387 = vmatprep.subr.mxu0 %v11358_v30  ;;  %6815 = vmatprep.subr.mxu1 %v12468_v46  ;;  %13326 = vst [vmem:[#allocation127_spill] sm:$0xff] %v11372_v16  ;;  %v11375_v30 = vld [vmem:[#allocation2 + $0x398] sm:$0xff]  ;;  %v11378_v25 = vld [vmem:[#allocation2 + $0x328] sm:$0xff] }
 0x989   :  { %4388 = vmatpush1.msra.mxu0 %v11362_v15  ;;  %6816 = vmatpush3.msra.mxu1 %v11365_v11  ;;  %13327 = vst [vmem:[#allocation128_spill] sm:$0xff] %v11375_v30  ;;  %13328 = vst [vmem:[#allocation129_spill] sm:$0xff] %v11378_v25  ;;  %v11382_v11 = vld [vmem:[#allocation2 + $0x320] sm:$0xff] }
 0x98a   :  { %4389 = vmatprep.subr.mxu0 %v11368_v3  ;;  %6817 = vmatprep.subr.mxu1 %v12468_v46  ;;  %13329 = vst [vmem:[#allocation130_spill] sm:$0xff] %v11382_v11  ;;  %v11385_v3 = vld [vmem:[#allocation2 + $0x330] sm:$0xff]  ;;  %v11388_v15 = vld [vmem:[#allocation2 + $0x2c0] sm:$0xff] }
 0x98b   :  { %4390 = vmatpush1.msra.mxu0 %v11372_v16  ;;  %6818 = vmatpush3.msra.mxu1 %v11375_v30  ;;  %13330 = vst [vmem:[#allocation131_spill] sm:$0xff] %v11385_v3  ;;  %13331 = vst [vmem:[#allocation132_spill] sm:$0xff] %v11388_v15  ;;  %v11392_v30 = vld [vmem:[#allocation2 + $0x2b8] sm:$0xff] }
 0x98c   :  { %4391 = vmatprep.subr.mxu0 %v11378_v25  ;;  %6819 = vmatprep.subr.mxu1 %v12468_v46  ;;  %13332 = vst [vmem:[#allocation133_spill] sm:$0xff] %v11392_v30  ;;  %v11395_v25 = vld [vmem:[#allocation2 + $0x2c8] sm:$0xff]  ;;  %v11398_v16 = vld [vmem:[#allocation2 + $0x258] sm:$0xff] }
 0x98d   :  { %4392 = vmatpush1.msra.mxu0 %v11382_v11  ;;  %6820 = vmatpush3.msra.mxu1 %v11385_v3  ;;  %13333 = vst [vmem:[#allocation134_spill] sm:$0xff] %v11395_v25  ;;  %13334 = vst [vmem:[#allocation135_spill] sm:$0xff] %v11398_v16  ;;  %v11402_v3 = vld [vmem:[#allocation2 + $0x250] sm:$0xff]  ;;  %v7145_v11 = vpop.eup %7144 }
 0x98e   :  { %4393 = vmatprep.subr.mxu0 %v11388_v15  ;;  %6821 = vmatprep.subr.mxu1 %v12468_v46  ;;  %13335 = vst [vmem:[#allocation136_spill] sm:$0xff] %v11402_v3  ;;  %v11405_v15 = vld [vmem:[#allocation2 + $0x260] sm:$0xff] }
 0x98f   :  { %4394 = vmatpush1.msra.mxu0 %v11392_v30  ;;  %6822 = vmatpush3.msra.mxu1 %v11395_v25  ;;  %13336 = vst [vmem:[#allocation137_spill] sm:$0xff] %v11405_v15  ;;  %v11408_v30 = vld [vmem:[#allocation2 + $0x1f0] sm:$0xff]  ;;  %v11412_v25 = vld [vmem:[#allocation2 + $0x1e8] sm:$0xff] }
 0x990   :  { %4395 = vmatprep.subr.mxu0 %v11398_v16  ;;  %6823 = vmatprep.subr.mxu1 %v12468_v46  ;;  %13337 = vst [vmem:[#allocation138_spill] sm:$0xff] %v11408_v30  ;;  %13338 = vst [vmem:[#allocation139_spill] sm:$0xff] %v11412_v25  ;;  %v11415_v16 = vld [vmem:[#allocation2 + $0x1f8] sm:$0xff] }
 0x991   :  { %4396 = vmatpush1.msra.mxu0 %v11402_v3  ;;  %6824 = vmatpush3.msra.mxu1 %v11405_v15  ;;  %13339 = vst [vmem:[#allocation140_spill] sm:$0xff] %v11415_v16  ;;  %v7147_v3 = vpop.eup %7146  ;;  %v11422_v15 = vld [vmem:[#allocation2 + $0x180] sm:$0xff] }
 0x992   :  { %4397 = vmatprep.subr.mxu0 %v11408_v30  ;;  %6825 = vmatprep.subr.mxu1 %v12468_v46  ;;  %13341 = vst [vmem:[#allocation142_spill] sm:$0xff] %v11422_v15  ;;  %v11425_v30 = vld [vmem:[#allocation2 + $0x190] sm:$0xff] }
 0x993   :  { %4398 = vmatpush1.msra.mxu0 %v11412_v25  ;;  %6826 = vmatpush3.msra.mxu1 %v11415_v16  ;;  %13342 = vst [vmem:[#allocation143_spill] sm:$0xff] %v11425_v30  ;;  %v3924_v25 = vsub.f32 1.0, %v7145_v11  ;;  %v11432_v16 = vld [vmem:[#allocation2 + $0x118] sm:$0xff] }
 0x994   :  { %4399 = vmatprep.subr.mxu0 %v11418_v23  ;;  %6827 = vmatprep.subr.mxu1 %v12468_v46  ;;  %13344 = vst [vmem:[#allocation145_spill] sm:$0xff] %v11432_v16  ;;  %v11435_v23 = vld [vmem:[#allocation2 + $0x128] sm:$0xff] }
 0x995   :  { %4400 = vmatpush1.msra.mxu0 %v11422_v15  ;;  %6828 = vmatpush3.msra.mxu1 %v11425_v30  ;;  %v3925_v15 = vmul.f32 %v7147_v3, %v3924_v25  ;;  %v11442_v30 = vld [vmem:[#allocation2 + $0xb0] sm:$0xff]  ;;  %v11453_v25 = vld [vmem:[#allocation2 + $0x48] sm:$0xff] }
 0x996   :  { %4401 = vmatprep.subr.mxu0 %v11428_v39  ;;  %6829 = vmatprep.subr.mxu1 %v12468_v46  ;;  %13345 = vst [vmem:[#allocation146_spill] sm:$0xff] %v11442_v30  ;;  %v11445_v39 = vld [vmem:[#allocation2 + $0xc0] sm:$0xff] }
 0x997   :  { %4402 = vmatpush1.msra.mxu0 %v11432_v16  ;;  %6830 = vmatpush3.msra.mxu1 %v11435_v23  ;;  %v3926_v16 = vmul.f32 %v7145_v11, %v10776_v36  ;;  %v13346_v36 = vld [vmem:[#allocation5_spill] sm:$0xff]  ;;  %v13381_v11 = vld [vmem:[#allocation51_spill] sm:$0xff] }
 0x998   :  { %4403 = vmatprep.subr.mxu0 %v11438_v34  ;;  %6831 = vmatprep.subr.mxu1 %v12468_v46 }
 0x999   :  { %4404 = vmatpush1.msra.mxu0 %v11442_v30  ;;  %6832 = vmatpush3.msra.mxu1 %v11445_v39  ;;  %v11457_v3 = vadd.f32 %v3926_v16, %v3925_v15  ;;  %v11459_v30 = vld [vmem:[#allocation2 + $0x58] sm:$0xff]  ;;  %v13383_v15 = vld [vmem:[#allocation37_spill] sm:$0xff] }
 0x99a   :  { %4405 = vmatprep.subr.mxu0 %v11449_v35  ;;  %6833 = vmatprep.subr.mxu1 %v12468_v46  ;;  %v13382_v16 = vld [vmem:[#allocation36_spill] sm:$0xff] }
 0x99b   :  { %4406 = vmatpush1.msra.mxu0 %v11453_v25  ;;  %4439 = vmatprep.mubr.f32.mxu0 %v12468_v46 }
 0x99c   :  { %6834 = vmatpush3.msra.mxu1 %v11459_v30  ;;  %6835 = vmatprep.mubr.msk.f32.mxu1 %vm7790_vm0, %v12468_v46 }
 0x99d   :  { %4440 = vmatmul.mubr.f32.vlgmr.msra.gmra.mxu0 %v11457_v3  ;;  %6836 = vmatmul.mubr.f32.vlgmr.msra.gmra.mxu1 %v11457_v3 }
 0x99e   :  { %4540 = vmatprep.subr.mxu0 %v10783_v1  ;;  %6838 = vmatprep.subr.mxu1 %v12468_v46  ;;  %v13347_v1 = vld [vmem:[#allocation6_spill] sm:$0xff] }
 0x99f   :  { %4541 = vmatpush1.msra.mxu0 %v10787_v44  ;;  %6839 = vmatpush3.msra.mxu1 %v10790_v61  ;;  %v13348_v44 = vld [vmem:[#allocation18_spill] sm:$0xff]  ;;  %v13349_v61 = vld [vmem:[#allocation7_spill] sm:$0xff] }
 0x9a0   :  { %4542 = vmatprep.subr.mxu0 %v10793_v47  ;;  %6840 = vmatprep.subr.mxu1 %v12468_v46  ;;  %v13350_v47 = vld [vmem:[#allocation8_spill] sm:$0xff] }
 0x9a1   :  { %4543 = vmatpush1.msra.mxu0 %v10797_v22  ;;  %6841 = vmatpush3.msra.mxu1 %v10800_v57  ;;  %v13351_v22 = vld [vmem:[#allocation23_spill] sm:$0xff]  ;;  %v13352_v57 = vld [vmem:[#allocation9_spill] sm:$0xff] }
 0x9a2   :  { %4544 = vmatprep.subr.mxu0 %v10803_v19  ;;  %6842 = vmatprep.subr.mxu1 %v12468_v46  ;;  %v13353_v19 = vld [vmem:[#allocation10_spill] sm:$0xff] }
 0x9a3   :  { %4545 = vmatpush1.msra.mxu0 %v10807_v58  ;;  %6843 = vmatpush3.msra.mxu1 %v10810_v14  ;;  %v13354_v58 = vld [vmem:[#allocation26_spill] sm:$0xff]  ;;  %v13355_v14 = vld [vmem:[#allocation11_spill] sm:$0xff] }
 0x9a4   :  { %4546 = vmatprep.subr.mxu0 %v10813_v55  ;;  %6844 = vmatprep.subr.mxu1 %v12468_v46  ;;  %v5291_v55 = vld [vmem:[%s11790_s0 + $0x38] sm:$0xff] }
 0x9a5   :  { %4547 = vmatpush1.msra.mxu0 %v10817_v9  ;;  %6845 = vmatpush3.msra.mxu1 %v10820_v31  ;;  %v13356_v9 = vld [vmem:[#allocation12_spill] sm:$0xff]  ;;  %v13357_v31 = vld [vmem:[#allocation29_spill] sm:$0xff] }
 0x9a6   :  { %4548 = vmatprep.subr.mxu0 %v10823_v24  ;;  %6846 = vmatprep.subr.mxu1 %v12468_v46  ;;  %v13358_v24 = vld [vmem:[#allocation13_spill] sm:$0xff] }
 0x9a7   :  { %4549 = vmatpush1.msra.mxu0 %v10827_v5  ;;  %6847 = vmatpush3.msra.mxu1 %v10830_v4  ;;  %v13359_v5 = vld [vmem:[#allocation14_spill] sm:$0xff]  ;;  %v13360_v4 = vld [vmem:[#allocation32_spill] sm:$0xff] }
 0x9a8   :  { %4550 = vmatprep.subr.mxu0 %v10833_v12  ;;  %6848 = vmatprep.subr.mxu1 %v12468_v46  ;;  %v13361_v12 = vld [vmem:[#allocation16_spill] sm:$0xff] }
 0x9a9   :  { %4551 = vmatpush1.msra.mxu0 %v10837_v6  ;;  %6849 = vmatpush3.msra.mxu1 %v10840_v0  ;;  %v13362_v6 = vld [vmem:[#allocation17_spill] sm:$0xff]  ;;  %v13363_v0 = vld [vmem:[#allocation35_spill] sm:$0xff] }
 0x9aa   :  { %4552 = vmatprep.subr.mxu0 %v10843_v50  ;;  %6850 = vmatprep.subr.mxu1 %v12468_v46  ;;  %v13364_v50 = vld [vmem:[#allocation19_spill] sm:$0xff] }
 0x9ab   :  { %4553 = vmatpush1.msra.mxu0 %v10847_v38  ;;  %6851 = vmatpush3.msra.mxu1 %v10850_v62  ;;  %v13365_v38 = vld [vmem:[#allocation20_spill] sm:$0xff]  ;;  %v13366_v62 = vld [vmem:[#allocation38_spill] sm:$0xff] }
 0x9ac   :  { %4554 = vmatprep.subr.mxu0 %v10853_v27  ;;  %6852 = vmatprep.subr.mxu1 %v12468_v46  ;;  %v13367_v27 = vld [vmem:[#allocation21_spill] sm:$0xff] }
 0x9ad   :  { %4555 = vmatpush1.msra.mxu0 %v10857_v40  ;;  %6853 = vmatpush3.msra.mxu1 %v10860_v45  ;;  %v13368_v40 = vld [vmem:[#allocation22_spill] sm:$0xff]  ;;  %v13369_v45 = vld [vmem:[#allocation41_spill] sm:$0xff] }
 0x9ae   :  { %4556 = vmatprep.subr.mxu0 %v10863_v37  ;;  %6854 = vmatprep.subr.mxu1 %v12468_v46  ;;  %v13370_v37 = vld [vmem:[#allocation24_spill] sm:$0xff] }
 0x9af   :  { %4557 = vmatpush1.msra.mxu0 %v10867_v17  ;;  %6855 = vmatpush3.msra.mxu1 %v10870_v42  ;;  %v13371_v17 = vld [vmem:[#allocation25_spill] sm:$0xff]  ;;  %v13372_v42 = vld [vmem:[#allocation44_spill] sm:$0xff] }
 0x9b0   :  { %4558 = vmatprep.subr.mxu0 %v10873_v51  ;;  %6856 = vmatprep.subr.mxu1 %v12468_v46  ;;  %v13373_v51 = vld [vmem:[#allocation27_spill] sm:$0xff] }
 0x9b1   :  { %4559 = vmatpush1.msra.mxu0 %v10877_v60  ;;  %6857 = vmatpush3.msra.mxu1 %v10880_v54  ;;  %v13374_v60 = vld [vmem:[#allocation28_spill] sm:$0xff]  ;;  %v13375_v54 = vld [vmem:[#allocation47_spill] sm:$0xff] }
 0x9b2   :  { %4560 = vmatprep.subr.mxu0 %v10883_v43  ;;  %6858 = vmatprep.subr.mxu1 %v12468_v46  ;;  %v13376_v43 = vld [vmem:[#allocation30_spill] sm:$0xff] }
 0x9b3   :  { %4561 = vmatpush1.msra.mxu0 %v10887_v48  ;;  %6859 = vmatpush3.msra.mxu1 %v10890_v41  ;;  %v13377_v48 = vld [vmem:[#allocation31_spill] sm:$0xff]  ;;  %v13378_v41 = vld [vmem:[#allocation50_spill] sm:$0xff] }
 0x9b4   :  { %4562 = vmatprep.subr.mxu0 %v10893_v56  ;;  %6860 = vmatprep.subr.mxu1 %v12468_v46  ;;  %v13379_v56 = vld [vmem:[#allocation33_spill] sm:$0xff] }
 0x9b5   :  { %4563 = vmatpush1.msra.mxu0 %v10897_v59  ;;  %6861 = vmatpush3.msra.mxu1 %v13346_v36  ;;  %v13380_v59 = vld [vmem:[#allocation34_spill] sm:$0xff]  ;;  %v13384_v36 = vld [vmem:[#allocation52_spill] sm:$0xff] }
 0x9b6   :  { %4564 = vmatprep.subr.mxu0 %v13347_v1  ;;  %6862 = vmatprep.subr.mxu1 %v12468_v46  ;;  %v13385_v1 = vld [vmem:[#allocation39_spill] sm:$0xff] }
 0x9b7   :  { %4565 = vmatpush1.msra.mxu0 %v13348_v44  ;;  %6863 = vmatpush3.msra.mxu1 %v13349_v61  ;;  %v13386_v44 = vld [vmem:[#allocation40_spill] sm:$0xff]  ;;  %v13387_v61 = vld [vmem:[#allocation53_spill] sm:$0xff] }
 0x9b8   :  { %4566 = vmatprep.subr.mxu0 %v13350_v47  ;;  %6864 = vmatprep.subr.mxu1 %v12468_v46  ;;  %v13388_v47 = vld [vmem:[#allocation42_spill] sm:$0xff] }
 0x9b9   :  { %4567 = vmatpush1.msra.mxu0 %v13351_v22  ;;  %6865 = vmatpush3.msra.mxu1 %v13352_v57  ;;  %v13389_v22 = vld [vmem:[#allocation43_spill] sm:$0xff]  ;;  %v13390_v57 = vld [vmem:[#allocation54_spill] sm:$0xff] }
 0x9ba   :  { %4568 = vmatprep.subr.mxu0 %v13353_v19  ;;  %6866 = vmatprep.subr.mxu1 %v12468_v46  ;;  %v13391_v19 = vld [vmem:[#allocation45_spill] sm:$0xff] }
 0x9bb   :  { %4569 = vmatpush1.msra.mxu0 %v13354_v58  ;;  %6867 = vmatpush3.msra.mxu1 %v13355_v14  ;;  %v13392_v58 = vld [vmem:[#allocation46_spill] sm:$0xff]  ;;  %v13393_v14 = vld [vmem:[#allocation55_spill] sm:$0xff] }
 0x9bc   :  { %4570 = vmatprep.subr.mxu0 %v13356_v9  ;;  %6868 = vmatprep.subr.mxu1 %v12468_v46  ;;  %v13395_v9 = vld [vmem:[#allocation49_spill] sm:$0xff] }
 0x9bd   :  { %4571 = vmatpush1.msra.mxu0 %v13357_v31  ;;  %4604 = vmatprep.mubr.f32.mxu0 %v12468_v46  ;;  %v13396_v31 = vld [vmem:[#allocation56_spill] sm:$0xff] }
 0x9be   :  { %6869 = vmatpush3.msra.mxu1 %v13358_v24  ;;  %4605 = vmatmul.mubr.f32.vlgmr.msra.gmra.mxu0 %v5291_v55  ;;  %v13397_v24 = vld [vmem:[#allocation57_spill] sm:$0xff] }
 0x9bf   :  { %6870 = vmatprep.mubr.msk.f32.mxu1 %vm7790_vm0, %v12468_v46  ;;  %4681 = vmatprep.subr.mxu0 %v13359_v5  ;;  %v13398_v5 = vld [vmem:[#allocation58_spill] sm:$0xff] }
 0x9c0   :  { %6873 = vmatprep.subr.mxu1 %v12468_v46  ;;  %6871 = vmatmul.mubr.f32.vlgmr.msra.gmra.mxu1 %v5291_v55  ;;  %v13394_v55 = vld [vmem:[#allocation48_spill] sm:$0xff] }
 0x9c1   :  { %4682 = vmatpush1.msra.mxu0 %v13360_v4  ;;  %6874 = vmatpush3.msra.mxu1 %v13361_v12  ;;  %v13399_v4 = vld [vmem:[#allocation59_spill] sm:$0xff]  ;;  %v13400_v12 = vld [vmem:[#allocation60_spill] sm:$0xff] }
 0x9c2   :  { %4683 = vmatprep.subr.mxu0 %v13362_v6  ;;  %6875 = vmatprep.subr.mxu1 %v12468_v46  ;;  %v13401_v6 = vld [vmem:[#allocation61_spill] sm:$0xff] }
 0x9c3   :  { %4684 = vmatpush1.msra.mxu0 %v13363_v0  ;;  %6876 = vmatpush3.msra.mxu1 %v13364_v50  ;;  %v13402_v0 = vld [vmem:[#allocation62_spill] sm:$0xff]  ;;  %v13403_v50 = vld [vmem:[#allocation63_spill] sm:$0xff] }
 0x9c4   :  { %4685 = vmatprep.subr.mxu0 %v13365_v38  ;;  %6877 = vmatprep.subr.mxu1 %v12468_v46  ;;  %v13404_v38 = vld [vmem:[#allocation65_spill] sm:$0xff] }
 0x9c5   :  { %4686 = vmatpush1.msra.mxu0 %v13366_v62  ;;  %6878 = vmatpush3.msra.mxu1 %v13367_v27  ;;  %v13405_v62 = vld [vmem:[#allocation64_spill] sm:$0xff]  ;;  %v13406_v27 = vld [vmem:[#allocation66_spill] sm:$0xff] }
 0x9c6   :  { %4687 = vmatprep.subr.mxu0 %v13368_v40  ;;  %6879 = vmatprep.subr.mxu1 %v12468_v46  ;;  %v13407_v40 = vld [vmem:[#allocation67_spill] sm:$0xff] }
 0x9c7   :  { %4688 = vmatpush1.msra.mxu0 %v13369_v45  ;;  %6880 = vmatpush3.msra.mxu1 %v13370_v37  ;;  %v13408_v45 = vld [vmem:[#allocation68_spill] sm:$0xff]  ;;  %v13409_v37 = vld [vmem:[#allocation69_spill] sm:$0xff] }
 0x9c8   :  { %4689 = vmatprep.subr.mxu0 %v13371_v17  ;;  %6881 = vmatprep.subr.mxu1 %v12468_v46  ;;  %v13410_v17 = vld [vmem:[#allocation70_spill] sm:$0xff] }
 0x9c9   :  { %4690 = vmatpush1.msra.mxu0 %v13372_v42  ;;  %6882 = vmatpush3.msra.mxu1 %v13373_v51  ;;  %v13411_v42 = vld [vmem:[#allocation71_spill] sm:$0xff]  ;;  %v13412_v51 = vld [vmem:[#allocation72_spill] sm:$0xff] }
 0x9ca   :  { %4691 = vmatprep.subr.mxu0 %v13374_v60  ;;  %6883 = vmatprep.subr.mxu1 %v12468_v46  ;;  %v13413_v60 = vld [vmem:[#allocation73_spill] sm:$0xff] }
 0x9cb   :  { %4692 = vmatpush1.msra.mxu0 %v13375_v54  ;;  %6884 = vmatpush3.msra.mxu1 %v13376_v43  ;;  %v13414_v54 = vld [vmem:[#allocation74_spill] sm:$0xff]  ;;  %v13415_v43 = vld [vmem:[#allocation75_spill] sm:$0xff] }
 0x9cc   :  { %4693 = vmatprep.subr.mxu0 %v13377_v48  ;;  %6885 = vmatprep.subr.mxu1 %v12468_v46  ;;  %v13416_v48 = vld [vmem:[#allocation76_spill] sm:$0xff] }
 0x9cd   :  { %4694 = vmatpush1.msra.mxu0 %v13378_v41  ;;  %6886 = vmatpush3.msra.mxu1 %v13379_v56  ;;  %v13417_v41 = vld [vmem:[#allocation77_spill] sm:$0xff]  ;;  %v13418_v56 = vld [vmem:[#allocation78_spill] sm:$0xff] }
 0x9ce   :  { %4695 = vmatprep.subr.mxu0 %v13380_v59  ;;  %6887 = vmatprep.subr.mxu1 %v12468_v46  ;;  %v13419_v59 = vld [vmem:[#allocation79_spill] sm:$0xff] }
 0x9cf   :  { %4696 = vmatpush1.msra.mxu0 %v13381_v11  ;;  %6888 = vmatpush3.msra.mxu1 %v13382_v16  ;;  %v13420_v11 = vld [vmem:[#allocation80_spill] sm:$0xff]  ;;  %v13421_v16 = vld [vmem:[#allocation81_spill] sm:$0xff] }
 0x9d0   :  { %4697 = vmatprep.subr.mxu0 %v13383_v15  ;;  %6889 = vmatprep.subr.mxu1 %v12468_v46  ;;  %v13422_v15 = vld [vmem:[#allocation82_spill] sm:$0xff] }
 0x9d1   :  { %4698 = vmatpush1.msra.mxu0 %v13384_v36  ;;  %6890 = vmatpush3.msra.mxu1 %v13385_v1  ;;  %v13423_v36 = vld [vmem:[#allocation83_spill] sm:$0xff]  ;;  %v13424_v1 = vld [vmem:[#allocation84_spill] sm:$0xff] }
 0x9d2   :  { %4699 = vmatprep.subr.mxu0 %v13386_v44  ;;  %6891 = vmatprep.subr.mxu1 %v12468_v46  ;;  %v13425_v44 = vld [vmem:[#allocation85_spill] sm:$0xff] }
 0x9d3   :  { %4700 = vmatpush1.msra.mxu0 %v13387_v61  ;;  %6892 = vmatpush3.msra.mxu1 %v13388_v47  ;;  %v13426_v61 = vld [vmem:[#allocation86_spill] sm:$0xff]  ;;  %v13427_v47 = vld [vmem:[#allocation87_spill] sm:$0xff] }
 0x9d4   :  { %4701 = vmatprep.subr.mxu0 %v13389_v22  ;;  %6893 = vmatprep.subr.mxu1 %v12468_v46  ;;  %v13428_v22 = vld [vmem:[#allocation88_spill] sm:$0xff] }
 0x9d5   :  { %4702 = vmatpush1.msra.mxu0 %v13390_v57  ;;  %6894 = vmatpush3.msra.mxu1 %v13391_v19  ;;  %v13429_v57 = vld [vmem:[#allocation89_spill] sm:$0xff]  ;;  %v13430_v19 = vld [vmem:[#allocation90_spill] sm:$0xff] }
 0x9d6   :  { %4703 = vmatprep.subr.mxu0 %v13392_v58  ;;  %6895 = vmatprep.subr.mxu1 %v12468_v46  ;;  %v13431_v58 = vld [vmem:[#allocation91_spill] sm:$0xff] }
 0x9d7   :  { %4704 = vmatpush1.msra.mxu0 %v13393_v14  ;;  %6896 = vmatpush3.msra.mxu1 %v13394_v55  ;;  %v13432_v14 = vld [vmem:[#allocation92_spill] sm:$0xff]  ;;  %v13433_v55 = vld [vmem:[#allocation93_spill] sm:$0xff] }
 0x9d8   :  { %4705 = vmatprep.subr.mxu0 %v13395_v9  ;;  %6897 = vmatprep.subr.mxu1 %v12468_v46  ;;  %v13434_v9 = vld [vmem:[#allocation94_spill] sm:$0xff] }
 0x9d9   :  { %4706 = vmatpush1.msra.mxu0 %v13396_v31  ;;  %6898 = vmatpush3.msra.mxu1 %v13397_v24  ;;  %v13435_v31 = vld [vmem:[#allocation95_spill] sm:$0xff]  ;;  %v13436_v24 = vld [vmem:[#allocation96_spill] sm:$0xff] }
 0x9da   :  { %4707 = vmatprep.subr.mxu0 %v13398_v5  ;;  %6899 = vmatprep.subr.mxu1 %v12468_v46  ;;  %v13437_v5 = vld [vmem:[#allocation97_spill] sm:$0xff] }
 0x9db   :  { %4708 = vmatpush1.msra.mxu0 %v13399_v4  ;;  %6900 = vmatpush3.msra.mxu1 %v13400_v12  ;;  %v13438_v4 = vld [vmem:[#allocation98_spill] sm:$0xff]  ;;  %v13439_v12 = vld [vmem:[#allocation99_spill] sm:$0xff] }
 0x9dc   :  { %4709 = vmatprep.subr.mxu0 %v13401_v6  ;;  %6901 = vmatprep.subr.mxu1 %v12468_v46  ;;  %v13440_v6 = vld [vmem:[#allocation100_spill] sm:$0xff] }
 0x9dd   :  { %4710 = vmatpush1.msra.mxu0 %v13402_v0  ;;  %6902 = vmatpush3.msra.mxu1 %v13403_v50  ;;  %v13441_v0 = vld [vmem:[#allocation101_spill] sm:$0xff]  ;;  %v13442_v50 = vld [vmem:[#allocation102_spill] sm:$0xff] }
 0x9de   :  { %4711 = vmatprep.subr.mxu0 %v13404_v38  ;;  %6903 = vmatprep.subr.mxu1 %v12468_v46  ;;  %v13443_v38 = vld [vmem:[#allocation103_spill] sm:$0xff] }
 0x9df   :  { %4712 = vmatpush1.msra.mxu0 %v13405_v62  ;;  %4745 = vmatprep.mubr.f32.mxu0 %v12468_v46  ;;  %v13444_v62 = vld [vmem:[#allocation104_spill] sm:$0xff] }
 0x9e0   :  { %6904 = vmatpush3.msra.mxu1 %v13406_v27  ;;  %6905 = vmatprep.mubr.msk.f32.mxu1 %vm7790_vm0, %v12468_v46  ;;  %v13445_v27 = vld [vmem:[#allocation105_spill] sm:$0xff] }
 0x9e1   :  { %4746 = vmatmul.mubr.f32.vlgmr.msra.gmra.mxu0 %v11297_v21  ;;  %6906 = vmatmul.mubr.f32.vlgmr.msra.gmra.mxu1 %v11297_v21 }
 0x9e2   :  { %4844 = vmatprep.subr.mxu0 %v13407_v40  ;;  %6908 = vmatprep.subr.mxu1 %v12468_v46  ;;  %v13446_v40 = vld [vmem:[#allocation106_spill] sm:$0xff] }
 0x9e3   :  { %4845 = vmatpush1.msra.mxu0 %v13408_v45  ;;  %6909 = vmatpush3.msra.mxu1 %v13409_v37  ;;  %v13447_v45 = vld [vmem:[#allocation107_spill] sm:$0xff]  ;;  %v13448_v37 = vld [vmem:[#allocation108_spill] sm:$0xff] }
 0x9e4   :  { %4846 = vmatprep.subr.mxu0 %v13410_v17  ;;  %6910 = vmatprep.subr.mxu1 %v12468_v46  ;;  %v13449_v17 = vld [vmem:[#allocation109_spill] sm:$0xff] }
 0x9e5   :  { %4847 = vmatpush1.msra.mxu0 %v13411_v42  ;;  %6911 = vmatpush3.msra.mxu1 %v13412_v51  ;;  %v13450_v42 = vld [vmem:[#allocation110_spill] sm:$0xff]  ;;  %v13451_v51 = vld [vmem:[#allocation111_spill] sm:$0xff] }
 0x9e6   :  { %4848 = vmatprep.subr.mxu0 %v13413_v60  ;;  %6912 = vmatprep.subr.mxu1 %v12468_v46  ;;  %v13452_v60 = vld [vmem:[#allocation112_spill] sm:$0xff] }
 0x9e7   :  { %4849 = vmatpush1.msra.mxu0 %v13414_v54  ;;  %6913 = vmatpush3.msra.mxu1 %v13415_v43  ;;  %v13453_v54 = vld [vmem:[#allocation113_spill] sm:$0xff]  ;;  %v13454_v43 = vld [vmem:[#allocation114_spill] sm:$0xff] }
 0x9e8   :  { %4850 = vmatprep.subr.mxu0 %v13416_v48  ;;  %6914 = vmatprep.subr.mxu1 %v12468_v46  ;;  %v13455_v48 = vld [vmem:[#allocation115_spill] sm:$0xff] }
 0x9e9   :  { %4851 = vmatpush1.msra.mxu0 %v13417_v41  ;;  %6915 = vmatpush3.msra.mxu1 %v13418_v56 }
 0x9ea   :  { %4852 = vmatprep.subr.mxu0 %v13419_v59  ;;  %6916 = vmatprep.subr.mxu1 %v12468_v46 }
 0x9eb   :  { %4853 = vmatpush1.msra.mxu0 %v13420_v11  ;;  %6917 = vmatpush3.msra.mxu1 %v13421_v16  ;;  %v13456_v16 = vld [vmem:[#allocation15_spill] sm:$0xff] }
 0x9ec   :  { %4854 = vmatprep.subr.mxu0 %v13422_v15  ;;  %6918 = vmatprep.subr.mxu1 %v12468_v46 }
 0x9ed   :  { %4855 = vmatpush1.msra.mxu0 %v13423_v36  ;;  %6919 = vmatpush3.msra.mxu1 %v13424_v1 }
 0x9ee   :  { %4856 = vmatprep.subr.mxu0 %v13425_v44  ;;  %6920 = vmatprep.subr.mxu1 %v12468_v46 }
 0x9ef   :  { %4857 = vmatpush1.msra.mxu0 %v13426_v61  ;;  %6921 = vmatpush3.msra.mxu1 %v13427_v47 }
 0x9f0   :  { %4858 = vmatprep.subr.mxu0 %v13428_v22  ;;  %6922 = vmatprep.subr.mxu1 %v12468_v46 }
 0x9f1   :  { %4859 = vmatpush1.msra.mxu0 %v13429_v57  ;;  %6923 = vmatpush3.msra.mxu1 %v13430_v19  ;;  %v11678_v19 = vld [vmem:[%s11792_s2 + $0x7] ss:$0 sm:$0xff] }
 0x9f2   :  { %4860 = vmatprep.subr.mxu0 %v13431_v58  ;;  %6924 = vmatprep.subr.mxu1 %v12468_v46 }
 0x9f3   :  { %4861 = vmatpush1.msra.mxu0 %v13432_v14  ;;  %6925 = vmatpush3.msra.mxu1 %v13433_v55 }
 0x9f4   :  { %4862 = vmatprep.subr.mxu0 %v13434_v9  ;;  %6926 = vmatprep.subr.mxu1 %v12468_v46 }
 0x9f5   :  { %4863 = vmatpush1.msra.mxu0 %v13435_v31  ;;  %6927 = vmatpush3.msra.mxu1 %v13436_v24 }
 0x9f6   :  { %4864 = vmatprep.subr.mxu0 %v13437_v5  ;;  %6928 = vmatprep.subr.mxu1 %v12468_v46 }
 0x9f7   :  { %4865 = vmatpush1.msra.mxu0 %v13438_v4  ;;  %6929 = vmatpush3.msra.mxu1 %v13439_v12 }
 0x9f8   :  { %4866 = vmatprep.subr.mxu0 %v13440_v6  ;;  %6930 = vmatprep.subr.mxu1 %v12468_v46 }
 0x9f9   :  { %4867 = vmatpush1.msra.mxu0 %v13441_v0  ;;  %6931 = vmatpush3.msra.mxu1 %v13442_v50 }
 0x9fa   :  { %4868 = vmatprep.subr.mxu0 %v13443_v38  ;;  %6932 = vmatprep.subr.mxu1 %v12468_v46 }
 0x9fb   :  { %4869 = vmatpush1.msra.mxu0 %v13444_v62  ;;  %6933 = vmatpush3.msra.mxu1 %v13445_v27 }
 0x9fc   :  { %4870 = vmatprep.subr.mxu0 %v13446_v40  ;;  %6934 = vmatprep.subr.mxu1 %v12468_v46 }
 0x9fd   :  { %4871 = vmatpush1.msra.mxu0 %v13447_v45  ;;  %6935 = vmatpush3.msra.mxu1 %v13448_v37 }
 0x9fe   :  { %4872 = vmatprep.subr.mxu0 %v13449_v17  ;;  %6936 = vmatprep.subr.mxu1 %v12468_v46 }
 0x9ff   :  { %4873 = vmatpush1.msra.mxu0 %v13450_v42  ;;  %6937 = vmatpush3.msra.mxu1 %v13451_v51 }
 0xa00   :  { %4874 = vmatprep.subr.mxu0 %v13452_v60  ;;  %6938 = vmatprep.subr.mxu1 %v12468_v46 }
 0xa01   :  { %4875 = vmatpush1.msra.mxu0 %v13453_v54  ;;  %6939 = vmatpush3.msra.mxu1 %v13454_v43 }
 0xa02   :  { %4908 = vmatprep.mubr.f32.mxu0 %v12468_v46  ;;  %6940 = vmatprep.mubr.msk.f32.mxu1 %vm7790_vm0, %v12468_v46 }
 0xa03   :  { %4985 = vmatprep.subr.mxu0 %v13455_v48  ;;  %6943 = vmatprep.subr.mxu1 %v12468_v46 }
 0xa3c   :  { %v4371_v41 = vpop.f32.mrf.mxu1  ;;  %v4300_v59 = vpop.f32.mrf.mxu0 }
 0xa3d   :  { %v4301_v15 = vadd.f32 %v4300_v59, %v13456_v16  ;;  %v4372_v55 = vadd.f32 %v4371_v41, %v8729_v33 }
 0xa3e   :  { %v6802_v56 = vpop.f32.mrf.mxu1  ;;  %v4302_v11 = vpop.f32.mrf.mxu0 }
 0xa3f   :  { %v4303_v59 = vadd.f32 %v4302_v11, %v8739_v18  ;;  %v13468_v11 = vld [vmem:[#allocation127_spill] sm:$0xff] }
 0xa5d   :  { %v4441_v36 = vpop.f32.mrf.mxu0  ;;  %v4512_v1 = vpop.f32.mrf.mxu1 }
 0xa5e   :  { %v4516_v44 = vadd.f32 %v4441_v36, %v4301_v15  ;;  %v4530_v58 = vadd.f32 %v11678_v19, %v4512_v1 }
 0xa5f   :  { %v6837_v61 = vpop.f32.mrf.mxu1  ;;  %v4443_v4 = vpop.f32.mrf.mxu0 }
 0xa60   :  { %v5289_v47 = vmul.f32 -1.442695, %v4516_v44 }
 0xa62   :  { %7148 = vpow2.f32 %v5289_v47 }
 0xa6f   :  { %v7149_v22 = vpop.eup %7148 }
 0xa70   :  { %v4520_v57 = vadd.f32 1.0, %v7149_v22 }
 0xa72   :  { %7150 = vrcp.f32 %v4520_v57 }
 0xa7e   :  { %v4606_v12 = vpop.f32.mrf.mxu0 }
 0xa7f   :  { %v7151_v14 = vpop.eup %7150  ;;  %v4607_v0 = vadd.f32 %v4606_v12, %v12605_v53  ;;  %v13477_v12 = vld [vmem:[#allocation136_spill] sm:$0xff] }
 0xa80   :  { %v4531_v9 = vmul.f32 %v7151_v14, %v4530_v58  ;;  %v4677_v31 = vpop.f32.mrf.mxu1  ;;  %v4608_v6 = vpop.f32.mrf.mxu0  ;;  %v13469_v58 = vld [vmem:[#allocation128_spill] sm:$0xff]  ;;  %v13470_v14 = vld [vmem:[#allocation129_spill] sm:$0xff] }
 0xa81   :  { %v4609_v37 = vadd.f32 %v4608_v6, %v12606_v8  ;;  %v4678_v41 = vadd.f32 %v4677_v31, %v8337_v49  ;;  %v4523_v8 = vadd.f32 %v4443_v4, %v4303_v59  ;;  %v13473_v31 = vld [vmem:[#allocation132_spill] sm:$0xff]  ;;  %v13476_v4 = vld [vmem:[#allocation135_spill] sm:$0xff]  ;;  %v13478_v6 = vld [vmem:[#allocation137_spill] sm:$0xff] }
 0xa82   :  { %v11682_v24 = vadd.f32 %v4531_v9, %v4372_v55  ;;  %v6872_v5 = vpop.f32.mrf.mxu1  ;;  %v13471_v55 = vld [vmem:[#allocation130_spill] sm:$0xff]  ;;  %v13472_v9 = vld [vmem:[#allocation131_spill] sm:$0xff] }
 0xa83   :  { %v5290_v36 = vmul.f32 -1.442695, %v4523_v8  ;;  %v13475_v5 = vld [vmem:[#allocation134_spill] sm:$0xff]  ;;  %v5151_v8 = vld [vmem:[#allocation2 + $0x198] sm:$0xff] }
 0xa84   :  { %v5153_v59 = vld [vmem:[#allocation2 + $0x268] sm:$0xff] }
 0xaa1   :  { %v4747_v50 = vpop.f32.mrf.mxu0  ;;  %v4818_v38 = vpop.f32.mrf.mxu1 }
 0xaa2   :  { %v4822_v62 = vadd.f32 %v4747_v50, %v4607_v0  ;;  %v4836_v48 = vadd.f32 %v11291_v52, %v4818_v38  ;;  %v13479_v50 = vld [vmem:[#allocation138_spill] sm:$0xff]  ;;  %v13480_v38 = vld [vmem:[#allocation139_spill] sm:$0xff] }
 0xaa3   :  { %v6907_v27 = vpop.f32.mrf.mxu1  ;;  %v4749_v45 = vpop.f32.mrf.mxu0 }
 0xaa4   :  { %v5292_v40 = vmul.f32 -1.442695, %v4822_v62  ;;  %v4829_v17 = vadd.f32 %v4749_v45, %v4609_v37  ;;  %v13481_v62 = vld [vmem:[#allocation140_spill] sm:$0xff]  ;;  %v13483_v45 = vld [vmem:[#allocation142_spill] sm:$0xff]  ;;  %v13484_v37 = vld [vmem:[#allocation143_spill] sm:$0xff] }
 0xaa6   :  { %7152 = vpow2.f32 %v5292_v40  ;;  %v5293_v42 = vmul.f32 -1.442695, %v4829_v17  ;;  %v13482_v40 = vld [vmem:[#allocation141_spill] sm:$0xff] }
 0xaa8   :  { %7154 = vpow2.f32 %v5293_v42  ;;  %v13485_v42 = vld [vmem:[#allocation144_spill] sm:$0xff] }
 0xab3   :  { %v7153_v51 = vpop.eup %7152 }
 0xab4   :  { %v4826_v60 = vadd.f32 1.0, %v7153_v51  ;;  %v13486_v51 = vld [vmem:[#allocation145_spill] sm:$0xff] }
 0xab5   :  { %v7155_v54 = vpop.eup %7154 }
 0xab6   :  { %7156 = vrcp.f32 %v4826_v60  ;;  %v4833_v43 = vadd.f32 1.0, %v7155_v54  ;;  %v13487_v54 = vld [vmem:[#allocation146_spill] sm:$0xff] }
 0xab8   :  { %7158 = vrcp.f32 %v4833_v43 }
 0xac3   :  { %v7157_v53 = vpop.eup %7156 }
 0xac4   :  { %v4837_v56 = vmul.f32 %v7157_v53, %v4836_v48  ;;  %v5157_v48 = vld [vmem:[#allocation2 + $0x408] sm:$0xff]  ;;  %v5156_v53 = vld [vmem:[#allocation2 + $0x3a0] sm:$0xff] }
 0xac5   :  { %v7159_v1 = vpop.eup %7158 }
 0xac6   :  { %v4838_v15 = vadd.f32 %v4837_v56, %v4678_v41  ;;  %v4840_v44 = vsub.f32 1.0, %v7159_v1  ;;  %v4842_v22 = vmul.f32 %v7159_v1, %v11297_v21  ;;  %v13457_v21 = vld [vmem:[#allocation116_spill] sm:$0xff]  ;;  %v5154_v56 = vld [vmem:[#allocation2 + $0x2d0] sm:$0xff]  ;;  %v5149_v1 = vld [vmem:[#allocation2 + $0xc8] sm:$0xff] }
 0xac7   :  { %v5155_v41 = vld [vmem:[#allocation2 + $0x338] sm:$0xff] }
 0xac8   :  { %7160 = vtanh.f32 %v4838_v15  ;;  %v5152_v15 = vld [vmem:[#allocation2 + $0x200] sm:$0xff] }
 0xac9   :  { %7162 = vpow2.f32 %v5290_v36  ;;  %v5150_v36 = vld [vmem:[#allocation2 + $0x130] sm:$0xff] }
 0xad5   :  { %v7161_v61 = vpop.eup %7160 }
 0xad6   :  { %v4841_v47 = vmul.f32 %v7161_v61, %v4840_v44  ;;  %v7163_v49 = vpop.eup %7162  ;;  %v5148_v44 = vld [vmem:[#allocation2 + $0x60] sm:$0xff] }
 0xad7   :  { %v4527_v52 = vadd.f32 1.0, %v7163_v49 }
 0xad8   :  { %v4843_v57 = vadd.f32 %v4842_v22, %v4841_v47 }
 0xad9   :  { %7164 = vrcp.f32 %v4527_v52 }
 0xada   :  { %4909 = vmatmul.mubr.f32.vlgmr.msra.gmra.mxu0 %v4843_v57  ;;  %6941 = vmatmul.mubr.f32.vlgmr.msra.gmra.mxu1 %v4843_v57  ;;  %7166 = vtanh.f32 %v11682_v24  ;;  %v13474_v24 = vld [vmem:[#allocation133_spill] sm:$0xff] }
 0xadb   :  { %4986 = vmatpush1.msra.mxu0 %v11301_v32  ;;  %6944 = vmatpush3.msra.mxu1 %v11304_v7  ;;  %v13458_v32 = vld [vmem:[#allocation117_spill] sm:$0xff]  ;;  %v13459_v7 = vld [vmem:[#allocation118_spill] sm:$0xff] }
 0xadc   :  { %4987 = vmatprep.subr.mxu0 %v11307_v13  ;;  %6945 = vmatprep.subr.mxu1 %v12468_v46  ;;  %v13460_v13 = vld [vmem:[#allocation119_spill] sm:$0xff] }
 0xadd   :  { %4988 = vmatpush1.msra.mxu0 %v11311_v63  ;;  %6946 = vmatpush3.msra.mxu1 %v11314_v28  ;;  %v13461_v63 = vld [vmem:[#allocation120_spill] sm:$0xff]  ;;  %v13462_v28 = vld [vmem:[#allocation121_spill] sm:$0xff] }
 0xade   :  { %4989 = vmatprep.subr.mxu0 %v11317_v2  ;;  %6947 = vmatprep.subr.mxu1 %v12468_v46  ;;  %v13463_v2 = vld [vmem:[#allocation122_spill] sm:$0xff] }
 0xadf   :  { %4990 = vmatpush1.msra.mxu0 %v11321_v10  ;;  %6948 = vmatpush3.msra.mxu1 %v11324_v26  ;;  %v13464_v10 = vld [vmem:[#allocation123_spill] sm:$0xff]  ;;  %v13465_v26 = vld [vmem:[#allocation124_spill] sm:$0xff] }
 0xae0   :  { %4991 = vmatprep.subr.mxu0 %v11327_v29  ;;  %6949 = vmatprep.subr.mxu1 %v12468_v46  ;;  %v13466_v29 = vld [vmem:[#allocation125_spill] sm:$0xff] }
 0xae1   :  { %4992 = vmatpush1.msra.mxu0 %v11331_v20  ;;  %6950 = vmatpush3.msra.mxu1 %v13457_v21  ;;  %v13467_v20 = vld [vmem:[#allocation126_spill] sm:$0xff] }
 0xae2   :  { %4993 = vmatprep.subr.mxu0 %v13458_v32  ;;  %6951 = vmatprep.subr.mxu1 %v12468_v46 }
 0xae3   :  { %4994 = vmatpush1.msra.mxu0 %v13459_v7  ;;  %6952 = vmatpush3.msra.mxu1 %v13460_v13 }
 0xae4   :  { %4995 = vmatprep.subr.mxu0 %v13461_v63  ;;  %6953 = vmatprep.subr.mxu1 %v12468_v46 }
 0xae5   :  { %4996 = vmatpush1.msra.mxu0 %v13462_v28  ;;  %6954 = vmatpush3.msra.mxu1 %v13463_v2 }
 0xae6   :  { %4997 = vmatprep.subr.mxu0 %v13464_v10  ;;  %6955 = vmatprep.subr.mxu1 %v12468_v46  ;;  %v7165_v0 = vpop.eup %7164 }
 0xae7   :  { %4998 = vmatpush1.msra.mxu0 %v13465_v26  ;;  %6956 = vmatpush3.msra.mxu1 %v13466_v29  ;;  %v7167_v27 = vpop.eup %7166  ;;  %v4534_v17 = vsub.f32 1.0, %v7165_v0  ;;  %v4536_v43 = vmul.f32 %v7165_v0, %v11457_v3  ;;  %v5158_v3 = vld [vmem:[#allocation2 + $0x470] sm:$0xff] }
 0xae8   :  { %4999 = vmatprep.subr.mxu0 %v13467_v20  ;;  %6957 = vmatprep.subr.mxu1 %v12468_v46 }
 0xae9   :  { %5000 = vmatpush1.msra.mxu0 %v13468_v11  ;;  %6958 = vmatpush3.msra.mxu1 %v13469_v58  ;;  %v4535_v60 = vmul.f32 %v7167_v27, %v4534_v17 }
 0xaea   :  { %5001 = vmatprep.subr.mxu0 %v13470_v14  ;;  %6959 = vmatprep.subr.mxu1 %v12468_v46 }
 0xaeb   :  { %5002 = vmatpush1.msra.mxu0 %v13471_v55  ;;  %6960 = vmatpush3.msra.mxu1 %v13472_v9 }
 0xaec   :  { %5003 = vmatprep.subr.mxu0 %v13473_v31  ;;  %6961 = vmatprep.subr.mxu1 %v12468_v46 }
 0xaed   :  { %5004 = vmatpush1.msra.mxu0 %v13474_v24  ;;  %6962 = vmatpush3.msra.mxu1 %v13475_v5 }
 0xaee   :  { %5005 = vmatprep.subr.mxu0 %v13476_v4  ;;  %6963 = vmatprep.subr.mxu1 %v12468_v46 }
 0xaef   :  { %5006 = vmatpush1.msra.mxu0 %v13477_v12  ;;  %6964 = vmatpush3.msra.mxu1 %v13478_v6  ;;  %v5296_v12 = vld [vmem:[%s11792_s2 + $0x8] ss:$0 sm:$0xff] }
 0xaf0   :  { %5007 = vmatprep.subr.mxu0 %v13479_v50  ;;  %6965 = vmatprep.subr.mxu1 %v12468_v46 }
 0xaf1   :  { %5008 = vmatpush1.msra.mxu0 %v13480_v38  ;;  %6966 = vmatpush3.msra.mxu1 %v13481_v62 }
 0xaf2   :  { %5009 = vmatprep.subr.mxu0 %v13482_v40  ;;  %6967 = vmatprep.subr.mxu1 %v12468_v46 }
 0xaf3   :  { %5010 = vmatpush1.msra.mxu0 %v13483_v45  ;;  %6968 = vmatpush3.msra.mxu1 %v13484_v37 }
 0xaf4   :  { %5011 = vmatprep.subr.mxu0 %v13485_v42  ;;  %6969 = vmatprep.subr.mxu1 %v12468_v46 }
 0xaf5   :  { %5012 = vmatpush1.msra.mxu0 %v13486_v51  ;;  %6970 = vmatpush3.msra.mxu1 %v11435_v23  ;;  %v11754_v23 = vadd.f32 %v4536_v43, %v4535_v60 }
 0xaf6   :  { %5013 = vmatprep.subr.mxu0 %v11438_v34  ;;  %6971 = vmatprep.subr.mxu1 %v12468_v46  ;;  %v5162_v34 = vld [vmem:[#allocation2 + $0x610] sm:$0xff] }
 0xaf7   :  { %5014 = vmatpush1.msra.mxu0 %v13487_v54  ;;  %6972 = vmatpush3.msra.mxu1 %v11445_v39  ;;  %v5161_v39 = vld [vmem:[#allocation2 + $0x5a8] sm:$0xff] }
 0xaf8   :  { %5015 = vmatprep.subr.mxu0 %v11449_v35  ;;  %6973 = vmatprep.subr.mxu1 %v12468_v46  ;;  %v5163_v35 = vld [vmem:[#allocation2 + $0x678] sm:$0xff] }
 0xaf9   :  { %5016 = vmatpush1.msra.mxu0 %v11453_v25  ;;  %5049 = vmatprep.mubr.f32.mxu0 %v12468_v46  ;;  %v5159_v25 = vld [vmem:[#allocation2 + $0x4d8] sm:$0xff] }
 0xafa   :  { %6974 = vmatpush3.msra.mxu1 %v11459_v30  ;;  %6975 = vmatprep.mubr.msk.f32.mxu1 %vm7790_vm0, %v12468_v46  ;;  %v5160_v30 = vld [vmem:[#allocation2 + $0x540] sm:$0xff] }
 0xafb   :  { %5050 = vmatmul.mubr.f32.vlgmr.msra.gmra.mxu0 %v11754_v23  ;;  %6976 = vmatmul.mubr.f32.vlgmr.msra.gmra.mxu1 %v11754_v23 }
 0xafc   :  { %6978 = vmatprep.subr.mxu0 %v12468_v46  ;;  %7010 = vmatprep.mubr.msk.f32.mxu0 %vm7790_vm0, %v12468_v46 }
 0xafd   :  { %6979 = vmatpush3.msra.mxu0 %v5163_v35 }
 0xafe   :  { %6980 = vmatprep.subr.mxu0 %v12468_v46 }
 0xaff   :  { %6981 = vmatpush3.msra.mxu0 %v5162_v34 }
 0xb00   :  { %6982 = vmatprep.subr.mxu0 %v12468_v46 }
 0xb01   :  { %6983 = vmatpush3.msra.mxu0 %v5161_v39 }
 0xb02   :  { %6984 = vmatprep.subr.mxu0 %v12468_v46 }
 0xb03   :  { %6985 = vmatpush3.msra.mxu0 %v5160_v30 }
 0xb04   :  { %6986 = vmatprep.subr.mxu0 %v12468_v46 }
 0xb05   :  { %6987 = vmatpush3.msra.mxu0 %v5159_v25 }
 0xb06   :  { %6988 = vmatprep.subr.mxu0 %v12468_v46 }
 0xb07   :  { %6989 = vmatpush3.msra.mxu0 %v5158_v3 }
 0xb08   :  { %6990 = vmatprep.subr.mxu0 %v12468_v46 }
 0xb09   :  { %6991 = vmatpush3.msra.mxu0 %v5157_v48 }
 0xb0a   :  { %6992 = vmatprep.subr.mxu0 %v12468_v46 }
 0xb0b   :  { %6993 = vmatpush3.msra.mxu0 %v5156_v53 }
 0xb0c   :  { %6994 = vmatprep.subr.mxu0 %v12468_v46 }
 0xb0d   :  { %6995 = vmatpush3.msra.mxu0 %v5155_v41 }
 0xb0e   :  { %6996 = vmatprep.subr.mxu0 %v12468_v46 }
 0xb0f   :  { %6997 = vmatpush3.msra.mxu0 %v5154_v56 }
 0xb10   :  { %6998 = vmatprep.subr.mxu0 %v12468_v46 }
 0xb11   :  { %6999 = vmatpush3.msra.mxu0 %v5153_v59 }
 0xb12   :  { %7000 = vmatprep.subr.mxu0 %v12468_v46 }
 0xb13   :  { %7001 = vmatpush3.msra.mxu0 %v5152_v15 }
 0xb14   :  { %7002 = vmatprep.subr.mxu0 %v12468_v46 }
 0xb15   :  { %7003 = vmatpush3.msra.mxu0 %v5151_v8 }
 0xb16   :  { %7004 = vmatprep.subr.mxu0 %v12468_v46 }
 0xb17   :  { %7005 = vmatpush3.msra.mxu0 %v5150_v36 }
 0xb18   :  { %7006 = vmatprep.subr.mxu0 %v12468_v46 }
 0xb19   :  { %7007 = vmatpush3.msra.mxu0 %v5149_v1 }
 0xb1a   :  { %7008 = vmatprep.subr.mxu0 %v12468_v46 }
 0xb1b   :  { %7009 = vmatpush3.msra.mxu0 %v5148_v44 }
 0xb9a   :  { %v4981_v61 = vpop.f32.mrf.mxu1  ;;  %v4910_v22 = vpop.f32.mrf.mxu0 }
 0xb9b   :  { %v4911_v49 = vadd.f32 %v4910_v22, %v13456_v16  ;;  %v4982_v58 = vadd.f32 %v4981_v61, %v8729_v33 }
 0xb9c   :  { %v6942_v47 = vpop.f32.mrf.mxu1  ;;  %v4912_v57 = vpop.f32.mrf.mxu0 }
 0xb9d   :  { %v4913_v28 = vadd.f32 %v4912_v57, %v8739_v18 }
 0xbbb   :  { %v5051_v52 = vpop.f32.mrf.mxu0  ;;  %v5122_v21 = vpop.f32.mrf.mxu1 }
 0xbbc   :  { %v5126_v32 = vadd.f32 %v5051_v52, %v4911_v49  ;;  %v5140_v11 = vadd.f32 %v11678_v19, %v5122_v21 }
 0xbbd   :  { %v6977_v7 = vpop.f32.mrf.mxu1  ;;  %v5053_v63 = vpop.f32.mrf.mxu0 }
 0xbbe   :  { %v5294_v13 = vmul.f32 -1.442695, %v5126_v32  ;;  %v5133_v2 = vadd.f32 %v5053_v63, %v4913_v28 }
 0xbc0   :  { %7168 = vpow2.f32 %v5294_v13  ;;  %v5295_v10 = vmul.f32 -1.442695, %v5133_v2 }
 0xbc2   :  { %7170 = vpow2.f32 %v5295_v10 }
 0xbcd   :  { %v7169_v46 = vpop.eup %7168 }
 0xbce   :  { %v5130_v26 = vadd.f32 1.0, %v7169_v46 }
 0xbcf   :  { %v7171_v29 = vpop.eup %7170 }
 0xbd0   :  { %7172 = vrcp.f32 %v5130_v26  ;;  %v5137_v20 = vadd.f32 1.0, %v7171_v29 }
 0xbd2   :  { %7174 = vrcp.f32 %v5137_v20 }
 0xbdd   :  { %v7173_v16 = vpop.eup %7172 }
 0xbde   :  { %v5141_v14 = vmul.f32 %v7173_v16, %v5140_v11 }
 0xbdf   :  { %v7175_v9 = vpop.eup %7174 }
 0xbe0   :  { %v5142_v55 = vadd.f32 %v5141_v14, %v4982_v58  ;;  %v5144_v18 = vsub.f32 1.0, %v7175_v9  ;;  %v5146_v5 = vmul.f32 %v7175_v9, %v11754_v23 }
 0xbe2   :  { %7176 = vtanh.f32 %v5142_v55 }
 0xbef   :  { %v7177_v31 = vpop.eup %7176 }
 0xbf0   :  { %v5145_v24 = vmul.f32 %v7177_v31, %v5144_v18 }
 0xbf2   :  { %v5147_v4 = vadd.f32 %v5146_v5, %v5145_v24 }
 0xbf4   :  { %7011 = vmatmul.mubr.f32.vlgmr.msra.gmra.mxu0 %v5147_v4 }
 0xcb4   :  { %v5236_v19 = vpop.f32.mrf.mxu0 }
 0xcb5   :  { %v5237_v6 = vadd.f32 %v5296_v12, %v5236_v19 }
 0xcb6   :  { %v7012_v0 = vpop.f32.mrf.mxu0 }
 0xcb7   :  { %5240 = vmax.xlane.f32.xlu0 %v5237_v6 }
 0xd40   :  { %v5241_v33 = vpop.xlane.xlu0 %5240 }
 0xd41   :  { %v5242_v50 = vsub.f32 %v5237_v6, %v5241_v33 }
 0xd43   :  { %v5243_v38 = vmul.f32 1.442695, %v5242_v50 }
 0xd45   :  { %7178 = vpow2.f32 %v5243_v38 }
 0xd52   :  { %v7179_v62 = vpop.eup %7178 }
 0xd53   :  { %5245 = vadd.xlane.f32.xlu0 %v7179_v62 }
 0xddc   :  { %v5246_v27 = vpop.xlane.xlu0 %5245 }
 0xddd   :  { %7180 = vrcp.f32 %v5246_v27 }
 0xdea   :  { %v7181_v40 = vpop.eup %7180 }
 0xdeb   :  { %v5248_v45 = vmul.f32 %v7181_v40, %v7179_v62 }
 0xded   :  { %5249 = vst [vmem:[%s11793_s3] sm:$0xff] %v5248_v45 }
 0xdee   :  { %5254 = vsyncpa [#allocation3], 1 }

</bundles_post_ra>
